<compile_context>
chip_gen: v6e
topology: v6e:2x2x1
jax: 0.10.0
libtpu: 0.0.40
codegen_flags: <defaults>
</compile_context>

<pallas_src>
import math
from functools import partial

import numpy as np
import jax
import jax.numpy as jnp
from jax.experimental import pallas as pl
from jax.experimental.pallas import tpu as pltpu


# ---------------------------------------------------------------------------
# small shared math helpers (used by the kernel and the pure-JAX reference)
# ---------------------------------------------------------------------------
def _layer_norm_f32(x, gamma, beta, eps=1e-5):
    mu = jnp.mean(x, axis=-1, keepdims=True)
    var = jnp.mean(jnp.square(x - mu), axis=-1, keepdims=True)
    return (x - mu) * jax.lax.rsqrt(var + eps) * gamma + beta


def _gelu_exact(x):
    return 0.5 * x * (1.0 + jax.lax.erf(x * (1.0 / math.sqrt(2.0))))


# ---------------------------------------------------------------------------
# fused per-block Pallas kernel
# ---------------------------------------------------------------------------
def _swin_block_kernel(x_ref, bias_ref, g1_ref, b1_ref, wqkv_ref, bqkv_ref,
                       wproj_ref, bproj_ref, g2_ref, b2_ref, w1_ref, fb1_ref,
                       w2_ref, fb2_ref, o_ref, *, ws):
    f32, bf16 = jnp.float32, jnp.bfloat16
    _, H, W, C = x_ref.shape
    nWh, nWw = H // ws, W // ws
    nW, N = nWh * nWw, ws * ws
    M = nW * N
    nh, hd = wproj_ref.shape[0], wproj_ref.shape[1]

    # ---- window partition: gather the (already shifted) image into
    #      window-major row order.  Static, sublane-aligned slices only.
    wins = []
    for i in range(nWh):
        for j in range(nWw):
            wins.append(
                x_ref[0, i * ws:(i + 1) * ws, j * ws:(j + 1) * ws, :].reshape(N, C))
    x = jnp.concatenate(wins, axis=0)                      # [M, C] f32

    # ---- LN1 + fused qkv projection (q-scale pre-folded into the weights)
    xn = _layer_norm_f32(x, g1_ref[...], b1_ref[...])
    qkv = jnp.dot(xn.astype(bf16), wqkv_ref[...],
                  preferred_element_type=f32) + bqkv_ref[...]          # [M, 3C]

    # ---- per-head windowed attention; output projection accumulated per head
    #      (no lane-axis concat of 32-wide pieces).
    attn = jnp.zeros((M, C), f32)
    for h in range(nh):
        q = qkv[:, h * hd:(h + 1) * hd].astype(bf16).reshape(nW, N, hd)
        k = qkv[:, C + h * hd:C + (h + 1) * hd].astype(bf16).reshape(nW, N, hd)
        v = qkv[:, 2 * C + h * hd:2 * C + (h + 1) * hd].astype(bf16).reshape(nW, N, hd)
        s = jnp.einsum('wnd,wmd->wnm', q, k,
                       preferred_element_type=f32)                     # [nW, N, N]
        s = s + bias_ref[h]                     # rel-pos bias (+ shift mask) fused
        m = jnp.max(s, axis=-1, keepdims=True)
        e = jnp.exp(s - m)
        p = e * pl.reciprocal(jnp.sum(e, axis=-1, keepdims=True), approx=True)
        o = jnp.einsum('wnm,wmd->wnd', p.astype(bf16), v,
                       preferred_element_type=f32)                     # [nW, N, hd]
        attn = attn + jnp.dot(o.reshape(M, hd).astype(bf16), wproj_ref[h],
                              preferred_element_type=f32)
    x1 = x + attn + bproj_ref[...]              # residual #1 fused (drop_path = id)

    # ---- LN2 + MLP (exact erf-GELU) + residual #2, still in window-major order
    #      (purely per-token, so it commutes with window reverse / roll-back).
    xn2 = _layer_norm_f32(x1, g2_ref[...], b2_ref[...])
    hmid = jnp.dot(xn2.astype(bf16), w1_ref[...],
                   preferred_element_type=f32) + fb1_ref[...]
    hmid = _gelu_exact(hmid)
    y = jnp.dot(hmid.astype(bf16), w2_ref[...],
                preferred_element_type=f32) + fb2_ref[...]
    out = (x1 + y).astype(o_ref.dtype)                                 # [M, C]

    # ---- window reverse: scatter window-major rows back to image layout
    out5 = out.reshape(nWh, nWw, ws, ws, C)
    for i in range(nWh):
        for j in range(nWw):
            o_ref[0, i * ws:(i + 1) * ws, j * ws:(j + 1) * ws, :] = out5[i, j]


# ---------------------------------------------------------------------------
# per-block wrapper (one pallas_call per TransformerBlock)
# ---------------------------------------------------------------------------
def swin_block_pallas(x, p, mask, rpi, *, window_size, shift_size, num_heads):
    """x: [B, H, W, C] f32 (channels-last view of the torch [B, C, H, W] buffer)."""
    B, H, W, C = x.shape
    ws, ss = window_size, shift_size
    nWh, nWw = H // ws, W // ws
    nW, N = nWh * nWw, ws * ws
    hd = C // num_heads
    Hd = p["fc1_w"].shape[1]
    bf16, f32 = jnp.bfloat16, jnp.float32
    scale = hd ** -0.5

    # relative position bias [nh, N, N], precombined with the shift mask
    rpb = p["rpb_table"][rpi.reshape(-1)].reshape(N, N, num_heads)
    rpb = jnp.transpose(rpb, (2, 0, 1)).astype(f32)
    if ss > 0:
        bias = rpb[:, None, :, :] + mask[None, :, :, :]
    else:
        bias = jnp.broadcast_to(rpb[:, None, :, :], (num_heads, nW, N, N))

    # fold 1/sqrt(head_dim) into the q third of the qkv weights/bias
    # (in f32, BEFORE the bf16 cast, so rounding stays close to the reference)
    qkv_w = jnp.concatenate([p["qkv_w"][:, :C] * scale, p["qkv_w"][:, C:]], axis=1)
    qkv_b = jnp.concatenate([p["qkv_b"][:C] * scale, p["qkv_b"][C:]])

    x_sh = jnp.roll(x, shift=(-ss, -ss), axis=(1, 2)) if ss > 0 else x

    M = H * W
    cost = pl.CostEstimate(
        flops=int(B * (2 * M * C * 3 * C                       # qkv
                       + num_heads * nW * 4 * N * N * hd       # qk^T + pv
                       + 2 * M * C * C                         # out proj
                       + 4 * M * C * Hd)),                     # fc1 + fc2
        transcendentals=int(B * (num_heads * nW * N * N + M * Hd)),
        bytes_accessed=int(2 * B * M * C * 4
                           + (C * 3 * C + C * C + 2 * C * Hd) * 2
                           + num_heads * nW * N * N * 4
                           + (6 * C + 3 * C + Hd) * 4))

    out = pl.pallas_call(
        partial(_swin_block_kernel, ws=ws),
        out_shape=jax.ShapeDtypeStruct((B, H, W, C), f32),
        grid=(B,),
        in_specs=[
            pl.BlockSpec((1, H, W, C), lambda b: (b, 0, 0, 0)),
            pl.BlockSpec((num_heads, nW, N, N), lambda b: (0, 0, 0, 0)),
            pl.BlockSpec((1, C), lambda b: (0, 0)),
            pl.BlockSpec((1, C), lambda b: (0, 0)),
            pl.BlockSpec((C, 3 * C), lambda b: (0, 0)),
            pl.BlockSpec((1, 3 * C), lambda b: (0, 0)),
            pl.BlockSpec((num_heads, hd, C), lambda b: (0, 0, 0)),
            pl.BlockSpec((1, C), lambda b: (0, 0)),
            pl.BlockSpec((1, C), lambda b: (0, 0)),
            pl.BlockSpec((1, C), lambda b: (0, 0)),
            pl.BlockSpec((C, Hd), lambda b: (0, 0)),
            pl.BlockSpec((1, Hd), lambda b: (0, 0)),
            pl.BlockSpec((Hd, C), lambda b: (0, 0)),
            pl.BlockSpec((1, C), lambda b: (0, 0)),
        ],
        out_specs=pl.BlockSpec((1, H, W, C), lambda b: (b, 0, 0, 0)),
        compiler_params=pltpu.CompilerParams(dimension_semantics=("parallel",)),
        cost_estimate=cost,
    )(x_sh, bias,
      p["ln1_g"].reshape(1, C), p["ln1_b"].reshape(1, C),
      qkv_w.astype(bf16), qkv_b.reshape(1, 3 * C),
      p["proj_w"].reshape(num_heads, hd, C).astype(bf16), p["proj_b"].reshape(1, C),
      p["ln2_g"].reshape(1, C), p["ln2_b"].reshape(1, C),
      p["fc1_w"].astype(bf16), p["fc1_b"].reshape(1, Hd),
      p["fc2_w"].astype(bf16), p["fc2_b"].reshape(1, C))

    if ss > 0:
        out = jnp.roll(out, shift=(ss, ss), axis=(1, 2))
    return out


def basic_layer_forward(x_bchw, params, masks, rpi, *, window_size, num_heads,
                        shift_sizes):
    B, C, H, W = x_bchw.shape
    x = x_bchw.reshape(B, H, W, C)      # torch does `x.view(B, H, W, C)` (reinterpret)
    for p, mask, ss in zip(params, masks, shift_sizes):
        x = swin_block_pallas(x, p, mask, rpi, window_size=window_size,
                              shift_size=ss, num_heads=num_heads)
    # TODO(synk): downsample (e.g. PatchMerging) not implemented; this BasicLayer
    # configuration uses downsample=None so the forward is complete as-is.
    return x.reshape(B, C, H, W)        # torch does `x.view(B, C, H, W)`


# ---------------------------------------------------------------------------
# static helpers (numpy): shift mask and relative-position index
# ---------------------------------------------------------------------------
def _window_partition_np(x, ws):
    B, H, W, C = x.shape
    x = x.reshape(B, H // ws, ws, W // ws, ws, C).transpose(0, 1, 3, 2, 4, 5)
    return x.reshape(-1, ws * ws, C)


def calculate_attn_mask(H, W, ws, ss):
    nW = (H // ws) * (W // ws)
    N = ws * ws
    if ss == 0:
        return np.zeros((nW, N, N), np.float32)
    img_mask = np.zeros((1, H, W, 1), np.float32)
    slices = (slice(0, -ws), slice(-ws, -ss), slice(-ss, None))
    cnt = 0
    for hs in slices:
        for wsl in slices:
            img_mask[:, hs, wsl, :] = cnt
            cnt += 1
    mw = _window_partition_np(img_mask, ws)[..., 0]             # [nW, N]
    am = mw[:, None, :] - mw[:, :, None]
    return np.where(am != 0, -100.0, 0.0).astype(np.float32)


def relative_position_index(ws):
    coords = np.stack(np.meshgrid(np.arange(ws), np.arange(ws), indexing="ij"))
    cf = coords.reshape(2, -1)
    rel = (cf[:, :, None] - cf[:, None, :]).transpose(1, 2, 0)  # [N, N, 2]
    rel[:, :, 0] += ws - 1
    rel[:, :, 1] += ws - 1
    rel[:, :, 0] *= 2 * ws - 1
    return rel.sum(-1).astype(np.int32)                         # [N, N]


# ---------------------------------------------------------------------------
# pure-JAX reference (mirrors the torch forward, bf16 matmul operands)
# ---------------------------------------------------------------------------
def window_partition(x, ws):
    B, H, W, C = x.shape
    x = x.reshape(B, H // ws, ws, W // ws, ws, C)
    x = jnp.transpose(x, (0, 1, 3, 2, 4, 5))
    return x.reshape(B, (H // ws) * (W // ws), ws * ws, C)


def window_reverse(windows, ws, H, W):
    B, nW, N, C = windows.shape
    x = windows.reshape(B, H // ws, W // ws, ws, ws, C)
    x = jnp.transpose(x, (0, 1, 3, 2, 4, 5))
    return x.reshape(B, H, W, C)


def reference_block(x, p, mask, rpi, *, ws, ss, nh):
    B, H, W, C = x.shape
    hd = C // nh
    N = ws * ws
    bf16, f32 = jnp.bfloat16, jnp.float32

    def mm(a, w):
        return jnp.einsum("...k,kn->...n", a.astype(bf16), w.astype(bf16),
                          preferred_element_type=f32)

    shortcut = x
    xn = _layer_norm_f32(x, p["ln1_g"], p["ln1_b"])
    if ss > 0:
        xn = jnp.roll(xn, shift=(-ss, -ss), axis=(1, 2))
    xw = window_partition(xn, ws).reshape(-1, N, C)             # [B*nW, N, C]
    Bn = xw.shape[0]
    qkv = mm(xw, p["qkv_w"]) + p["qkv_b"]
    qkv = qkv.reshape(Bn, N, 3, nh, hd).transpose(2, 0, 3, 1, 4)
    q, k, v = qkv[0] * (hd ** -0.5), qkv[1], qkv[2]             # [Bn, nh, N, hd]
    att = jnp.einsum("bhnd,bhmd->bhnm", q.astype(bf16), k.astype(bf16),
                     preferred_element_type=f32)
    rpb = p["rpb_table"][rpi.reshape(-1)].reshape(N, N, nh).transpose(2, 0, 1)
    att = att + rpb[None]
    nW = mask.shape[0]
    att = att.reshape(Bn // nW, nW, nh, N, N) + mask[None, :, None]
    att = jax.nn.softmax(att.reshape(Bn, nh, N, N), axis=-1)
    out = jnp.einsum("bhnm,bhmd->bhnd", att.astype(bf16), v.astype(bf16),
                     preferred_element_type=f32)
    out = out.transpose(0, 2, 1, 3).reshape(Bn, N, C)
    out = mm(out, p["proj_w"]) + p["proj_b"]
    out = window_reverse(out.reshape(B, -1, N, C), ws, H, W)
    if ss > 0:
        out = jnp.roll(out, shift=(ss, ss), axis=(1, 2))
    x = shortcut + out
    xn2 = _layer_norm_f32(x, p["ln2_g"], p["ln2_b"])
    h = _gelu_exact(mm(xn2, p["fc1_w"]) + p["fc1_b"])
    y = mm(h, p["fc2_w"]) + p["fc2_b"]
    return x + y


def reference_forward(x_bchw, params, masks, rpi, *, ws, nh, shift_sizes):
    B, C, H, W = x_bchw.shape
    x = x_bchw.reshape(B, H, W, C)
    for p, mask, ss in zip(params, masks, shift_sizes):
        x = reference_block(x, p, mask, rpi, ws=ws, ss=ss, nh=nh)
    return x.reshape(B, C, H, W)


# ---------------------------------------------------------------------------
# main
# ---------------------------------------------------------------------------
if __name__ == "__main__":
    # BasicLayer config: dim=128, input_resolution=(16,16), depth=2, num_heads=4,
    # window_size=8, mlp_ratio=4.0 -> blocks alternate shift 0 / 4 (Swin).
    B, dim, H, W = 2, 128, 16, 16
    depth, num_heads, window_size, mlp_ratio = 2, 4, 8, 4.0
    hidden = int(dim * mlp_ratio)

    # torch TransformerBlock clamps window/shift when the resolution is small.
    if min(H, W) <= window_size:
        window_size = min(H, W)
        shift_sizes = tuple(0 for _ in range(depth))
    else:
        shift_sizes = tuple(0 if i % 2 == 0 else window_size // 2 for i in range(depth))

    key = jax.random.PRNGKey(0)
    key, kx = jax.random.split(key)
    x = jax.random.normal(kx, (B, dim, H, W), dtype=jnp.float32)

    def linear_init(k, fan_in, fan_out):
        k1, k2 = jax.random.split(k)
        lim = 1.0 / math.sqrt(fan_in)
        w = jax.random.uniform(k1, (fan_in, fan_out), minval=-lim, maxval=lim,
                               dtype=jnp.float32)
        b = jax.random.uniform(k2, (fan_out,), minval=-lim, maxval=lim,
                               dtype=jnp.float32)
        return w, b

    def init_block(k):
        ks = jax.random.split(k, 9)
        qkv_w, qkv_b = linear_init(ks[0], dim, 3 * dim)
        proj_w, proj_b = linear_init(ks[1], dim, dim)
        fc1_w, fc1_b = linear_init(ks[2], dim, hidden)
        fc2_w, fc2_b = linear_init(ks[3], hidden, dim)
        rpb_table = 0.02 * jax.random.normal(
            ks[4], ((2 * window_size - 1) ** 2, num_heads), dtype=jnp.float32)
        ln1_g = 1.0 + 0.02 * jax.random.normal(ks[5], (dim,), dtype=jnp.float32)
        ln1_b = 0.02 * jax.random.normal(ks[6], (dim,), dtype=jnp.float32)
        ln2_g = 1.0 + 0.02 * jax.random.normal(ks[7], (dim,), dtype=jnp.float32)
        ln2_b = 0.02 * jax.random.normal(ks[8], (dim,), dtype=jnp.float32)
        return dict(qkv_w=qkv_w, qkv_b=qkv_b, proj_w=proj_w, proj_b=proj_b,
                    fc1_w=fc1_w, fc1_b=fc1_b, fc2_w=fc2_w, fc2_b=fc2_b,
                    rpb_table=rpb_table, ln1_g=ln1_g, ln1_b=ln1_b,
                    ln2_g=ln2_g, ln2_b=ln2_b)

    params = tuple(init_block(k) for k in jax.random.split(key, depth))
    masks = tuple(jnp.asarray(calculate_attn_mask(H, W, window_size, ss))
                  for ss in shift_sizes)
    rpi = jnp.asarray(relative_position_index(window_size))

    fwd = jax.jit(lambda xx, pp, mm, rr: basic_layer_forward(
        xx, pp, mm, rr, window_size=window_size, num_heads=num_heads,
        shift_sizes=shift_sizes))
    out = jax.block_until_ready(fwd(x, params, masks, rpi))

    ref_fn = jax.jit(lambda xx, pp, mm, rr: reference_forward(
        xx, pp, mm, rr, ws=window_size, nh=num_heads, shift_sizes=shift_sizes))
    ref = jax.block_until_ready(ref_fn(x, params, masks, rpi))

    assert out.shape == (B, dim, H, W)
    max_err = float(jnp.max(jnp.abs(out - ref)))
    # bf16 MXU operands + folded q-scale + approx-reciprocal softmax move the
    # rounding points slightly vs. the reference -> tolerance sized for bf16.
    assert jnp.allclose(out, ref, atol=2e-2, rtol=2e-2), \
        f"mismatch vs reference (max abs err {max_err})"
    print("KERNEL_OK")
</pallas_src>

<mosaic_0001>
module attributes {stable_mosaic.version = 11 : i64} {
  func.func @_swin_block_kernel(%arg0: i32, %arg1: memref<1x16x16x128xf32, #tpu.memory_space<vmem>>, %arg2: memref<4x4x64x64xf32, #tpu.memory_space<vmem>>, %arg3: memref<1x128xf32, #tpu.memory_space<vmem>>, %arg4: memref<1x128xf32, #tpu.memory_space<vmem>>, %arg5: memref<128x384xbf16, #tpu.memory_space<vmem>>, %arg6: memref<1x384xf32, #tpu.memory_space<vmem>>, %arg7: memref<4x32x128xbf16, #tpu.memory_space<vmem>>, %arg8: memref<1x128xf32, #tpu.memory_space<vmem>>, %arg9: memref<1x128xf32, #tpu.memory_space<vmem>>, %arg10: memref<1x128xf32, #tpu.memory_space<vmem>>, %arg11: memref<128x512xbf16, #tpu.memory_space<vmem>>, %arg12: memref<1x512xf32, #tpu.memory_space<vmem>>, %arg13: memref<512x128xbf16, #tpu.memory_space<vmem>>, %arg14: memref<1x128xf32, #tpu.memory_space<vmem>>, %arg15: memref<1x16x16x128xf32, #tpu.memory_space<vmem>>) attributes {dimension_semantics = [#tpu.dimension_semantics<parallel>], iteration_bounds = array<i64: 2>, scalar_prefetch = 0 : i64, scratch_operands = 0 : i64, tpu.core_type = #tpu.core_type<tc>, window_params = [{transform_indices = @transform_0, window_bounds = array<i64: 1, 16, 16, 128>}, {pipeline_mode = #tpu.pipeline_mode<synchronous>, transform_indices = @transform_1, window_bounds = array<i64: 4, 4, 64, 64>}, {pipeline_mode = #tpu.pipeline_mode<synchronous>, transform_indices = @transform_2, window_bounds = array<i64: 1, 128>}, {pipeline_mode = #tpu.pipeline_mode<synchronous>, transform_indices = @transform_3, window_bounds = array<i64: 1, 128>}, {pipeline_mode = #tpu.pipeline_mode<synchronous>, transform_indices = @transform_4, window_bounds = array<i64: 128, 384>}, {pipeline_mode = #tpu.pipeline_mode<synchronous>, transform_indices = @transform_5, window_bounds = array<i64: 1, 384>}, {pipeline_mode = #tpu.pipeline_mode<synchronous>, transform_indices = @transform_6, window_bounds = array<i64: 4, 32, 128>}, {pipeline_mode = #tpu.pipeline_mode<synchronous>, transform_indices = @transform_7, window_bounds = array<i64: 1, 128>}, {pipeline_mode = #tpu.pipeline_mode<synchronous>, transform_indices = @transform_8, window_bounds = array<i64: 1, 128>}, {pipeline_mode = #tpu.pipeline_mode<synchronous>, transform_indices = @transform_9, window_bounds = array<i64: 1, 128>}, {pipeline_mode = #tpu.pipeline_mode<synchronous>, transform_indices = @transform_10, window_bounds = array<i64: 128, 512>}, {pipeline_mode = #tpu.pipeline_mode<synchronous>, transform_indices = @transform_11, window_bounds = array<i64: 1, 512>}, {pipeline_mode = #tpu.pipeline_mode<synchronous>, transform_indices = @transform_12, window_bounds = array<i64: 512, 128>}, {pipeline_mode = #tpu.pipeline_mode<synchronous>, transform_indices = @transform_13, window_bounds = array<i64: 1, 128>}, {transform_indices = @transform_14, window_bounds = array<i64: 1, 16, 16, 128>}]} {
    %c0 = arith.constant 0 : index
    %c0_0 = arith.constant 0 : index
    %c0_1 = arith.constant 0 : index
    %c0_2 = arith.constant 0 : index
    %0 = vector.load %arg1[%c0, %c0_0, %c0_1, %c0_2] : memref<1x16x16x128xf32, #tpu.memory_space<vmem>>, vector<1x8x8x128xf32>
    %1 = vector.shape_cast %0 : vector<1x8x8x128xf32> to vector<8x8x128xf32>
    %2 = vector.shape_cast %1 : vector<8x8x128xf32> to vector<64x128xf32>
    %c0_3 = arith.constant 0 : index
    %c0_4 = arith.constant 0 : index
    %c8 = arith.constant 8 : index
    %c0_5 = arith.constant 0 : index
    %3 = vector.load %arg1[%c0_3, %c0_4, %c8, %c0_5] : memref<1x16x16x128xf32, #tpu.memory_space<vmem>>, vector<1x8x8x128xf32>
    %4 = vector.shape_cast %3 : vector<1x8x8x128xf32> to vector<8x8x128xf32>
    %5 = vector.shape_cast %4 : vector<8x8x128xf32> to vector<64x128xf32>
    %c0_6 = arith.constant 0 : index
    %c8_7 = arith.constant 8 : index
    %c0_8 = arith.constant 0 : index
    %c0_9 = arith.constant 0 : index
    %6 = vector.load %arg1[%c0_6, %c8_7, %c0_8, %c0_9] : memref<1x16x16x128xf32, #tpu.memory_space<vmem>>, vector<1x8x8x128xf32>
    %7 = vector.shape_cast %6 : vector<1x8x8x128xf32> to vector<8x8x128xf32>
    %8 = vector.shape_cast %7 : vector<8x8x128xf32> to vector<64x128xf32>
    %c0_10 = arith.constant 0 : index
    %c8_11 = arith.constant 8 : index
    %c8_12 = arith.constant 8 : index
    %c0_13 = arith.constant 0 : index
    %9 = vector.load %arg1[%c0_10, %c8_11, %c8_12, %c0_13] : memref<1x16x16x128xf32, #tpu.memory_space<vmem>>, vector<1x8x8x128xf32>
    %10 = vector.shape_cast %9 : vector<1x8x8x128xf32> to vector<8x8x128xf32>
    %11 = vector.shape_cast %10 : vector<8x8x128xf32> to vector<64x128xf32>
    %12 = tpu.concatenate %2, %5, %8, %11 in 0 : vector<64x128xf32>, vector<64x128xf32>, vector<64x128xf32>, vector<64x128xf32> -> vector<256x128xf32>
    %c0_14 = arith.constant 0 : index
    %c0_15 = arith.constant 0 : index
    %13 = vector.load %arg3[%c0_14, %c0_15] : memref<1x128xf32, #tpu.memory_space<vmem>>, vector<1x128xf32>
    %c0_16 = arith.constant 0 : index
    %c0_17 = arith.constant 0 : index
    %14 = vector.load %arg4[%c0_16, %c0_17] : memref<1x128xf32, #tpu.memory_space<vmem>>, vector<1x128xf32>
    %cst = arith.constant dense<0.000000e+00> : vector<256xf32>
    %15 = vector.multi_reduction <add>, %12, %cst [1] : vector<256x128xf32> to vector<256xf32>
    %16 = vector.shape_cast %15 : vector<256xf32> to vector<256x1xf32>
    %cst_18 = arith.constant 1.280000e+02 : f32
    %17 = vector.broadcast %cst_18 : f32 to vector<256x1xf32>
    %18 = arith.divf %16, %17 : vector<256x1xf32>
    %19 = vector.broadcast %18 : vector<256x1xf32> to vector<256x128xf32>
    %20 = arith.subf %12, %19 : vector<256x128xf32>
    %21 = arith.mulf %20, %20 : vector<256x128xf32>
    %cst_19 = arith.constant dense<0.000000e+00> : vector<256xf32>
    %22 = vector.multi_reduction <add>, %21, %cst_19 [1] : vector<256x128xf32> to vector<256xf32>
    %23 = vector.shape_cast %22 : vector<256xf32> to vector<256x1xf32>
    %cst_20 = arith.constant 1.280000e+02 : f32
    %24 = vector.broadcast %cst_20 : f32 to vector<256x1xf32>
    %25 = arith.divf %23, %24 : vector<256x1xf32>
    %26 = vector.broadcast %18 : vector<256x1xf32> to vector<256x128xf32>
    %27 = arith.subf %12, %26 : vector<256x128xf32>
    %cst_21 = arith.constant 9.99999974E-6 : f32
    %28 = vector.broadcast %cst_21 : f32 to vector<256x1xf32>
    %29 = arith.addf %25, %28 : vector<256x1xf32>
    %30 = math.rsqrt %29 : vector<256x1xf32>
    %31 = vector.broadcast %30 : vector<256x1xf32> to vector<256x128xf32>
    %32 = arith.mulf %27, %31 : vector<256x128xf32>
    %33 = vector.broadcast %13 : vector<1x128xf32> to vector<256x128xf32>
    %34 = arith.mulf %32, %33 : vector<256x128xf32>
    %35 = vector.broadcast %14 : vector<1x128xf32> to vector<256x128xf32>
    %36 = arith.addf %34, %35 : vector<256x128xf32>
    %37 = arith.truncf %36 : vector<256x128xf32> to vector<256x128xbf16>
    %c0_22 = arith.constant 0 : index
    %c0_23 = arith.constant 0 : index
    %38 = vector.load %arg5[%c0_22, %c0_23] : memref<128x384xbf16, #tpu.memory_space<vmem>>, vector<128x384xbf16>
    %cst_24 = arith.constant dense<0.000000e+00> : vector<256x384xf32>
    %39 = tpu.matmul %37, %38, %cst_24 {dimension_numbers = #tpu.dot_dimension_numbers<[1], [0], [0], [1], [0, 0, 1, 1], [], []>} : vector<256x128xbf16>, vector<128x384xbf16>, vector<256x384xf32> -> vector<256x384xf32>
    %c0_25 = arith.constant 0 : index
    %c0_26 = arith.constant 0 : index
    %40 = vector.load %arg6[%c0_25, %c0_26] : memref<1x384xf32, #tpu.memory_space<vmem>>, vector<1x384xf32>
    %41 = vector.broadcast %40 : vector<1x384xf32> to vector<256x384xf32>
    %42 = arith.addf %39, %41 : vector<256x384xf32>
    %cst_27 = arith.constant 0.000000e+00 : f32
    %43 = vector.broadcast %cst_27 : f32 to vector<256x128xf32>
    %44 = vector.extract_strided_slice %42 {offsets = [0, 0], sizes = [256, 32], strides = [1, 1]} : vector<256x384xf32> to vector<256x32xf32>
    %45 = arith.truncf %44 : vector<256x32xf32> to vector<256x32xbf16>
    %46 = vector.shape_cast %45 : vector<256x32xbf16> to vector<4x64x32xbf16>
    %47 = vector.extract_strided_slice %42 {offsets = [0, 128], sizes = [256, 32], strides = [1, 1]} : vector<256x384xf32> to vector<256x32xf32>
    %48 = arith.truncf %47 : vector<256x32xf32> to vector<256x32xbf16>
    %49 = vector.shape_cast %48 : vector<256x32xbf16> to vector<4x64x32xbf16>
    %50 = vector.extract_strided_slice %42 {offsets = [0, 256], sizes = [256, 32], strides = [1, 1]} : vector<256x384xf32> to vector<256x32xf32>
    %51 = arith.truncf %50 : vector<256x32xf32> to vector<256x32xbf16>
    %52 = vector.shape_cast %51 : vector<256x32xbf16> to vector<4x64x32xbf16>
    "tpu.trace_start"() <{level = 10 : i32, message = "wnd,wmd->wnm"}> : () -> ()
    %cst_28 = arith.constant dense<0.000000e+00> : vector<4x64x64xf32>
    %53 = tpu.matmul %46, %49, %cst_28 {dimension_numbers = #tpu.dot_dimension_numbers<[2], [2], [1], [1], [0, 0, 0, 1, 1, 1], [0], [0]>} : vector<4x64x32xbf16>, vector<4x64x32xbf16>, vector<4x64x64xf32> -> vector<4x64x64xf32>
    "tpu.trace_stop"() : () -> ()
    %c0_29 = arith.constant 0 : index
    %c0_30 = arith.constant 0 : index
    %c0_31 = arith.constant 0 : index
    %c0_32 = arith.constant 0 : index
    %54 = vector.load %arg2[%c0_29, %c0_30, %c0_31, %c0_32] : memref<4x4x64x64xf32, #tpu.memory_space<vmem>>, vector<1x4x64x64xf32>
    %55 = vector.shape_cast %54 : vector<1x4x64x64xf32> to vector<4x64x64xf32>
    %56 = arith.addf %53, %55 : vector<4x64x64xf32>
    %cst_33 = arith.constant dense<0xFF800000> : vector<4x64xf32>
    %57 = vector.multi_reduction <maximumf>, %56, %cst_33 [2] : vector<4x64x64xf32> to vector<4x64xf32>
    %58 = vector.shape_cast %57 : vector<4x64xf32> to vector<4x64x1xf32>
    %59 = vector.broadcast %58 : vector<4x64x1xf32> to vector<4x64x64xf32>
    %60 = arith.subf %56, %59 : vector<4x64x64xf32>
    %61 = math.exp %60 : vector<4x64x64xf32>
    %cst_34 = arith.constant dense<0.000000e+00> : vector<4x64xf32>
    %62 = vector.multi_reduction <add>, %61, %cst_34 [2] : vector<4x64x64xf32> to vector<4x64xf32>
    %63 = vector.shape_cast %62 : vector<4x64xf32> to vector<4x64x1xf32>
    %64 = tpu.reciprocal %63 {approx = true} : vector<4x64x1xf32> -> vector<4x64x1xf32>
    %65 = vector.broadcast %64 : vector<4x64x1xf32> to vector<4x64x64xf32>
    %66 = arith.mulf %61, %65 : vector<4x64x64xf32>
    %67 = arith.truncf %66 : vector<4x64x64xf32> to vector<4x64x64xbf16>
    "tpu.trace_start"() <{level = 10 : i32, message = "wnm,wmd->wnd"}> : () -> ()
    %cst_35 = arith.constant dense<0.000000e+00> : vector<4x64x32xf32>
    %68 = tpu.matmul %67, %52, %cst_35 {dimension_numbers = #tpu.dot_dimension_numbers<[2], [1], [1], [2], [0, 0, 0, 1, 1, 2], [0], [0]>} : vector<4x64x64xbf16>, vector<4x64x32xbf16>, vector<4x64x32xf32> -> vector<4x64x32xf32>
    "tpu.trace_stop"() : () -> ()
    %69 = vector.shape_cast %68 : vector<4x64x32xf32> to vector<256x32xf32>
    %70 = arith.truncf %69 : vector<256x32xf32> to vector<256x32xbf16>
    %c0_36 = arith.constant 0 : index
    %c0_37 = arith.constant 0 : index
    %c0_38 = arith.constant 0 : index
    %71 = vector.load %arg7[%c0_36, %c0_37, %c0_38] : memref<4x32x128xbf16, #tpu.memory_space<vmem>>, vector<1x32x128xbf16>
    %72 = vector.shape_cast %71 : vector<1x32x128xbf16> to vector<32x128xbf16>
    %cst_39 = arith.constant dense<0.000000e+00> : vector<256x128xf32>
    %73 = tpu.matmul %70, %72, %cst_39 {dimension_numbers = #tpu.dot_dimension_numbers<[1], [0], [0], [1], [0, 0, 1, 1], [], []>} : vector<256x32xbf16>, vector<32x128xbf16>, vector<256x128xf32> -> vector<256x128xf32>
    %74 = arith.addf %43, %73 : vector<256x128xf32>
    %75 = vector.extract_strided_slice %42 {offsets = [0, 32], sizes = [256, 32], strides = [1, 1]} : vector<256x384xf32> to vector<256x32xf32>
    %76 = arith.truncf %75 : vector<256x32xf32> to vector<256x32xbf16>
    %77 = vector.shape_cast %76 : vector<256x32xbf16> to vector<4x64x32xbf16>
    %78 = vector.extract_strided_slice %42 {offsets = [0, 160], sizes = [256, 32], strides = [1, 1]} : vector<256x384xf32> to vector<256x32xf32>
    %79 = arith.truncf %78 : vector<256x32xf32> to vector<256x32xbf16>
    %80 = vector.shape_cast %79 : vector<256x32xbf16> to vector<4x64x32xbf16>
    %81 = vector.extract_strided_slice %42 {offsets = [0, 288], sizes = [256, 32], strides = [1, 1]} : vector<256x384xf32> to vector<256x32xf32>
    %82 = arith.truncf %81 : vector<256x32xf32> to vector<256x32xbf16>
    %83 = vector.shape_cast %82 : vector<256x32xbf16> to vector<4x64x32xbf16>
    "tpu.trace_start"() <{level = 10 : i32, message = "wnd,wmd->wnm"}> : () -> ()
    %cst_40 = arith.constant dense<0.000000e+00> : vector<4x64x64xf32>
    %84 = tpu.matmul %77, %80, %cst_40 {dimension_numbers = #tpu.dot_dimension_numbers<[2], [2], [1], [1], [0, 0, 0, 1, 1, 1], [0], [0]>} : vector<4x64x32xbf16>, vector<4x64x32xbf16>, vector<4x64x64xf32> -> vector<4x64x64xf32>
    "tpu.trace_stop"() : () -> ()
    %c1 = arith.constant 1 : index
    %c0_41 = arith.constant 0 : index
    %c0_42 = arith.constant 0 : index
    %c0_43 = arith.constant 0 : index
    %85 = vector.load %arg2[%c1, %c0_41, %c0_42, %c0_43] : memref<4x4x64x64xf32, #tpu.memory_space<vmem>>, vector<1x4x64x64xf32>
    %86 = vector.shape_cast %85 : vector<1x4x64x64xf32> to vector<4x64x64xf32>
    %87 = arith.addf %84, %86 : vector<4x64x64xf32>
    %cst_44 = arith.constant dense<0xFF800000> : vector<4x64xf32>
    %88 = vector.multi_reduction <maximumf>, %87, %cst_44 [2] : vector<4x64x64xf32> to vector<4x64xf32>
    %89 = vector.shape_cast %88 : vector<4x64xf32> to vector<4x64x1xf32>
    %90 = vector.broadcast %89 : vector<4x64x1xf32> to vector<4x64x64xf32>
    %91 = arith.subf %87, %90 : vector<4x64x64xf32>
    %92 = math.exp %91 : vector<4x64x64xf32>
    %cst_45 = arith.constant dense<0.000000e+00> : vector<4x64xf32>
    %93 = vector.multi_reduction <add>, %92, %cst_45 [2] : vector<4x64x64xf32> to vector<4x64xf32>
    %94 = vector.shape_cast %93 : vector<4x64xf32> to vector<4x64x1xf32>
    %95 = tpu.reciprocal %94 {approx = true} : vector<4x64x1xf32> -> vector<4x64x1xf32>
    %96 = vector.broadcast %95 : vector<4x64x1xf32> to vector<4x64x64xf32>
    %97 = arith.mulf %92, %96 : vector<4x64x64xf32>
    %98 = arith.truncf %97 : vector<4x64x64xf32> to vector<4x64x64xbf16>
    "tpu.trace_start"() <{level = 10 : i32, message = "wnm,wmd->wnd"}> : () -> ()
    %cst_46 = arith.constant dense<0.000000e+00> : vector<4x64x32xf32>
    %99 = tpu.matmul %98, %83, %cst_46 {dimension_numbers = #tpu.dot_dimension_numbers<[2], [1], [1], [2], [0, 0, 0, 1, 1, 2], [0], [0]>} : vector<4x64x64xbf16>, vector<4x64x32xbf16>, vector<4x64x32xf32> -> vector<4x64x32xf32>
    "tpu.trace_stop"() : () -> ()
    %100 = vector.shape_cast %99 : vector<4x64x32xf32> to vector<256x32xf32>
    %101 = arith.truncf %100 : vector<256x32xf32> to vector<256x32xbf16>
    %c1_47 = arith.constant 1 : index
    %c0_48 = arith.constant 0 : index
    %c0_49 = arith.constant 0 : index
    %102 = vector.load %arg7[%c1_47, %c0_48, %c0_49] : memref<4x32x128xbf16, #tpu.memory_space<vmem>>, vector<1x32x128xbf16>
    %103 = vector.shape_cast %102 : vector<1x32x128xbf16> to vector<32x128xbf16>
    %cst_50 = arith.constant dense<0.000000e+00> : vector<256x128xf32>
    %104 = tpu.matmul %101, %103, %cst_50 {dimension_numbers = #tpu.dot_dimension_numbers<[1], [0], [0], [1], [0, 0, 1, 1], [], []>} : vector<256x32xbf16>, vector<32x128xbf16>, vector<256x128xf32> -> vector<256x128xf32>
    %105 = arith.addf %74, %104 : vector<256x128xf32>
    %106 = vector.extract_strided_slice %42 {offsets = [0, 64], sizes = [256, 32], strides = [1, 1]} : vector<256x384xf32> to vector<256x32xf32>
    %107 = arith.truncf %106 : vector<256x32xf32> to vector<256x32xbf16>
    %108 = vector.shape_cast %107 : vector<256x32xbf16> to vector<4x64x32xbf16>
    %109 = vector.extract_strided_slice %42 {offsets = [0, 192], sizes = [256, 32], strides = [1, 1]} : vector<256x384xf32> to vector<256x32xf32>
    %110 = arith.truncf %109 : vector<256x32xf32> to vector<256x32xbf16>
    %111 = vector.shape_cast %110 : vector<256x32xbf16> to vector<4x64x32xbf16>
    %112 = vector.extract_strided_slice %42 {offsets = [0, 320], sizes = [256, 32], strides = [1, 1]} : vector<256x384xf32> to vector<256x32xf32>
    %113 = arith.truncf %112 : vector<256x32xf32> to vector<256x32xbf16>
    %114 = vector.shape_cast %113 : vector<256x32xbf16> to vector<4x64x32xbf16>
    "tpu.trace_start"() <{level = 10 : i32, message = "wnd,wmd->wnm"}> : () -> ()
    %cst_51 = arith.constant dense<0.000000e+00> : vector<4x64x64xf32>
    %115 = tpu.matmul %108, %111, %cst_51 {dimension_numbers = #tpu.dot_dimension_numbers<[2], [2], [1], [1], [0, 0, 0, 1, 1, 1], [0], [0]>} : vector<4x64x32xbf16>, vector<4x64x32xbf16>, vector<4x64x64xf32> -> vector<4x64x64xf32>
    "tpu.trace_stop"() : () -> ()
    %c2 = arith.constant 2 : index
    %c0_52 = arith.constant 0 : index
    %c0_53 = arith.constant 0 : index
    %c0_54 = arith.constant 0 : index
    %116 = vector.load %arg2[%c2, %c0_52, %c0_53, %c0_54] : memref<4x4x64x64xf32, #tpu.memory_space<vmem>>, vector<1x4x64x64xf32>
    %117 = vector.shape_cast %116 : vector<1x4x64x64xf32> to vector<4x64x64xf32>
    %118 = arith.addf %115, %117 : vector<4x64x64xf32>
    %cst_55 = arith.constant dense<0xFF800000> : vector<4x64xf32>
    %119 = vector.multi_reduction <maximumf>, %118, %cst_55 [2] : vector<4x64x64xf32> to vector<4x64xf32>
    %120 = vector.shape_cast %119 : vector<4x64xf32> to vector<4x64x1xf32>
    %121 = vector.broadcast %120 : vector<4x64x1xf32> to vector<4x64x64xf32>
    %122 = arith.subf %118, %121 : vector<4x64x64xf32>
    %123 = math.exp %122 : vector<4x64x64xf32>
    %cst_56 = arith.constant dense<0.000000e+00> : vector<4x64xf32>
    %124 = vector.multi_reduction <add>, %123, %cst_56 [2] : vector<4x64x64xf32> to vector<4x64xf32>
    %125 = vector.shape_cast %124 : vector<4x64xf32> to vector<4x64x1xf32>
    %126 = tpu.reciprocal %125 {approx = true} : vector<4x64x1xf32> -> vector<4x64x1xf32>
    %127 = vector.broadcast %126 : vector<4x64x1xf32> to vector<4x64x64xf32>
    %128 = arith.mulf %123, %127 : vector<4x64x64xf32>
    %129 = arith.truncf %128 : vector<4x64x64xf32> to vector<4x64x64xbf16>
    "tpu.trace_start"() <{level = 10 : i32, message = "wnm,wmd->wnd"}> : () -> ()
    %cst_57 = arith.constant dense<0.000000e+00> : vector<4x64x32xf32>
    %130 = tpu.matmul %129, %114, %cst_57 {dimension_numbers = #tpu.dot_dimension_numbers<[2], [1], [1], [2], [0, 0, 0, 1, 1, 2], [0], [0]>} : vector<4x64x64xbf16>, vector<4x64x32xbf16>, vector<4x64x32xf32> -> vector<4x64x32xf32>
    "tpu.trace_stop"() : () -> ()
    %131 = vector.shape_cast %130 : vector<4x64x32xf32> to vector<256x32xf32>
    %132 = arith.truncf %131 : vector<256x32xf32> to vector<256x32xbf16>
    %c2_58 = arith.constant 2 : index
    %c0_59 = arith.constant 0 : index
    %c0_60 = arith.constant 0 : index
    %133 = vector.load %arg7[%c2_58, %c0_59, %c0_60] : memref<4x32x128xbf16, #tpu.memory_space<vmem>>, vector<1x32x128xbf16>
    %134 = vector.shape_cast %133 : vector<1x32x128xbf16> to vector<32x128xbf16>
    %cst_61 = arith.constant dense<0.000000e+00> : vector<256x128xf32>
    %135 = tpu.matmul %132, %134, %cst_61 {dimension_numbers = #tpu.dot_dimension_numbers<[1], [0], [0], [1], [0, 0, 1, 1], [], []>} : vector<256x32xbf16>, vector<32x128xbf16>, vector<256x128xf32> -> vector<256x128xf32>
    %136 = arith.addf %105, %135 : vector<256x128xf32>
    %137 = vector.extract_strided_slice %42 {offsets = [0, 96], sizes = [256, 32], strides = [1, 1]} : vector<256x384xf32> to vector<256x32xf32>
    %138 = arith.truncf %137 : vector<256x32xf32> to vector<256x32xbf16>
    %139 = vector.shape_cast %138 : vector<256x32xbf16> to vector<4x64x32xbf16>
    %140 = vector.extract_strided_slice %42 {offsets = [0, 224], sizes = [256, 32], strides = [1, 1]} : vector<256x384xf32> to vector<256x32xf32>
    %141 = arith.truncf %140 : vector<256x32xf32> to vector<256x32xbf16>
    %142 = vector.shape_cast %141 : vector<256x32xbf16> to vector<4x64x32xbf16>
    %143 = vector.extract_strided_slice %42 {offsets = [0, 352], sizes = [256, 32], strides = [1, 1]} : vector<256x384xf32> to vector<256x32xf32>
    %144 = arith.truncf %143 : vector<256x32xf32> to vector<256x32xbf16>
    %145 = vector.shape_cast %144 : vector<256x32xbf16> to vector<4x64x32xbf16>
    "tpu.trace_start"() <{level = 10 : i32, message = "wnd,wmd->wnm"}> : () -> ()
    %cst_62 = arith.constant dense<0.000000e+00> : vector<4x64x64xf32>
    %146 = tpu.matmul %139, %142, %cst_62 {dimension_numbers = #tpu.dot_dimension_numbers<[2], [2], [1], [1], [0, 0, 0, 1, 1, 1], [0], [0]>} : vector<4x64x32xbf16>, vector<4x64x32xbf16>, vector<4x64x64xf32> -> vector<4x64x64xf32>
    "tpu.trace_stop"() : () -> ()
    %c3 = arith.constant 3 : index
    %c0_63 = arith.constant 0 : index
    %c0_64 = arith.constant 0 : index
    %c0_65 = arith.constant 0 : index
    %147 = vector.load %arg2[%c3, %c0_63, %c0_64, %c0_65] : memref<4x4x64x64xf32, #tpu.memory_space<vmem>>, vector<1x4x64x64xf32>
    %148 = vector.shape_cast %147 : vector<1x4x64x64xf32> to vector<4x64x64xf32>
    %149 = arith.addf %146, %148 : vector<4x64x64xf32>
    %cst_66 = arith.constant dense<0xFF800000> : vector<4x64xf32>
    %150 = vector.multi_reduction <maximumf>, %149, %cst_66 [2] : vector<4x64x64xf32> to vector<4x64xf32>
    %151 = vector.shape_cast %150 : vector<4x64xf32> to vector<4x64x1xf32>
    %152 = vector.broadcast %151 : vector<4x64x1xf32> to vector<4x64x64xf32>
    %153 = arith.subf %149, %152 : vector<4x64x64xf32>
    %154 = math.exp %153 : vector<4x64x64xf32>
    %cst_67 = arith.constant dense<0.000000e+00> : vector<4x64xf32>
    %155 = vector.multi_reduction <add>, %154, %cst_67 [2] : vector<4x64x64xf32> to vector<4x64xf32>
    %156 = vector.shape_cast %155 : vector<4x64xf32> to vector<4x64x1xf32>
    %157 = tpu.reciprocal %156 {approx = true} : vector<4x64x1xf32> -> vector<4x64x1xf32>
    %158 = vector.broadcast %157 : vector<4x64x1xf32> to vector<4x64x64xf32>
    %159 = arith.mulf %154, %158 : vector<4x64x64xf32>
    %160 = arith.truncf %159 : vector<4x64x64xf32> to vector<4x64x64xbf16>
    "tpu.trace_start"() <{level = 10 : i32, message = "wnm,wmd->wnd"}> : () -> ()
    %cst_68 = arith.constant dense<0.000000e+00> : vector<4x64x32xf32>
    %161 = tpu.matmul %160, %145, %cst_68 {dimension_numbers = #tpu.dot_dimension_numbers<[2], [1], [1], [2], [0, 0, 0, 1, 1, 2], [0], [0]>} : vector<4x64x64xbf16>, vector<4x64x32xbf16>, vector<4x64x32xf32> -> vector<4x64x32xf32>
    "tpu.trace_stop"() : () -> ()
    %162 = vector.shape_cast %161 : vector<4x64x32xf32> to vector<256x32xf32>
    %163 = arith.truncf %162 : vector<256x32xf32> to vector<256x32xbf16>
    %c3_69 = arith.constant 3 : index
    %c0_70 = arith.constant 0 : index
    %c0_71 = arith.constant 0 : index
    %164 = vector.load %arg7[%c3_69, %c0_70, %c0_71] : memref<4x32x128xbf16, #tpu.memory_space<vmem>>, vector<1x32x128xbf16>
    %165 = vector.shape_cast %164 : vector<1x32x128xbf16> to vector<32x128xbf16>
    %cst_72 = arith.constant dense<0.000000e+00> : vector<256x128xf32>
    %166 = tpu.matmul %163, %165, %cst_72 {dimension_numbers = #tpu.dot_dimension_numbers<[1], [0], [0], [1], [0, 0, 1, 1], [], []>} : vector<256x32xbf16>, vector<32x128xbf16>, vector<256x128xf32> -> vector<256x128xf32>
    %167 = arith.addf %136, %166 : vector<256x128xf32>
    %168 = arith.addf %12, %167 : vector<256x128xf32>
    %c0_73 = arith.constant 0 : index
    %c0_74 = arith.constant 0 : index
    %169 = vector.load %arg8[%c0_73, %c0_74] : memref<1x128xf32, #tpu.memory_space<vmem>>, vector<1x128xf32>
    %170 = vector.broadcast %169 : vector<1x128xf32> to vector<256x128xf32>
    %171 = arith.addf %168, %170 : vector<256x128xf32>
    %c0_75 = arith.constant 0 : index
    %c0_76 = arith.constant 0 : index
    %172 = vector.load %arg9[%c0_75, %c0_76] : memref<1x128xf32, #tpu.memory_space<vmem>>, vector<1x128xf32>
    %c0_77 = arith.constant 0 : index
    %c0_78 = arith.constant 0 : index
    %173 = vector.load %arg10[%c0_77, %c0_78] : memref<1x128xf32, #tpu.memory_space<vmem>>, vector<1x128xf32>
    %cst_79 = arith.constant dense<0.000000e+00> : vector<256xf32>
    %174 = vector.multi_reduction <add>, %171, %cst_79 [1] : vector<256x128xf32> to vector<256xf32>
    %175 = vector.shape_cast %174 : vector<256xf32> to vector<256x1xf32>
    %cst_80 = arith.constant 1.280000e+02 : f32
    %176 = vector.broadcast %cst_80 : f32 to vector<256x1xf32>
    %177 = arith.divf %175, %176 : vector<256x1xf32>
    %178 = vector.broadcast %177 : vector<256x1xf32> to vector<256x128xf32>
    %179 = arith.subf %171, %178 : vector<256x128xf32>
    %180 = arith.mulf %179, %179 : vector<256x128xf32>
    %cst_81 = arith.constant dense<0.000000e+00> : vector<256xf32>
    %181 = vector.multi_reduction <add>, %180, %cst_81 [1] : vector<256x128xf32> to vector<256xf32>
    %182 = vector.shape_cast %181 : vector<256xf32> to vector<256x1xf32>
    %cst_82 = arith.constant 1.280000e+02 : f32
    %183 = vector.broadcast %cst_82 : f32 to vector<256x1xf32>
    %184 = arith.divf %182, %183 : vector<256x1xf32>
    %185 = vector.broadcast %177 : vector<256x1xf32> to vector<256x128xf32>
    %186 = arith.subf %171, %185 : vector<256x128xf32>
    %cst_83 = arith.constant 9.99999974E-6 : f32
    %187 = vector.broadcast %cst_83 : f32 to vector<256x1xf32>
    %188 = arith.addf %184, %187 : vector<256x1xf32>
    %189 = math.rsqrt %188 : vector<256x1xf32>
    %190 = vector.broadcast %189 : vector<256x1xf32> to vector<256x128xf32>
    %191 = arith.mulf %186, %190 : vector<256x128xf32>
    %192 = vector.broadcast %172 : vector<1x128xf32> to vector<256x128xf32>
    %193 = arith.mulf %191, %192 : vector<256x128xf32>
    %194 = vector.broadcast %173 : vector<1x128xf32> to vector<256x128xf32>
    %195 = arith.addf %193, %194 : vector<256x128xf32>
    %196 = arith.truncf %195 : vector<256x128xf32> to vector<256x128xbf16>
    %c0_84 = arith.constant 0 : index
    %c0_85 = arith.constant 0 : index
    %197 = vector.load %arg11[%c0_84, %c0_85] : memref<128x512xbf16, #tpu.memory_space<vmem>>, vector<128x512xbf16>
    %cst_86 = arith.constant dense<0.000000e+00> : vector<256x512xf32>
    %198 = tpu.matmul %196, %197, %cst_86 {dimension_numbers = #tpu.dot_dimension_numbers<[1], [0], [0], [1], [0, 0, 1, 1], [], []>} : vector<256x128xbf16>, vector<128x512xbf16>, vector<256x512xf32> -> vector<256x512xf32>
    %c0_87 = arith.constant 0 : index
    %c0_88 = arith.constant 0 : index
    %199 = vector.load %arg12[%c0_87, %c0_88] : memref<1x512xf32, #tpu.memory_space<vmem>>, vector<1x512xf32>
    %200 = vector.broadcast %199 : vector<1x512xf32> to vector<256x512xf32>
    %201 = arith.addf %198, %200 : vector<256x512xf32>
    %cst_89 = arith.constant 5.000000e-01 : f32
    %202 = vector.broadcast %cst_89 : f32 to vector<256x512xf32>
    %203 = arith.mulf %202, %201 : vector<256x512xf32>
    %cst_90 = arith.constant 0.707106769 : f32
    %204 = vector.broadcast %cst_90 : f32 to vector<256x512xf32>
    %205 = arith.mulf %201, %204 : vector<256x512xf32>
    %206 = math.erf %205 : vector<256x512xf32>
    %cst_91 = arith.constant 1.000000e+00 : f32
    %207 = vector.broadcast %cst_91 : f32 to vector<256x512xf32>
    %208 = arith.addf %207, %206 : vector<256x512xf32>
    %209 = arith.mulf %203, %208 : vector<256x512xf32>
    %210 = arith.truncf %209 : vector<256x512xf32> to vector<256x512xbf16>
    %c0_92 = arith.constant 0 : index
    %c0_93 = arith.constant 0 : index
    %211 = vector.load %arg13[%c0_92, %c0_93] : memref<512x128xbf16, #tpu.memory_space<vmem>>, vector<512x128xbf16>
    %cst_94 = arith.constant dense<0.000000e+00> : vector<256x128xf32>
    %212 = tpu.matmul %210, %211, %cst_94 {dimension_numbers = #tpu.dot_dimension_numbers<[1], [0], [0], [1], [0, 0, 1, 1], [], []>} : vector<256x512xbf16>, vector<512x128xbf16>, vector<256x128xf32> -> vector<256x128xf32>
    %c0_95 = arith.constant 0 : index
    %c0_96 = arith.constant 0 : index
    %213 = vector.load %arg14[%c0_95, %c0_96] : memref<1x128xf32, #tpu.memory_space<vmem>>, vector<1x128xf32>
    %214 = vector.broadcast %213 : vector<1x128xf32> to vector<256x128xf32>
    %215 = arith.addf %212, %214 : vector<256x128xf32>
    %216 = arith.addf %171, %215 : vector<256x128xf32>
    %217 = vector.shape_cast %216 : vector<256x128xf32> to vector<2x2x8x8x128xf32>
    %218 = vector.extract_strided_slice %217 {offsets = [0, 0, 0, 0, 0], sizes = [1, 1, 8, 8, 128], strides = [1, 1, 1, 1, 1]} : vector<2x2x8x8x128xf32> to vector<1x1x8x8x128xf32>
    %219 = vector.shape_cast %218 : vector<1x1x8x8x128xf32> to vector<8x8x128xf32>
    %c0_97 = arith.constant 0 : index
    %c0_98 = arith.constant 0 : index
    %c0_99 = arith.constant 0 : index
    %c0_100 = arith.constant 0 : index
    %220 = vector.load %arg15[%c0_97, %c0_98, %c0_99, %c0_100] : memref<1x16x16x128xf32, #tpu.memory_space<vmem>>, vector<1x8x8x128xf32>
    %221 = vector.shape_cast %220 : vector<1x8x8x128xf32> to vector<8x8x128xf32>
    %222 = vector.shape_cast %219 : vector<8x8x128xf32> to vector<1x8x8x128xf32>
    tpu.vector_store %arg15[%c0_97, %c0_98, %c0_99, %c0_100], %222 {strides = array<i32>} : memref<1x16x16x128xf32, #tpu.memory_space<vmem>>, vector<1x8x8x128xf32>,
    %223 = vector.extract_strided_slice %217 {offsets = [0, 1, 0, 0, 0], sizes = [1, 1, 8, 8, 128], strides = [1, 1, 1, 1, 1]} : vector<2x2x8x8x128xf32> to vector<1x1x8x8x128xf32>
    %224 = vector.shape_cast %223 : vector<1x1x8x8x128xf32> to vector<8x8x128xf32>
    %c0_101 = arith.constant 0 : index
    %c0_102 = arith.constant 0 : index
    %c8_103 = arith.constant 8 : index
    %c0_104 = arith.constant 0 : index
    %225 = vector.load %arg15[%c0_101, %c0_102, %c8_103, %c0_104] : memref<1x16x16x128xf32, #tpu.memory_space<vmem>>, vector<1x8x8x128xf32>
    %226 = vector.shape_cast %225 : vector<1x8x8x128xf32> to vector<8x8x128xf32>
    %227 = vector.shape_cast %224 : vector<8x8x128xf32> to vector<1x8x8x128xf32>
    tpu.vector_store %arg15[%c0_101, %c0_102, %c8_103, %c0_104], %227 {strides = array<i32>} : memref<1x16x16x128xf32, #tpu.memory_space<vmem>>, vector<1x8x8x128xf32>,
    %228 = vector.extract_strided_slice %217 {offsets = [1, 0, 0, 0, 0], sizes = [1, 1, 8, 8, 128], strides = [1, 1, 1, 1, 1]} : vector<2x2x8x8x128xf32> to vector<1x1x8x8x128xf32>
    %229 = vector.shape_cast %228 : vector<1x1x8x8x128xf32> to vector<8x8x128xf32>
    %c0_105 = arith.constant 0 : index
    %c8_106 = arith.constant 8 : index
    %c0_107 = arith.constant 0 : index
    %c0_108 = arith.constant 0 : index
    %230 = vector.load %arg15[%c0_105, %c8_106, %c0_107, %c0_108] : memref<1x16x16x128xf32, #tpu.memory_space<vmem>>, vector<1x8x8x128xf32>
    %231 = vector.shape_cast %230 : vector<1x8x8x128xf32> to vector<8x8x128xf32>
    %232 = vector.shape_cast %229 : vector<8x8x128xf32> to vector<1x8x8x128xf32>
    tpu.vector_store %arg15[%c0_105, %c8_106, %c0_107, %c0_108], %232 {strides = array<i32>} : memref<1x16x16x128xf32, #tpu.memory_space<vmem>>, vector<1x8x8x128xf32>,
    %233 = vector.extract_strided_slice %217 {offsets = [1, 1, 0, 0, 0], sizes = [1, 1, 8, 8, 128], strides = [1, 1, 1, 1, 1]} : vector<2x2x8x8x128xf32> to vector<1x1x8x8x128xf32>
    %234 = vector.shape_cast %233 : vector<1x1x8x8x128xf32> to vector<8x8x128xf32>
    %c0_109 = arith.constant 0 : index
    %c8_110 = arith.constant 8 : index
    %c8_111 = arith.constant 8 : index
    %c0_112 = arith.constant 0 : index
    %235 = vector.load %arg15[%c0_109, %c8_110, %c8_111, %c0_112] : memref<1x16x16x128xf32, #tpu.memory_space<vmem>>, vector<1x8x8x128xf32>
    %236 = vector.shape_cast %235 : vector<1x8x8x128xf32> to vector<8x8x128xf32>
    %237 = vector.shape_cast %234 : vector<8x8x128xf32> to vector<1x8x8x128xf32>
    tpu.vector_store %arg15[%c0_109, %c8_110, %c8_111, %c0_112], %237 {strides = array<i32>} : memref<1x16x16x128xf32, #tpu.memory_space<vmem>>, vector<1x8x8x128xf32>,
    return
  }
  func.func @transform_0(%arg0: i32) -> (i32, i32, i32, i32) {
    %c0_i32 = arith.constant 0 : i32
    %c0_i32_0 = arith.constant 0 : i32
    %c0_i32_1 = arith.constant 0 : i32
    %c0_i32_2 = arith.constant 0 : i32
    return %arg0, %c0_i32, %c0_i32_0, %c0_i32_1 : i32, i32, i32, i32
  }
  func.func @transform_1(%arg0: i32) -> (i32, i32, i32, i32) {
    %c0_i32 = arith.constant 0 : i32
    %c0_i32_0 = arith.constant 0 : i32
    %c0_i32_1 = arith.constant 0 : i32
    %c0_i32_2 = arith.constant 0 : i32
    %c0_i32_3 = arith.constant 0 : i32
    return %c0_i32, %c0_i32_0, %c0_i32_1, %c0_i32_2 : i32, i32, i32, i32
  }
  func.func @transform_2(%arg0: i32) -> (i32, i32) {
    %c0_i32 = arith.constant 0 : i32
    %c0_i32_0 = arith.constant 0 : i32
    %c0_i32_1 = arith.constant 0 : i32
    return %c0_i32, %c0_i32_0 : i32, i32
  }
  func.func @transform_3(%arg0: i32) -> (i32, i32) {
    %c0_i32 = arith.constant 0 : i32
    %c0_i32_0 = arith.constant 0 : i32
    %c0_i32_1 = arith.constant 0 : i32
    return %c0_i32, %c0_i32_0 : i32, i32
  }
  func.func @transform_4(%arg0: i32) -> (i32, i32) {
    %c0_i32 = arith.constant 0 : i32
    %c0_i32_0 = arith.constant 0 : i32
    %c0_i32_1 = arith.constant 0 : i32
    return %c0_i32, %c0_i32_0 : i32, i32
  }
  func.func @transform_5(%arg0: i32) -> (i32, i32) {
    %c0_i32 = arith.constant 0 : i32
    %c0_i32_0 = arith.constant 0 : i32
    %c0_i32_1 = arith.constant 0 : i32
    return %c0_i32, %c0_i32_0 : i32, i32
  }
  func.func @transform_6(%arg0: i32) -> (i32, i32, i32) {
    %c0_i32 = arith.constant 0 : i32
    %c0_i32_0 = arith.constant 0 : i32
    %c0_i32_1 = arith.constant 0 : i32
    %c0_i32_2 = arith.constant 0 : i32
    return %c0_i32, %c0_i32_0, %c0_i32_1 : i32, i32, i32
  }
  func.func @transform_7(%arg0: i32) -> (i32, i32) {
    %c0_i32 = arith.constant 0 : i32
    %c0_i32_0 = arith.constant 0 : i32
    %c0_i32_1 = arith.constant 0 : i32
    return %c0_i32, %c0_i32_0 : i32, i32
  }
  func.func @transform_8(%arg0: i32) -> (i32, i32) {
    %c0_i32 = arith.constant 0 : i32
    %c0_i32_0 = arith.constant 0 : i32
    %c0_i32_1 = arith.constant 0 : i32
    return %c0_i32, %c0_i32_0 : i32, i32
  }
  func.func @transform_9(%arg0: i32) -> (i32, i32) {
    %c0_i32 = arith.constant 0 : i32
    %c0_i32_0 = arith.constant 0 : i32
    %c0_i32_1 = arith.constant 0 : i32
    return %c0_i32, %c0_i32_0 : i32, i32
  }
  func.func @transform_10(%arg0: i32) -> (i32, i32) {
    %c0_i32 = arith.constant 0 : i32
    %c0_i32_0 = arith.constant 0 : i32
    %c0_i32_1 = arith.constant 0 : i32
    return %c0_i32, %c0_i32_0 : i32, i32
  }
  func.func @transform_11(%arg0: i32) -> (i32, i32) {
    %c0_i32 = arith.constant 0 : i32
    %c0_i32_0 = arith.constant 0 : i32
    %c0_i32_1 = arith.constant 0 : i32
    return %c0_i32, %c0_i32_0 : i32, i32
  }
  func.func @transform_12(%arg0: i32) -> (i32, i32) {
    %c0_i32 = arith.constant 0 : i32
    %c0_i32_0 = arith.constant 0 : i32
    %c0_i32_1 = arith.constant 0 : i32
    return %c0_i32, %c0_i32_0 : i32, i32
  }
  func.func @transform_13(%arg0: i32) -> (i32, i32) {
    %c0_i32 = arith.constant 0 : i32
    %c0_i32_0 = arith.constant 0 : i32
    %c0_i32_1 = arith.constant 0 : i32
    return %c0_i32, %c0_i32_0 : i32, i32
  }
  func.func @transform_14(%arg0: i32) -> (i32, i32, i32, i32) {
    %c0_i32 = arith.constant 0 : i32
    %c0_i32_0 = arith.constant 0 : i32
    %c0_i32_1 = arith.constant 0 : i32
    %c0_i32_2 = arith.constant 0 : i32
    return %arg0, %c0_i32, %c0_i32_0, %c0_i32_1 : i32, i32, i32, i32
  }
}

</mosaic_0001>

<bundles_post_ra>
// kernel: _lambda_.2
= control target key start
LH: loop header
LB: loop body
LE: loop exit
PB: predicated region body
PF: predicated region fallthrough
CT: control target
= control target key end

     0   :  { %s12668_s29 = smov 0   ;;  %s18249_s0 = inlined_call_operand.vmem [shape: f32[2,16,16,128], index: 0, kind: input, shape index: {}]   ;;  %s18250_s1 = inlined_call_operand.vmem [shape: f32[4,4,64,64], index: 1, kind: input, shape index: {}]   ;;  %s18251_s2 = inlined_call_operand.vmem [shape: f32[1,128], index: 2, kind: input, shape index: {}]   ;;  %s18252_s3 = inlined_call_operand.vmem [shape: f32[1,128], index: 3, kind: input, shape index: {}]   ;;  %s18253_s4 = inlined_call_operand.vmem [shape: bf16[128,384], index: 4, kind: input, shape index: {}]   ;;  %s18254_s5 = inlined_call_operand.vmem [shape: f32[1,384], index: 5, kind: input, shape index: {}]   ;;  %s18255_s6 = inlined_call_operand.vmem [shape: bf16[4,32,128], index: 6, kind: input, shape index: {}]   ;;  %s18256_s7 = inlined_call_operand.vmem [shape: f32[1,128], index: 7, kind: input, shape index: {}]   ;;  %s18257_s8 = inlined_call_operand.vmem [shape: f32[1,128], index: 8, kind: input, shape index: {}]   ;;  %s18258_s9 = inlined_call_operand.vmem [shape: f32[1,128], index: 9, kind: input, shape index: {}]   ;;  %s18259_s10 = inlined_call_operand.vmem [shape: bf16[128,512], index: 10, kind: input, shape index: {}]   ;;  %s18260_s11 = inlined_call_operand.vmem [shape: f32[1,512], index: 11, kind: input, shape index: {}]   ;;  %s18261_s12 = inlined_call_operand.vmem [shape: bf16[512,128], index: 12, kind: input, shape index: {}]   ;;  %s18262_s13 = inlined_call_operand.vmem [shape: f32[1,128], index: 13, kind: input, shape index: {}]   ;;  %s18263_s14 = inlined_call_operand.vmem [shape: f32[2,16,16,128], index: 14, kind: output, shape index: {}]  }
   0x1 LB: > { %s9730_s30 = sadd.s32 4294967295, %s12587_s29   ;;  %p9734_p0 = scmp.ge.s32.totalorder %s12587_s29, 1  ;;  %s12587_s29 = sphi %s12668_s29, %s24_s29  }
   0x2   : > { %p412_p1 = scmp.lt.s32.totalorder %s12587_s29, 3 }
   0x4   : > { %p413_p2 = pnand %p9734_p0, %p412_p1 }
   0x6   : > { %416 = sbr.rel (%p413_p2) target bundleno = 4780 (0x12ac), region = 76 }
   0xb   : > { %p458_p3 = scmp.lt.s32.totalorder %s9730_s30, 1  ;;  %v11533_v20 = vld [vmem:[%s18253_s4 + $0xac] ss:$12 sps:$4 sm:$0xff]   ;;  %v11535_v21 = vld [vmem:[%s18253_s4 + $0xa8] ss:$12 sps:$4 sm:$0xff]   ;;  %vm1560_vm0 = vcmask 261120  }
   0xc   : > { %1126 = vmatprep.subr.bf16.mxu0 %v11533_v20  ;;  %v11536_v47 = vld [vmem:[%s18253_s4 + $0x94] ss:$12 sps:$4 sm:$0xff]   ;;  %v11538_v48 = vld [vmem:[%s18253_s4 + $0x90] ss:$12 sps:$4 sm:$0xff]   ;;  %v11542_v56 = vld [vmem:[%s18253_s4 + $0x78] ss:$12 sps:$4 sm:$0xff]  }
   0xd   : > { %s18909_s30 = smov (!%p458_p3, %s9730_s30), 1  ;;  %1127 = vmatpush1.bf16.msra.mxu0 %v11535_v21  ;;  %v11539_v54 = vld [vmem:[%s18253_s4 + $0x7c] ss:$12 sps:$4 sm:$0xff]   ;;  %v11543_v62 = vld [vmem:[%s18253_s4 + $0x64] ss:$12 sps:$4 sm:$0xff]   ;;  %s12590_s25 = smov 96  }
   0xe   : > { %s10175_s15 = sshll.u32 %s18909_s30, 8  ;;  %1128 = vmatprep.subr.bf16.mxu0 %v11536_v47  ;;  %v11541_v55 = vld [vmem:[%s18253_s4 + $0xb0] ss:$12 sps:$4 sm:$0xff]   ;;  %v11545_v63 = vld [vmem:[%s18253_s4 + $0x98] ss:$12 sps:$4 sm:$0xff]   ;;  %vm1917_vm1 = vcmask 523264  }
   0xf   : > { %s12684_s18 = scalar_lea.vmem %s18249_s0, %s10175_s15  ;;  %10753 = vmatprep.subr.bf16.mxu1 %v11541_v55  ;;  %v11549_v20 = vld [vmem:[%s18253_s4 + $0x80] ss:$12 sps:$4 sm:$0xff]   ;;  %s12591_s21 = smov 64  }
  0x10   : > { %v469_v0 = vld [vmem:[%s12684_s18] sm:$0xff]  ;;  %v470_v2 = vld [vmem:[%s12684_s18 + $0x10] sm:$0xff]  ;;  %v12705_v8 = vld [vmem:[%s12684_s18 + $0x8] sm:$0xff]  ;;  %10754 = vmatpush3.bf16.msra.mxu1 %v11541_v55  ;;  %s12592_s28 = smov 32  }
  0x11   : > { %v471_v1 = vld [vmem:[%s12684_s18 + $0x20] sm:$0xff]  ;;  %504 = vadd.xlane.f32.xlu0 %v469_v0  ;;  %v472_v3 = vld [vmem:[%s12684_s18 + $0x30] sm:$0xff]  ;;  %v12708_v9 = vld [vmem:[%s12684_s18 + $0x18] sm:$0xff]  ;;  %1129 = vmatpush1.bf16.msra.mxu0 %v11538_v48 }
  0x12   : > { %508 = vadd.xlane.f32.xlu1 %v471_v1  ;;  %v12691_v4 = vld [vmem:[%s12684_s18 + $0x40] sm:$0xff]  ;;  %v12694_v5 = vld [vmem:[%s12684_s18 + $0x50] sm:$0xff]  ;;  %v12713_v10 = vld [vmem:[%s12684_s18 + $0x28] sm:$0xff]  ;;  %1130 = vmatprep.subr.bf16.mxu0 %v11539_v54 }
  0x13   : > { %v12697_v6 = vld [vmem:[%s12684_s18 + $0x60] sm:$0xff]  ;;  %v12700_v7 = vld [vmem:[%s12684_s18 + $0x70] sm:$0xff]  ;;  %v12718_v11 = vld [vmem:[%s12684_s18 + $0x38] sm:$0xff]  ;;  %10755 = vmatprep.subr.bf16.mxu1 %v11545_v63 }
  0x14   : > { %v12721_v12 = vld [vmem:[%s12684_s18 + $0x48] sm:$0xff]  ;;  %v12724_v13 = vld [vmem:[%s12684_s18 + $0x58] sm:$0xff]  ;;  %v12737_v16 = vld [vmem:[%s12684_s18 + $0x80] sm:$0xff]  ;;  %10756 = vmatpush3.bf16.msra.mxu1 %v11545_v63 }
  0x15   : > { %506 = vadd.xlane.f32.xlu0 %v470_v2  ;;  %v12729_v14 = vld [vmem:[%s12684_s18 + $0x68] sm:$0xff]  ;;  %v12734_v15 = vld [vmem:[%s12684_s18 + $0x78] sm:$0xff]  ;;  %v12742_v17 = vld [vmem:[%s12684_s18 + $0x90] sm:$0xff]  ;;  %1131 = vmatpush1.bf16.msra.mxu0 %v11542_v56 }
  0x16   : > { %510 = vadd.xlane.f32.xlu1 %v472_v3  ;;  %v12745_v18 = vld [vmem:[%s12684_s18 + $0xa0] sm:$0xff]  ;;  %v12748_v19 = vld [vmem:[%s12684_s18 + $0xb0] sm:$0xff]  ;;  %v12821_v60 = vld [vmem:[%s12684_s18 + $0x88] sm:$0xff]  ;;  %1132 = vmatprep.subr.bf16.mxu0 %v11543_v62 }
  0x17   : > { %v12769_v34 = vld [vmem:[%s12684_s18 + $0xc0] sm:$0xff]  ;;  %v12779_v40 = vld [vmem:[%s12684_s18 + $0xd0] sm:$0xff]  ;;  %10757 = vmatprep.subr.bf16.mxu1 %v11549_v20  ;;  %v12893_v48 = vld [vmem:[%s12684_s18 + $0xc8] sm:$0xff] }
  0x18   : > { %v12788_v45 = vld [vmem:[%s12684_s18 + $0xe0] sm:$0xff]  ;;  %v12803_v52 = vld [vmem:[%s12684_s18 + $0xf0] sm:$0xff]  ;;  %10758 = vmatpush3.bf16.msra.mxu1 %v11549_v20 }
  0x19   : > { %512 = vadd.xlane.f32.xlu0 %v12691_v4 }
  0x1a   : > { %514 = vadd.xlane.f32.xlu1 %v12694_v5 }
  0x1d   : > { %516 = vadd.xlane.f32.xlu0 %v12697_v6 }
  0x1e   : > { %518 = vadd.xlane.f32.xlu1 %v12700_v7 }
  0x21   : > { %520 = vadd.xlane.f32.xlu0 %v12705_v8 }
  0x22   : > { %522 = vadd.xlane.f32.xlu1 %v12708_v9 }
  0x25   : > { %524 = vadd.xlane.f32.xlu0 %v12713_v10 }
  0x26   : > { %526 = vadd.xlane.f32.xlu1 %v12718_v11 }
  0x29   : > { %528 = vadd.xlane.f32.xlu0 %v12721_v12 }
  0x2a   : > { %530 = vadd.xlane.f32.xlu1 %v12724_v13 }
  0x2d   : > { %532 = vadd.xlane.f32.xlu0 %v12729_v14 }
  0x2e   : > { %534 = vadd.xlane.f32.xlu1 %v12734_v15 }
  0x31   : > { %536 = vadd.xlane.f32.xlu0 %v12737_v16 }
  0x32   : > { %538 = vadd.xlane.f32.xlu1 %v12742_v17 }
  0x35   : > { %540 = vadd.xlane.f32.xlu0 %v12745_v18 }
  0x36   : > { %542 = vadd.xlane.f32.xlu1 %v12748_v19 }
  0x9a   : > { %v505_v22 = vpop.xlane.xlu0 %504 }
  0x9b   : > { %v509_v23 = vpop.xlane.xlu1 %508  ;;  %v569_v24 = vmul.f32 0.0078125, %v505_v22 }
  0x9c   : > { %v571_v26 = vmul.f32 0.0078125, %v509_v23 }
  0x9d   : > { %v12760_v25 = vsub.f32 %v469_v0, %v569_v24  ;;  %v11546_v0 = vld [vmem:[%s18253_s4 + $0x60] ss:$12 sps:$4 sm:$0xff]  }
  0x9e   : > { %v507_v27 = vpop.xlane.xlu0 %506  ;;  %v12766_v33 = vsub.f32 %v471_v1, %v571_v26  ;;  %1133 = vmatpush1.bf16.msra.mxu0 %v11546_v0  ;;  %v12857_v26 = vld [vmem:[%s12684_s18 + $0xa8] sm:$0xff]  ;;  %v18267_v0 = vmov 0  }
  0x9f   : > { %v511_v28 = vpop.xlane.xlu1 %510  ;;  %v570_v29 = vmul.f32 0.0078125, %v507_v27  ;;  %v633_v30 = vmul.f32 %v12760_v25, %v12760_v25  ;;  %v11551_v27 = vld [vmem:[%s18253_s4 + $0x34] ss:$12 sps:$4 sm:$0xff]   ;;  %1158 = vmatprep.mubr.bf16.mxu0 %v18267_v0 }
  0xa0   : > { %v572_v32 = vmul.f32 0.0078125, %v511_v28  ;;  %v635_v37 = vmul.f32 %v12766_v33, %v12766_v33  ;;  %v11553_v28 = vld [vmem:[%s18253_s4 + $0x68] ss:$12 sps:$4 sm:$0xff]  }
  0xa1   : > { %665 = vadd.xlane.f32.xlu0 %v633_v30  ;;  %v12764_v31 = vsub.f32 %v470_v2, %v570_v29  ;;  %10759 = vmatprep.subr.bf16.mxu1 %v11553_v28 }
  0xa2   : > { %v513_v35 = vpop.xlane.xlu0 %512  ;;  %v12776_v39 = vsub.f32 %v472_v3, %v572_v32  ;;  %10760 = vmatpush3.bf16.msra.mxu1 %v11553_v28 }
  0xa3   : > { %v634_v36 = vmul.f32 %v12764_v31, %v12764_v31  ;;  %v573_v38 = vmul.f32 0.0078125, %v513_v35  ;;  %v515_v41 = vpop.xlane.xlu1 %514 }
  0xa4   : > { %v636_v42 = vmul.f32 %v12776_v39, %v12776_v39  ;;  %v574_v43 = vmul.f32 0.0078125, %v515_v41  ;;  %v11557_v41 = vld [vmem:[%s18253_s4 + $0x50] ss:$12 sps:$4 sm:$0xff]  }
  0xa5   : > { %544 = vadd.xlane.f32.xlu0 %v12769_v34  ;;  %667 = vadd.xlane.f32.xlu1 %v634_v36  ;;  %v12785_v44 = vsub.f32 %v12691_v4, %v573_v38  ;;  %v12839_v4 = vld [vmem:[%s12684_s18 + $0x98] sm:$0xff] }
  0xa6   : > { %v517_v46 = vpop.xlane.xlu0 %516  ;;  %v12800_v51 = vsub.f32 %v12694_v5, %v574_v43  ;;  %v11555_v38 = vld [vmem:[%s18253_s4 + $0x1c] ss:$12 sps:$4 sm:$0xff]   ;;  %10761 = vmatprep.subr.bf16.mxu1 %v11557_v41 }
  0xa7   : > { %v637_v49 = vmul.f32 %v12785_v44, %v12785_v44  ;;  %v575_v50 = vmul.f32 0.0078125, %v517_v46  ;;  %v519_v53 = vpop.xlane.xlu1 %518  ;;  %10762 = vmatpush3.bf16.msra.mxu1 %v11557_v41 }
  0xa8   : > { %v638_v57 = vmul.f32 %v12800_v51, %v12800_v51  ;;  %v576_v58 = vmul.f32 0.0078125, %v519_v53  ;;  %v11561_v53 = vld [vmem:[%s18253_s4 + $0x38] ss:$12 sps:$4 sm:$0xff]  }
  0xa9   : > { %669 = vadd.xlane.f32.xlu0 %v635_v37  ;;  %546 = vadd.xlane.f32.xlu1 %v12779_v40  ;;  %v12818_v59 = vsub.f32 %v12697_v6, %v575_v50  ;;  %v11547_v6 = vld [vmem:[%s18253_s4 + $0x4c] ss:$12 sps:$4 sm:$0xff]   ;;  %v11559_v50 = vld [vmem:[%s18253_s4 + $0x4] ss:$12 sps:$4 sm:$0xff]  }
  0xaa   : > { %v521_v61 = vpop.xlane.xlu0 %520  ;;  %v12836_v3 = vsub.f32 %v12700_v7, %v576_v58  ;;  %v11550_v7 = vld [vmem:[%s18253_s4 + $0x48] ss:$12 sps:$4 sm:$0xff]   ;;  %1134 = vmatprep.subr.bf16.mxu0 %v11547_v6  ;;  %v12875_v37 = vld [vmem:[%s12684_s18 + $0xb8] sm:$0xff]  ;;  %10763 = vmatprep.subr.bf16.mxu1 %v11561_v53 }
  0xab   : > { %v639_v1 = vmul.f32 %v12818_v59, %v12818_v59  ;;  %v577_v2 = vmul.f32 0.0078125, %v521_v61  ;;  %v523_v5 = vpop.xlane.xlu1 %522  ;;  %1135 = vmatpush1.bf16.msra.mxu0 %v11550_v7  ;;  %10764 = vmatpush3.bf16.msra.mxu1 %v11561_v53  ;;  %v11563_v61 = vld [vmem:[%s18253_s4 + $0x20] ss:$12 sps:$4 sm:$0xff]   ;;  %v11564_v7 = vld [vmem:[%s18253_s4 + $0x8] ss:$12 sps:$4 sm:$0xff]  }
  0xac   : > { %v640_v22 = vmul.f32 %v12836_v3, %v12836_v3  ;;  %v578_v23 = vmul.f32 0.0078125, %v523_v5  ;;  %1136 = vmatprep.subr.bf16.mxu0 %v11551_v27  ;;  %v12924_v5 = vld [vmem:[%s12684_s18 + $0xe8] sm:$0xff]  ;;  %10765 = vmatprep.subr.bf16.mxu1 %v11563_v61  ;;  %v12939_v27 = vld [vmem:[%s12684_s18 + $0xf8] sm:$0xff] }
  0xad   : > { %548 = vadd.xlane.f32.xlu0 %v12788_v45  ;;  %671 = vadd.xlane.f32.xlu1 %v636_v42  ;;  %v12854_v24 = vsub.f32 %v12705_v8, %v577_v2  ;;  %v11554_v8 = vld [vmem:[%s18253_s4 + $0x30] ss:$12 sps:$4 sm:$0xff]  }
  0xae   : > { %v525_v21 = vpop.xlane.xlu0 %524  ;;  %v12872_v36 = vsub.f32 %v12708_v9, %v578_v23  ;;  %v11558_v9 = vld [vmem:[%s18253_s4 + $0x18] ss:$12 sps:$4 sm:$0xff]  }
  0xaf   : > { %v527_v29 = vpop.xlane.xlu1 %526  ;;  %v641_v32 = vmul.f32 %v12854_v24, %v12854_v24  ;;  %v579_v35 = vmul.f32 0.0078125, %v525_v21  ;;  %1137 = vmatpush1.bf16.msra.mxu0 %v11554_v8  ;;  %10766 = vmatpush3.bf16.msra.mxu1 %v11563_v61 }
  0xb0   : > { %v642_v43 = vmul.f32 %v12872_v36, %v12872_v36  ;;  %v580_v46 = vmul.f32 0.0078125, %v527_v29  ;;  %1138 = vmatprep.subr.bf16.mxu0 %v11555_v38  ;;  %10767 = vmatprep.subr.bf16.mxu1 %v11564_v7 }
  0xb1   : > { %550 = vadd.xlane.f32.xlu1 %v12803_v52  ;;  %673 = vadd.xlane.f32.xlu0 %v637_v49  ;;  %v12890_v47 = vsub.f32 %v12713_v10, %v579_v35  ;;  %v11562_v10 = vld [vmem:[%s18253_s4] ss:$12 sps:$4 sm:$0xff]  }
  0xb2   : > { %v529_v30 = vpop.xlane.xlu0 %528  ;;  %v12908_v56 = vsub.f32 %v12718_v11, %v580_v46 }
  0xb3   : > { %v531_v42 = vpop.xlane.xlu1 %530  ;;  %1139 = vmatpush1.bf16.msra.mxu0 %v11558_v9  ;;  %v643_v54 = vmul.f32 %v12890_v47, %v12890_v47  ;;  %v581_v55 = vmul.f32 0.0078125, %v529_v30  ;;  %10768 = vmatpush3.bf16.msra.mxu1 %v11564_v7 }
  0xb4   : > { %1140 = vmatprep.subr.bf16.mxu0 %v11559_v50  ;;  %v582_v62 = vmul.f32 0.0078125, %v531_v42  ;;  %v644_v11 = vmul.f32 %v12908_v56, %v12908_v56 }
  0xb5   : > { %675 = vadd.xlane.f32.xlu1 %v638_v57  ;;  %552 = vadd.xlane.f32.xlu0 %v12821_v60  ;;  %v12911_v57 = vld [vmem:[%s12684_s18 + $0xd8] sm:$0xff]  ;;  %v12921_v2 = vsub.f32 %v12721_v12, %v581_v55 }
  0xb6   : > { %v533_v49 = vpop.xlane.xlu0 %532  ;;  %v12927_v20 = vsub.f32 %v12724_v13, %v582_v62 }
  0xb7   : > { %v535_v58 = vpop.xlane.xlu1 %534  ;;  %1141 = vmatpush1.bf16.msra.mxu0 %v11562_v10  ;;  %v645_v12 = vmul.f32 %v12921_v2, %v12921_v2 }
  0xb8   : > { %v584_v6 = vmul.f32 0.0078125, %v535_v58  ;;  %v646_v13 = vmul.f32 %v12927_v20, %v12927_v20 }
  0xb9   : > { %554 = vadd.xlane.f32.xlu1 %v12839_v4  ;;  %677 = vadd.xlane.f32.xlu0 %v639_v1  ;;  %v583_v1 = vmul.f32 0.0078125, %v533_v49 }
  0xba   : > { %v537_v63 = vpop.xlane.xlu0 %536  ;;  %v12944_v29 = vsub.f32 %v12734_v15, %v584_v6 }
  0xbb   : > { %v539_v21 = vpop.xlane.xlu1 %538  ;;  %v12936_v23 = vsub.f32 %v12729_v14, %v583_v1 }
  0xbc   : > { %v586_v8 = vmul.f32 0.0078125, %v539_v21  ;;  %v648_v38 = vmul.f32 %v12944_v29, %v12944_v29 }
  0xbd   : > { %679 = vadd.xlane.f32.xlu1 %v640_v22  ;;  %556 = vadd.xlane.f32.xlu0 %v12857_v26  ;;  %v585_v22 = vmul.f32 0.0078125, %v537_v63  ;;  %v647_v30 = vmul.f32 %v12936_v23, %v12936_v23 }
  0xbe   : > { %v541_v28 = vpop.xlane.xlu0 %540  ;;  %v12957_v42 = vsub.f32 %v12742_v17, %v586_v8 }
  0xbf   : > { %v587_v14 = vmul.f32 0.0078125, %v541_v28  ;;  %v543_v35 = vpop.xlane.xlu1 %542 }
  0xc0   : > { %v588_v41 = vmul.f32 0.0078125, %v543_v35 }
  0xc1   : > { %558 = vadd.xlane.f32.xlu1 %v12875_v37  ;;  %681 = vadd.xlane.f32.xlu0 %v641_v32  ;;  %v12950_v32 = vsub.f32 %v12737_v16, %v585_v22  ;;  %v12960_v9 = vsub.f32 %v12745_v18, %v587_v14  ;;  %v650_v16 = vmul.f32 %v12957_v42, %v12957_v42 }
  0xc2   : > { %v12967_v46 = vsub.f32 %v12748_v19, %v588_v41 }
  0xc3   : > { %v649_v15 = vmul.f32 %v12950_v32, %v12950_v32 }
  0xc4   : > { %v652_v17 = vmul.f32 %v12967_v46, %v12967_v46 }
  0xc5   : > { %683 = vadd.xlane.f32.xlu1 %v642_v43  ;;  %560 = vadd.xlane.f32.xlu0 %v12893_v48  ;;  %v651_v43 = vmul.f32 %v12960_v9, %v12960_v9 }
  0xc9   : > { %562 = vadd.xlane.f32.xlu1 %v12911_v57  ;;  %685 = vadd.xlane.f32.xlu0 %v643_v54 }
  0xcd   : > { %687 = vadd.xlane.f32.xlu1 %v644_v11  ;;  %564 = vadd.xlane.f32.xlu0 %v12924_v5 }
  0xd1   : > { %566 = vadd.xlane.f32.xlu1 %v12939_v27  ;;  %689 = vadd.xlane.f32.xlu0 %v645_v12 }
  0xd5   : > { %691 = vadd.xlane.f32.xlu1 %v646_v13  ;;  %693 = vadd.xlane.f32.xlu0 %v647_v30 }
  0xd9   : > { %695 = vadd.xlane.f32.xlu1 %v648_v38  ;;  %697 = vadd.xlane.f32.xlu0 %v649_v15 }
  0xdd   : > { %699 = vadd.xlane.f32.xlu1 %v650_v16  ;;  %701 = vadd.xlane.f32.xlu0 %v651_v43 }
  0xe1   : > { %703 = vadd.xlane.f32.xlu1 %v652_v17 }
 0x12a   : > { %v666_v49 = vpop.xlane.xlu0 %665 }
 0x12b   : > { %v729_v18 = vmul.f32 0.0078125, %v666_v49 }
 0x12d   : > { %v761_v50 = vadd.f32 1e-05, %v729_v18 }
 0x12e   : > { %v668_v53 = vpop.xlane.xlu1 %667  ;;  %v545_v10 = vpop.xlane.xlu0 %544 }
 0x12f   : > { %11653 = vrsqrt.f32 %v761_v50  ;;  %v730_v54 = vmul.f32 0.0078125, %v668_v53  ;;  %v589_v55 = vmul.f32 0.0078125, %v545_v10  ;;  %v12995_v53 = vld [vmem:[%s18251_s2] ss:$0 sm:$0xff] }
 0x131   : > { %v762_v58 = vadd.f32 1e-05, %v730_v54  ;;  %v12972_v61 = vsub.f32 %v12769_v34, %v589_v55 }
 0x132   : > { %v547_v19 = vpop.xlane.xlu1 %546  ;;  %v670_v62 = vpop.xlane.xlu0 %669 }
 0x133   : > { %11655 = vrsqrt.f32 %v762_v58  ;;  %v590_v63 = vmul.f32 0.0078125, %v547_v19  ;;  %v731_v11 = vmul.f32 0.0078125, %v670_v62  ;;  %v653_v1 = vmul.f32 %v12972_v61, %v12972_v61 }
 0x135   : > { %v763_v6 = vadd.f32 1e-05, %v731_v11  ;;  %705 = vadd.xlane.f32.xlu0 %v653_v1  ;;  %v12977_v21 = vsub.f32 %v12779_v40, %v590_v63  ;;  %v13007_v1 = vld [vmem:[%s18252_s3] ss:$0 sm:$0xff] }
 0x136   : > { %v672_v7 = vpop.xlane.xlu1 %671  ;;  %v549_v12 = vpop.xlane.xlu0 %548 }
 0x137   : > { %11657 = vrsqrt.f32 %v763_v6  ;;  %v732_v22 = vmul.f32 0.0078125, %v672_v7  ;;  %v591_v28 = vmul.f32 0.0078125, %v549_v12  ;;  %v654_v34 = vmul.f32 %v12977_v21, %v12977_v21 }
 0x139   : > { %v764_v13 = vadd.f32 1e-05, %v732_v22  ;;  %707 = vadd.xlane.f32.xlu1 %v654_v34  ;;  %v12982_v30 = vsub.f32 %v12788_v45, %v591_v28 }
 0x13a   : > { %v551_v8 = vpop.xlane.xlu1 %550  ;;  %v674_v14 = vpop.xlane.xlu0 %673 }
 0x13b   : > { %11659 = vrsqrt.f32 %v764_v13  ;;  %v592_v35 = vmul.f32 0.0078125, %v551_v8  ;;  %v733_v38 = vmul.f32 0.0078125, %v674_v14  ;;  %v655_v40 = vmul.f32 %v12982_v30, %v12982_v30 }
 0x13c   : > { %v11654_v15 = vpop.eup %11653 }
 0x13d   : > { %v765_v41 = vadd.f32 1e-05, %v733_v38  ;;  %709 = vadd.xlane.f32.xlu0 %v655_v40  ;;  %v12987_v16 = vsub.f32 %v12803_v52, %v592_v35  ;;  %v825_v49 = vmul.f32 %v11654_v15, %v12760_v25 }
 0x13e   : > { %v676_v43 = vpop.xlane.xlu1 %675  ;;  %v553_v17 = vpop.xlane.xlu0 %552 }
 0x13f   : > { %11661 = vrsqrt.f32 %v765_v41  ;;  %v734_v45 = vmul.f32 0.0078125, %v676_v43  ;;  %v593_v18 = vmul.f32 0.0078125, %v553_v17  ;;  %v656_v50 = vmul.f32 %v12987_v16, %v12987_v16 }
 0x140   : > { %v11656_v10 = vpop.eup %11655  ;;  %v863_v19 = vmul.f32 %v12995_v53, %v825_v49 }
 0x141   : > { %v766_v54 = vadd.f32 1e-05, %v734_v45  ;;  %711 = vadd.xlane.f32.xlu1 %v656_v50  ;;  %v12998_v52 = vsub.f32 %v12821_v60, %v593_v18  ;;  %v826_v55 = vmul.f32 %v11656_v10, %v12764_v31 }
 0x142   : > { %v555_v25 = vpop.xlane.xlu1 %554  ;;  %v678_v58 = vpop.xlane.xlu0 %677  ;;  %v901_v28 = vadd.f32 %v13007_v1, %v863_v19 }
 0x143   : > { %11663 = vrsqrt.f32 %v766_v54  ;;  %v594_v62 = vmul.f32 0.0078125, %v555_v25  ;;  %v735_v63 = vmul.f32 0.0078125, %v678_v58  ;;  %v657_v11 = vmul.f32 %v12998_v52, %v12998_v52 }
 0x144   : > { %v11658_v6 = vpop.eup %11657  ;;  %v864_v60 = vmul.f32 %v12995_v53, %v826_v55 }
 0x145   : > { %v767_v7 = vadd.f32 1e-05, %v735_v63  ;;  %713 = vadd.xlane.f32.xlu0 %v657_v11  ;;  %v13011_v31 = vsub.f32 %v12839_v4, %v594_v62  ;;  %v827_v13 = vmul.f32 %v11658_v6, %v12766_v33 }
 0x146   : > { %v680_v12 = vpop.xlane.xlu1 %679  ;;  %v557_v22 = vpop.xlane.xlu0 %556  ;;  %v902_v34 = vadd.f32 %v13007_v1, %v864_v60 }
 0x147   : > { %11665 = vrsqrt.f32 %v767_v7  ;;  %v736_v8 = vmul.f32 0.0078125, %v680_v12  ;;  %v595_v14 = vmul.f32 0.0078125, %v557_v22  ;;  %v658_v35 = vmul.f32 %v13011_v31, %v13011_v31 }
 0x148   : > { %v11660_v38 = vpop.eup %11659  ;;  %v933_v40 = vpack.c.bf16 %v902_v34, %v901_v28  ;;  %v865_v33 = vmul.f32 %v12995_v53, %v827_v13 }
 0x149   : > { %v768_v15 = vadd.f32 1e-05, %v736_v8  ;;  %715 = vadd.xlane.f32.xlu1 %v658_v35  ;;  %v13019_v4 = vsub.f32 %v12857_v26, %v595_v14  ;;  %v828_v41 = vmul.f32 %v11660_v38, %v12776_v39 }
 0x14a   : > { %1159 = vmatmul.mubr.bf16.vlgmr.msra.gmra.mxu0 %v933_v40  ;;  %10769 = vmatprep.mubr.bf16.mxu1 %v933_v40  ;;  %v559_v43 = vpop.xlane.xlu1 %558  ;;  %v682_v17 = vpop.xlane.xlu0 %681  ;;  %v903_v25 = vadd.f32 %v13007_v1, %v865_v33 }
 0x14b   : > { %11667 = vrsqrt.f32 %v768_v15  ;;  %v596_v49 = vmul.f32 0.0078125, %v559_v43  ;;  %v737_v45 = vmul.f32 0.0078125, %v682_v17  ;;  %v659_v18 = vmul.f32 %v13019_v4, %v13019_v4  ;;  %1168 = vmatprep.mubr.bf16.mxu0 %v18267_v0 }
 0x14c   : > { %v11662_v50 = vpop.eup %11661  ;;  %v866_v26 = vmul.f32 %v12995_v53, %v828_v41 }
 0x14d   : > { %v769_v10 = vadd.f32 1e-05, %v737_v45  ;;  %717 = vadd.xlane.f32.xlu0 %v659_v18  ;;  %v13028_v39 = vsub.f32 %v12875_v37, %v596_v49  ;;  %v829_v19 = vmul.f32 %v11662_v50, %v12785_v44 }
 0x14e   : > { %v684_v54 = vpop.xlane.xlu1 %683  ;;  %v561_v55 = vpop.xlane.xlu0 %560  ;;  %v904_v58 = vadd.f32 %v13007_v1, %v866_v26 }
 0x14f   : > { %11669 = vrsqrt.f32 %v769_v10  ;;  %v738_v62 = vmul.f32 0.0078125, %v684_v54  ;;  %v597_v63 = vmul.f32 0.0078125, %v561_v55  ;;  %v660_v11 = vmul.f32 %v13028_v39, %v13028_v39 }
 0x150   : > { %v11664_v6 = vpop.eup %11663  ;;  %v934_v60 = vpack.c.bf16 %v904_v58, %v903_v25  ;;  %v867_v44 = vmul.f32 %v12995_v53, %v829_v19 }
 0x151   : > { %v770_v7 = vadd.f32 1e-05, %v738_v62  ;;  %719 = vadd.xlane.f32.xlu1 %v660_v11  ;;  %v13036_v37 = vsub.f32 %v12893_v48, %v597_v63  ;;  %v830_v12 = vmul.f32 %v11664_v6, %v12800_v51 }
 0x152   : > { %1169 = vmatmul.mubr.bf16.gmra.mxu0 %v934_v60  ;;  %10770 = vmatmul.mubr.bf16.vlgmr.msra.gmra.mxu1 %v934_v60  ;;  %v563_v22 = vpop.xlane.xlu1 %562  ;;  %v686_v28 = vpop.xlane.xlu0 %685  ;;  %v905_v15 = vadd.f32 %v13007_v1, %v867_v44 }
 0x153   : > { %11671 = vrsqrt.f32 %v770_v7  ;;  %v598_v34 = vmul.f32 0.0078125, %v563_v22  ;;  %v739_v13 = vmul.f32 0.0078125, %v686_v28  ;;  %v661_v8 = vmul.f32 %v13036_v37, %v13036_v37  ;;  %1178 = vmatprep.mubr.bf16.mxu0 %v18267_v0 }
 0x154   : > { %v11666_v14 = vpop.eup %11665  ;;  %v868_v48 = vmul.f32 %v12995_v53, %v830_v12 }
 0x155   : > { %v771_v35 = vadd.f32 1e-05, %v739_v13  ;;  %721 = vadd.xlane.f32.xlu0 %v661_v8  ;;  %v13045_v51 = vsub.f32 %v12911_v57, %v598_v34  ;;  %v831_v43 = vmul.f32 %v11666_v14, %v12818_v59 }
 0x156   : > { %v688_v38 = vpop.xlane.xlu1 %687  ;;  %v565_v40 = vpop.xlane.xlu0 %564  ;;  %v906_v41 = vadd.f32 %v13007_v1, %v868_v48 }
 0x157   : > { %11673 = vrsqrt.f32 %v771_v35  ;;  %v740_v17 = vmul.f32 0.0078125, %v688_v38  ;;  %v599_v33 = vmul.f32 0.0078125, %v565_v40  ;;  %v662_v49 = vmul.f32 %v13045_v51, %v13045_v51 }
 0x158   : > { %v11668_v45 = vpop.eup %11667  ;;  %v935_v18 = vpack.c.bf16 %v906_v41, %v905_v15  ;;  %v869_v59 = vmul.f32 %v12995_v53, %v831_v43 }
 0x159   : > { %v772_v50 = vadd.f32 1e-05, %v740_v17  ;;  %723 = vadd.xlane.f32.xlu1 %v662_v49  ;;  %v13053_v57 = vsub.f32 %v12924_v5, %v599_v33  ;;  %v832_v26 = vmul.f32 %v11668_v45, %v12836_v3 }
 0x15a   : > { %1179 = vmatmul.mubr.bf16.gmra.mxu0 %v935_v18  ;;  %10773 = vmatprep.mubr.bf16.mxu1 %v935_v18  ;;  %v567_v10 = vpop.xlane.xlu1 %566  ;;  %v690_v54 = vpop.xlane.xlu0 %689  ;;  %v907_v60 = vadd.f32 %v13007_v1, %v869_v59 }
 0x15b   : > { %11675 = vrsqrt.f32 %v772_v50  ;;  %v600_v55 = vmul.f32 0.0078125, %v567_v10  ;;  %v741_v25 = vmul.f32 0.0078125, %v690_v54  ;;  %v663_v58 = vmul.f32 %v13053_v57, %v13053_v57  ;;  %1188 = vmatprep.mubr.bf16.mxu0 %v18267_v0 }
 0x15c   : > { %v11670_v19 = vpop.eup %11669  ;;  %v870_v5 = vmul.f32 %v12995_v53, %v832_v26 }
 0x15d   : > { %v773_v62 = vadd.f32 1e-05, %v741_v25  ;;  %725 = vadd.xlane.f32.xlu0 %v663_v58  ;;  %v13062_v3 = vsub.f32 %v12939_v27, %v600_v55  ;;  %v833_v63 = vmul.f32 %v11670_v19, %v12854_v24 }
 0x15e   : > { %v692_v11 = vpop.xlane.xlu1 %691  ;;  %v694_v6 = vpop.xlane.xlu0 %693  ;;  %v908_v7 = vadd.f32 %v13007_v1, %v870_v5 }
 0x15f   : > { %11677 = vrsqrt.f32 %v773_v62  ;;  %v742_v12 = vmul.f32 0.0078125, %v692_v11  ;;  %v743_v22 = vmul.f32 0.0078125, %v694_v6  ;;  %v664_v28 = vmul.f32 %v13062_v3, %v13062_v3 }
 0x160   : > { %v11672_v44 = vpop.eup %11671  ;;  %v936_v34 = vpack.c.bf16 %v908_v7, %v907_v60  ;;  %v871_v13 = vmul.f32 %v12995_v53, %v833_v63 }
 0x161   : > { %v774_v27 = vadd.f32 1e-05, %v742_v12  ;;  %v775_v8 = vadd.f32 1e-05, %v743_v22  ;;  %727 = vadd.xlane.f32.xlu1 %v664_v28  ;;  %v834_v24 = vmul.f32 %v11672_v44, %v12872_v36 }
 0x162   : > { %1189 = vmatmul.mubr.bf16.gmra.mxu0 %v936_v34  ;;  %10774 = vmatmul.mubr.bf16.gmra.mxu1 %v936_v34  ;;  %v696_v14 = vpop.xlane.xlu1 %695  ;;  %v698_v48 = vpop.xlane.xlu0 %697  ;;  %v909_v41 = vadd.f32 %v13007_v1, %v871_v13 }
 0x163   : > { %11679 = vrsqrt.f32 %v774_v27  ;;  %v744_v35 = vmul.f32 0.0078125, %v696_v14  ;;  %v745_v38 = vmul.f32 0.0078125, %v698_v48  ;;  %1198 = vmatprep.mubr.bf16.mxu0 %v18267_v0  ;;  %v872_v40 = vmul.f32 %v12995_v53, %v834_v24 }
 0x164   : > { %v11674_v15 = vpop.eup %11673  ;;  %11681 = vrsqrt.f32 %v775_v8 }
 0x165   : > { %v776_v43 = vadd.f32 1e-05, %v744_v35  ;;  %v777_v17 = vadd.f32 1e-05, %v745_v38  ;;  %v910_v33 = vadd.f32 %v13007_v1, %v872_v40  ;;  %v835_v36 = vmul.f32 %v11674_v15, %v12890_v47 }
 0x166   : > { %v700_v49 = vpop.xlane.xlu1 %699  ;;  %v702_v45 = vpop.xlane.xlu0 %701 }
 0x167   : > { %11683 = vrsqrt.f32 %v776_v43  ;;  %v746_v18 = vmul.f32 0.0078125, %v700_v49  ;;  %v747_v50 = vmul.f32 0.0078125, %v702_v45  ;;  %v937_v26 = vpack.c.bf16 %v910_v33, %v909_v41 }
 0x168   : > { %v11676_v10 = vpop.eup %11675  ;;  %11685 = vrsqrt.f32 %v777_v17  ;;  %v873_v25 = vmul.f32 %v12995_v53, %v835_v36 }
 0x169   : > { %v778_v54 = vadd.f32 1e-05, %v746_v18  ;;  %v779_v59 = vadd.f32 1e-05, %v747_v50  ;;  %10777 = vmatprep.mubr.bf16.mxu1 %v937_v26  ;;  %v836_v55 = vmul.f32 %v11676_v10, %v12908_v56 }
 0x16a   : > { %1199 = vmatmul.mubr.bf16.gmra.mxu0 %v937_v26  ;;  %v704_v58 = vpop.xlane.xlu1 %703  ;;  %v911_v63 = vadd.f32 %v13007_v1, %v873_v25 }
 0x16b   : > { %11687 = vrsqrt.f32 %v778_v54  ;;  %v748_v19 = vmul.f32 0.0078125, %v704_v58  ;;  %1208 = vmatprep.mubr.bf16.mxu0 %v18267_v0  ;;  %v874_v47 = vmul.f32 %v12995_v53, %v836_v55 }
 0x16c   : > { %v11678_v5 = vpop.eup %11677  ;;  %11689 = vrsqrt.f32 %v779_v59 }
 0x16d   : > { %v780_v62 = vadd.f32 1e-05, %v748_v19  ;;  %v912_v11 = vadd.f32 %v13007_v1, %v874_v47  ;;  %v837_v6 = vmul.f32 %v11678_v5, %v12921_v2 }
 0x16f   : > { %11691 = vrsqrt.f32 %v780_v62  ;;  %v938_v56 = vpack.c.bf16 %v912_v11, %v911_v63  ;;  %v875_v22 = vmul.f32 %v12995_v53, %v837_v6 }
 0x170   : > { %v11680_v60 = vpop.eup %11679 }
 0x171   : > { %v11682_v7 = vpop.eup %11681  ;;  %10778 = vmatmul.mubr.bf16.gmra.mxu1 %v938_v56  ;;  %v838_v12 = vmul.f32 %v11680_v60, %v12927_v20  ;;  %v913_v2 = vadd.f32 %v13007_v1, %v875_v22 }
 0x172   : > { %1209 = vmatmul.mubr.bf16.gmra.mxu0 %v938_v56  ;;  %v839_v28 = vmul.f32 %v11682_v7, %v12936_v23 }
 0x173   : > { %1218 = vmatprep.mubr.bf16.mxu0 %v18267_v0  ;;  %v876_v44 = vmul.f32 %v12995_v53, %v838_v12 }
 0x174   : > { %v11684_v34 = vpop.eup %11683  ;;  %v877_v24 = vmul.f32 %v12995_v53, %v839_v28 }
 0x175   : > { %v11686_v13 = vpop.eup %11685  ;;  %v914_v27 = vadd.f32 %v13007_v1, %v876_v44  ;;  %v840_v8 = vmul.f32 %v11684_v34, %v12944_v29 }
 0x176   : > { %v841_v20 = vmul.f32 %v11686_v13, %v12950_v32  ;;  %v915_v38 = vadd.f32 %v13007_v1, %v877_v24 }
 0x177   : > { %v939_v14 = vpack.c.bf16 %v914_v27, %v913_v2  ;;  %v878_v48 = vmul.f32 %v12995_v53, %v840_v8 }
 0x178   : > { %v11688_v23 = vpop.eup %11687  ;;  %v879_v41 = vmul.f32 %v12995_v53, %v841_v20 }
 0x179   : > { %v11690_v35 = vpop.eup %11689  ;;  %10781 = vmatprep.mubr.bf16.mxu1 %v939_v14  ;;  %v916_v40 = vadd.f32 %v13007_v1, %v878_v48  ;;  %v842_v15 = vmul.f32 %v11688_v23, %v12957_v42 }
 0x17a   : > { %1219 = vmatmul.mubr.bf16.gmra.mxu0 %v939_v14  ;;  %v843_v29 = vmul.f32 %v11690_v35, %v12960_v9  ;;  %v917_v33 = vadd.f32 %v13007_v1, %v879_v41 }
 0x17b   : > { %v940_v43 = vpack.c.bf16 %v916_v40, %v915_v38  ;;  %1228 = vmatprep.mubr.bf16.mxu0 %v18267_v0  ;;  %v880_v32 = vmul.f32 %v12995_v53, %v842_v15 }
 0x17c   : > { %v11692_v17 = vpop.eup %11691  ;;  %v881_v42 = vmul.f32 %v12995_v53, %v843_v29 }
 0x17d   : > { %10782 = vmatmul.mubr.bf16.gmra.mxu1 %v940_v43  ;;  %v918_v36 = vadd.f32 %v13007_v1, %v880_v32  ;;  %v844_v49 = vmul.f32 %v11692_v17, %v12967_v46 }
 0x17e   : > { %v919_v9 = vadd.f32 %v13007_v1, %v881_v42 }
 0x17f   : > { %v941_v45 = vpack.c.bf16 %v918_v36, %v917_v33  ;;  %v882_v18 = vmul.f32 %v12995_v53, %v844_v49 }
 0x181   : > { %10785 = vmatprep.mubr.bf16.mxu1 %v941_v45  ;;  %v920_v50 = vadd.f32 %v13007_v1, %v882_v18 }
 0x182   : > { %1229 = vmatmul.mubr.bf16.gmra.mxu0 %v940_v43 }
 0x183   : > { %v942_v26 = vpack.c.bf16 %v920_v50, %v919_v9  ;;  %1238 = vmatprep.mubr.bf16.mxu0 %v18267_v0 }
 0x185   : > { %10786 = vmatmul.mubr.bf16.gmra.mxu1 %v942_v26 }
 0x18a   : > { %1239 = vmatmul.mubr.bf16.gmra.mxu0 %v941_v45 }
 0x18b   : > { %1248 = vmatprep.mubr.bf16.mxu0 %v18267_v0 }
 0x192   : > { %1249 = vmatmul.mubr.bf16.gmra.mxu0 %v942_v26 }
 0x193   : > { %1258 = vmatprep.mubr.bf16.mxu0 %v18267_v0 }
 0x1be   : > { %v706_v46 = vpop.xlane.xlu0 %705 }
 0x1bf   : > { %v749_v10 = vmul.f32 0.0078125, %v706_v46 }
 0x1c1   : > { %v781_v54 = vadd.f32 1e-05, %v749_v10 }
 0x1c2   : > { %v708_v59 = vpop.xlane.xlu1 %707 }
 0x1c3   : > { %11693 = vrsqrt.f32 %v781_v54  ;;  %v750_v55 = vmul.f32 0.0078125, %v708_v59 }
 0x1c5   : > { %v782_v25 = vadd.f32 1e-05, %v750_v55 }
 0x1c6   : > { %v710_v58 = vpop.xlane.xlu0 %709 }
 0x1c7   : > { %11695 = vrsqrt.f32 %v782_v25  ;;  %v751_v19 = vmul.f32 0.0078125, %v710_v58 }
 0x1c9   : > { %v783_v47 = vadd.f32 1e-05, %v751_v19 }
 0x1ca   : > { %v712_v5 = vpop.xlane.xlu1 %711 }
 0x1cb   : > { %11697 = vrsqrt.f32 %v783_v47  ;;  %v752_v62 = vmul.f32 0.0078125, %v712_v5 }
 0x1cd   : > { %v784_v63 = vadd.f32 1e-05, %v752_v62 }
 0x1ce   : > { %v714_v11 = vpop.xlane.xlu0 %713 }
 0x1cf   : > { %11699 = vrsqrt.f32 %v784_v63  ;;  %v753_v6 = vmul.f32 0.0078125, %v714_v11 }
 0x1d0   : > { %v11694_v56 = vpop.eup %11693 }
 0x1d1   : > { %v785_v60 = vadd.f32 1e-05, %v753_v6  ;;  %v845_v7 = vmul.f32 %v11694_v56, %v12972_v61 }
 0x1d2   : > { %v716_v12 = vpop.xlane.xlu1 %715 }
 0x1d3   : > { %11701 = vrsqrt.f32 %v785_v60  ;;  %v754_v22 = vmul.f32 0.0078125, %v716_v12  ;;  %v883_v13 = vmul.f32 %v12995_v53, %v845_v7 }
 0x1d4   : > { %v11696_v28 = vpop.eup %11695 }
 0x1d5   : > { %v786_v44 = vadd.f32 1e-05, %v754_v22  ;;  %v846_v34 = vmul.f32 %v11696_v28, %v12977_v21  ;;  %v921_v14 = vadd.f32 %v13007_v1, %v883_v13 }
 0x1d6   : > { %v718_v2 = vpop.xlane.xlu0 %717 }
 0x1d7   : > { %11703 = vrsqrt.f32 %v786_v44  ;;  %v755_v27 = vmul.f32 0.0078125, %v718_v2  ;;  %v884_v8 = vmul.f32 %v12995_v53, %v846_v34 }
 0x1d8   : > { %v11698_v24 = vpop.eup %11697 }
 0x1d9   : > { %v787_v20 = vadd.f32 1e-05, %v755_v27  ;;  %v922_v61 = vadd.f32 %v13007_v1, %v884_v8  ;;  %v847_v48 = vmul.f32 %v11698_v24, %v12982_v30 }
 0x1da   : > { %v720_v23 = vpop.xlane.xlu1 %719 }
 0x1db   : > { %11705 = vrsqrt.f32 %v787_v20  ;;  %v756_v35 = vmul.f32 0.0078125, %v720_v23  ;;  %v943_v38 = vpack.c.bf16 %v922_v61, %v921_v14  ;;  %v885_v41 = vmul.f32 %v12995_v53, %v847_v48 }
 0x1dc   : > { %v11700_v21 = vpop.eup %11699  ;;  %v983_v14 = vlaneseq }
 0x1dd   : > { %v788_v40 = vadd.f32 1e-05, %v756_v35  ;;  %1259 = vmatmul.mubr.bf16.gmra.mxu0 %v943_v38  ;;  %10789 = vmatprep.mubr.bf16.mxu1 %v943_v38  ;;  %v848_v15 = vmul.f32 %v11700_v21, %v12987_v16  ;;  %v923_v33 = vadd.f32 %v13007_v1, %v885_v41 }
 0x1de   : > { %v722_v29 = vpop.xlane.xlu0 %721  ;;  %1268 = vmatprep.mubr.bf16.mxu0 %v18267_v0  ;;  %v13152_v35 = vshrl.u32 %v983_v14, 7 }
 0x1df   : > { %11707 = vrsqrt.f32 %v788_v40  ;;  %v757_v43 = vmul.f32 0.0078125, %v722_v29  ;;  %v886_v32 = vmul.f32 %v12995_v53, %v848_v15 }
 0x1e0   : > { %v11702_v30 = vpop.eup %11701  ;;  %18432 = vst [vmem:[#allocation2_spill] sm:$0xff] %v13152_v35  ;;  %v18266_v38 = vsub.s32 1, %v13152_v35 }
 0x1e1   : > { %v789_v17 = vadd.f32 1e-05, %v757_v43  ;;  %v924_v36 = vadd.f32 %v13007_v1, %v886_v32  ;;  %v849_v49 = vmul.f32 %v11702_v30, %v12998_v52 }
 0x1e2   : > { %v724_v42 = vpop.xlane.xlu1 %723 }
 0x1e3   : > { %11709 = vrsqrt.f32 %v789_v17  ;;  %v758_v16 = vmul.f32 0.0078125, %v724_v42  ;;  %v944_v45 = vpack.c.bf16 %v924_v36, %v923_v33  ;;  %v887_v26 = vmul.f32 %v12995_v53, %v849_v49 }
 0x1e4   : > { %v11704_v18 = vpop.eup %11703 }
 0x1e5   : > { %v790_v9 = vadd.f32 1e-05, %v758_v16  ;;  %1269 = vmatmul.mubr.bf16.gmra.mxu0 %v944_v45  ;;  %10790 = vmatmul.mubr.bf16.gmra.mxu1 %v944_v45  ;;  %v850_v50 = vmul.f32 %v11704_v18, %v13011_v31  ;;  %v925_v55 = vadd.f32 %v13007_v1, %v887_v26 }
 0x1e6   : > { %v726_v46 = vpop.xlane.xlu0 %725  ;;  %1278 = vmatprep.mubr.bf16.mxu0 %v18267_v0 }
 0x1e7   : > { %11711 = vrsqrt.f32 %v790_v9  ;;  %v759_v10 = vmul.f32 0.0078125, %v726_v46  ;;  %v888_v54 = vmul.f32 %v12995_v53, %v850_v50 }
 0x1e8   : > { %v11706_v52 = vpop.eup %11705 }
 0x1e9   : > { %v791_v59 = vadd.f32 1e-05, %v759_v10  ;;  %v926_v25 = vadd.f32 %v13007_v1, %v888_v54  ;;  %v851_v58 = vmul.f32 %v11706_v52, %v13019_v4 }
 0x1ea   : > { %v728_v19 = vpop.xlane.xlu1 %727 }
 0x1eb   : > { %11713 = vrsqrt.f32 %v791_v59  ;;  %v760_v31 = vmul.f32 0.0078125, %v728_v19  ;;  %v945_v47 = vpack.c.bf16 %v926_v25, %v925_v55  ;;  %v889_v11 = vmul.f32 %v12995_v53, %v851_v58 }
 0x1ec   : > { %v11708_v5 = vpop.eup %11707 }
 0x1ed   : > { %v792_v62 = vadd.f32 1e-05, %v760_v31  ;;  %1279 = vmatmul.mubr.bf16.gmra.mxu0 %v945_v47  ;;  %10793 = vmatprep.mubr.bf16.mxu1 %v945_v47  ;;  %v852_v63 = vmul.f32 %v11708_v5, %v13028_v39  ;;  %v927_v4 = vadd.f32 %v13007_v1, %v889_v11 }
 0x1ee   : > { %1288 = vmatprep.mubr.bf16.mxu0 %v18267_v0 }
 0x1ef   : > { %11715 = vrsqrt.f32 %v792_v62  ;;  %v890_v6 = vmul.f32 %v12995_v53, %v852_v63 }
 0x1f0   : > { %v11710_v56 = vpop.eup %11709 }
 0x1f1   : > { %v928_v60 = vadd.f32 %v13007_v1, %v890_v6  ;;  %v853_v7 = vmul.f32 %v11710_v56, %v13036_v37 }
 0x1f3   : > { %v946_v12 = vpack.c.bf16 %v928_v60, %v927_v4  ;;  %v891_v28 = vmul.f32 %v12995_v53, %v853_v7 }
 0x1f4   : > { %v11712_v22 = vpop.eup %11711 }
 0x1f5   : > { %1289 = vmatmul.mubr.bf16.gmra.mxu0 %v946_v12  ;;  %10794 = vmatmul.mubr.bf16.gmra.mxu1 %v946_v12  ;;  %v854_v39 = vmul.f32 %v11712_v22, %v13045_v51  ;;  %v929_v13 = vadd.f32 %v13007_v1, %v891_v28 }
 0x1f6   : > { %1298 = vmatprep.mubr.bf16.mxu0 %v18267_v0 }
 0x1f7   : > { %v892_v44 = vmul.f32 %v12995_v53, %v854_v39 }
 0x1f8   : > { %v11714_v34 = vpop.eup %11713 }
 0x1f9   : > { %v930_v2 = vadd.f32 %v13007_v1, %v892_v44  ;;  %v855_v27 = vmul.f32 %v11714_v34, %v13053_v57  ;;  %v18265_v57 = vsub.s32 0, %v13152_v35 }
 0x1fb   : > { %v947_v37 = vpack.c.bf16 %v930_v2, %v929_v13  ;;  %v893_v51 = vmul.f32 %v12995_v53, %v855_v27  ;;  %v18264_v2 = vsub.s32 2, %v13152_v35 }
 0x1fc   : > { %v11716_v8 = vpop.eup %11715 }
 0x1fd   : > { %1299 = vmatmul.mubr.bf16.gmra.mxu0 %v947_v37  ;;  %10797 = vmatprep.mubr.bf16.mxu1 %v947_v37  ;;  %v856_v24 = vmul.f32 %v11716_v8, %v13062_v3  ;;  %v931_v61 = vadd.f32 %v13007_v1, %v893_v51  ;;  %v13158_v3 = vld [vmem:[%s18254_s5] sm:$0x7] }
 0x1fe   : > { %1308 = vmatprep.mubr.bf16.mxu0 %v18267_v0  ;;  %v13164_v21 = vrot.slane %v13158_v3, %v18265_v57  ;;  %v13169_v40 = vrot.slane %v13158_v3, %v18266_v38  ;;  %v13255_v51 = vrot.slane %v13158_v3, %v18264_v2 }
 0x1ff   : > { %v894_v20 = vmul.f32 %v12995_v53, %v856_v24 }
 0x201   : > { %v932_v48 = vadd.f32 %v13007_v1, %v894_v20 }
 0x203   : > { %v948_v23 = vpack.c.bf16 %v932_v48, %v931_v61 }
 0x205   : > { %1309 = vmatmul.mubr.bf16.gmra.mxu0 %v948_v23  ;;  %10798 = vmatmul.mubr.bf16.gmra.mxu1 %v948_v23 }
 0x20a   : > { %v1160_v53 = vpop.f32.mrf.mxu0 }
 0x20b   : > { %v1161_v41 = vadd.f32 %v1160_v53, %v13164_v21 }
 0x20c   : > { %v1162_v1 = vpop.f32.mrf.mxu0 }
 0x20d   : > { %v1163_v32 = vadd.f32 %v1162_v1, %v13169_v40 }
 0x20e   : > { %v1164_v15 = vpop.f32.mrf.mxu0 }
 0x20f   : > { %v1165_v29 = vadd.f32 %v1164_v15, %v13164_v21 }
 0x210   : > { %v1166_v43 = vpop.f32.mrf.mxu0 }
 0x211   : > { %v13174_v30 = vpack.c.bf16 %v1165_v29, %v1161_v41  ;;  %v1167_v17 = vadd.f32 %v1166_v43, %v13169_v40 }
 0x212   : > { %v1170_v33 = vpop.f32.mrf.mxu0  ;;  %v13183_v42 = vpop.f32.mrf.mxu1 }
 0x213   : > { %18433 = vst [vmem:[#allocation3_spill] sm:$0xff] %v13174_v30  ;;  %v13177_v36 = vpack.c.bf16 %v1167_v17, %v1163_v32  ;;  %2651 = vrot.lane.b32.xlu0 %v13174_v30, %s12590_s25  ;;  %10809 = vmatprep.mubr.msk.bf16.mxu1 %vm1560_vm0, %v13174_v30  ;;  %v1171_v45 = vadd.f32 %v1170_v33, %v13164_v21 }
 0x214   : > { %v1172_v49 = vpop.f32.mrf.mxu0  ;;  %v13190_v26 = vpop.f32.mrf.mxu1 }
 0x215   : > { %18434 = vst [vmem:[#allocation4_spill] sm:$0xff] %v13177_v36  ;;  %2663 = vrot.lane.b32.xlu1 %v13177_v36, %s12590_s25  ;;  %v1173_v50 = vadd.f32 %v1172_v49, %v13169_v40 }
 0x216   : > { %v1174_v16 = vpop.f32.mrf.mxu0  ;;  %v13201_v55 = vpop.f32.mrf.mxu1 }
 0x217   : > { %v1175_v18 = vadd.f32 %v1174_v16, %v13164_v21 }
 0x218   : > { %v1176_v9 = vpop.f32.mrf.mxu0  ;;  %v13207_v19 = vpop.f32.mrf.mxu1 }
 0x219   : > { %v13192_v46 = vpack.c.bf16 %v1175_v18, %v1171_v45  ;;  %v1177_v10 = vadd.f32 %v1176_v9, %v13169_v40 }
 0x21a   : > { %v13195_v54 = vpop.f32.mrf.mxu0 }
 0x21b   : > { %18435 = vst [vmem:[#allocation5_spill] sm:$0xff] %v13192_v46  ;;  %v13197_v52 = vpack.c.bf16 %v1177_v10, %v1173_v50  ;;  %2653 = vrot.lane.b32.xlu1 %v13192_v46, %s12590_s25 }
 0x21c   : > { %v1182_v59 = vpop.f32.mrf.mxu0 }
 0x21d   : > { %18436 = vst [vmem:[#allocation6_spill] sm:$0xff] %v13197_v52  ;;  %2665 = vrot.lane.b32.xlu0 %v13197_v52, %s12590_s25  ;;  %v1183_v31 = vadd.f32 %v1182_v59, %v13169_v40  ;;  %v1577_v49 = vsel %vm1560_vm0, %v13197_v52, 0 }
 0x21e   : > { %v13205_v25 = vpop.f32.mrf.mxu0 }
 0x220   : > { %v1186_v58 = vpop.f32.mrf.mxu0 }
 0x221   : > { %v1187_v47 = vadd.f32 %v1186_v58, %v13169_v40 }
 0x222   : > { %v13211_v5 = vpop.f32.mrf.mxu0  ;;  %v13215_v63 = vpop.f32.mrf.mxu1 }
 0x223   : > { %v13213_v62 = vpack.c.bf16 %v1187_v47, %v1183_v31 }
 0x224   : > { %v1192_v11 = vpop.f32.mrf.mxu0  ;;  %v13221_v56 = vpop.f32.mrf.mxu1 }
 0x225   : > { %18437 = vst [vmem:[#allocation7_spill] sm:$0xff] %v13213_v62  ;;  %2667 = vrot.lane.b32.xlu1 %v13213_v62, %s12590_s25  ;;  %v1193_v60 = vadd.f32 %v1192_v11, %v13169_v40  ;;  %v1580_v61 = vsel %vm1560_vm0, %v13213_v62, 0 }
 0x226   : > { %v13219_v6 = vpop.f32.mrf.mxu0  ;;  %v13227_v22 = vpop.f32.mrf.mxu1 }
 0x228   : > { %v1196_v4 = vpop.f32.mrf.mxu0  ;;  %v13241_v13 = vpop.f32.mrf.mxu1 }
 0x229   : > { %v1197_v7 = vadd.f32 %v1196_v4, %v13169_v40  ;;  %v1574_v4 = vsel %vm1560_vm0, %v13177_v36, 0 }
 0x22a   : > { %v13225_v12 = vpop.f32.mrf.mxu0 }
 0x22b   : > { %v13229_v39 = vpack.c.bf16 %v1197_v7, %v1193_v60 }
 0x22c   : > { %v13231_v28 = vpop.f32.mrf.mxu0 }
 0x22d   : > { %18438 = vst [vmem:[#allocation8_spill] sm:$0xff] %v13229_v39  ;;  %11457 = vmatprep.subr.msk.bf16.mxu1 %vm1560_vm0, %v13229_v39  ;;  %2669 = vrot.lane.b32.xlu0 %v13229_v39, %s12590_s25  ;;  %v1583_v44 = vsel %vm1560_vm0, %v13229_v39, 0 }
 0x22e   : > { %v13239_v34 = vpop.f32.mrf.mxu0  ;;  %10802 = vmatpush3.bf16.xpose.msra.mxu1 %v1583_v44  ;;  %v1185_v44 = vadd.f32 %v13205_v25, %v13164_v21 }
 0x22f   : > { %11458 = vmatprep.subr.msk.bf16.mxu1 %vm1560_vm0, %v13213_v62 }
 0x230   : > { %v13246_v27 = vpop.f32.mrf.mxu0 }
 0x231   : > { %v10779_v37 = vpop.f32.mrf.mxu1 }
 0x232   : > { %v13248_v8 = vpop.f32.mrf.mxu0  ;;  %v1394_v48 = vadd.f32 %v10779_v37, %v13255_v51 }
 0x233   : > { %v13250_v24 = vpop.f32.mrf.mxu1 }
 0x234   : > { %v1212_v20 = vpop.f32.mrf.mxu0 }
 0x235   : > { %v10780_v14 = vpop.f32.mrf.mxu1  ;;  %v1213_v3 = vadd.f32 %v1212_v20, %v13169_v40 }
 0x236   : > { %v13260_v23 = vpop.f32.mrf.mxu0  ;;  %v1397_v53 = vadd.f32 %v10780_v14, %v13255_v51  ;;  %10804 = vmatpush3.bf16.xpose.msra.mxu1 %v1580_v61 }
 0x237   : > { %11459 = vmatprep.subr.msk.bf16.mxu1 %vm1560_vm0, %v13197_v52  ;;  %v13273_v32 = vpop.f32.mrf.mxu1 }
 0x238   : > { %v13265_v1 = vpack.c.bf16 %v1397_v53, %v1394_v48  ;;  %v1216_v15 = vpop.f32.mrf.mxu0  ;;  %v1181_v48 = vadd.f32 %v13195_v54, %v13164_v21 }
 0x239   : > { %v1217_v41 = vadd.f32 %v1216_v15, %v13169_v40 }
 0x23a   : > { %18439 = vst [vmem:[#allocation9_spill] sm:$0xff] %v13265_v1  ;;  %v13269_v29 = vpop.f32.mrf.mxu0 }
 0x23b   : > { %v13271_v43 = vpack.c.bf16 %v1217_v41, %v1213_v3 }
 0x23c   : > { %v1222_v17 = vpop.f32.mrf.mxu0 }
 0x23d   : > { %18440 = vst [vmem:[#allocation10_spill] sm:$0xff] %v13271_v43  ;;  %2778 = vrot.lane.b32.xlu0 %v13271_v43, %s12590_s25  ;;  %v13277_v33 = vpop.f32.mrf.mxu1  ;;  %v1223_v9 = vadd.f32 %v1222_v17, %v13169_v40  ;;  %v13313_v17 = vpack.c.bf16 %v1185_v44, %v1181_v48 }
 0x23e   : > { %v13281_v16 = vpop.f32.mrf.mxu0  ;;  %10806 = vmatpush3.bf16.xpose.msra.mxu1 %v1577_v49 }
 0x23f   : > { %11460 = vmatprep.subr.msk.bf16.mxu1 %vm1560_vm0, %v13177_v36  ;;  %v13285_v45 = vpop.f32.mrf.mxu1 }
 0x240   : > { %v1226_v18 = vpop.f32.mrf.mxu0 }
 0x241   : > { %v1227_v50 = vadd.f32 %v1226_v18, %v13169_v40  ;;  %v13289_v10 = vpop.f32.mrf.mxu1 }
 0x242   : > { %v13291_v59 = vpop.f32.mrf.mxu0 }
 0x243   : > { %v13293_v58 = vpack.c.bf16 %v1227_v50, %v1223_v9  ;;  %v13295_v31 = vpop.f32.mrf.mxu1  ;;  %v1195_v9 = vadd.f32 %v13219_v6, %v13164_v21 }
 0x244   : > { %v1232_v47 = vpop.f32.mrf.mxu0 }
 0x245   : > { %18441 = vst [vmem:[#allocation11_spill] sm:$0xff] %v13293_v58  ;;  %2780 = vrot.lane.b32.xlu1 %v13293_v58, %s12590_s25  ;;  %v10787_v11 = vpop.f32.mrf.mxu1  ;;  %v1233_v20 = vadd.f32 %v1232_v47, %v13169_v40 }
 0x246   : > { %v1234_v60 = vpop.f32.mrf.mxu0  ;;  %10808 = vmatpush3.bf16.xpose.msra.mxu1 %v1574_v4  ;;  %v1426_v53 = vadd.f32 %v10787_v11, %v13255_v51  ;;  %v1205_v11 = vadd.f32 %v13239_v34, %v13164_v21  ;;  %v1191_v4 = vadd.f32 %v13211_v5, %v13164_v21  ;;  %v1669_v34 = vsel %vm1560_vm0, %v13293_v58, 0 }
 0x247   : > { %v13301_v7 = vpop.f32.mrf.mxu1  ;;  %v1207_v5 = vadd.f32 %v13246_v27, %v13169_v40  ;;  %v1225_v27 = vadd.f32 %v13281_v16, %v13164_v21  ;;  %v1231_v16 = vadd.f32 %v13291_v59, %v13164_v21 }
 0x248   : > { %v1236_v37 = vpop.f32.mrf.mxu0  ;;  %v13343_v6 = vpack.c.bf16 %v1195_v9, %v1191_v4 }
 0x249   : > { %v1237_v14 = vadd.f32 %v1236_v37, %v13169_v40  ;;  %v10788_v61 = vpop.f32.mrf.mxu1  ;;  %v1201_v37 = vadd.f32 %v13225_v12, %v13164_v21  ;;  %v1203_v12 = vadd.f32 %v13231_v28, %v13169_v40  ;;  %v1211_v28 = vadd.f32 %v13248_v8, %v13164_v21 }
 0x24a   : > { %v1240_v15 = vpop.f32.mrf.mxu0  ;;  %v1429_v3 = vadd.f32 %v10788_v61, %v13255_v51  ;;  %18445 = vst [vmem:[#allocation15_spill] sm:$0xff] %v13343_v6  ;;  %v1666_v61 = vsel %vm1560_vm0, %v13271_v43, 0 }
 0x24b   : > { %v13311_v41 = vpack.c.bf16 %v1237_v14, %v1233_v20  ;;  %v1241_v50 = vadd.f32 %v1240_v15, %v13164_v21  ;;  %v13347_v20 = vpack.c.bf16 %v1205_v11, %v1201_v37  ;;  %v13361_v14 = vpack.c.bf16 %v1207_v5, %v1203_v12 }
 0x24c   : > { %v13315_v49 = vpack.c.bf16 %v1429_v3, %v1426_v53  ;;  %v13317_v25 = vpop.f32.mrf.mxu0  ;;  %v1215_v53 = vadd.f32 %v13260_v23, %v13164_v21  ;;  %v1221_v15 = vadd.f32 %v13269_v29, %v13164_v21  ;;  %v1235_v23 = vadd.f32 %v1234_v60, %v13164_v21  ;;  %v13400_v60 = vpop.f32.mrf.mxu1 }
 0x24d   : > { %18442 = vst [vmem:[#allocation12_spill] sm:$0xff] %v13311_v41  ;;  %2782 = vrot.lane.b32.xlu1 %v13311_v41, %s12590_s25  ;;  %10810 = vmatmul.mubr.msk.bf16.vlgmr.msra.gmra.mxu1 %vm1560_vm0, %v13192_v46  ;;  %v1672_v54 = vsel %vm1560_vm0, %v13311_v41, 0  ;;  %18446 = vst [vmem:[#allocation16_spill] sm:$0xff] %v13347_v20  ;;  %v1663_v48 = vsel %vm1560_vm0, %v13361_v14, 0 }
 0x24e   : > { %18443 = vst [vmem:[#allocation13_spill] sm:$0xff] %v13315_v49  ;;  %11461 = vmatprep.subr.msk.bf16.mxu1 %vm1560_vm0, %v13311_v41  ;;  %v1244_v18 = vpop.f32.mrf.mxu0  ;;  %10813 = vmatprep.mubr.msk.bf16.mxu1 %vm1560_vm0, %v13313_v17  ;;  %v13377_v3 = vpack.c.bf16 %v1215_v53, %v1211_v28 }
 0x24f   : > { %v1245_v47 = vadd.f32 %v1244_v18, %v13164_v21  ;;  %10818 = vmatpush3.bf16.xpose.msra.mxu1 %v1672_v54  ;;  %v13379_v54 = vpack.c.bf16 %v1225_v27, %v1221_v15  ;;  %v13388_v18 = vpack.c.bf16 %v1235_v23, %v1231_v16 }
 0x250   : > { %11462 = vmatprep.subr.msk.bf16.mxu1 %vm1560_vm0, %v13293_v58  ;;  %18447 = vst [vmem:[#allocation17_spill] sm:$0xff] %v13377_v3  ;;  %v1246_v8 = vpop.f32.mrf.mxu0 }
 0x251   : > { %v13339_v44 = vpack.c.bf16 %v1245_v47, %v1241_v50  ;;  %18448 = vst [vmem:[#allocation18_spill] sm:$0xff] %v13379_v54  ;;  %18449 = vst [vmem:[#allocation19_spill] sm:$0xff] %v13388_v18 }
 0x252   : > { %v13392_v29 = vpop.f32.mrf.mxu0 }
 0x253   : > { %18444 = vst [vmem:[#allocation14_spill] sm:$0xff] %v13339_v44  ;;  %10841 = vmatprep.mubr.msk.bf16.mxu0 %vm1560_vm0, %v13339_v44 }
 0x254   : > { %v1252_v9 = vpop.f32.mrf.mxu0 }
 0x255   : > { %10814 = vmatmul.mubr.msk.bf16.gmra.mxu1 %vm1560_vm0, %v13343_v6 }
 0x256   : > { %10825 = vmatprep.mubr.msk.bf16.mxu1 %vm1560_vm0, %v13347_v20  ;;  %v13394_v50 = vpop.f32.mrf.mxu0 }
 0x257   : > { %10820 = vmatpush3.bf16.xpose.msra.mxu1 %v1669_v34 }
 0x258   : > { %11463 = vmatprep.subr.msk.bf16.mxu1 %vm1560_vm0, %v13271_v43  ;;  %v1256_v47 = vpop.f32.mrf.mxu0 }
 0x25f   : > { %10822 = vmatpush3.bf16.xpose.msra.mxu1 %v1666_v61 }
 0x260   : > { %11464 = vmatprep.subr.msk.bf16.mxu1 %vm1560_vm0, %v13361_v14 }
 0x267   : > { %10824 = vmatpush3.bf16.xpose.msra.mxu1 %v1663_v48 }
 0x26e   : > { %10826 = vmatmul.mubr.msk.bf16.vlgmr.msra.gmra.mxu1 %vm1560_vm0, %v13377_v3 }
 0x26f   : > { %10829 = vmatprep.mubr.msk.bf16.mxu1 %vm1560_vm0, %v13379_v54 }
 0x276   : > { %10830 = vmatmul.mubr.msk.bf16.gmra.mxu1 %vm1560_vm0, %v13388_v18 }
 0x29d   : > { %v13396_v11 = vpop.f32.mrf.mxu0 }
 0x29e   : > { %v1261_v41 = vadd.f32 %v13396_v11, %v13164_v21 }
 0x29f   : > { %v1262_v4 = vpop.f32.mrf.mxu0 }
 0x2a0   : > { %v1263_v0 = vadd.f32 %v1262_v4, %v13169_v40  ;;  %v1257_v4 = vadd.f32 %v1256_v47, %v13169_v40 }
 0x2a1   : > { %v13398_v37 = vpop.f32.mrf.mxu0 }
 0x2a3   : > { %v1266_v59 = vpop.f32.mrf.mxu0 }
 0x2a4   : > { %v1267_v23 = vadd.f32 %v1266_v59, %v13169_v40 }
 0x2a5   : > { %v13402_v34 = vpop.f32.mrf.mxu0  ;;  %v10791_v5 = vpop.f32.mrf.mxu1 }
 0x2a6   : > { %v1442_v27 = vadd.f32 %v10791_v5, %v13255_v51  ;;  %v13420_v30 = vpack.c.bf16 %v1267_v23, %v1263_v0 }
 0x2a7   : > { %v1272_v12 = vpop.f32.mrf.mxu0  ;;  %v13404_v61 = vpop.f32.mrf.mxu1 }
 0x2a8   : > { %v1273_v16 = vadd.f32 %v1272_v12, %v13169_v40  ;;  %v1758_v23 = vsel %vm1560_vm0, %v13420_v30, 0 }
 0x2a9   : > { %v13406_v48 = vpop.f32.mrf.mxu0  ;;  %v10792_v53 = vpop.f32.mrf.mxu1 }
 0x2aa   : > { %v1445_v28 = vadd.f32 %v10792_v53, %v13255_v51 }
 0x2ab   : > { %v1276_v15 = vpop.f32.mrf.mxu0  ;;  %v13473_v39 = vpop.f32.mrf.mxu1 }
 0x2ac   : > { %v13412_v2 = vpack.c.bf16 %v1445_v28, %v1442_v27  ;;  %v1277_v57 = vadd.f32 %v1276_v15, %v13169_v40  ;;  %v1253_v28 = vadd.f32 %v1252_v9, %v13169_v40  ;;  %v1243_v9 = vadd.f32 %v13317_v25, %v13169_v40 }
 0x2ad   : > { %v1280_v38 = vpop.f32.mrf.mxu0  ;;  %v1378_v25 = vadd.f32 %v13215_v63, %v13255_v51 }
 0x2ae   : > { %18450 = vst [vmem:[#allocation20_spill] sm:$0xff] %v13412_v2  ;;  %v13416_v35 = vpack.c.bf16 %v1277_v57, %v1273_v16  ;;  %v1281_v12 = vadd.f32 %v1280_v38, %v13164_v21  ;;  %v13442_v38 = vpack.c.bf16 %v1257_v4, %v1253_v28 }
 0x2af   : > { %v13418_v43 = vpop.f32.mrf.mxu0 }
 0x2b0   : > { %18451 = vst [vmem:[#allocation21_spill] sm:$0xff] %v13416_v35  ;;  %2895 = vrot.lane.b32.xlu1 %v13416_v35, %s12590_s25  ;;  %11465 = vmatprep.subr.msk.bf16.mxu0 %vm1560_vm0, %v13416_v35  ;;  %v1761_v59 = vsel %vm1560_vm0, %v13416_v35, 0  ;;  %18453 = vst [vmem:[#allocation23_spill] sm:$0xff] %v13442_v38  ;;  %v1755_v4 = vsel %vm1560_vm0, %v13442_v38, 0  ;;  %v1255_v35 = vadd.f32 %v13394_v50, %v13164_v21 }
 0x2b1   : > { %v1284_v5 = vpop.f32.mrf.mxu0  ;;  %10834 = vmatpush3.bf16.xpose.msra.mxu0 %v1761_v59  ;;  %v1247_v59 = vadd.f32 %v1246_v8, %v13169_v40  ;;  %v1381_v8 = vadd.f32 %v13227_v22, %v13255_v51  ;;  %v1265_v22 = vadd.f32 %v13398_v37, %v13164_v21  ;;  %v1373_v50 = vadd.f32 %v13241_v13, %v13255_v51 }
 0x2b2   : > { %v1285_v57 = vadd.f32 %v1284_v5, %v13164_v21  ;;  %11466 = vmatprep.subr.msk.bf16.mxu0 %vm1560_vm0, %v13420_v30  ;;  %v1365_v13 = vadd.f32 %v13201_v55, %v13255_v51  ;;  %v1271_v55 = vadd.f32 %v13402_v34, %v13164_v21 }
 0x2b3   : > { %v13432_v0 = vpop.f32.mrf.mxu0 }
 0x2b4   : > { %v13435_v53 = vpack.c.bf16 %v1285_v57, %v1281_v12  ;;  %v13455_v57 = vpack.c.bf16 %v1247_v59, %v1243_v9  ;;  %v13469_v9 = vpack.c.bf16 %v1381_v8, %v1378_v25  ;;  %v1251_v25 = vadd.f32 %v13392_v29, %v13164_v21 }
 0x2b5   : > { %v13437_v27 = vpop.f32.mrf.mxu0  ;;  %v13482_v63 = vpop.f32.mrf.mxu1  ;;  %v1370_v29 = vadd.f32 %v13221_v56, %v13255_v51  ;;  %v1362_v56 = vadd.f32 %v13183_v42, %v13255_v51  ;;  %v1354_v42 = vadd.f32 %v13190_v26, %v13255_v51  ;;  %v1410_v26 = vadd.f32 %v13277_v33, %v13255_v51 }
 0x2b6   : > { %18452 = vst [vmem:[#allocation22_spill] sm:$0xff] %v13435_v53  ;;  %10857 = vmatprep.mubr.msk.bf16.mxu1 %vm1560_vm0, %v13435_v53  ;;  %18454 = vst [vmem:[#allocation24_spill] sm:$0xff] %v13455_v57  ;;  %v1752_v52 = vsel %vm1560_vm0, %v13455_v57, 0  ;;  %v13493_v62 = vpack.c.bf16 %v1255_v35, %v1251_v25 }
 0x2b7   : > { %v1292_v15 = vpop.f32.mrf.mxu0  ;;  %18455 = vst [vmem:[#allocation25_spill] sm:$0xff] %v13469_v9 }
 0x2b8   : > { %18456 = vst [vmem:[#allocation26_spill] sm:$0xff] %v13493_v62  ;;  %v1293_v25 = vadd.f32 %v1292_v15, %v13169_v40  ;;  %v1413_v15 = vadd.f32 %v13289_v10, %v13255_v51  ;;  %v1283_v10 = vadd.f32 %v13418_v43, %v13169_v40 }
 0x2b9   : > { %v13446_v16 = vpop.f32.mrf.mxu0  ;;  %10836 = vmatpush3.bf16.xpose.msra.mxu0 %v1758_v23 }
 0x2ba   : > { %11467 = vmatprep.subr.msk.bf16.mxu0 %vm1560_vm0, %v13442_v38 }
 0x2bb   : > { %v1296_v47 = vpop.f32.mrf.mxu0 }
 0x2bc   : > { %v1297_v11 = vadd.f32 %v1296_v47, %v13169_v40 }
 0x2bd   : > { %v13451_v5 = vpop.f32.mrf.mxu0 }
 0x2be   : > { %v13540_v34 = vpack.c.bf16 %v1297_v11, %v1293_v25  ;;  %v1295_v11 = vadd.f32 %v13446_v16, %v13164_v21  ;;  %v1291_v25 = vadd.f32 %v13437_v27, %v13164_v21 }
 0x2bf   : > { %v1302_v12 = vpop.f32.mrf.mxu0 }
 0x2c0   : > { %v1303_v37 = vadd.f32 %v1302_v12, %v13169_v40  ;;  %v13529_v12 = vpack.c.bf16 %v1365_v13, %v1362_v56  ;;  %18463 = vst [vmem:[#allocation33_spill] sm:$0xff] %v13540_v34  ;;  %v1844_v33 = vsel %vm1560_vm0, %v13540_v34, 0 }
 0x2c1   : > { %v13459_v28 = vpop.f32.mrf.mxu0  ;;  %10838 = vmatpush3.bf16.xpose.msra.mxu0 %v1755_v4 }
 0x2c2   : > { %11468 = vmatprep.subr.msk.bf16.mxu0 %vm1560_vm0, %v13455_v57  ;;  %18461 = vst [vmem:[#allocation31_spill] sm:$0xff] %v13529_v12 }
 0x2c3   : > { %v1306_v23 = vpop.f32.mrf.mxu0 }
 0x2c4   : > { %v1307_v46 = vadd.f32 %v1306_v23, %v13169_v40  ;;  %v13500_v23 = vpack.c.bf16 %v1265_v22, %v1261_v41 }
 0x2c5   : > { %v13465_v36 = vpop.f32.mrf.mxu0 }
 0x2c6   : > { %18458 = vst [vmem:[#allocation28_spill] sm:$0xff] %v13500_v23 }
 0x2c7   : > { %v1312_v59 = vpop.f32.mrf.mxu0 }
 0x2c8   : > { %v1313_v58 = vadd.f32 %v1312_v59, %v13169_v40  ;;  %v13502_v59 = vpop.f32.mrf.mxu1 }
 0x2c9   : > { %v13475_v4 = vpop.f32.mrf.mxu0  ;;  %10840 = vmatpush3.bf16.xpose.msra.mxu0 %v1752_v52 }
 0x2ca   : > { %10865 = vmatprep.subr.bf16.mxu0 %v13469_v9  ;;  %v10796_v41 = vpop.f32.mrf.mxu1 }
 0x2cb   : > { %v1316_v8 = vpop.f32.mrf.mxu0 }
 0x2cc   : > { %v1317_v52 = vadd.f32 %v1316_v8, %v13169_v40  ;;  %v13504_v8 = vpack.c.bf16 %v1307_v46, %v1303_v37  ;;  %v1275_v46 = vadd.f32 %v13406_v48, %v13164_v21  ;;  %v1357_v48 = vadd.f32 %v13207_v19, %v13255_v51 }
 0x2cd   : > { %v1287_v37 = vadd.f32 %v13432_v0, %v13169_v40 }
 0x2ce   : > { %v13496_v53 = vpack.c.bf16 %v1317_v52, %v1313_v58  ;;  %18459 = vst [vmem:[#allocation29_spill] sm:$0xff] %v13504_v8  ;;  %v13514_v58 = vpack.c.bf16 %v1373_v50, %v1370_v29  ;;  %v13533_v22 = vpack.c.bf16 %v1275_v46, %v1271_v55  ;;  %v1452_v52 = vpop.f32.mrf.mxu1  ;;  %v1847_v19 = vsel %vm1560_vm0, %v13504_v8, 0 }
 0x2cf   : > { %v13546_v47 = vpack.c.bf16 %v1357_v48, %v1354_v42  ;;  %v13558_v29 = vpack.c.bf16 %v1413_v15, %v1410_v26  ;;  %v13564_v13 = vpack.c.bf16 %v1287_v37, %v1283_v10  ;;  %v1305_v48 = vadd.f32 %v13459_v28, %v13164_v21 }
 0x2d0   : > { %18457 = vst [vmem:[#allocation27_spill] sm:$0xff] %v13496_v53  ;;  %10842 = vmatmul.mubr.msk.bf16.vlgmr.msra.gmra.mxu0 %vm1560_vm0, %v13493_v62  ;;  %11469 = vmatprep.subr.msk.bf16.mxu1 %vm1560_vm0, %v13496_v53  ;;  %v1850_v35 = vsel %vm1560_vm0, %v13496_v53, 0  ;;  %18460 = vst [vmem:[#allocation30_spill] sm:$0xff] %v13514_v58  ;;  %v10799_v50 = vpop.f32.mrf.mxu1  ;;  %v1301_v15 = vadd.f32 %v13451_v5, %v13164_v21  ;;  %v1461_v37 = vadd.f32 %v10796_v41, %v13255_v51 }
 0x2d1   : > { %10845 = vmatprep.mubr.msk.bf16.mxu0 %vm1560_vm0, %v13500_v23  ;;  %10850 = vmatpush3.bf16.xpose.msra.mxu1 %v1850_v35  ;;  %18462 = vst [vmem:[#allocation32_spill] sm:$0xff] %v13533_v22  ;;  %18464 = vst [vmem:[#allocation34_spill] sm:$0xff] %v13546_v47  ;;  %v1474_v56 = vadd.f32 %v10799_v50, %v13255_v51  ;;  %v1841_v40 = vsel %vm1560_vm0, %v13564_v13, 0  ;;  %v13588_v50 = vpack.c.bf16 %v1295_v11, %v1291_v25  ;;  %v1531_v11 = vld [vmem:[%s18250_s1 + $0x18] sm:$0xff] }
 0x2d2   : > { %10866 = vmatpush3.bf16.msra.mxu0 %v13469_v9  ;;  %11470 = vmatprep.subr.msk.bf16.mxu1 %vm1560_vm0, %v13504_v8  ;;  %18465 = vst [vmem:[#allocation35_spill] sm:$0xff] %v13558_v29  ;;  %v1465_v35 = vpop.f32.mrf.mxu1  ;;  %18466 = vst [vmem:[#allocation36_spill] sm:$0xff] %v13564_v13  ;;  %v13591_v16 = vpack.c.bf16 %v1305_v48, %v1301_v15  ;;  %v1458_v5 = vadd.f32 %v13482_v63, %v13255_v51  ;;  %v1529_v15 = vld [vmem:[%s18250_s1 + $0x8] sm:$0xff] }
 0x2d3   : > { %10867 = vmatprep.subr.bf16.mxu0 %v13514_v58  ;;  %18469 = vst [vmem:[#allocation39_spill] sm:$0xff] %v13588_v50  ;;  %v1466_v26 = vadd.f32 %v1465_v35, %v13255_v51  ;;  %v1315_v28 = vadd.f32 %v13475_v4, %v13164_v21  ;;  %v1453_v35 = vadd.f32 %v1452_v52, %v13255_v51 }
 0x2d4   : > { %v10800_v46 = vpop.f32.mrf.mxu1  ;;  %18470 = vst [vmem:[#allocation40_spill] sm:$0xff] %v13591_v16  ;;  %v13608_v41 = vpack.c.bf16 %v1461_v37, %v1458_v5  ;;  %v1534_v5 = vld [vmem:[%s18250_s1 + $0x30] sm:$0xff] }
 0x2d5   : > { %v1477_v0 = vadd.f32 %v10800_v46, %v13255_v51 }
 0x2d6   : > { %10868 = vmatpush3.bf16.msra.mxu0 %v13514_v58  ;;  %v1468_v43 = vpop.f32.mrf.mxu1  ;;  %18473 = vst [vmem:[#allocation43_spill] sm:$0xff] %v13608_v41 }
 0x2d7   : > { %10869 = vmatprep.subr.bf16.mxu0 %v13529_v12  ;;  %v13572_v55 = vpack.c.bf16 %v1477_v0, %v1474_v56  ;;  %v1469_v42 = vadd.f32 %v1468_v43, %v13255_v51  ;;  %v1450_v0 = vadd.f32 %v13502_v59, %v13255_v51  ;;  %v1528_v56 = vld [vmem:[%s18250_s1] sm:$0xff] }
 0x2d8   : > { %10846 = vmatmul.mubr.msk.bf16.gmra.mxu0 %vm1560_vm0, %v13533_v22 }
 0x2d9   : > { %10852 = vmatpush3.bf16.xpose.msra.mxu1 %v1847_v19  ;;  %18467 = vst [vmem:[#allocation37_spill] sm:$0xff] %v13572_v55  ;;  %v13584_v19 = vpop.permute.xlu1 %2663  ;;  %v13594_v10 = vpack.c.bf16 %v1469_v42, %v1466_v26  ;;  %v13621_v4 = vpack.c.bf16 %v1453_v35, %v1450_v0 }
 0x2da   : > { %10870 = vmatpush3.bf16.msra.mxu0 %v13529_v12  ;;  %11471 = vmatprep.subr.msk.bf16.mxu1 %vm1560_vm0, %v13540_v34  ;;  %18468 = vst [vmem:[#allocation38_spill] sm:$0xff] %v13584_v19 }
 0x2db   : > { %10871 = vmatprep.subr.bf16.mxu0 %v13546_v47  ;;  %18471 = vst [vmem:[#allocation41_spill] sm:$0xff] %v13594_v10  ;;  %18476 = vst [vmem:[#allocation46_spill] sm:$0xff] %v13621_v4 }
 0x2dd   : > { %v13598_v27 = vpop.permute.xlu1 %2653 }
 0x2de   : > { %10872 = vmatpush3.bf16.msra.mxu0 %v13546_v47  ;;  %18472 = vst [vmem:[#allocation42_spill] sm:$0xff] %v13598_v27  ;;  %v1545_v47 = vld [vmem:[%s18250_s1 + $0x88] sm:$0xff] }
 0x2df   : > { %10881 = vmatprep.subr.bf16.mxu0 %v13558_v29 }
 0x2e1   : > { %10854 = vmatpush3.bf16.xpose.msra.mxu1 %v1844_v33  ;;  %v1311_v33 = vadd.f32 %v13465_v36, %v13164_v21  ;;  %v13613_v46 = vpop.permute.xlu1 %2667  ;;  %v1530_v36 = vld [vmem:[%s18250_s1 + $0x10] sm:$0xff] }
 0x2e2   : > { %11472 = vmatprep.subr.msk.bf16.mxu1 %vm1560_vm0, %v13564_v13  ;;  %18474 = vst [vmem:[#allocation44_spill] sm:$0xff] %v13613_v46 }
 0x2e3   : > { %v13618_v63 = vpack.c.bf16 %v1315_v28, %v1311_v33 }
 0x2e5   : > { %18475 = vst [vmem:[#allocation45_spill] sm:$0xff] %v13618_v63  ;;  %v13625_v52 = vpop.permute.xlu1 %2780 }
 0x2e6   : > { %18477 = vst [vmem:[#allocation47_spill] sm:$0xff] %v13625_v52 }
 0x2e9   : > { %10856 = vmatpush3.bf16.xpose.msra.mxu1 %v1841_v40  ;;  %v13629_v21 = vpop.permute.xlu1 %2782 }
 0x2ea   : > { %10913 = vmatprep.subr.bf16.mxu1 %v13572_v55  ;;  %18478 = vst [vmem:[#allocation48_spill] sm:$0xff] %v13629_v21 }
 0x2f0   : > { %10858 = vmatmul.mubr.msk.bf16.vlgmr.msra.gmra.mxu1 %vm1560_vm0, %v13588_v50 }
 0x2f1   : > { %10861 = vmatprep.mubr.msk.bf16.mxu1 %vm1560_vm0, %v13591_v16  ;;  %10914 = vmatpush3.bf16.msra.mxu1 %v13572_v55  ;;  %v1537_v55 = vld [vmem:[%s18250_s1 + $0x48] sm:$0xff] }
 0x2f2   : > { %10915 = vmatprep.subr.bf16.mxu1 %v13594_v10 }
 0x2f5   : > { %10916 = vmatpush3.bf16.msra.mxu1 %v13594_v10 }
 0x2f6   : > { %10917 = vmatprep.subr.bf16.mxu1 %v13608_v41 }
 0x2f8   : > { %10862 = vmatmul.mubr.msk.bf16.gmra.mxu1 %vm1560_vm0, %v13618_v63 }
 0x2f9   : > { %10918 = vmatpush3.bf16.msra.mxu1 %v13608_v41 }
 0x2fa   : > { %10919 = vmatprep.subr.bf16.mxu1 %v13621_v4 }
 0x2fd   : > { %10920 = vmatpush3.bf16.msra.mxu1 %v13621_v4 }
 0x2fe   : > { %11477 = vmatprep.subr.msk.bf16.mxu1 %vm1560_vm0, %v13629_v21 }
 0x30d   : > { %v10811_v59 = vpop.f32.mrf.mxu1 }
 0x30e   : > { %v13640_v40 = vadd.f32 %v10811_v59, %v1530_v36  ;;  %v1532_v36 = vld [vmem:[%s18250_s1 + $0x20] sm:$0xff] }
 0x30f   : > { %v1619_v43 = vpop.f32.mrf.mxu1 }
 0x310   : > { %v13645_v48 = vadd.f32 %v1619_v43, %v1528_v56  ;;  %v1924_v25 = vsel %vm1917_vm1, %v13640_v40, -inf  ;;  %v1535_v43 = vld [vmem:[%s18250_s1 + $0x38] sm:$0xff] }
 0x311   : > { %1925 = vmax.xlane.f32.xlu0 %v1924_v25  ;;  %v10812_v42 = vpop.f32.mrf.mxu1 }
 0x312   : > { %v13652_v26 = vadd.f32 %v10812_v42, %v1531_v11  ;;  %v1918_v33 = vsel %vm1917_vm1, %v13645_v48, -inf }
 0x313   : > { %v1622_v37 = vpop.f32.mrf.mxu1 }
 0x314   : > { %v13657_v28 = vadd.f32 %v1622_v37, %v1529_v15  ;;  %v1927_v35 = vsel %vm1917_vm1, %v13652_v26, -inf  ;;  %v1533_v37 = vld [vmem:[%s18250_s1 + $0x28] sm:$0xff] }
 0x315   : > { %1928 = vmax.xlane.f32.xlu1 %v1927_v35  ;;  %v10815_v0 = vpop.f32.mrf.mxu1  ;;  %1919 = vmax.xlane.f32.xlu0 %v1918_v33 }
 0x316   : > { %v13666_v59 = vadd.f32 %v10815_v0, %v1534_v5  ;;  %v1921_v25 = vsel %vm1917_vm1, %v13657_v28, -inf }
 0x317   : > { %v1635_v56 = vpop.f32.mrf.mxu1 }
 0x318   : > { %v13671_v11 = vadd.f32 %v1635_v56, %v1532_v36  ;;  %v1936_v42 = vsel %vm1917_vm1, %v13666_v59, -inf }
 0x319   : > { %v10816_v15 = vpop.f32.mrf.mxu1  ;;  %1922 = vmax.xlane.f32.xlu1 %v1921_v25  ;;  %1937 = vmax.xlane.f32.xlu0 %v1936_v42  ;;  %v1536_v42 = vld [vmem:[%s18250_s1 + $0x40] sm:$0xff] }
 0x31a   : > { %v13680_v5 = vadd.f32 %v10816_v15, %v1535_v43  ;;  %v1930_v36 = vsel %vm1917_vm1, %v13671_v11, -inf  ;;  %v1538_v43 = vld [vmem:[%s18250_s1 + $0x50] sm:$0xff] }
 0x31b   : > { %v1638_v35 = vpop.f32.mrf.mxu1 }
 0x31c   : > { %v13682_v33 = vadd.f32 %v1638_v35, %v1533_v37  ;;  %v1939_v0 = vsel %vm1917_vm1, %v13680_v5, -inf  ;;  %v1539_v35 = vld [vmem:[%s18250_s1 + $0x58] sm:$0xff] }
 0x31d   : > { %1940 = vmax.xlane.f32.xlu1 %v1939_v0  ;;  %1931 = vmax.xlane.f32.xlu0 %v1930_v36 }
 0x31e   : > { %v1933_v56 = vsel %vm1917_vm1, %v13682_v33, -inf }
 0x321   : > { %1934 = vmax.xlane.f32.xlu1 %v1933_v56 }
 0x32e   : > { %v10827_v25 = vpop.f32.mrf.mxu1 }
 0x32f   : > { %v13696_v15 = vadd.f32 %v10827_v25, %v1538_v43  ;;  %v1542_v25 = vld [vmem:[%s18250_s1 + $0x70] sm:$0xff] }
 0x330   : > { %v1708_v37 = vpop.f32.mrf.mxu1 }
 0x331   : > { %v13701_v0 = vadd.f32 %v1708_v37, %v1536_v42  ;;  %v1948_v36 = vsel %vm1917_vm1, %v13696_v15, -inf }
 0x332   : > { %v10828_v56 = vpop.f32.mrf.mxu1  ;;  %1949 = vmax.xlane.f32.xlu0 %v1948_v36 }
 0x333   : > { %v13708_v4 = vadd.f32 %v10828_v56, %v1539_v35  ;;  %v1942_v37 = vsel %vm1917_vm1, %v13701_v0, -inf  ;;  %v1540_v35 = vld [vmem:[%s18250_s1 + $0x60] sm:$0xff] }
 0x334   : > { %v1711_v43 = vpop.f32.mrf.mxu1 }
 0x335   : > { %v13713_v41 = vadd.f32 %v1711_v43, %v1537_v55  ;;  %v1951_v42 = vsel %vm1917_vm1, %v13708_v4, -inf  ;;  %v1543_v55 = vld [vmem:[%s18250_s1 + $0x78] sm:$0xff] }
 0x336   : > { %v10831_v36 = vpop.f32.mrf.mxu1  ;;  %1952 = vmax.xlane.f32.xlu1 %v1951_v42  ;;  %1943 = vmax.xlane.f32.xlu0 %v1942_v37 }
 0x337   : > { %v13722_v56 = vadd.f32 %v10831_v36, %v1542_v25  ;;  %v1945_v52 = vsel %vm1917_vm1, %v13713_v41, -inf  ;;  %v1541_v25 = vld [vmem:[%s18250_s1 + $0x68] sm:$0xff] }
 0x338   : > { %v1724_v10 = vpop.f32.mrf.mxu1 }
 0x339   : > { %v13727_v43 = vadd.f32 %v1724_v10, %v1540_v35  ;;  %v1960_v42 = vsel %vm1917_vm1, %v13722_v56, -inf }
 0x33a   : > { %v10832_v37 = vpop.f32.mrf.mxu1  ;;  %1946 = vmax.xlane.f32.xlu1 %v1945_v52  ;;  %1961 = vmax.xlane.f32.xlu0 %v1960_v42 }
 0x33b   : > { %v13736_v36 = vadd.f32 %v10832_v37, %v1543_v55  ;;  %v1954_v35 = vsel %vm1917_vm1, %v13727_v43, -inf  ;;  %v1546_v55 = vld [vmem:[%s18250_s1 + $0x90] sm:$0xff]  ;;  %v13752_v37 = vpop.permute.xlu0 %2651 }
 0x33c   : > { %v1727_v21 = vpop.f32.mrf.mxu1  ;;  %18479 = vst [vmem:[#allocation49_spill] sm:$0xff] %v13752_v37  ;;  %v1550_v37 = vld [vmem:[%s18250_s1 + $0xb0] sm:$0xff] }
 0x33d   : > { %v13738_v27 = vadd.f32 %v1727_v21, %v1541_v25  ;;  %v1963_v10 = vsel %vm1917_vm1, %v13736_v36, -inf  ;;  %v1544_v21 = vld [vmem:[%s18250_s1 + $0x80] sm:$0xff] }
 0x33e   : > { %1964 = vmax.xlane.f32.xlu1 %v1963_v10  ;;  %1955 = vmax.xlane.f32.xlu0 %v1954_v35  ;;  %v1547_v10 = vld [vmem:[%s18250_s1 + $0x98] sm:$0xff] }
 0x33f   : > { %v1957_v52 = vsel %vm1917_vm1, %v13738_v27, -inf  ;;  %v13766_v12 = vpop.permute.xlu0 %2665 }
 0x340   : > { %18480 = vst [vmem:[#allocation50_spill] sm:$0xff] %v13766_v12 }
 0x342   : > { %1958 = vmax.xlane.f32.xlu1 %v1957_v52 }
 0x390   : > { %v10843_v42 = vpop.f32.mrf.mxu0 }
 0x391   : > { %v13754_v25 = vadd.f32 %v10843_v42, %v1546_v55 }
 0x392   : > { %v1797_v19 = vpop.f32.mrf.mxu0 }
 0x393   : > { %v13759_v35 = vadd.f32 %v1797_v19, %v1544_v21  ;;  %v1972_v52 = vsel %vm1917_vm1, %v13754_v25, -inf }
 0x394   : > { %1973 = vmax.xlane.f32.xlu0 %v1972_v52  ;;  %v10844_v46 = vpop.f32.mrf.mxu0 }
 0x395   : > { %v13768_v55 = vadd.f32 %v10844_v46, %v1547_v10  ;;  %v1966_v52 = vsel %vm1917_vm1, %v13759_v35, -inf  ;;  %v1548_v46 = vld [vmem:[%s18250_s1 + $0xa0] sm:$0xff]  ;;  %v13782_v10 = vpop.permute.xlu0 %2669 }
 0x396   : > { %v1800_v42 = vpop.f32.mrf.mxu0 }
 0x397   : > { %v13773_v19 = vadd.f32 %v1800_v42, %v1545_v47  ;;  %v1975_v21 = vsel %vm1917_vm1, %v13768_v55, -inf  ;;  %v1551_v47 = vld [vmem:[%s18250_s1 + $0xb8] sm:$0xff] }
 0x398   : > { %1976 = vmax.xlane.f32.xlu1 %v1975_v21  ;;  %v10847_v9 = vpop.f32.mrf.mxu0  ;;  %1967 = vmax.xlane.f32.xlu0 %v1966_v52 }
 0x399   : > { %v13784_v12 = vadd.f32 %v10847_v9, %v1550_v37  ;;  %v1969_v21 = vsel %vm1917_vm1, %v13773_v19, -inf  ;;  %v13795_v63 = vpop.permute.xlu0 %2778  ;;  %v1549_v37 = vld [vmem:[%s18250_s1 + $0xa8] sm:$0xff] }
 0x39a   : > { %v1813_v58 = vpop.f32.mrf.mxu0  ;;  %18481 = vst [vmem:[#allocation51_spill] sm:$0xff] %v13795_v63 }
 0x39b   : > { %v13789_v42 = vadd.f32 %v1813_v58, %v1548_v46  ;;  %v1984_v52 = vsel %vm1917_vm1, %v13784_v12, -inf }
 0x39c   : > { %v10848_v16 = vpop.f32.mrf.mxu0  ;;  %1970 = vmax.xlane.f32.xlu1 %v1969_v21  ;;  %1985 = vmax.xlane.f32.xlu0 %v1984_v52  ;;  %v13808_v21 = vpop.permute.xlu1 %2895 }
 0x39d   : > { %v13797_v9 = vadd.f32 %v10848_v16, %v1551_v47  ;;  %v1978_v46 = vsel %vm1917_vm1, %v13789_v42, -inf  ;;  %18482 = vst [vmem:[#allocation52_spill] sm:$0xff] %v13808_v21  ;;  %v1926_v52 = vpop.xlane.xlu0 %1925 }
 0x39e   : > { %v1816_v50 = vpop.f32.mrf.mxu0  ;;  %v2016_v13 = vsub.f32 %v13640_v40, %v1926_v52 }
 0x39f   : > { %v1987_v58 = vsel %vm1917_vm1, %v13797_v9, -inf  ;;  %v13806_v22 = vadd.f32 %v1816_v50, %v1549_v37  ;;  %v1554_v37 = vld [vmem:[%s18250_s1 + $0xd0] sm:$0xff] }
 0x3a0   : > { %1988 = vmax.xlane.f32.xlu1 %v1987_v58  ;;  %1979 = vmax.xlane.f32.xlu0 %v1978_v46  ;;  %v1929_v47 = vpop.xlane.xlu1 %1928  ;;  %v2050_v58 = vmul.f32 1.442695, %v2016_v13 }
 0x3a1   : > { %v1981_v16 = vsel %vm1917_vm1, %v13806_v22, -inf  ;;  %v1920_v63 = vpop.xlane.xlu0 %1919  ;;  %v2017_v23 = vsub.f32 %v13652_v26, %v1929_v47 }
 0x3a2   : > { %v2014_v50 = vsub.f32 %v13645_v48, %v1920_v63  ;;  %v1555_v63 = vld [vmem:[%s18250_s1 + $0xd8] sm:$0xff]  ;;  %11717 = vpow2.f32 %v2050_v58 }
 0x3a3   : > { %v2052_v21 = vmul.f32 1.442695, %v2017_v23 }
 0x3a4   : > { %1982 = vmax.xlane.f32.xlu1 %v1981_v16  ;;  %v1923_v34 = vpop.xlane.xlu1 %1922  ;;  %v1552_v16 = vld [vmem:[%s18250_s1 + $0xc0] sm:$0xff]  ;;  %v2046_v40 = vmul.f32 1.442695, %v2014_v50 }
 0x3a5   : > { %v1938_v44 = vpop.xlane.xlu0 %1937  ;;  %v2015_v26 = vsub.f32 %v13657_v28, %v1923_v34  ;;  %v1553_v34 = vld [vmem:[%s18250_s1 + $0xc8] sm:$0xff]  ;;  %11719 = vpow2.f32 %v2052_v21 }
 0x3a6   : > { %v2020_v13 = vsub.f32 %v13666_v59, %v1938_v44  ;;  %11721 = vpow2.f32 %v2046_v40 }
 0x3a7   : > { %v2048_v58 = vmul.f32 1.442695, %v2015_v26 }
 0x3a8   : > { %v1941_v62 = vpop.xlane.xlu1 %1940 }
 0x3a9   : > { %v1932_v48 = vpop.xlane.xlu0 %1931  ;;  %v2021_v28 = vsub.f32 %v13680_v5, %v1941_v62  ;;  %11723 = vpow2.f32 %v2048_v58 }
 0x3aa   : > { %v2018_v44 = vsub.f32 %v13671_v11, %v1932_v48  ;;  %v1556_v11 = vld [vmem:[%s18250_s1 + $0xe0] sm:$0xff] }
 0x3ab   : > { %v2060_v40 = vmul.f32 1.442695, %v2021_v28 }
 0x3b0   : > { %v10859_v46 = vpop.f32.mrf.mxu1 }
 0x3b1   : > { %v13821_v57 = vadd.f32 %v10859_v46, %v1554_v37  ;;  %v1558_v46 = vld [vmem:[%s18250_s1 + $0xf0] sm:$0xff] }
 0x3b2   : > { %v1886_v52 = vpop.f32.mrf.mxu1 }
 0x3b3   : > { %v13828_v47 = vadd.f32 %v1886_v52, %v1552_v16  ;;  %v1996_v23 = vsel %vm1917_vm1, %v13821_v57, -inf  ;;  %v2058_v16 = vmul.f32 1.442695, %v2020_v13  ;;  %v1935_v52 = vpop.xlane.xlu1 %1934 }
 0x3b4   : > { %1997 = vmax.xlane.f32.xlu0 %v1996_v23  ;;  %v10860_v37 = vpop.f32.mrf.mxu1  ;;  %v2019_v13 = vsub.f32 %v13682_v33, %v1935_v52 }
 0x3b5   : > { %v13836_v50 = vadd.f32 %v10860_v37, %v1555_v63  ;;  %v1990_v62 = vsel %vm1917_vm1, %v13828_v47, -inf  ;;  %v2054_v63 = vmul.f32 1.442695, %v2018_v44  ;;  %v1559_v37 = vld [vmem:[%s18250_s1 + $0xf8] sm:$0xff]  ;;  %11725 = vpow2.f32 %v2058_v16  ;;  %v1557_v44 = vld [vmem:[%s18250_s1 + $0xe8] sm:$0xff] }
 0x3b6   : > { %v1889_v59 = vpop.f32.mrf.mxu1  ;;  %11727 = vpow2.f32 %v2060_v40  ;;  %v2056_v16 = vmul.f32 1.442695, %v2019_v13 }
 0x3b7   : > { %v13842_v23 = vadd.f32 %v1889_v59, %v1553_v34  ;;  %v1999_v21 = vsel %vm1917_vm1, %v13836_v50, -inf  ;;  %11729 = vpow2.f32 %v2054_v63 }
 0x3b8   : > { %2000 = vmax.xlane.f32.xlu1 %v1999_v21  ;;  %1991 = vmax.xlane.f32.xlu0 %v1990_v62  ;;  %v10863_v5 = vpop.f32.mrf.mxu1  ;;  %11731 = vpow2.f32 %v2056_v16 }
 0x3b9   : > { %v13851_v26 = vadd.f32 %v10863_v5, %v1558_v46  ;;  %v1993_v21 = vsel %vm1917_vm1, %v13842_v23, -inf }
 0x3ba   : > { %v1902_v48 = vpop.f32.mrf.mxu1 }
 0x3bb   : > { %v1950_v34 = vpop.xlane.xlu0 %1949  ;;  %v13857_v59 = vadd.f32 %v1902_v48, %v1556_v11  ;;  %v2008_v28 = vsel %vm1917_vm1, %v13851_v26, -inf }
 0x3bc   : > { %v2024_v58 = vsub.f32 %v13696_v15, %v1950_v34  ;;  %1994 = vmax.xlane.f32.xlu1 %v1993_v21  ;;  %2009 = vmax.xlane.f32.xlu0 %v2008_v28  ;;  %v10864_v33 = vpop.f32.mrf.mxu1  ;;  %v13875_v21 = vpop.eup %11717 }
 0x3bd   : > { %v13867_v46 = vadd.f32 %v10864_v33, %v1559_v37  ;;  %v2002_v34 = vsel %vm1917_vm1, %v13857_v59, -inf  ;;  %v13879_v63 = vpop.eup %11719 }
 0x3be   : > { %v1905_v52 = vpop.f32.mrf.mxu1  ;;  %v2066_v62 = vmul.f32 1.442695, %v2024_v58  ;;  %v13881_v28 = vpop.eup %11721 }
 0x3bf   : > { %v1953_v5 = vpop.xlane.xlu1 %1952  ;;  %v1944_v11 = vpop.xlane.xlu0 %1943  ;;  %v13869_v48 = vadd.f32 %v1905_v52, %v1557_v44  ;;  %v2011_v15 = vsel %vm1917_vm1, %v13867_v46, -inf }
 0x3c0   : > { %v2025_v40 = vsub.f32 %v13708_v4, %v1953_v5  ;;  %v2022_v37 = vsub.f32 %v13701_v0, %v1944_v11  ;;  %2012 = vmax.xlane.f32.xlu1 %v2011_v15  ;;  %2003 = vmax.xlane.f32.xlu0 %v2002_v34  ;;  %11733 = vpow2.f32 %v2066_v62  ;;  %v2116_v4 = vsel %vm1917_vm1, %v13875_v21, 0.0  ;;  %v13889_v11 = vpop.eup %11723 }
 0x3c1   : > { %v2005_v52 = vsel %vm1917_vm1, %v13869_v48, -inf }
 0x3c2   : > { %v2068_v13 = vmul.f32 1.442695, %v2025_v40  ;;  %v2062_v58 = vmul.f32 1.442695, %v2022_v37  ;;  %v2119_v40 = vsel %vm1917_vm1, %v13879_v63, 0.0  ;;  %v2110_v37 = vsel %vm1917_vm1, %v13881_v28, 0.0  ;;  %v13895_v8 = vpop.eup %11725 }
 0x3c3   : > { %v1947_v33 = vpop.xlane.xlu1 %1946  ;;  %v1962_v44 = vpop.xlane.xlu0 %1961 }
 0x3c4   : > { %v2023_v0 = vsub.f32 %v13713_v41, %v1947_v33  ;;  %v2028_v5 = vsub.f32 %v13722_v56, %v1962_v44  ;;  %2006 = vmax.xlane.f32.xlu1 %v2005_v52  ;;  %2117 = vadd.xlane.f32.xlu0 %v2116_v4  ;;  %11735 = vpow2.f32 %v2068_v13  ;;  %v13899_v13 = vpop.eup %11727  ;;  %v2113_v4 = vsel %vm1917_vm1, %v13889_v11, 0.0 }
 0x3c5   : > { %11737 = vpow2.f32 %v2062_v58  ;;  %v13901_v33 = vpop.eup %11729 }
 0x3c6   : > { %v2064_v16 = vmul.f32 1.442695, %v2023_v0  ;;  %v2074_v62 = vmul.f32 1.442695, %v2028_v5  ;;  %v2128_v0 = vsel %vm1917_vm1, %v13895_v8, 0.0 }
 0x3c7   : > { %v1965_v15 = vpop.xlane.xlu1 %1964  ;;  %v1956_v34 = vpop.xlane.xlu0 %1955 }
 0x3c8   : > { %v2029_v41 = vsub.f32 %v13736_v36, %v1965_v15  ;;  %v2026_v56 = vsub.f32 %v13727_v43, %v1956_v34  ;;  %2120 = vadd.xlane.f32.xlu1 %v2119_v40  ;;  %2111 = vadd.xlane.f32.xlu0 %v2110_v37  ;;  %11739 = vpow2.f32 %v2064_v16  ;;  %v13908_v43 = vpop.eup %11731  ;;  %v2131_v16 = vsel %vm1917_vm1, %v13899_v13, 0.0 }
 0x3c9   : > { %11741 = vpow2.f32 %v2074_v62  ;;  %v2122_v62 = vsel %vm1917_vm1, %v13901_v33, 0.0 }
 0x3ca   : > { %v2076_v58 = vmul.f32 1.442695, %v2029_v41  ;;  %v2070_v44 = vmul.f32 1.442695, %v2026_v56 }
 0x3cb   : > { %v1959_v52 = vpop.xlane.xlu1 %1958 }
 0x3cc   : > { %v2027_v36 = vsub.f32 %v13738_v27, %v1959_v52  ;;  %2114 = vadd.xlane.f32.xlu1 %v2113_v4  ;;  %2129 = vadd.xlane.f32.xlu0 %v2128_v0  ;;  %11743 = vpow2.f32 %v2076_v58  ;;  %v2125_v27 = vsel %vm1917_vm1, %v13908_v43, 0.0 }
 0x3cd   : > { %11745 = vpow2.f32 %v2070_v44  ;;  %v13914_v15 = vpop.eup %11733 }
 0x3ce   : > { %v2072_v5 = vmul.f32 1.442695, %v2027_v36  ;;  %v2140_v40 = vsel %vm1917_vm1, %v13914_v15, 0.0 }
 0x3d0   : > { %2132 = vadd.xlane.f32.xlu1 %v2131_v16  ;;  %2123 = vadd.xlane.f32.xlu0 %v2122_v62  ;;  %11747 = vpow2.f32 %v2072_v5 }
 0x3d1   : > { %v13916_v34 = vpop.eup %11735 }
 0x3d2   : > { %v13922_v37 = vpop.eup %11737  ;;  %v2143_v56 = vsel %vm1917_vm1, %v13916_v34, 0.0 }
 0x3d3   : > { %v2134_v58 = vsel %vm1917_vm1, %v13922_v37, 0.0 }
 0x3d4   : > { %2126 = vadd.xlane.f32.xlu1 %v2125_v27  ;;  %2141 = vadd.xlane.f32.xlu0 %v2140_v40 }
 0x3d5   : > { %v13924_v41 = vpop.eup %11739 }
 0x3d6   : > { %v13930_v44 = vpop.eup %11741  ;;  %v2137_v4 = vsel %vm1917_vm1, %v13924_v41, 0.0 }
 0x3d7   : > { %v2152_v0 = vsel %vm1917_vm1, %v13930_v44, 0.0 }
 0x3d8   : > { %2144 = vadd.xlane.f32.xlu1 %v2143_v56  ;;  %2135 = vadd.xlane.f32.xlu0 %v2134_v58 }
 0x3d9   : > { %v13932_v52 = vpop.eup %11743 }
 0x3da   : > { %v13938_v36 = vpop.eup %11745  ;;  %v2155_v5 = vsel %vm1917_vm1, %v13932_v52, 0.0 }
 0x3db   : > { %v2146_v16 = vsel %vm1917_vm1, %v13938_v36, 0.0 }
 0x3dc   : > { %2138 = vadd.xlane.f32.xlu1 %v2137_v4  ;;  %2153 = vadd.xlane.f32.xlu0 %v2152_v0 }
 0x3dd   : > { %v13944_v62 = vpop.eup %11747 }
 0x3de   : > { %v2149_v27 = vsel %vm1917_vm1, %v13944_v62, 0.0 }
 0x3e0   : > { %2156 = vadd.xlane.f32.xlu1 %v2155_v5  ;;  %2147 = vadd.xlane.f32.xlu0 %v2146_v16 }
 0x3e4   : > { %2150 = vadd.xlane.f32.xlu1 %v2149_v27 }
 0x41d   : > { %v1974_v40 = vpop.xlane.xlu0 %1973 }
 0x41e   : > { %v2032_v56 = vsub.f32 %v13754_v25, %v1974_v40 }
 0x420   : > { %v2082_v58 = vmul.f32 1.442695, %v2032_v56 }
 0x421   : > { %v1977_v4 = vpop.xlane.xlu1 %1976  ;;  %v1968_v0 = vpop.xlane.xlu0 %1967 }
 0x422   : > { %11749 = vpow2.f32 %v2082_v58  ;;  %v2033_v54 = vsub.f32 %v13768_v55, %v1977_v4  ;;  %v2030_v18 = vsub.f32 %v13759_v35, %v1968_v0 }
 0x424   : > { %v2084_v38 = vmul.f32 1.442695, %v2033_v54  ;;  %v2078_v53 = vmul.f32 1.442695, %v2030_v18 }
 0x425   : > { %v1971_v20 = vpop.xlane.xlu1 %1970  ;;  %v1986_v5 = vpop.xlane.xlu0 %1985 }
 0x426   : > { %11751 = vpow2.f32 %v2084_v38  ;;  %v2031_v16 = vsub.f32 %v13773_v19, %v1971_v20  ;;  %v2036_v27 = vsub.f32 %v13784_v12, %v1986_v5 }
 0x427   : > { %11753 = vpow2.f32 %v2078_v53 }
 0x428   : > { %v2080_v3 = vmul.f32 1.442695, %v2031_v16  ;;  %v2090_v25 = vmul.f32 1.442695, %v2036_v27 }
 0x429   : > { %v1989_v40 = vpop.xlane.xlu1 %1988  ;;  %v1980_v56 = vpop.xlane.xlu0 %1979 }
 0x42a   : > { %11755 = vpow2.f32 %v2080_v3  ;;  %v2037_v58 = vsub.f32 %v13797_v9, %v1989_v40  ;;  %v2034_v55 = vsub.f32 %v13789_v42, %v1980_v56 }
 0x42b   : > { %11757 = vpow2.f32 %v2090_v25 }
 0x42c   : > { %v2092_v54 = vmul.f32 1.442695, %v2037_v58  ;;  %v2086_v18 = vmul.f32 1.442695, %v2034_v55 }
 0x42d   : > { %v1983_v35 = vpop.xlane.xlu1 %1982 }
 0x42e   : > { %11759 = vpow2.f32 %v2092_v54  ;;  %v2035_v38 = vsub.f32 %v13806_v22, %v1983_v35 }
 0x42f   : > { %v13956_v20 = vpop.eup %11749  ;;  %11761 = vpow2.f32 %v2086_v18 }
 0x430   : > { %v2088_v53 = vmul.f32 1.442695, %v2035_v38  ;;  %v2164_v12 = vsel %vm1917_vm1, %v13956_v20, 0.0 }
 0x431   : > { %2165 = vadd.xlane.f32.xlu0 %v2164_v12 }
 0x432   : > { %11763 = vpow2.f32 %v2088_v53 }
 0x433   : > { %v13960_v3 = vpop.eup %11751 }
 0x434   : > { %v13962_v19 = vpop.eup %11753  ;;  %v2167_v42 = vsel %vm1917_vm1, %v13960_v3, 0.0 }
 0x435   : > { %2168 = vadd.xlane.f32.xlu1 %v2167_v42  ;;  %v2158_v22 = vsel %vm1917_vm1, %v13962_v19, 0.0 }
 0x436   : > { %2159 = vadd.xlane.f32.xlu0 %v2158_v22 }
 0x437   : > { %v13968_v9 = vpop.eup %11755 }
 0x438   : > { %v13970_v4 = vpop.eup %11757  ;;  %v2161_v0 = vsel %vm1917_vm1, %v13968_v9, 0.0 }
 0x439   : > { %18483 = vst [vmem:[#allocation53_spill] sm:$0xff] %v13970_v4  ;;  %2162 = vadd.xlane.f32.xlu1 %v2161_v0  ;;  %v2176_v5 = vsel %vm1917_vm1, %v13970_v4, 0.0 }
 0x43a   : > { %2177 = vadd.xlane.f32.xlu0 %v2176_v5 }
 0x43b   : > { %v13976_v16 = vpop.eup %11759 }
 0x43c   : > { %v13978_v27 = vpop.eup %11761  ;;  %v2179_v25 = vsel %vm1917_vm1, %v13976_v16, 0.0 }
 0x43d   : > { %2180 = vadd.xlane.f32.xlu1 %v2179_v25  ;;  %v2170_v40 = vsel %vm1917_vm1, %v13978_v27, 0.0  ;;  %v1998_v56 = vpop.xlane.xlu0 %1997 }
 0x43e   : > { %2171 = vadd.xlane.f32.xlu0 %v2170_v40  ;;  %v2040_v58 = vsub.f32 %v13821_v57, %v1998_v56 }
 0x43f   : > { %v13985_v55 = vpop.eup %11763 }
 0x440   : > { %18484 = vst [vmem:[#allocation54_spill] sm:$0xff] %v13985_v55  ;;  %v2098_v54 = vmul.f32 1.442695, %v2040_v58  ;;  %v2173_v18 = vsel %vm1917_vm1, %v13985_v55, 0.0  ;;  %v1402_v55 = vadd.f32 %v13285_v45, %v13255_v51 }
 0x441   : > { %v2001_v35 = vpop.xlane.xlu1 %2000  ;;  %2174 = vadd.xlane.f32.xlu1 %v2173_v18  ;;  %v1992_v38 = vpop.xlane.xlu0 %1991 }
 0x442   : > { %11765 = vpow2.f32 %v2098_v54  ;;  %v2041_v53 = vsub.f32 %v13836_v50, %v2001_v35  ;;  %v2038_v12 = vsub.f32 %v13828_v47, %v1992_v38 }
 0x444   : > { %v2100_v42 = vmul.f32 1.442695, %v2041_v53  ;;  %v2094_v22 = vmul.f32 1.442695, %v2038_v12 }
 0x445   : > { %v1995_v0 = vpop.xlane.xlu1 %1994  ;;  %v13991_v5 = vpop.xlane.xlu0 %2009 }
 0x446   : > { %11767 = vpow2.f32 %v2100_v42  ;;  %v2039_v57 = vsub.f32 %v13842_v23, %v1995_v0 }
 0x447   : > { %11769 = vpow2.f32 %v2094_v22 }
 0x448   : > { %v2096_v25 = vmul.f32 1.442695, %v2039_v57 }
 0x449   : > { %v13994_v40 = vpop.xlane.xlu1 %2012  ;;  %v13996_v56 = vpop.xlane.xlu0 %2003 }
 0x44a   : > { %11771 = vpow2.f32 %v2096_v25 }
 0x44d   : > { %v13998_v58 = vpop.xlane.xlu1 %2006  ;;  %v2118_v50 = vpop.xlane.xlu0 %2117 }
 0x44f   : > { %v14000_v54 = vpop.eup %11765 }
 0x450   : > { %18485 = vst [vmem:[#allocation55_spill] sm:$0xff] %v14000_v54  ;;  %v2188_v47 = vsel %vm1917_vm1, %v14000_v54, 0.0 }
 0x451   : > { %v2121_v18 = vpop.xlane.xlu1 %2120  ;;  %2189 = vadd.xlane.f32.xlu0 %v2188_v47  ;;  %v2112_v35 = vpop.xlane.xlu0 %2111 }
 0x452   : > { %11773 = vrcp.f32 %v2121_v18 }
 0x453   : > { %v14004_v38 = vpop.eup %11767  ;;  %11775 = vrcp.f32 %v2112_v35 }
 0x454   : > { %18486 = vst [vmem:[#allocation56_spill] sm:$0xff] %v14004_v38  ;;  %v14006_v23 = vpop.eup %11769  ;;  %v2191_v53 = vsel %vm1917_vm1, %v14004_v38, 0.0  ;;  %11777 = vrcp.f32 %v2118_v50 }
 0x455   : > { %18487 = vst [vmem:[#allocation57_spill] sm:$0xff] %v14006_v23  ;;  %2192 = vadd.xlane.f32.xlu1 %v2191_v53  ;;  %v2115_v12 = vpop.xlane.xlu1 %2114  ;;  %v2182_v42 = vsel %vm1917_vm1, %v14006_v23, 0.0  ;;  %v2130_v22 = vpop.xlane.xlu0 %2129 }
 0x456   : > { %11779 = vrcp.f32 %v2115_v12  ;;  %2183 = vadd.xlane.f32.xlu0 %v2182_v42 }
 0x457   : > { %v14012_v0 = vpop.eup %11771 }
 0x458   : > { %18488 = vst [vmem:[#allocation58_spill] sm:$0xff] %v14012_v0  ;;  %v2185_v57 = vsel %vm1917_vm1, %v14012_v0, 0.0 }
 0x459   : > { %2186 = vadd.xlane.f32.xlu1 %v2185_v57  ;;  %v2133_v25 = vpop.xlane.xlu1 %2132  ;;  %v2124_v47 = vpop.xlane.xlu0 %2123 }
 0x45a   : > { %11781 = vrcp.f32 %v2133_v25 }
 0x45b   : > { %11783 = vrcp.f32 %v2124_v47 }
 0x45c   : > { %11785 = vrcp.f32 %v2130_v22  ;;  %v1405_v22 = vadd.f32 %v13295_v31, %v13255_v51 }
 0x45d   : > { %v2127_v50 = vpop.xlane.xlu1 %2126  ;;  %v2142_v18 = vpop.xlane.xlu0 %2141 }
 0x45e   : > { %11787 = vrcp.f32 %v2127_v50 }
 0x45f   : > { %v11774_v35 = vpop.eup %11773 }
 0x460   : > { %v11776_v53 = vpop.eup %11775  ;;  %v2241_v38 = vmul.f32 %v11774_v35, %v13879_v63 }
 0x461   : > { %v2145_v54 = vpop.xlane.xlu1 %2144  ;;  %v2136_v23 = vpop.xlane.xlu0 %2135  ;;  %v2238_v57 = vmul.f32 %v11776_v53, %v13881_v28 }
 0x462   : > { %v11778_v12 = vpop.eup %11777  ;;  %11789 = vrcp.f32 %v2145_v54 }
 0x463   : > { %v11780_v42 = vpop.eup %11779  ;;  %11791 = vrcp.f32 %v2136_v23  ;;  %v2240_v25 = vmul.f32 %v11778_v12, %v13875_v21  ;;  %v14025_v23 = vpack.c.bf16 %v1405_v22, %v1402_v55 }
 0x464   : > { %v2239_v0 = vmul.f32 %v11780_v42, %v13889_v11  ;;  %11793 = vrcp.f32 %v2142_v18 }
 0x465   : > { %v2139_v47 = vpop.xlane.xlu1 %2138  ;;  %v2154_v50 = vpop.xlane.xlu0 %2153  ;;  %v2271_v63 = vpack.c.bf16 %v2241_v38, %v2240_v25  ;;  %18489 = vst [vmem:[#allocation59_spill] sm:$0xff] %v14025_v23  ;;  %v1389_v38 = vadd.f32 %v13273_v32, %v13255_v51 }
 0x466   : > { %11795 = vrcp.f32 %v2139_v47  ;;  %v2270_v4 = vpack.c.bf16 %v2239_v0, %v2238_v57  ;;  %v1437_v47 = vadd.f32 %v13473_v39, %v13255_v51 }
 0x467   : > { %v11782_v54 = vpop.eup %11781 }
 0x468   : > { %10873 = vmatprep.mubr.msk.bf16.mxu0 %vm1917_vm1, %v2270_v4  ;;  %v11784_v28 = vpop.eup %11783  ;;  %v2245_v45 = vmul.f32 %v11782_v54, %v13899_v13  ;;  %v1386_v13 = vadd.f32 %v13250_v24, %v13255_v51 }
 0x469   : > { %v2157_v11 = vpop.xlane.xlu1 %2156  ;;  %10874 = vmatmul.mubr.msk.bf16.vlgmr.msra.gmra.mxu0 %vm1917_vm1, %v2271_v63  ;;  %v2148_v31 = vpop.xlane.xlu0 %2147  ;;  %v2242_v4 = vmul.f32 %v11784_v28, %v13901_v33 }
 0x46a   : > { %v11786_v21 = vpop.eup %11785  ;;  %10882 = vmatpush3.bf16.msra.mxu0 %v13558_v29  ;;  %2657 = vrot.lane.b32.xlu1 %v13343_v6, %s12590_s25  ;;  %11797 = vrcp.f32 %v2157_v11  ;;  %v14045_v42 = vpack.c.bf16 %v1389_v38, %v1386_v13  ;;  %v18496_v13 = vld [vmem:[#allocation23_spill] sm:$0xff] }
 0x46b   : > { %v11788_v0 = vpop.eup %11787  ;;  %10883 = vmatprep.subr.bf16.mxu0 %v14025_v23  ;;  %11799 = vrcp.f32 %v2148_v31  ;;  %v2244_v35 = vmul.f32 %v11786_v21, %v13895_v8  ;;  %v2044_v8 = vsub.f32 %v13851_v26, %v13991_v5  ;;  %v2043_v5 = vsub.f32 %v13869_v48, %v13998_v58 }
 0x46c   : > { %2655 = vrot.lane.b32.xlu0 %v13313_v17, %s12590_s25  ;;  %v2243_v55 = vmul.f32 %v11788_v0, %v13908_v43  ;;  %11801 = vrcp.f32 %v2154_v50  ;;  %18490 = vst [vmem:[#allocation60_spill] sm:$0xff] %v14045_v42  ;;  %v2042_v50 = vsub.f32 %v13857_v59, %v13996_v56 }
 0x46d   : > { %v2151_v18 = vpop.xlane.xlu1 %2150  ;;  %v2273_v12 = vpack.c.bf16 %v2245_v45, %v2244_v35  ;;  %v2106_v26 = vmul.f32 1.442695, %v2044_v8  ;;  %v2104_v58 = vmul.f32 1.442695, %v2043_v5  ;;  %v1418_v45 = vadd.f32 %v13301_v7, %v13255_v51  ;;  %v18494_v35 = vld [vmem:[#allocation16_spill] sm:$0xff]  ;;  %v18501_v8 = vld [vmem:[#allocation26_spill] sm:$0xff] }
 0x46e   : > { %11803 = vrcp.f32 %v2151_v18  ;;  %10884 = vmatpush3.bf16.msra.mxu0 %v14025_v23  ;;  %v2272_v53 = vpack.c.bf16 %v2243_v55, %v2242_v4  ;;  %v2102_v56 = vmul.f32 1.442695, %v2042_v50  ;;  %v18493_v18 = vld [vmem:[#allocation17_spill] sm:$0xff] }
 0x46f   : > { %10885 = vmatprep.subr.bf16.mxu0 %v13265_v1  ;;  %v11790_v33 = vpop.eup %11789  ;;  %11805 = vpow2.f32 %v2106_v26  ;;  %v18506_v26 = vld [vmem:[#allocation32_spill] sm:$0xff] }
 0x470   : > { %10877 = vmatprep.mubr.msk.bf16.mxu0 %vm1917_vm1, %v2272_v53  ;;  %v11792_v43 = vpop.eup %11791  ;;  %v2249_v24 = vmul.f32 %v11790_v33, %v13916_v34  ;;  %11807 = vpow2.f32 %v2102_v56  ;;  %v18495_v53 = vld [vmem:[#allocation27_spill] sm:$0xff]  ;;  %v18498_v33 = vld [vmem:[#allocation18_spill] sm:$0xff]  ;;  %v18510_v56 = vld [vmem:[#allocation40_spill] sm:$0xff] }
 0x471   : > { %10878 = vmatmul.mubr.msk.bf16.gmra.mxu0 %vm1917_vm1, %v2273_v12  ;;  %v11794_v32 = vpop.eup %11793  ;;  %v2246_v22 = vmul.f32 %v11792_v43, %v13922_v37  ;;  %v1434_v37 = vadd.f32 %v13404_v61, %v13255_v51  ;;  %11809 = vpow2.f32 %v2104_v58  ;;  %v18497_v12 = vld [vmem:[#allocation19_spill] sm:$0xff]  ;;  %v18499_v43 = vld [vmem:[#allocation29_spill] sm:$0xff]  ;;  %v18511_v58 = vld [vmem:[#allocation30_spill] sm:$0xff] }
 0x472   : > { %10886 = vmatpush3.bf16.msra.mxu0 %v13265_v1  ;;  %v2248_v63 = vmul.f32 %v11794_v32, %v13914_v15  ;;  %v2045_v15 = vsub.f32 %v13867_v46, %v13994_v40  ;;  %v1421_v46 = vadd.f32 %v13400_v60, %v13255_v51  ;;  %v18500_v32 = vld [vmem:[#allocation24_spill] sm:$0xff] }
 0x473   : > { %v11796_v57 = vpop.eup %11795  ;;  %10887 = vmatprep.subr.bf16.mxu0 %v14045_v42  ;;  %v14067_v59 = vpack.c.bf16 %v1437_v47, %v1434_v37  ;;  %v18507_v37 = vld [vmem:[#allocation39_spill] sm:$0xff] }
 0x474   : > { %v2247_v25 = vmul.f32 %v11796_v57, %v13924_v41  ;;  %v2275_v41 = vpack.c.bf16 %v2249_v24, %v2248_v63  ;;  %v2108_v40 = vmul.f32 1.442695, %v2045_v15  ;;  %v18502_v57 = vld [vmem:[#allocation14_spill] sm:$0xff]  ;;  %v18505_v63 = vld [vmem:[#allocation36_spill] sm:$0xff]  ;;  %v18509_v15 = vld [vmem:[#allocation45_spill] sm:$0xff] }
 0x475   : > { %18491 = vst [vmem:[#allocation61_spill] sm:$0xff] %v14067_v59 }
 0x476   : > { %10888 = vmatpush3.bf16.msra.mxu0 %v14045_v42  ;;  %v2274_v34 = vpack.c.bf16 %v2247_v25, %v2246_v22  ;;  %11811 = vpow2.f32 %v2108_v40  ;;  %v18503_v22 = vld [vmem:[#allocation28_spill] sm:$0xff]  ;;  %v18504_v25 = vld [vmem:[#allocation33_spill] sm:$0xff] }
 0x477   : > { %10897 = vmatprep.subr.bf16.mxu0 %v13412_v2  ;;  %v11798_v54 = vpop.eup %11797 }
 0x478   : > { %10889 = vmatprep.mubr.msk.bf16.mxu0 %vm1917_vm1, %v2274_v34  ;;  %v11800_v39 = vpop.eup %11799  ;;  %v2253_v28 = vmul.f32 %v11798_v54, %v13932_v52 }
 0x479   : > { %10890 = vmatmul.mubr.msk.bf16.vlgmr.msra.gmra.mxu0 %vm1917_vm1, %v2275_v41  ;;  %v11802_v48 = vpop.eup %11801  ;;  %v2250_v11 = vmul.f32 %v11800_v39, %v13938_v36  ;;  %v14085_v36 = vpack.c.bf16 %v1421_v46, %v1418_v45  ;;  %v18508_v41 = vld [vmem:[#allocation22_spill] sm:$0xff] }
 0x47a   : > { %10898 = vmatpush3.bf16.msra.mxu0 %v13412_v2  ;;  %v2252_v21 = vmul.f32 %v11802_v48, %v13930_v44 }
 0x47b   : > { %v11804_v61 = vpop.eup %11803  ;;  %10899 = vmatprep.subr.bf16.mxu0 %v14067_v59  ;;  %18492 = vst [vmem:[#allocation62_spill] sm:$0xff] %v14085_v36 }
 0x47c   : > { %v2251_v31 = vmul.f32 %v11804_v61, %v13944_v62  ;;  %v2277_v52 = vpack.c.bf16 %v2253_v28, %v2252_v21  ;;  %v14091_v60 = vpop.eup %11805  ;;  %v18512_v28 = vld [vmem:[#allocation25_spill] sm:$0xff]  ;;  %v18513_v21 = vld [vmem:[#allocation31_spill] sm:$0xff] }
 0x47d   : > { %v14095_v51 = vpop.eup %11807  ;;  %v2200_v7 = vsel %vm1917_vm1, %v14091_v60, 0.0 }
 0x47e   : > { %10900 = vmatpush3.bf16.msra.mxu0 %v14067_v59  ;;  %v2276_v0 = vpack.c.bf16 %v2251_v31, %v2250_v11  ;;  %v14099_v44 = vpop.eup %11809  ;;  %v2194_v62 = vsel %vm1917_vm1, %v14095_v51, 0.0 }
 0x47f   : > { %10901 = vmatprep.subr.bf16.mxu0 %v13315_v49  ;;  %v2197_v55 = vsel %vm1917_vm1, %v14099_v44, 0.0 }
 0x480   : > { %10893 = vmatprep.mubr.msk.bf16.mxu0 %vm1917_vm1, %v2276_v0 }
 0x481   : > { %10894 = vmatmul.mubr.msk.bf16.gmra.mxu0 %vm1917_vm1, %v2277_v52 }
 0x482   : > { %10902 = vmatpush3.bf16.msra.mxu0 %v13315_v49 }
 0x483   : > { %10903 = vmatprep.subr.bf16.mxu0 %v14085_v36  ;;  %v14103_v4 = vpop.eup %11811 }
 0x484   : > { %v2203_v38 = vsel %vm1917_vm1, %v14103_v4, 0.0 }
 0x486   : > { %10904 = vmatpush3.bf16.msra.mxu0 %v14085_v36 }
 0x487   : > { %11473 = vmatprep.subr.msk.bf16.mxu0 %vm1560_vm0, %v13782_v10 }
 0x48b   : > { %2201 = vadd.xlane.f32.xlu0 %v2200_v7 }
 0x48e   : > { %2195 = vadd.xlane.f32.xlu1 %v2194_v62 }
 0x48f   : > { %2198 = vadd.xlane.f32.xlu0 %v2197_v55 }
 0x492   : > { %2204 = vadd.xlane.f32.xlu1 %v2203_v38  ;;  %v18514_v38 = vld [vmem:[#allocation34_spill] sm:$0xff] }
 0x4a3   : > { %2893 = vrot.lane.b32.xlu1 %v13420_v30, %s12590_s25 }
 0x4a5   : > { %2776 = vrot.lane.b32.xlu0 %v13361_v14, %s12590_s25 }
 0x4a7   : > { %2766 = vrot.lane.b32.xlu1 %v18493_v18, %s12590_s25 }
 0x4a9   : > { %2764 = vrot.lane.b32.xlu0 %v18494_v35, %s12590_s25 }
 0x4ab   : > { %3008 = vrot.lane.b32.xlu1 %v18495_v53, %s12590_s25 }
 0x4ad   : > { %2891 = vrot.lane.b32.xlu0 %v18496_v13, %s12590_s25 }
 0x4af   : > { %2770 = vrot.lane.b32.xlu1 %v18497_v12, %s12590_s25 }
 0x4b1   : > { %2768 = vrot.lane.b32.xlu0 %v18498_v33, %s12590_s25 }
 0x4b3   : > { %3006 = vrot.lane.b32.xlu1 %v18499_v43, %s12590_s25 }
 0x4b5   : > { %2889 = vrot.lane.b32.xlu0 %v18500_v32, %s12590_s25 }
 0x4b7   : > { %2879 = vrot.lane.b32.xlu1 %v18501_v8, %s12590_s25 }
 0x4b9   : > { %2877 = vrot.lane.b32.xlu0 %v18502_v57, %s12590_s25 }
 0x4ba   : > { %v2166_v24 = vpop.xlane.xlu0 %2165 }
 0x4bb   : > { %2881 = vrot.lane.b32.xlu1 %v18503_v22, %s12590_s25 }
 0x4bd   : > { %3004 = vrot.lane.b32.xlu0 %v18504_v25, %s12590_s25 }
 0x4be   : > { %v2169_v47 = vpop.xlane.xlu1 %2168 }
 0x4bf   : > { %v2160_v50 = vpop.xlane.xlu0 %2159  ;;  %3002 = vrot.lane.b32.xlu1 %v18505_v63, %s12590_s25  ;;  %11813 = vrcp.f32 %v2169_v47 }
 0x4c0   : > { %11815 = vrcp.f32 %v2160_v50 }
 0x4c1   : > { %2883 = vrot.lane.b32.xlu0 %v18506_v26, %s12590_s25  ;;  %11817 = vrcp.f32 %v2166_v24  ;;  %v18515_v24 = vld [vmem:[#allocation44_spill] sm:$0xff] }
 0x4c2   : > { %v2163_v5 = vpop.xlane.xlu1 %2162 }
 0x4c3   : > { %11819 = vrcp.f32 %v2163_v5  ;;  %v2178_v34 = vpop.xlane.xlu0 %2177  ;;  %2992 = vrot.lane.b32.xlu1 %v18507_v37, %s12590_s25  ;;  %v18516_v5 = vld [vmem:[#allocation54_spill] sm:$0xff] }
 0x4c5   : > { %2990 = vrot.lane.b32.xlu0 %v18508_v41, %s12590_s25 }
 0x4c6   : > { %v2181_v54 = vpop.xlane.xlu1 %2180 }
 0x4c7   : > { %v2172_v39 = vpop.xlane.xlu0 %2171  ;;  %2996 = vrot.lane.b32.xlu1 %v18509_v15, %s12590_s25  ;;  %11821 = vrcp.f32 %v2181_v54 }
 0x4c8   : > { %11823 = vrcp.f32 %v2172_v39 }
 0x4c9   : > { %2994 = vrot.lane.b32.xlu0 %v18510_v56, %s12590_s25  ;;  %11825 = vrcp.f32 %v2178_v34 }
 0x4ca   : > { %v2175_v48 = vpop.xlane.xlu1 %2174 }
 0x4cb   : > { %11827 = vrcp.f32 %v2175_v48  ;;  %3475 = vrot.lane.b32.xlu1 %v18511_v58, %s12590_s25 }
 0x4cc   : > { %v11814_v61 = vpop.eup %11813 }
 0x4cd   : > { %3477 = vrot.lane.b32.xlu0 %v18512_v28, %s12590_s25  ;;  %v11816_v11 = vpop.eup %11815  ;;  %v2257_v40 = vmul.f32 %v11814_v61, %v13960_v3 }
 0x4ce   : > { %v11818_v31 = vpop.eup %11817  ;;  %v2254_v0 = vmul.f32 %v11816_v11, %v13962_v19  ;;  %v2693_v19 = vsel %vm1560_vm0, %v13782_v10, 0  ;;  %v18517_v10 = vld [vmem:[#allocation53_spill] sm:$0xff] }
 0x4cf   : > { %3570 = vrot.lane.b32.xlu1 %v13558_v29, %s12590_s25  ;;  %v2256_v52 = vmul.f32 %v11818_v31, %v13956_v20  ;;  %v18518_v31 = vld [vmem:[#allocation49_spill] sm:$0xff] }
 0x4d0   : > { %v11820_v46 = vpop.eup %11819 }
 0x4d1   : > { %3473 = vrot.lane.b32.xlu0 %v18513_v21, %s12590_s25  ;;  %v2255_v45 = vmul.f32 %v11820_v46, %v13968_v9  ;;  %v2279_v62 = vpack.c.bf16 %v2257_v40, %v2256_v52  ;;  %v18519_v46 = vld [vmem:[#allocation50_spill] sm:$0xff]  ;;  %v9834_v21 = vld [vmem:[%s18250_s1 + $0x1a8] sm:$0xff] }
 0x4d3   : > { %3568 = vrot.lane.b32.xlu1 %v14025_v23, %s12590_s25  ;;  %v2278_v7 = vpack.c.bf16 %v2255_v45, %v2254_v0  ;;  %v2687_v0 = vsel %vm1560_vm0, %v18519_v46, 0  ;;  %v18520_v45 = vld [vmem:[#allocation38_spill] sm:$0xff] }
 0x4d4   : > { %v11822_v55 = vpop.eup %11821 }
 0x4d5   : > { %3471 = vrot.lane.b32.xlu0 %v18514_v38, %s12590_s25  ;;  %10905 = vmatprep.mubr.msk.bf16.mxu0 %vm1917_vm1, %v2278_v7  ;;  %v11824_v3 = vpop.eup %11823  ;;  %v2261_v47 = vmul.f32 %v11822_v55, %v13976_v16 }
 0x4d6   : > { %10906 = vmatmul.mubr.msk.bf16.vlgmr.msra.gmra.mxu0 %vm1917_vm1, %v2279_v62  ;;  %v11826_v9 = vpop.eup %11825  ;;  %v2258_v50 = vmul.f32 %v11824_v3, %v13978_v27  ;;  %v2690_v27 = vsel %vm1560_vm0, %v18515_v24, 0  ;;  %v2684_v62 = vsel %vm1560_vm0, %v18520_v45, 0 }
 0x4d7   : > { %10930 = vmatpush3.bf16.xpose.msra.mxu0 %v2693_v19  ;;  %3564 = vrot.lane.b32.xlu1 %v14045_v42, %s12590_s25  ;;  %v2260_v39 = vmul.f32 %v11826_v9, %v18517_v10  ;;  %v18521_v19 = vld [vmem:[#allocation56_spill] sm:$0xff] }
 0x4d8   : > { %v11828_v20 = vpop.eup %11827  ;;  %11474 = vmatprep.subr.msk.bf16.mxu0 %vm1560_vm0, %v18515_v24  ;;  %v18523_v24 = vld [vmem:[#allocation57_spill] sm:$0xff] }
 0x4d9   : > { %3566 = vrot.lane.b32.xlu0 %v13265_v1, %s12590_s25  ;;  %v2259_v34 = vmul.f32 %v11828_v20, %v18516_v5  ;;  %v2281_v61 = vpack.c.bf16 %v2261_v47, %v2260_v39  ;;  %v18522_v20 = vld [vmem:[#allocation52_spill] sm:$0xff]  ;;  %v9836_v1 = vld [vmem:[%s18250_s1 + $0x1b8] sm:$0xff] }
 0x4da   : > { %v2190_v54 = vpop.xlane.xlu0 %2189 }
 0x4db   : > { %3661 = vrot.lane.b32.xlu1 %v14067_v59, %s12590_s25  ;;  %v2280_v48 = vpack.c.bf16 %v2259_v34, %v2258_v50  ;;  %v18524_v50 = vld [vmem:[#allocation58_spill] sm:$0xff]  ;;  %v18525_v34 = vld [vmem:[#allocation55_spill] sm:$0xff] }
 0x4dd   : > { %3663 = vrot.lane.b32.xlu0 %v13412_v2, %s12590_s25  ;;  %10909 = vmatprep.mubr.msk.bf16.mxu0 %vm1917_vm1, %v2280_v48  ;;  %v9825_v2 = vld [vmem:[%s18250_s1 + $0x160] sm:$0xff] }
 0x4de   : > { %v2193_v16 = vpop.xlane.xlu1 %2192  ;;  %10910 = vmatmul.mubr.msk.bf16.gmra.mxu0 %vm1917_vm1, %v2281_v61  ;;  %v18526_v61 = vld [vmem:[#allocation42_spill] sm:$0xff] }
 0x4df   : > { %10932 = vmatpush3.bf16.xpose.msra.mxu0 %v2690_v27  ;;  %v2184_v11 = vpop.xlane.xlu0 %2183  ;;  %10937 = vmatprep.mubr.msk.bf16.mxu0 %vm1560_vm0, %v18518_v31  ;;  %11829 = vrcp.f32 %v2193_v16  ;;  %v18527_v16 = vld [vmem:[#allocation48_spill] sm:$0xff]  ;;  %v18528_v31 = vld [vmem:[#allocation47_spill] sm:$0xff] }
 0x4e0   : > { %11475 = vmatprep.subr.msk.bf16.mxu0 %vm1560_vm0, %v18519_v46  ;;  %11831 = vrcp.f32 %v2184_v11  ;;  %v2806_v27 = vsel %vm1560_vm0, %v18527_v16, 0  ;;  %v2919_v11 = vsel %vm1560_vm0, %v18522_v20, 0 }
 0x4e1   : > { %11833 = vrcp.f32 %v2190_v54 }
 0x4e2   : > { %v2187_v40 = vpop.xlane.xlu1 %2186 }
 0x4e3   : > { %11835 = vrcp.f32 %v2187_v40  ;;  %v2656_v48 = vpop.permute.xlu0 %2655  ;;  %v2803_v40 = vsel %vm1560_vm0, %v18528_v31, 0 }
 0x4e6   : > { %v2658_v46 = vpop.permute.xlu1 %2657 }
 0x4e7   : > { %10934 = vmatpush3.bf16.xpose.msra.mxu0 %v2687_v0  ;;  %v18529_v0 = vld [vmem:[#allocation51_spill] sm:$0xff] }
 0x4e8   : > { %11476 = vmatprep.subr.msk.bf16.mxu0 %vm1560_vm0, %v18520_v45  ;;  %v2800_v45 = vsel %vm1560_vm0, %v18529_v0, 0 }
 0x4ec   : > { %v11830_v52 = vpop.eup %11829 }
 0x4ed   : > { %v11832_v7 = vpop.eup %11831  ;;  %v2265_v9 = vmul.f32 %v11830_v52, %v18521_v19 }
 0x4ee   : > { %v11834_v55 = vpop.eup %11833  ;;  %v2262_v47 = vmul.f32 %v11832_v7, %v18523_v24 }
 0x4ef   : > { %10936 = vmatpush3.bf16.xpose.msra.mxu0 %v2684_v62  ;;  %v2264_v54 = vmul.f32 %v11834_v55, %v18525_v34 }
 0x4f0   : > { %v11836_v3 = vpop.eup %11835  ;;  %11481 = vmatprep.subr.msk.bf16.mxu0 %vm1560_vm0, %v18522_v20 }
 0x4f1   : > { %v2263_v5 = vmul.f32 %v11836_v3, %v18524_v50  ;;  %v2283_v39 = vpack.c.bf16 %v2265_v9, %v2264_v54 }
 0x4f3   : > { %v2282_v10 = vpack.c.bf16 %v2263_v5, %v2262_v47 }
 0x4f5   : > { %10921 = vmatprep.mubr.msk.bf16.mxu1 %vm1917_vm1, %v2282_v10 }
 0x4f6   : > { %10938 = vmatmul.mubr.msk.bf16.vlgmr.msra.gmra.mxu0 %vm1560_vm0, %v18526_v61  ;;  %10922 = vmatmul.mubr.msk.bf16.vlgmr.msra.gmra.mxu1 %vm1917_vm1, %v2283_v39 }
 0x4f7   : > { %10941 = vmatprep.mubr.msk.bf16.mxu0 %vm1560_vm0, %v2656_v48  ;;  %10946 = vmatpush3.bf16.xpose.msra.mxu1 %v2806_v27 }
 0x4f8   : > { %10962 = vmatpush3.bf16.xpose.msra.mxu0 %v2919_v11  ;;  %11478 = vmatprep.subr.msk.bf16.mxu1 %vm1560_vm0, %v18528_v31 }
 0x4fe   : > { %10942 = vmatmul.mubr.msk.bf16.gmra.mxu0 %vm1560_vm0, %v2658_v46 }
 0x4ff   : > { %10948 = vmatpush3.bf16.xpose.msra.mxu1 %v2803_v40 }
 0x500   : > { %11479 = vmatprep.subr.msk.bf16.mxu1 %vm1560_vm0, %v18529_v0 }
 0x507   : > { %10950 = vmatpush3.bf16.xpose.msra.mxu1 %v2800_v45 }
 0x514   : > { %v2202_v52 = vpop.xlane.xlu0 %2201 }
 0x517   : > { %v2196_v7 = vpop.xlane.xlu1 %2195 }
 0x518   : > { %11837 = vrcp.f32 %v2196_v7  ;;  %v2199_v62 = vpop.xlane.xlu0 %2198 }
 0x519   : > { %11839 = vrcp.f32 %v2199_v62 }
 0x51a   : > { %11841 = vrcp.f32 %v2202_v52 }
 0x51b   : > { %v2205_v55 = vpop.xlane.xlu1 %2204 }
 0x51c   : > { %11843 = vrcp.f32 %v2205_v55  ;;  %v2777_v3 = vpop.permute.xlu0 %2776 }
 0x51d   : > { %11480 = vmatprep.subr.msk.bf16.mxu1 %vm1560_vm0, %v2777_v3  ;;  %v2797_v19 = vsel %vm1560_vm0, %v2777_v3, 0 }
 0x51e   : > { %10952 = vmatpush3.bf16.xpose.msra.mxu1 %v2797_v19 }
 0x51f   : > { %v2894_v9 = vpop.permute.xlu1 %2893 }
 0x520   : > { %v2765_v20 = vpop.permute.xlu0 %2764  ;;  %11482 = vmatprep.subr.msk.bf16.mxu0 %vm1560_vm0, %v2894_v9  ;;  %v2916_v24 = vsel %vm1560_vm0, %v2894_v9, 0 }
 0x521   : > { %10964 = vmatpush3.bf16.xpose.msra.mxu0 %v2916_v24 }
 0x523   : > { %v2767_v47 = vpop.permute.xlu1 %2766 }
 0x524   : > { %v2892_v50 = vpop.permute.xlu0 %2891 }
 0x525   : > { %v11838_v5 = vpop.eup %11837  ;;  %11483 = vmatprep.subr.msk.bf16.mxu0 %vm1560_vm0, %v2892_v50  ;;  %v2913_v16 = vsel %vm1560_vm0, %v2892_v50, 0 }
 0x526   : > { %v11840_v34 = vpop.eup %11839  ;;  %v2266_v54 = vmul.f32 %v11838_v5, %v14095_v51 }
 0x527   : > { %v11842_v10 = vpop.eup %11841  ;;  %v3009_v39 = vpop.permute.xlu1 %3008  ;;  %v2267_v48 = vmul.f32 %v11840_v34, %v14099_v44 }
 0x528   : > { %v2769_v61 = vpop.permute.xlu0 %2768  ;;  %11485 = vmatprep.subr.msk.bf16.mxu1 %vm1560_vm0, %v3009_v39  ;;  %v2268_v46 = vmul.f32 %v11842_v10, %v14091_v60 }
 0x529   : > { %v11844_v27 = vpop.eup %11843  ;;  %v14230_v11 = vpop.f32.mrf.mxu0  ;;  %10966 = vmatpush3.bf16.xpose.msra.mxu0 %v2913_v16  ;;  %v2284_v31 = vpack.c.bf16 %v2267_v48, %v2266_v54 }
 0x52a   : > { %18530 = vst [vmem:[#allocation17_spill] sm:$0xff] %v14230_v11  ;;  %v2269_v40 = vmul.f32 %v11844_v27, %v14103_v4  ;;  %v9829_v11 = vld [vmem:[%s18250_s1 + $0x180] sm:$0xff] }
 0x52b   : > { %10925 = vmatprep.mubr.msk.bf16.mxu1 %vm1917_vm1, %v2284_v31  ;;  %v2771_v51 = vpop.permute.xlu1 %2770  ;;  %v14235_v0 = vpop.f32.mrf.mxu0 }
 0x52c   : > { %18531 = vst [vmem:[#allocation27_spill] sm:$0xff] %v14235_v0  ;;  %v2890_v44 = vpop.permute.xlu0 %2889  ;;  %v2285_v45 = vpack.c.bf16 %v2269_v40, %v2268_v46  ;;  %v9828_v0 = vld [vmem:[%s18250_s1 + $0x178] sm:$0xff] }
 0x52d   : > { %11484 = vmatprep.subr.msk.bf16.mxu0 %vm1560_vm0, %v2890_v44  ;;  %v14238_v52 = vpop.f32.mrf.mxu0  ;;  %v2910_v55 = vsel %vm1560_vm0, %v2890_v44, 0 }
 0x52e   : > { %18532 = vst [vmem:[#allocation19_spill] sm:$0xff] %v14238_v52  ;;  %10926 = vmatmul.mubr.msk.bf16.gmra.mxu1 %vm1917_vm1, %v2285_v45 }
 0x52f   : > { %v3007_v62 = vpop.permute.xlu1 %3006  ;;  %v14243_v60 = vpop.f32.mrf.mxu0  ;;  %10953 = vmatprep.mubr.msk.bf16.mxu1 %vm1560_vm0, %v2765_v20  ;;  %v3032_v20 = vsel %vm1560_vm0, %v3009_v39, 0 }
 0x530   : > { %18533 = vst [vmem:[#allocation28_spill] sm:$0xff] %v14243_v60  ;;  %v2878_v4 = vpop.permute.xlu0 %2877  ;;  %v9835_v60 = vld [vmem:[%s18250_s1 + $0x1b0] sm:$0xff] }
 0x531   : > { %10969 = vmatprep.mubr.msk.bf16.mxu0 %vm1560_vm0, %v2878_v4  ;;  %v14248_v3 = vpop.f32.mrf.mxu0  ;;  %10968 = vmatpush3.bf16.xpose.msra.mxu0 %v2910_v55 }
 0x532   : > { %18534 = vst [vmem:[#allocation44_spill] sm:$0xff] %v14248_v3 }
 0x533   : > { %v2880_v19 = vpop.permute.xlu1 %2879  ;;  %v14250_v9 = vpop.f32.mrf.mxu0 }
 0x534   : > { %18535 = vst [vmem:[#allocation54_spill] sm:$0xff] %v14250_v9  ;;  %v3005_v24 = vpop.permute.xlu0 %3004 }
 0x535   : > { %v14252_v50 = vpop.f32.mrf.mxu0 }
 0x536   : > { %18536 = vst [vmem:[#allocation53_spill] sm:$0xff] %v14252_v50  ;;  %10954 = vmatmul.mubr.msk.bf16.vlgmr.msra.gmra.mxu1 %vm1560_vm0, %v2767_v47 }
 0x537   : > { %10978 = vmatpush3.bf16.xpose.msra.mxu1 %v3032_v20  ;;  %v2882_v34 = vpop.permute.xlu1 %2881  ;;  %v14258_v54 = vpop.f32.mrf.mxu0  ;;  %10957 = vmatprep.mubr.msk.bf16.mxu1 %vm1560_vm0, %v2769_v61  ;;  %v3029_v61 = vsel %vm1560_vm0, %v3007_v62, 0  ;;  %v3026_v20 = vsel %vm1560_vm0, %v3005_v24, 0 }
 0x538   : > { %18537 = vst [vmem:[#allocation49_spill] sm:$0xff] %v14258_v54  ;;  %11486 = vmatprep.subr.msk.bf16.mxu1 %vm1560_vm0, %v3007_v62  ;;  %v2884_v10 = vpop.permute.xlu0 %2883  ;;  %10970 = vmatmul.mubr.msk.bf16.vlgmr.msra.gmra.mxu0 %vm1560_vm0, %v2880_v19  ;;  %v9827_v54 = vld [vmem:[%s18250_s1 + $0x170] sm:$0xff] }
 0x539   : > { %v14263_v48 = vpop.f32.mrf.mxu0  ;;  %10973 = vmatprep.mubr.msk.bf16.mxu0 %vm1560_vm0, %v2882_v34 }
 0x53a   : > { %18538 = vst [vmem:[#allocation50_spill] sm:$0xff] %v14263_v48 }
 0x53b   : > { %v3003_v16 = vpop.permute.xlu1 %3002  ;;  %v14266_v27 = vpop.f32.mrf.mxu0 }
 0x53c   : > { %18539 = vst [vmem:[#allocation38_spill] sm:$0xff] %v14266_v27  ;;  %v2991_v47 = vpop.permute.xlu0 %2990 }
 0x53d   : > { %v14268_v39 = vpop.f32.mrf.mxu0 }
 0x53e   : > { %18540 = vst [vmem:[#allocation56_spill] sm:$0xff] %v14268_v39  ;;  %10958 = vmatmul.mubr.msk.bf16.gmra.mxu1 %vm1560_vm0, %v2771_v51 }
 0x53f   : > { %10980 = vmatpush3.bf16.xpose.msra.mxu1 %v3029_v61  ;;  %v2993_v46 = vpop.permute.xlu1 %2992  ;;  %v14274_v40 = vpop.f32.mrf.mxu0  ;;  %10985 = vmatprep.mubr.msk.bf16.mxu1 %vm1560_vm0, %v2991_v47  ;;  %v3023_v61 = vsel %vm1560_vm0, %v3003_v16, 0 }
 0x540   : > { %18541 = vst [vmem:[#allocation52_spill] sm:$0xff] %v14274_v40  ;;  %11487 = vmatprep.subr.msk.bf16.mxu1 %vm1560_vm0, %v3005_v24  ;;  %v2995_v44 = vpop.permute.xlu0 %2994  ;;  %10974 = vmatmul.mubr.msk.bf16.gmra.mxu0 %vm1560_vm0, %v2884_v10 }
 0x541   : > { %v14279_v45 = vpop.f32.mrf.mxu0 }
 0x542   : > { %18542 = vst [vmem:[#allocation57_spill] sm:$0xff] %v14279_v45 }
 0x543   : > { %v2997_v4 = vpop.permute.xlu1 %2996  ;;  %v14281_v55 = vpop.f32.mrf.mxu0 }
 0x544   : > { %18543 = vst [vmem:[#allocation58_spill] sm:$0xff] %v14281_v55  ;;  %v3478_v19 = vpop.permute.xlu0 %3477  ;;  %v9824_v55 = vld [vmem:[%s18250_s1 + $0x158] sm:$0xff] }
 0x545   : > { %10993 = vmatprep.subr.bf16.mxu0 %v3478_v19  ;;  %v14283_v51 = vpop.f32.mrf.mxu0 }
 0x546   : > { %18544 = vst [vmem:[#allocation55_spill] sm:$0xff] %v14283_v51  ;;  %10994 = vmatpush3.bf16.msra.mxu0 %v3478_v19  ;;  %v9819_v51 = vld [vmem:[%s18250_s1 + $0x130] sm:$0xff] }
 0x547   : > { %10982 = vmatpush3.bf16.xpose.msra.mxu1 %v3026_v20  ;;  %v3476_v34 = vpop.permute.xlu1 %3475  ;;  %v14296_v20 = vpop.f32.mrf.mxu0 }
 0x548   : > { %11488 = vmatprep.subr.msk.bf16.mxu1 %vm1560_vm0, %v3003_v16  ;;  %v3474_v10 = vpop.permute.xlu0 %3473  ;;  %10995 = vmatprep.subr.bf16.mxu0 %v3476_v34  ;;  %18545 = vst [vmem:[#allocation42_spill] sm:$0xff] %v14296_v20 }
 0x54a   : > { %10996 = vmatpush3.bf16.msra.mxu0 %v3476_v34 }
 0x54b   : > { %10997 = vmatprep.subr.bf16.mxu0 %v3474_v10  ;;  %v3571_v31 = vpop.permute.xlu1 %3570 }
 0x54c   : > { %v3472_v47 = vpop.permute.xlu0 %3471 }
 0x54e   : > { %10998 = vmatpush3.bf16.msra.mxu0 %v3474_v10 }
 0x54f   : > { %10984 = vmatpush3.bf16.xpose.msra.mxu1 %v3023_v61  ;;  %10999 = vmatprep.subr.bf16.mxu0 %v3472_v47  ;;  %v3569_v24 = vpop.permute.xlu1 %3568 }
 0x550   : > { %11009 = vmatprep.subr.bf16.mxu1 %v3571_v31  ;;  %v3567_v62 = vpop.permute.xlu0 %3566 }
 0x552   : > { %11000 = vmatpush3.bf16.msra.mxu0 %v3472_v47 }
 0x553   : > { %v3565_v16 = vpop.permute.xlu1 %3564 }
 0x554   : > { %v14290_v19 = vpop.permute.xlu0 %3663 }
 0x555   : > { %11025 = vmatprep.subr.bf16.mxu0 %v14290_v19 }
 0x556   : > { %10986 = vmatmul.mubr.msk.bf16.vlgmr.msra.gmra.mxu1 %vm1560_vm0, %v2993_v46 }
 0x557   : > { %10989 = vmatprep.mubr.msk.bf16.mxu1 %vm1560_vm0, %v2995_v44  ;;  %11010 = vmatpush3.bf16.msra.mxu1 %v3571_v31  ;;  %v9813_v31 = vld [vmem:[%s18250_s1 + $0x100] sm:$0xff] }
 0x558   : > { %11011 = vmatprep.subr.bf16.mxu1 %v3569_v24 }
 0x55b   : > { %11012 = vmatpush3.bf16.msra.mxu1 %v3569_v24 }
 0x55c   : > { %11013 = vmatprep.subr.bf16.mxu1 %v3567_v62 }
 0x55e   : > { %10990 = vmatmul.mubr.msk.bf16.gmra.mxu1 %vm1560_vm0, %v2997_v4 }
 0x55f   : > { %11014 = vmatpush3.bf16.msra.mxu1 %v3567_v62 }
 0x560   : > { %11015 = vmatprep.subr.bf16.mxu1 %v3565_v16 }
 0x563   : > { %11016 = vmatpush3.bf16.msra.mxu1 %v3565_v16  ;;  %v9815_v16 = vld [vmem:[%s18250_s1 + $0x110] sm:$0xff] }
 0x596   : > { %v14298_v34 = vpop.f32.mrf.mxu0 }
 0x597   : > { %18546 = vst [vmem:[#allocation48_spill] sm:$0xff] %v14298_v34 }
 0x598   : > { %v14300_v10 = vpop.f32.mrf.mxu0 }
 0x599   : > { %18547 = vst [vmem:[#allocation47_spill] sm:$0xff] %v14300_v10 }
 0x59a   : > { %v14302_v46 = vpop.f32.mrf.mxu0 }
 0x59b   : > { %18548 = vst [vmem:[#allocation51_spill] sm:$0xff] %v14302_v46 }
 0x59c   : > { %v14306_v44 = vpop.f32.mrf.mxu0 }
 0x59d   : > { %18549 = vst [vmem:[#allocation63_spill] sm:$0xff] %v14306_v44 }
 0x59e   : > { %v14308_v47 = vpop.f32.mrf.mxu0 }
 0x59f   : > { %18550 = vst [vmem:[#allocation64_spill] sm:$0xff] %v14308_v47  ;;  %v9816_v47 = vld [vmem:[%s18250_s1 + $0x118] sm:$0xff] }
 0x5a0   : > { %v14310_v4 = vpop.f32.mrf.mxu0 }
 0x5a1   : > { %18551 = vst [vmem:[#allocation65_spill] sm:$0xff] %v14310_v4 }
 0x5a2   : > { %v14312_v62 = vpop.f32.mrf.mxu0 }
 0x5a3   : > { %18552 = vst [vmem:[#allocation66_spill] sm:$0xff] %v14312_v62 }
 0x5a4   : > { %v14316_v24 = vpop.f32.mrf.mxu0 }
 0x5a5   : > { %18553 = vst [vmem:[#allocation67_spill] sm:$0xff] %v14316_v24 }
 0x5b6   : > { %v10939_v5 = vpop.f32.mrf.mxu0  ;;  %v14321_v7 = vpop.f32.mrf.mxu1 }
 0x5b7   : > { %18554 = vst [vmem:[#allocation68_spill] sm:$0xff] %v14321_v7  ;;  %v14326_v34 = vadd.f32 %v10939_v5, %v9815_v16  ;;  %v9814_v5 = vld [vmem:[%s18250_s1 + $0x108] sm:$0xff] }
 0x5b8   : > { %v2729_v46 = vpop.f32.mrf.mxu0  ;;  %v14328_v4 = vpop.f32.mrf.mxu1 }
 0x5b9   : > { %18555 = vst [vmem:[#allocation69_spill] sm:$0xff] %v14328_v4  ;;  %v14330_v45 = vadd.f32 %v9813_v31, %v2729_v46  ;;  %v3105_v61 = vsel %vm1917_vm1, %v14326_v34, -inf }
 0x5ba   : > { %3106 = vmax.xlane.f32.xlu0 %v3105_v61  ;;  %v10940_v62 = vpop.f32.mrf.mxu0  ;;  %v14337_v24 = vpop.f32.mrf.mxu1 }
 0x5bb   : > { %18556 = vst [vmem:[#allocation70_spill] sm:$0xff] %v14337_v24  ;;  %v14344_v31 = vadd.f32 %v10940_v62, %v9816_v47  ;;  %v3099_v61 = vsel %vm1917_vm1, %v14330_v45, -inf  ;;  %v9820_v47 = vld [vmem:[%s18250_s1 + $0x138] sm:$0xff] }
 0x5bc   : > { %v2732_v46 = vpop.f32.mrf.mxu0 }
 0x5bd   : > { %v14346_v4 = vadd.f32 %v9814_v5, %v2732_v46  ;;  %v3108_v5 = vsel %vm1917_vm1, %v14344_v31, -inf  ;;  %v9817_v46 = vld [vmem:[%s18250_s1 + $0x120] sm:$0xff] }
 0x5be   : > { %3100 = vmax.xlane.f32.xlu0 %v3099_v61  ;;  %v10943_v44 = vpop.f32.mrf.mxu0 }
 0x5bf   : > { %v3102_v10 = vsel %vm1917_vm1, %v14346_v4, -inf  ;;  %v14358_v62 = vadd.f32 %v10943_v44, %v9819_v51 }
 0x5c0   : > { %3103 = vmax.xlane.f32.xlu1 %v3102_v10  ;;  %v2745_v48 = vpop.f32.mrf.mxu0  ;;  %v9818_v10 = vld [vmem:[%s18250_s1 + $0x128] sm:$0xff] }
 0x5c1   : > { %v14370_v24 = vadd.f32 %v9817_v46, %v2745_v48  ;;  %v3117_v44 = vsel %vm1917_vm1, %v14358_v62, -inf  ;;  %v14382_v48 = vpop.f32.mrf.mxu1 }
 0x5c2   : > { %3109 = vmax.xlane.f32.xlu0 %v3108_v5  ;;  %v10944_v61 = vpop.f32.mrf.mxu0  ;;  %18557 = vst [vmem:[#allocation71_spill] sm:$0xff] %v14382_v48 }
 0x5c3   : > { %v14368_v16 = vadd.f32 %v10944_v61, %v9820_v47  ;;  %v3111_v47 = vsel %vm1917_vm1, %v14370_v24, -inf }
 0x5c4   : > { %v2748_v7 = vpop.f32.mrf.mxu0 }
 0x5c5   : > { %v14372_v51 = vadd.f32 %v9818_v10, %v2748_v7  ;;  %v3120_v39 = vsel %vm1917_vm1, %v14368_v16, -inf }
 0x5c6   : > { %3118 = vmax.xlane.f32.xlu0 %v3117_v44  ;;  %3121 = vmax.xlane.f32.xlu1 %v3120_v39  ;;  %v9823_v44 = vld [vmem:[%s18250_s1 + $0x150] sm:$0xff] }
 0x5c7   : > { %v3114_v5 = vsel %vm1917_vm1, %v14372_v51, -inf }
 0x5ca   : > { %3115 = vmax.xlane.f32.xlu1 %v3114_v5  ;;  %3112 = vmax.xlane.f32.xlu0 %v3111_v47  ;;  %v9831_v5 = vld [vmem:[%s18250_s1 + $0x190] sm:$0xff] }
 0x5ee   : > { %v14384_v7 = vpop.f32.mrf.mxu1 }
 0x5ef   : > { %18558 = vst [vmem:[#allocation72_spill] sm:$0xff] %v14384_v7 }
 0x5f0   : > { %v14386_v46 = vpop.f32.mrf.mxu1 }
 0x5f1   : > { %18559 = vst [vmem:[#allocation73_spill] sm:$0xff] %v14386_v46 }
 0x5f2   : > { %v14388_v61 = vpop.f32.mrf.mxu1 }
 0x5f3   : > { %18560 = vst [vmem:[#allocation74_spill] sm:$0xff] %v14388_v61  ;;  %v9821_v61 = vld [vmem:[%s18250_s1 + $0x140] sm:$0xff] }
 0x5f4   : > { %v14392_v39 = vpop.f32.mrf.mxu1 }
 0x5f5   : > { %18561 = vst [vmem:[#allocation75_spill] sm:$0xff] %v14392_v39 }
 0x5f6   : > { %v10955_v20 = vpop.f32.mrf.mxu1 }
 0x5f7   : > { %v14400_v47 = vadd.f32 %v10955_v20, %v9823_v44  ;;  %v9832_v20 = vld [vmem:[%s18250_s1 + $0x198] sm:$0xff] }
 0x5f8   : > { %v2842_v48 = vpop.f32.mrf.mxu1  ;;  %v10971_v46 = vpop.f32.mrf.mxu0 }
 0x5f9   : > { %v14405_v10 = vadd.f32 %v10971_v46, %v9831_v5  ;;  %v3129_v7 = vsel %vm1917_vm1, %v14400_v47, -inf  ;;  %v14417_v46 = vadd.f32 %v9821_v61, %v2842_v48 }
 0x5fa   : > { %3130 = vmax.xlane.f32.xlu0 %v3129_v7  ;;  %v10956_v39 = vpop.f32.mrf.mxu1  ;;  %v2955_v3 = vpop.f32.mrf.mxu0 }
 0x5fb   : > { %v14415_v44 = vadd.f32 %v10956_v39, %v9824_v55  ;;  %v3153_v7 = vsel %vm1917_vm1, %v14405_v10, -inf  ;;  %v9822_v55 = vld [vmem:[%s18250_s1 + $0x148] sm:$0xff] }
 0x5fc   : > { %v2845_v50 = vpop.f32.mrf.mxu1  ;;  %v10972_v40 = vpop.f32.mrf.mxu0 }
 0x5fd   : > { %v14419_v5 = vadd.f32 %v10972_v40, %v9832_v20  ;;  %v3132_v27 = vsel %vm1917_vm1, %v14415_v44, -inf  ;;  %v14431_v40 = vadd.f32 %v9829_v11, %v2955_v3  ;;  %v14433_v61 = vadd.f32 %v9822_v55, %v2845_v50 }
 0x5fe   : > { %3133 = vmax.xlane.f32.xlu1 %v3132_v27  ;;  %v10959_v39 = vpop.f32.mrf.mxu1  ;;  %3154 = vmax.xlane.f32.xlu0 %v3153_v7  ;;  %v2958_v48 = vpop.f32.mrf.mxu0  ;;  %v3123_v20 = vsel %vm1917_vm1, %v14417_v46, -inf  ;;  %v9830_v27 = vld [vmem:[%s18250_s1 + $0x188] sm:$0xff] }
 0x5ff   : > { %v3156_v52 = vsel %vm1917_vm1, %v14419_v5, -inf  ;;  %v14445_v11 = vadd.f32 %v10959_v39, %v9827_v54  ;;  %v14447_v3 = vadd.f32 %v9830_v27, %v2958_v48  ;;  %v3126_v50 = vsel %vm1917_vm1, %v14433_v61, -inf }
 0x600   : > { %v2858_v7 = vpop.f32.mrf.mxu1  ;;  %v10975_v9 = vpop.f32.mrf.mxu0  ;;  %v3147_v55 = vsel %vm1917_vm1, %v14431_v40, -inf }
 0x601   : > { %v14459_v54 = vadd.f32 %v10975_v9, %v9835_v60  ;;  %v3150_v48 = vsel %vm1917_vm1, %v14447_v3, -inf  ;;  %v3141_v27 = vsel %vm1917_vm1, %v14445_v11, -inf  ;;  %v14473_v60 = vadd.f32 %v9825_v2, %v2858_v7 }
 0x602   : > { %3124 = vmax.xlane.f32.xlu0 %v3123_v20  ;;  %3157 = vmax.xlane.f32.xlu1 %v3156_v52  ;;  %v10960_v20 = vpop.f32.mrf.mxu1  ;;  %v2971_v52 = vpop.f32.mrf.mxu0 }
 0x603   : > { %v14461_v39 = vadd.f32 %v10960_v20, %v9828_v0  ;;  %v9833_v20 = vld [vmem:[%s18250_s1 + $0x1a0] sm:$0xff]  ;;  %v3135_v7 = vsel %vm1917_vm1, %v14473_v60, -inf }
 0x604   : > { %v2861_v38 = vpop.f32.mrf.mxu1  ;;  %v14487_v2 = vadd.f32 %v9833_v20, %v2971_v52  ;;  %v9839_v52 = vld [vmem:[%s18250_s1 + $0x1d0] sm:$0xff] }
 0x605   : > { %v3144_v9 = vsel %vm1917_vm1, %v14461_v39, -inf }
 0x606   : > { %3127 = vmax.xlane.f32.xlu1 %v3126_v50  ;;  %3148 = vmax.xlane.f32.xlu0 %v3147_v55  ;;  %v10976_v50 = vpop.f32.mrf.mxu0  ;;  %v3165_v55 = vsel %vm1917_vm1, %v14459_v54, -inf }
 0x607   : > { %v14475_v0 = vadd.f32 %v10976_v50, %v9836_v1 }
 0x608   : > { %v2974_v50 = vpop.f32.mrf.mxu0 }
 0x60a   : > { %3151 = vmax.xlane.f32.xlu1 %v3150_v48  ;;  %3142 = vmax.xlane.f32.xlu0 %v3141_v27  ;;  %v9826_v48 = vld [vmem:[%s18250_s1 + $0x168] sm:$0xff]  ;;  %v3168_v27 = vsel %vm1917_vm1, %v14475_v0, -inf }
 0x60b   : > { %v14489_v1 = vadd.f32 %v9826_v48, %v2861_v38  ;;  %v9837_v48 = vld [vmem:[%s18250_s1 + $0x1c0] sm:$0xff] }
 0x60d   : > { %v3138_v38 = vsel %vm1917_vm1, %v14489_v1, -inf }
 0x60e   : > { %3145 = vmax.xlane.f32.xlu1 %v3144_v9  ;;  %3166 = vmax.xlane.f32.xlu0 %v3165_v55  ;;  %v14501_v9 = vadd.f32 %v9834_v21, %v2974_v50  ;;  %v3159_v55 = vsel %vm1917_vm1, %v14487_v2, -inf  ;;  %v9840_v21 = vld [vmem:[%s18250_s1 + $0x1d8] sm:$0xff] }
 0x610   : > { %v3162_v28 = vsel %vm1917_vm1, %v14501_v9, -inf }
 0x612   : > { %3136 = vmax.xlane.f32.xlu0 %v3135_v7  ;;  %3169 = vmax.xlane.f32.xlu1 %v3168_v27 }
 0x616   : > { %v10987_v20 = vpop.f32.mrf.mxu1  ;;  %3139 = vmax.xlane.f32.xlu1 %v3138_v38  ;;  %3160 = vmax.xlane.f32.xlu0 %v3159_v55 }
 0x617   : > { %v14510_v7 = vadd.f32 %v10987_v20, %v9839_v52  ;;  %v9838_v52 = vld [vmem:[%s18250_s1 + $0x1c8] sm:$0xff] }
 0x618   : > { %v3068_v27 = vpop.f32.mrf.mxu1 }
 0x619   : > { %v14515_v50 = vadd.f32 %v9837_v48, %v3068_v27  ;;  %v3177_v38 = vsel %vm1917_vm1, %v14510_v7, -inf  ;;  %v9843_v48 = vld [vmem:[%s18250_s1 + $0x1f0] sm:$0xff] }
 0x61a   : > { %v10988_v55 = vpop.f32.mrf.mxu1  ;;  %3163 = vmax.xlane.f32.xlu1 %v3162_v28  ;;  %3178 = vmax.xlane.f32.xlu0 %v3177_v38 }
 0x61b   : > { %v14524_v20 = vadd.f32 %v10988_v55, %v9840_v21  ;;  %v3171_v28 = vsel %vm1917_vm1, %v14515_v50, -inf  ;;  %v9841_v21 = vld [vmem:[%s18250_s1 + $0x1e0] sm:$0xff] }
 0x61c   : > { %v3071_v56 = vpop.f32.mrf.mxu1 }
 0x61d   : > { %v14529_v27 = vadd.f32 %v9838_v52, %v3071_v56  ;;  %v3180_v41 = vsel %vm1917_vm1, %v14524_v20, -inf }
 0x61e   : > { %v10991_v38 = vpop.f32.mrf.mxu1  ;;  %3181 = vmax.xlane.f32.xlu1 %v3180_v41  ;;  %3172 = vmax.xlane.f32.xlu0 %v3171_v28  ;;  %v14553_v28 = vpop.permute.xlu1 %3661 }
 0x61f   : > { %v14538_v55 = vadd.f32 %v10991_v38, %v9843_v48  ;;  %v3174_v56 = vsel %vm1917_vm1, %v14529_v27, -inf }
 0x620   : > { %v3084_v26 = vpop.f32.mrf.mxu1 }
 0x621   : > { %v14540_v25 = vadd.f32 %v9841_v21, %v3084_v26  ;;  %v3189_v52 = vsel %vm1917_vm1, %v14538_v55, -inf }
 0x622   : > { %3175 = vmax.xlane.f32.xlu1 %v3174_v56  ;;  %3190 = vmax.xlane.f32.xlu0 %v3189_v52  ;;  %v10992_v33 = vpop.f32.mrf.mxu1 }
 0x623   : > { %v3183_v41 = vsel %vm1917_vm1, %v14540_v25, -inf }
 0x626   : > { %3184 = vmax.xlane.f32.xlu0 %v3183_v41 }
 0x633   : > { %3657 = vrot.lane.b32.xlu1 %v14085_v36, %s12590_s25 }
 0x63c   : > { %3659 = vrot.lane.b32.xlu0 %v13315_v49, %s12590_s25 }
 0x643   : > { %v3107_v26 = vpop.xlane.xlu0 %3106 }
 0x644   : > { %v3197_v48 = vsub.f32 %v14326_v34, %v3107_v26  ;;  %v9844_v34 = vld [vmem:[%s18250_s1 + $0x1f8] sm:$0xff] }
 0x646   : > { %v3231_v38 = vmul.f32 1.442695, %v3197_v48 }
 0x647   : > { %v3101_v21 = vpop.xlane.xlu0 %3100 }
 0x648   : > { %v3195_v56 = vsub.f32 %v14330_v45, %v3101_v21  ;;  %11845 = vpow2.f32 %v3231_v38  ;;  %v14563_v21 = vadd.f32 %v10992_v33, %v9844_v34 }
 0x649   : > { %v3104_v52 = vpop.xlane.xlu1 %3103 }
 0x64a   : > { %v3227_v57 = vmul.f32 1.442695, %v3195_v56  ;;  %v3196_v41 = vsub.f32 %v14346_v4, %v3104_v52  ;;  %v3087_v4 = vpop.f32.mrf.mxu1 }
 0x64b   : > { %v3110_v32 = vpop.xlane.xlu0 %3109 }
 0x64c   : > { %v3198_v36 = vsub.f32 %v14344_v31, %v3110_v32  ;;  %11847 = vpow2.f32 %v3227_v57  ;;  %v3229_v49 = vmul.f32 1.442695, %v3196_v41  ;;  %v9842_v32 = vld [vmem:[%s18250_s1 + $0x1e8] sm:$0xff] }
 0x64d   : > { %v14570_v41 = vadd.f32 %v9842_v32, %v3087_v4 }
 0x64e   : > { %v3233_v59 = vmul.f32 1.442695, %v3198_v36 }
 0x64f   : > { %v3122_v26 = vpop.xlane.xlu1 %3121  ;;  %v3119_v48 = vpop.xlane.xlu0 %3118 }
 0x650   : > { %11849 = vpow2.f32 %v3233_v59  ;;  %v3202_v45 = vsub.f32 %v14368_v16, %v3122_v26  ;;  %v3201_v38 = vsub.f32 %v14358_v62, %v3119_v48  ;;  %v3192_v62 = vsel %vm1917_vm1, %v14563_v21, -inf }
 0x651   : > { %11851 = vpow2.f32 %v3229_v49  ;;  %v3186_v49 = vsel %vm1917_vm1, %v14570_v41, -inf }
 0x652   : > { %v3241_v36 = vmul.f32 1.442695, %v3202_v45  ;;  %v3239_v57 = vmul.f32 1.442695, %v3201_v38 }
 0x653   : > { %v3116_v31 = vpop.xlane.xlu1 %3115  ;;  %v3113_v56 = vpop.xlane.xlu0 %3112 }
 0x654   : > { %v3200_v52 = vsub.f32 %v14372_v51, %v3116_v31  ;;  %v3199_v59 = vsub.f32 %v14370_v24, %v3113_v56  ;;  %11853 = vpow2.f32 %v3239_v57 }
 0x655   : > { %11855 = vpow2.f32 %v3241_v36  ;;  %v14574_v34 = vpop.eup %11845 }
 0x656   : > { %v3237_v33 = vmul.f32 1.442695, %v3200_v52  ;;  %v3235_v16 = vmul.f32 1.442695, %v3199_v59  ;;  %v3297_v24 = vsel %vm1917_vm1, %v14574_v34, 0.0 }
 0x657   : > { %3193 = vmax.xlane.f32.xlu1 %v3192_v62 }
 0x658   : > { %11857 = vpow2.f32 %v3235_v16 }
 0x659   : > { %11859 = vpow2.f32 %v3237_v33  ;;  %v14580_v51 = vpop.eup %11847 }
 0x65a   : > { %v3291_v48 = vsel %vm1917_vm1, %v14580_v51, 0.0 }
 0x65b   : > { %3187 = vmax.xlane.f32.xlu1 %v3186_v49  ;;  %3298 = vadd.xlane.f32.xlu0 %v3297_v24 }
 0x65d   : > { %v14582_v26 = vpop.eup %11849 }
 0x65e   : > { %v3300_v45 = vsel %vm1917_vm1, %v14582_v26, 0.0  ;;  %v14588_v38 = vpop.eup %11851 }
 0x65f   : > { %3292 = vadd.xlane.f32.xlu0 %v3291_v48  ;;  %3301 = vadd.xlane.f32.xlu1 %v3300_v45  ;;  %v3294_v32 = vsel %vm1917_vm1, %v14588_v38, 0.0 }
 0x661   : > { %v14590_v4 = vpop.eup %11853 }
 0x662   : > { %v14594_v36 = vpop.eup %11855  ;;  %v3309_v57 = vsel %vm1917_vm1, %v14590_v4, 0.0 }
 0x663   : > { %3295 = vadd.xlane.f32.xlu1 %v3294_v32  ;;  %3310 = vadd.xlane.f32.xlu0 %v3309_v57  ;;  %v3312_v56 = vsel %vm1917_vm1, %v14594_v36, 0.0 }
 0x665   : > { %v14598_v31 = vpop.eup %11857 }
 0x666   : > { %v14602_v52 = vpop.eup %11859  ;;  %v3303_v59 = vsel %vm1917_vm1, %v14598_v31, 0.0 }
 0x667   : > { %3313 = vadd.xlane.f32.xlu1 %v3312_v56  ;;  %3304 = vadd.xlane.f32.xlu0 %v3303_v59  ;;  %v3306_v33 = vsel %vm1917_vm1, %v14602_v52, 0.0 }
 0x66b   : > { %3307 = vadd.xlane.f32.xlu1 %v3306_v33 }
 0x683   : > { %v3131_v16 = vpop.xlane.xlu0 %3130 }
 0x684   : > { %v3205_v62 = vsub.f32 %v14400_v47, %v3131_v16 }
 0x686   : > { %v3247_v49 = vmul.f32 1.442695, %v3205_v62 }
 0x687   : > { %v3134_v24 = vpop.xlane.xlu1 %3133  ;;  %v3155_v48 = vpop.xlane.xlu0 %3154 }
 0x688   : > { %11861 = vpow2.f32 %v3247_v49  ;;  %v3213_v45 = vsub.f32 %v14405_v10, %v3155_v48  ;;  %v3206_v33 = vsub.f32 %v14415_v44, %v3134_v24 }
 0x68a   : > { %v3263_v32 = vmul.f32 1.442695, %v3213_v45  ;;  %v3249_v10 = vmul.f32 1.442695, %v3206_v33 }
 0x68b   : > { %v3158_v57 = vpop.xlane.xlu1 %3157  ;;  %v3125_v56 = vpop.xlane.xlu0 %3124 }
 0x68c   : > { %v3214_v13 = vsub.f32 %v14419_v5, %v3158_v57  ;;  %v3203_v59 = vsub.f32 %v14417_v46, %v3125_v56  ;;  %11863 = vpow2.f32 %v3263_v32 }
 0x68e   : > { %v3265_v42 = vmul.f32 1.442695, %v3214_v13  ;;  %v3243_v35 = vmul.f32 1.442695, %v3203_v59 }
 0x68f   : > { %v3128_v23 = vpop.xlane.xlu1 %3127  ;;  %v3149_v47 = vpop.xlane.xlu0 %3148 }
 0x690   : > { %11865 = vpow2.f32 %v3265_v42  ;;  %v3211_v16 = vsub.f32 %v14431_v40, %v3149_v47  ;;  %v3204_v49 = vsub.f32 %v14433_v61, %v3128_v23 }
 0x691   : > { %11867 = vpow2.f32 %v3243_v35 }
 0x692   : > { %v3259_v62 = vmul.f32 1.442695, %v3211_v16  ;;  %v3245_v35 = vmul.f32 1.442695, %v3204_v49 }
 0x693   : > { %v3152_v48 = vpop.xlane.xlu1 %3151  ;;  %v3143_v45 = vpop.xlane.xlu0 %3142 }
 0x694   : > { %v3212_v5 = vsub.f32 %v14447_v3, %v3152_v48  ;;  %v3209_v46 = vsub.f32 %v14445_v11, %v3143_v45  ;;  %11869 = vpow2.f32 %v3259_v62 }
 0x695   : > { %v14617_v13 = vpop.eup %11861  ;;  %11871 = vpow2.f32 %v3249_v10 }
 0x696   : > { %v3261_v44 = vmul.f32 1.442695, %v3212_v5  ;;  %v3255_v24 = vmul.f32 1.442695, %v3209_v46  ;;  %v3321_v42 = vsel %vm1917_vm1, %v14617_v13, 0.0 }
 0x697   : > { %v3146_v40 = vpop.xlane.xlu1 %3145  ;;  %3322 = vadd.xlane.f32.xlu1 %v3321_v42  ;;  %v3167_v32 = vpop.xlane.xlu0 %3166 }
 0x698   : > { %11873 = vpow2.f32 %v3261_v44  ;;  %v3217_v23 = vsub.f32 %v14459_v54, %v3167_v32  ;;  %v3210_v11 = vsub.f32 %v14461_v39, %v3146_v40 }
 0x699   : > { %v14622_v61 = vpop.eup %11863  ;;  %11875 = vpow2.f32 %v3255_v24 }
 0x69a   : > { %11877 = vpow2.f32 %v3245_v35  ;;  %v3271_v3 = vmul.f32 1.442695, %v3217_v23  ;;  %v3345_v56 = vsel %vm1917_vm1, %v14622_v61, 0.0  ;;  %v3257_v39 = vmul.f32 1.442695, %v3210_v11 }
 0x69b   : > { %v3170_v57 = vpop.xlane.xlu1 %3169  ;;  %v3137_v59 = vpop.xlane.xlu0 %3136  ;;  %3346 = vadd.xlane.f32.xlu0 %v3345_v56 }
 0x69c   : > { %v3207_v33 = vsub.f32 %v14473_v60, %v3137_v59  ;;  %v3218_v54 = vsub.f32 %v14475_v0, %v3170_v57  ;;  %11879 = vpow2.f32 %v3271_v3 }
 0x69d   : > { %v14628_v47 = vpop.eup %11865 }
 0x69e   : > { %v14630_v16 = vpop.eup %11867  ;;  %v3251_v62 = vmul.f32 1.442695, %v3207_v33  ;;  %v3348_v10 = vsel %vm1917_vm1, %v14628_v47, 0.0  ;;  %v3273_v0 = vmul.f32 1.442695, %v3218_v54 }
 0x69f   : > { %v3140_v49 = vpop.xlane.xlu1 %3139  ;;  %v3315_v48 = vsel %vm1917_vm1, %v14630_v16, 0.0  ;;  %v3161_v45 = vpop.xlane.xlu0 %3160  ;;  %3349 = vadd.xlane.f32.xlu0 %v3348_v10 }
 0x6a0   : > { %v3208_v5 = vsub.f32 %v14489_v1, %v3140_v49  ;;  %3316 = vadd.xlane.f32.xlu1 %v3315_v48  ;;  %v3215_v60 = vsub.f32 %v14487_v2, %v3161_v45  ;;  %11881 = vpow2.f32 %v3251_v62 }
 0x6a1   : > { %v14639_v46 = vpop.eup %11869  ;;  %11883 = vpow2.f32 %v3257_v39 }
 0x6a2   : > { %v3267_v44 = vmul.f32 1.442695, %v3215_v60  ;;  %v3253_v24 = vmul.f32 1.442695, %v3208_v5  ;;  %v3339_v35 = vsel %vm1917_vm1, %v14639_v46, 0.0  ;;  %v14643_v32 = vpop.eup %11871 }
 0x6a3   : > { %v3164_v42 = vpop.xlane.xlu1 %3163  ;;  %v3179_v40 = vpop.xlane.xlu0 %3178 }
 0x6a4   : > { %v3216_v1 = vsub.f32 %v14501_v9, %v3164_v42  ;;  %3340 = vadd.xlane.f32.xlu1 %v3339_v35  ;;  %v3221_v23 = vsub.f32 %v14510_v7, %v3179_v40  ;;  %11885 = vpow2.f32 %v3267_v44  ;;  %v3324_v9 = vsel %vm1917_vm1, %v14643_v32, 0.0 }
 0x6a5   : > { %v14647_v2 = vpop.eup %11873  ;;  %11887 = vpow2.f32 %v3273_v0 }
 0x6a6   : > { %v3269_v11 = vmul.f32 1.442695, %v3216_v1  ;;  %v3342_v3 = vsel %vm1917_vm1, %v14647_v2, 0.0  ;;  %v14651_v57 = vpop.eup %11875  ;;  %11889 = vpow2.f32 %v3253_v24  ;;  %v3279_v56 = vmul.f32 1.442695, %v3221_v23 }
 0x6a7   : > { %v3182_v59 = vpop.xlane.xlu1 %3181  ;;  %3343 = vadd.xlane.f32.xlu0 %v3342_v3  ;;  %v3173_v33 = vpop.xlane.xlu0 %3172  ;;  %v3333_v39 = vsel %vm1917_vm1, %v14651_v57, 0.0 }
 0x6a8   : > { %v14655_v54 = vpop.eup %11877  ;;  %v3222_v7 = vsub.f32 %v14524_v20, %v3182_v59  ;;  %3325 = vadd.xlane.f32.xlu1 %v3324_v9  ;;  %v3219_v62 = vsub.f32 %v14515_v50, %v3173_v33  ;;  %11891 = vpow2.f32 %v3269_v11 }
 0x6a9   : > { %11893 = vpow2.f32 %v3279_v56  ;;  %v3318_v45 = vsel %vm1917_vm1, %v14655_v54, 0.0  ;;  %v14663_v60 = vpop.eup %11879 }
 0x6aa   : > { %v3281_v10 = vmul.f32 1.442695, %v3222_v7  ;;  %v3275_v49 = vmul.f32 1.442695, %v3219_v62  ;;  %v3357_v42 = vsel %vm1917_vm1, %v14663_v60, 0.0 }
 0x6ab   : > { %v3176_v48 = vpop.xlane.xlu1 %3175  ;;  %3334 = vadd.xlane.f32.xlu0 %v3333_v39  ;;  %v3191_v5 = vpop.xlane.xlu0 %3190 }
 0x6ac   : > { %v3220_v20 = vsub.f32 %v14529_v27, %v3176_v48  ;;  %3319 = vadd.xlane.f32.xlu1 %v3318_v45  ;;  %v3225_v50 = vsub.f32 %v14538_v55, %v3191_v5  ;;  %11895 = vpow2.f32 %v3281_v10 }
 0x6ad   : > { %v14667_v0 = vpop.eup %11881  ;;  %11897 = vpow2.f32 %v3275_v49 }
 0x6ae   : > { %v3277_v44 = vmul.f32 1.442695, %v3220_v20  ;;  %v3287_v24 = vmul.f32 1.442695, %v3225_v50  ;;  %v3327_v35 = vsel %vm1917_vm1, %v14667_v0, 0.0  ;;  %v14673_v1 = vpop.eup %11883 }
 0x6af   : > { %v3185_v40 = vpop.xlane.xlu0 %3184  ;;  %3328 = vadd.xlane.f32.xlu0 %v3327_v35  ;;  %v3336_v3 = vsel %vm1917_vm1, %v14673_v1, 0.0  ;;  %v18562_v35 = vld [vmem:[#allocation41_spill] sm:$0xff] }
 0x6b0   : > { %3358 = vadd.xlane.f32.xlu1 %v3357_v42  ;;  %v3223_v27 = vsub.f32 %v14540_v25, %v3185_v40  ;;  %11899 = vpow2.f32 %v3277_v44  ;;  %v14720_v40 = vpop.permute.xlu1 %3657 }
 0x6b1   : > { %v14676_v55 = vpop.eup %11885  ;;  %11901 = vpow2.f32 %v3287_v24 }
 0x6b2   : > { %v14678_v23 = vpop.eup %11887  ;;  %v3283_v11 = vmul.f32 1.442695, %v3223_v27  ;;  %v3351_v56 = vsel %vm1917_vm1, %v14676_v55, 0.0  ;;  %v18563_v27 = vld [vmem:[#allocation43_spill] sm:$0xff] }
 0x6b3   : > { %v14684_v59 = vpop.eup %11889  ;;  %3337 = vadd.xlane.f32.xlu0 %v3336_v3  ;;  %v3360_v25 = vsel %vm1917_vm1, %v14678_v23, 0.0 }
 0x6b4   : > { %3352 = vadd.xlane.f32.xlu1 %v3351_v56  ;;  %11903 = vpow2.f32 %v3283_v11  ;;  %v3330_v33 = vsel %vm1917_vm1, %v14684_v59, 0.0  ;;  %v14724_v11 = vpop.permute.xlu0 %3659 }
 0x6b5   : > { %v14686_v9 = vpop.eup %11891 }
 0x6b6   : > { %v14692_v7 = vpop.eup %11893  ;;  %v3354_v10 = vsel %vm1917_vm1, %v14686_v9, 0.0 }
 0x6b7   : > { %3361 = vadd.xlane.f32.xlu0 %v3360_v25  ;;  %v3369_v39 = vsel %vm1917_vm1, %v14692_v7, 0.0  ;;  %v18564_v25 = vld [vmem:[#allocation46_spill] sm:$0xff] }
 0x6b8   : > { %3331 = vadd.xlane.f32.xlu1 %v3330_v33 }
 0x6b9   : > { %v14694_v62 = vpop.eup %11895 }
 0x6ba   : > { %v14700_v49 = vpop.eup %11897  ;;  %v3372_v45 = vsel %vm1917_vm1, %v14694_v62, 0.0 }
 0x6bb   : > { %3355 = vadd.xlane.f32.xlu0 %v3354_v10  ;;  %v3363_v5 = vsel %vm1917_vm1, %v14700_v49, 0.0 }
 0x6bc   : > { %3370 = vadd.xlane.f32.xlu1 %v3369_v39 }
 0x6bd   : > { %v14702_v48 = vpop.eup %11899 }
 0x6be   : > { %v14708_v20 = vpop.eup %11901  ;;  %v3366_v50 = vsel %vm1917_vm1, %v14702_v48, 0.0 }
 0x6bf   : > { %3373 = vadd.xlane.f32.xlu0 %v3372_v45  ;;  %v3381_v44 = vsel %vm1917_vm1, %v14708_v20, 0.0 }
 0x6c0   : > { %3364 = vadd.xlane.f32.xlu1 %v3363_v5  ;;  %v18565_v5 = vld [vmem:[#allocation7_spill] sm:$0xff] }
 0x6c1   : > { %v14714_v24 = vpop.eup %11903 }
 0x6c2   : > { %v3375_v42 = vsel %vm1917_vm1, %v14714_v24, 0.0 }
 0x6c3   : > { %3367 = vadd.xlane.f32.xlu0 %v3366_v50 }
 0x6c4   : > { %3382 = vadd.xlane.f32.xlu1 %v3381_v44 }
 0x6c8   : > { %3376 = vadd.xlane.f32.xlu1 %v3375_v42 }
 0x6d9   : > { %3754 = vrot.lane.b32.xlu1 %v18562_v35, %s12590_s25 }
 0x6dd   : > { %3752 = vrot.lane.b32.xlu1 %v18563_v27, %s12590_s25  ;;  %v18566_v27 = vld [vmem:[#allocation12_spill] sm:$0xff] }
 0x6e0   : > { %v3194_v3 = vpop.xlane.xlu1 %3193 }
 0x6e1   : > { %v3226_v56 = vsub.f32 %v14563_v21, %v3194_v3  ;;  %3750 = vrot.lane.b32.xlu1 %v18564_v25, %s12590_s25  ;;  %v18567_v3 = vld [vmem:[#allocation11_spill] sm:$0xff] }
 0x6e3   : > { %v3289_v33 = vmul.f32 1.442695, %v3226_v56 }
 0x6e4   : > { %v3188_v10 = vpop.xlane.xlu1 %3187  ;;  %v3299_v39 = vpop.xlane.xlu0 %3298 }
 0x6e5   : > { %11905 = vpow2.f32 %v3289_v33  ;;  %v3224_v45 = vsub.f32 %v14570_v41, %v3188_v10  ;;  %4347 = vrot.lane.b32.xlu1 %v18565_v5, %s12591_s21  ;;  %v18568_v33 = vld [vmem:[#allocation5_spill] sm:$0xff] }
 0x6e7   : > { %v3285_v50 = vmul.f32 1.442695, %v3224_v45 }
 0x6e8   : > { %v3302_v44 = vpop.xlane.xlu1 %3301  ;;  %v3293_v42 = vpop.xlane.xlu0 %3292 }
 0x6e9   : > { %11907 = vpow2.f32 %v3285_v50  ;;  %4454 = vrot.lane.b32.xlu1 %v18566_v27, %s12591_s21 }
 0x6ea   : > { %11909 = vrcp.f32 %v3302_v44  ;;  %v18569_v44 = vld [vmem:[#allocation21_spill] sm:$0xff] }
 0x6eb   : > { %11911 = vrcp.f32 %v3293_v42 }
 0x6ec   : > { %11913 = vrcp.f32 %v3299_v39  ;;  %v3296_v21 = vpop.xlane.xlu1 %3295  ;;  %v3311_v41 = vpop.xlane.xlu0 %3310 }
 0x6ed   : > { %11915 = vrcp.f32 %v3296_v21  ;;  %4452 = vrot.lane.b32.xlu1 %v18567_v3, %s12591_s21 }
 0x6f0   : > { %v3314_v56 = vpop.xlane.xlu1 %3313  ;;  %v3305_v10 = vpop.xlane.xlu0 %3304 }
 0x6f1   : > { %4337 = vrot.lane.b32.xlu1 %v18568_v33, %s12591_s21  ;;  %11917 = vrcp.f32 %v3314_v56 }
 0x6f2   : > { %v14738_v45 = vpop.eup %11905  ;;  %11919 = vrcp.f32 %v3305_v10 }
 0x6f3   : > { %v3384_v50 = vsel %vm1917_vm1, %v14738_v45, 0.0  ;;  %11921 = vrcp.f32 %v3311_v41 }
 0x6f4   : > { %v3308_v39 = vpop.xlane.xlu1 %3307  ;;  %3385 = vadd.xlane.f32.xlu0 %v3384_v50 }
 0x6f5   : > { %11923 = vrcp.f32 %v3308_v39  ;;  %4559 = vrot.lane.b32.xlu1 %v18569_v44, %s12591_s21 }
 0x6f6   : > { %v14744_v42 = vpop.eup %11907 }
 0x6f7   : > { %v11910_v21 = vpop.eup %11909  ;;  %v3378_v3 = vsel %vm1917_vm1, %v14744_v42, 0.0 }
 0x6f8   : > { %v11912_v33 = vpop.eup %11911  ;;  %3379 = vadd.xlane.f32.xlu0 %v3378_v3  ;;  %v3422_v41 = vmul.f32 %v11910_v21, %v14582_v26 }
 0x6f9   : > { %v11914_v56 = vpop.eup %11913  ;;  %4341 = vrot.lane.b32.xlu1 %v13343_v6, %s12591_s21  ;;  %v3419_v50 = vmul.f32 %v11912_v33, %v14580_v51 }
 0x6fa   : > { %v11916_v10 = vpop.eup %11915  ;;  %v3421_v5 = vmul.f32 %v11914_v56, %v14574_v34  ;;  %v18576_v56 = vld [vmem:[#allocation59_spill] sm:$0xff] }
 0x6fb   : > { %v3420_v39 = vmul.f32 %v11916_v10, %v14588_v38  ;;  %v18577_v10 = vld [vmem:[#allocation16_spill] sm:$0xff] }
 0x6fc   : > { %v3452_v25 = vpack.c.bf16 %v3422_v41, %v3421_v5 }
 0x6fd   : > { %4557 = vrot.lane.b32.xlu1 %v13420_v30, %s12591_s21  ;;  %v3451_v44 = vpack.c.bf16 %v3420_v39, %v3419_v50  ;;  %v18578_v39 = vld [vmem:[#allocation60_spill] sm:$0xff] }
 0x6fe   : > { %v11918_v35 = vpop.eup %11917 }
 0x6ff   : > { %11001 = vmatprep.mubr.msk.bf16.mxu0 %vm1917_vm1, %v3451_v44  ;;  %v11920_v3 = vpop.eup %11919  ;;  %v3426_v34 = vmul.f32 %v11918_v35, %v14594_v36  ;;  %v18572_v36 = vld [vmem:[#allocation6_spill] sm:$0xff] }
 0x700   : > { %11002 = vmatmul.mubr.msk.bf16.vlgmr.msra.gmra.mxu0 %vm1917_vm1, %v3452_v25  ;;  %v11922_v6 = vpop.eup %11921  ;;  %v3423_v26 = vmul.f32 %v11920_v3, %v14598_v31  ;;  %v18573_v31 = vld [vmem:[#allocation4_spill] sm:$0xff]  ;;  %v18575_v35 = vld [vmem:[#allocation10_spill] sm:$0xff]  ;;  %v18579_v3 = vld [vmem:[#allocation23_spill] sm:$0xff] }
 0x701   : > { %4442 = vrot.lane.b32.xlu1 %v18493_v18, %s12591_s21  ;;  %11026 = vmatpush3.bf16.msra.mxu0 %v14290_v19  ;;  %v3425_v5 = vmul.f32 %v11922_v6, %v14590_v4  ;;  %v14779_v6 = vld [vmem:[%s18255_s6 + $0x18] sm:$0xff]   ;;  %v18571_v4 = vld [vmem:[#allocation8_spill] sm:$0xff] }
 0x702   : > { %v11924_v51 = vpop.eup %11923  ;;  %11027 = vmatprep.subr.bf16.mxu0 %v14553_v28 }
 0x703   : > { %v3424_v38 = vmul.f32 %v11924_v51, %v14602_v52  ;;  %v3454_v19 = vpack.c.bf16 %v3426_v34, %v3425_v5  ;;  %v18574_v52 = vld [vmem:[#allocation3_spill] sm:$0xff] }
 0x705   : > { %4664 = vrot.lane.b32.xlu1 %v18495_v53, %s12591_s21  ;;  %11028 = vmatpush3.bf16.msra.mxu0 %v14553_v28  ;;  %v3453_v25 = vpack.c.bf16 %v3424_v38, %v3423_v26  ;;  %v18570_v28 = vld [vmem:[#allocation37_spill] sm:$0xff]  ;;  %v18581_v38 = vld [vmem:[#allocation18_spill] sm:$0xff] }
 0x706   : > { %11029 = vmatprep.subr.bf16.mxu0 %v14724_v11  ;;  %v18580_v26 = vld [vmem:[#allocation61_spill] sm:$0xff] }
 0x707   : > { %11005 = vmatprep.mubr.msk.bf16.mxu0 %vm1917_vm1, %v3453_v25 }
 0x708   : > { %11006 = vmatmul.mubr.msk.bf16.gmra.mxu0 %vm1917_vm1, %v3454_v19  ;;  %v18582_v19 = vld [vmem:[#allocation24_spill] sm:$0xff] }
 0x709   : > { %4446 = vrot.lane.b32.xlu1 %v18497_v12, %s12591_s21  ;;  %11030 = vmatpush3.bf16.msra.mxu0 %v14724_v11 }
 0x70a   : > { %11031 = vmatprep.subr.bf16.mxu0 %v14720_v40 }
 0x70d   : > { %4662 = vrot.lane.b32.xlu1 %v18499_v43, %s12591_s21  ;;  %11032 = vmatpush3.bf16.msra.mxu0 %v14720_v40 }
 0x70e   : > { %3756 = vrot.lane.b32.xlu0 %v18570_v28, %s12590_s25  ;;  %11057 = vmatprep.subr.bf16.mxu0 %v14779_v6  ;;  %s18135_s25 = scalar_lea.vmem %s18263_s14, %s10175_s15 }
 0x711   : > { %4547 = vrot.lane.b32.xlu1 %v18501_v8, %s12591_s21 }
 0x712   : > { %4349 = vrot.lane.b32.xlu0 %v18571_v4, %s12591_s21 }
 0x715   : > { %4549 = vrot.lane.b32.xlu1 %v18503_v22, %s12591_s21 }
 0x716   : > { %4345 = vrot.lane.b32.xlu0 %v18572_v36, %s12591_s21 }
 0x719   : > { %4658 = vrot.lane.b32.xlu1 %v18505_v63, %s12591_s21 }
 0x71a   : > { %4343 = vrot.lane.b32.xlu0 %v18573_v31, %s12591_s21 }
 0x71d   : > { %4652 = vrot.lane.b32.xlu1 %v18507_v37, %s12591_s21 }
 0x71e   : > { %4335 = vrot.lane.b32.xlu0 %v18574_v52, %s12591_s21 }
 0x720   : > { %v3323_v40 = vpop.xlane.xlu1 %3322 }
 0x721   : > { %4656 = vrot.lane.b32.xlu1 %v18509_v15, %s12591_s21 }
 0x722   : > { %4450 = vrot.lane.b32.xlu0 %v18575_v35, %s12591_s21 }
 0x724   : > { %v3347_v11 = vpop.xlane.xlu0 %3346 }
 0x725   : > { %5127 = vrot.lane.b32.xlu1 %v18511_v58, %s12591_s21 }
 0x726   : > { %4339 = vrot.lane.b32.xlu0 %v13313_v17, %s12591_s21 }
 0x728   : > { %v3350_v44 = vpop.xlane.xlu0 %3349 }
 0x729   : > { %v3317_v33 = vpop.xlane.xlu1 %3316  ;;  %5218 = vrot.lane.b32.xlu1 %v13558_v29, %s12591_s21  ;;  %11925 = vrcp.f32 %v3350_v44 }
 0x72a   : > { %4448 = vrot.lane.b32.xlu0 %v13361_v14, %s12591_s21 }
 0x72d   : > { %v3341_v21 = vpop.xlane.xlu1 %3340  ;;  %5216 = vrot.lane.b32.xlu1 %v18576_v56, %s12591_s21 }
 0x72e   : > { %4440 = vrot.lane.b32.xlu0 %v18577_v10, %s12591_s21  ;;  %11927 = vrcp.f32 %v3341_v21 }
 0x72f   : > { %11929 = vrcp.f32 %v3347_v11 }
 0x730   : > { %v3344_v41 = vpop.xlane.xlu0 %3343 }
 0x731   : > { %v3326_v50 = vpop.xlane.xlu1 %3325  ;;  %5212 = vrot.lane.b32.xlu1 %v18578_v39, %s12591_s21  ;;  %11931 = vrcp.f32 %v3344_v41  ;;  %v18583_v39 = vld [vmem:[#allocation14_spill] sm:$0xff] }
 0x732   : > { %4555 = vrot.lane.b32.xlu0 %v18579_v3, %s12591_s21  ;;  %11933 = vrcp.f32 %v3326_v50 }
 0x733   : > { %11935 = vrcp.f32 %v3317_v33 }
 0x734   : > { %v3335_v51 = vpop.xlane.xlu0 %3334  ;;  %11937 = vrcp.f32 %v3323_v40 }
 0x735   : > { %v3320_v34 = vpop.xlane.xlu1 %3319  ;;  %5305 = vrot.lane.b32.xlu1 %v18580_v26, %s12591_s21 }
 0x736   : > { %11939 = vrcp.f32 %v3320_v34  ;;  %4444 = vrot.lane.b32.xlu0 %v18581_v38, %s12591_s21  ;;  %v11926_v11 = vpop.eup %11925 }
 0x737   : > { %v3438_v40 = vmul.f32 %v11926_v11, %v14628_v47  ;;  %v18584_v47 = vld [vmem:[#allocation33_spill] sm:$0xff] }
 0x738   : > { %v3329_v25 = vpop.xlane.xlu0 %3328 }
 0x739   : > { %v3359_v5 = vpop.xlane.xlu1 %3358 }
 0x73a   : > { %4553 = vrot.lane.b32.xlu0 %v18582_v19, %s12591_s21 }
 0x73b   : > { %v11928_v44 = vpop.eup %11927 }
 0x73c   : > { %v11930_v21 = vpop.eup %11929  ;;  %v3338_v33 = vpop.xlane.xlu0 %3337  ;;  %v3435_v34 = vmul.f32 %v11928_v44, %v14639_v46  ;;  %v11566_v46 = vld [vmem:[%s18255_s6 + $0x10] sm:$0xff]  }
 0x73d   : > { %v3353_v41 = vpop.xlane.xlu1 %3352  ;;  %11941 = vrcp.f32 %v3338_v33  ;;  %v3437_v29 = vmul.f32 %v11930_v21, %v14622_v61 }
 0x73e   : > { %v11932_v50 = vpop.eup %11931  ;;  %4545 = vrot.lane.b32.xlu0 %v18583_v39, %s12591_s21  ;;  %11943 = vrcp.f32 %v3329_v25  ;;  %v18585_v25 = vld [vmem:[#allocation32_spill] sm:$0xff] }
 0x73f   : > { %v3436_v26 = vmul.f32 %v11932_v50, %v14647_v2  ;;  %v11934_v56 = vpop.eup %11933  ;;  %11945 = vrcp.f32 %v3335_v51  ;;  %v3460_v8 = vpack.c.bf16 %v3438_v40, %v3437_v29  ;;  %v18588_v40 = vld [vmem:[#allocation25_spill] sm:$0xff] }
 0x740   : > { %v11936_v58 = vpop.eup %11935  ;;  %v3362_v37 = vpop.xlane.xlu0 %3361  ;;  %v3430_v11 = vmul.f32 %v11934_v56, %v14643_v32 }
 0x741   : > { %v3332_v15 = vpop.xlane.xlu1 %3331  ;;  %v3459_v63 = vpack.c.bf16 %v3436_v26, %v3435_v34  ;;  %v11938_v43 = vpop.eup %11937  ;;  %v3427_v61 = vmul.f32 %v11936_v58, %v14630_v16 }
 0x742   : > { %11947 = vrcp.f32 %v3332_v15  ;;  %4660 = vrot.lane.b32.xlu0 %v18584_v47, %s12591_s21  ;;  %v3429_v15 = vmul.f32 %v11938_v43, %v14617_v13 }
 0x743   : > { %v11940_v2 = vpop.eup %11939  ;;  %11033 = vmatprep.mubr.msk.bf16.mxu0 %vm1917_vm1, %v3459_v63  ;;  %11949 = vrcp.f32 %v3362_v37  ;;  %v18586_v37 = vld [vmem:[#allocation22_spill] sm:$0xff] }
 0x744   : > { %11034 = vmatmul.mubr.msk.bf16.vlgmr.msra.gmra.mxu0 %vm1917_vm1, %v3460_v8  ;;  %v3428_v29 = vmul.f32 %v11940_v2, %v14655_v54  ;;  %11951 = vrcp.f32 %v3353_v41  ;;  %v3356_v26 = vpop.xlane.xlu0 %3355  ;;  %v3456_v63 = vpack.c.bf16 %v3430_v11, %v3429_v15 }
 0x745   : > { %v3371_v51 = vpop.xlane.xlu1 %3370  ;;  %11058 = vmatpush3.bf16.msra.mxu0 %v14779_v6  ;;  %11953 = vrcp.f32 %v3359_v5  ;;  %v18587_v6 = vld [vmem:[#allocation40_spill] sm:$0xff] }
 0x746   : > { %4551 = vrot.lane.b32.xlu0 %v18585_v25, %s12591_s21  ;;  %v3455_v32 = vpack.c.bf16 %v3428_v29, %v3427_v61  ;;  %11059 = vmatprep.subr.bf16.mxu0 %v11566_v46  ;;  %11955 = vrcp.f32 %v3356_v26 }
 0x748   : > { %11017 = vmatprep.mubr.msk.bf16.mxu1 %vm1917_vm1, %v3455_v32  ;;  %v3374_v8 = vpop.xlane.xlu0 %3373 }
 0x749   : > { %11018 = vmatmul.mubr.msk.bf16.vlgmr.msra.gmra.mxu1 %vm1917_vm1, %v3456_v63  ;;  %11060 = vmatpush3.bf16.msra.mxu0 %v11566_v46  ;;  %v3365_v43 = vpop.xlane.xlu1 %3364  ;;  %v18591_v63 = vld [vmem:[#allocation9_spill] sm:$0xff] }
 0x74a   : > { %4650 = vrot.lane.b32.xlu0 %v18586_v37, %s12591_s21  ;;  %v11942_v58 = vpop.eup %11941  ;;  %11957 = vrcp.f32 %v3365_v43 }
 0x74b   : > { %v11944_v13 = vpop.eup %11943  ;;  %v3434_v5 = vmul.f32 %v11942_v58, %v14673_v1 }
 0x74c   : > { %v3368_v16 = vpop.xlane.xlu0 %3367  ;;  %v11946_v54 = vpop.eup %11945  ;;  %v3431_v44 = vmul.f32 %v11944_v13, %v14667_v0 }
 0x74d   : > { %11959 = vrcp.f32 %v3368_v16  ;;  %v3433_v33 = vmul.f32 %v11946_v54, %v14651_v57  ;;  %v18589_v57 = vld [vmem:[#allocation31_spill] sm:$0xff]  ;;  %v3383_v58 = vpop.xlane.xlu1 %3382 }
 0x74e   : > { %4654 = vrot.lane.b32.xlu0 %v18587_v6, %s12591_s21  ;;  %11961 = vrcp.f32 %v3374_v8 }
 0x74f   : > { %v11948_v56 = vpop.eup %11947  ;;  %v3458_v2 = vpack.c.bf16 %v3434_v5, %v3433_v33  ;;  %11963 = vrcp.f32 %v3371_v51 }
 0x750   : > { %v3432_v21 = vmul.f32 %v11948_v56, %v14684_v59  ;;  %v11950_v41 = vpop.eup %11949 }
 0x751   : > { %v11952_v50 = vpop.eup %11951  ;;  %v3442_v61 = vmul.f32 %v11950_v41, %v14678_v23  ;;  %v18590_v23 = vld [vmem:[#allocation34_spill] sm:$0xff]  ;;  %v3377_v13 = vpop.xlane.xlu1 %3376 }
 0x752   : > { %5129 = vrot.lane.b32.xlu0 %v18588_v40, %s12591_s21  ;;  %v3457_v34 = vpack.c.bf16 %v3432_v21, %v3431_v44  ;;  %v11954_v46 = vpop.eup %11953  ;;  %v3439_v0 = vmul.f32 %v11952_v50, %v14676_v55 }
 0x753   : > { %v11956_v11 = vpop.eup %11955  ;;  %v3441_v59 = vmul.f32 %v11954_v46, %v14663_v60  ;;  %v18592_v60 = vld [vmem:[#allocation20_spill] sm:$0xff] }
 0x754   : > { %11021 = vmatprep.mubr.msk.bf16.mxu1 %vm1917_vm1, %v3457_v34  ;;  %v3440_v1 = vmul.f32 %v11956_v11, %v14686_v9  ;;  %v11567_v34 = vld [vmem:[%s18255_s6 + $0x8] sm:$0xff]  }
 0x755   : > { %11022 = vmatmul.mubr.msk.bf16.gmra.mxu1 %vm1917_vm1, %v3458_v2  ;;  %v3462_v15 = vpack.c.bf16 %v3442_v61, %v3441_v59  ;;  %v3755_v16 = vpop.permute.xlu1 %3754 }
 0x756   : > { %5125 = vrot.lane.b32.xlu0 %v18589_v57, %s12591_s21  ;;  %v3461_v29 = vpack.c.bf16 %v3440_v1, %v3439_v0  ;;  %v11568_v0 = vld [vmem:[%s18255_s6] sm:$0xff]   ;;  %v9939_v57 = vld [vmem:[%s18250_s1 + $0x2b0] sm:$0xff] }
 0x757   : > { %v11958_v26 = vpop.eup %11957 }
 0x758   : > { %11037 = vmatprep.mubr.msk.bf16.mxu0 %vm1917_vm1, %v3461_v29  ;;  %v3443_v55 = vmul.f32 %v11958_v26, %v14700_v49 }
 0x759   : > { %11038 = vmatmul.mubr.msk.bf16.gmra.mxu0 %vm1917_vm1, %v3462_v15  ;;  %v3753_v49 = vpop.permute.xlu1 %3752 }
 0x75a   : > { %5123 = vrot.lane.b32.xlu0 %v18590_v23, %s12591_s21  ;;  %v11960_v32 = vpop.eup %11959 }
 0x75b   : > { %v3444_v9 = vmul.f32 %v11960_v32, %v14702_v48  ;;  %v11962_v8 = vpop.eup %11961  ;;  %v18593_v32 = vld [vmem:[#allocation27_spill] sm:$0xff] }
 0x75c   : > { %v11964_v51 = vpop.eup %11963  ;;  %v3446_v50 = vmul.f32 %v11962_v8, %v14694_v62 }
 0x75d   : > { %v3463_v43 = vpack.c.bf16 %v3444_v9, %v3443_v55  ;;  %v3751_v5 = vpop.permute.xlu1 %3750  ;;  %v3445_v2 = vmul.f32 %v11964_v51, %v14692_v7  ;;  %v18594_v55 = vld [vmem:[#allocation28_spill] sm:$0xff]  ;;  %v18600_v51 = vld [vmem:[#allocation38_spill] sm:$0xff] }
 0x75e   : > { %5214 = vrot.lane.b32.xlu0 %v18591_v63, %s12591_s21  ;;  %v2594_v9 = vpack.c.bf16 %v18594_v55, %v18593_v32  ;;  %v18610_v55 = vld [vmem:[#allocation47_spill] sm:$0xff] }
 0x75f   : > { %11049 = vmatprep.mubr.msk.bf16.mxu1 %vm1917_vm1, %v3463_v43  ;;  %v3464_v61 = vpack.c.bf16 %v3446_v50, %v3445_v2 }
 0x761   : > { %v14884_v41 = vpop.permute.xlu1 %4347 }
 0x762   : > { %5307 = vrot.lane.b32.xlu0 %v18592_v60, %s12591_s21 }
 0x765   : > { %v4455_v62 = vpop.permute.xlu1 %4454 }
 0x769   : > { %v4453_v15 = vpop.permute.xlu1 %4452 }
 0x77d   : > { %v3386_v54 = vpop.xlane.xlu0 %3385 }
 0x781   : > { %v3380_v56 = vpop.xlane.xlu0 %3379 }
 0x782   : > { %11965 = vrcp.f32 %v3380_v56  ;;  %v18598_v56 = vld [vmem:[#allocation17_spill] sm:$0xff] }
 0x783   : > { %11967 = vrcp.f32 %v3377_v13  ;;  %v18596_v13 = vld [vmem:[#allocation49_spill] sm:$0xff] }
 0x784   : > { %11969 = vrcp.f32 %v3386_v54  ;;  %v18597_v54 = vld [vmem:[#allocation19_spill] sm:$0xff] }
 0x785   : > { %v3757_v48 = vpop.permute.xlu0 %3756  ;;  %11971 = vrcp.f32 %v3383_v58  ;;  %v14909_v58 = vpop.permute.xlu1 %4337 }
 0x786   : > { %11041 = vmatprep.subr.bf16.mxu1 %v3757_v48 }
 0x787   : > { %11042 = vmatpush3.bf16.msra.mxu1 %v3757_v48  ;;  %v4478_v48 = vsel %vm1560_vm0, %v4455_v62, 0 }
 0x788   : > { %11043 = vmatprep.subr.bf16.mxu1 %v3755_v16 }
 0x789   : > { %v14880_v44 = vpop.permute.xlu0 %4349 }
 0x78a   : > { %11489 = vmatprep.subr.msk.bf16.mxu0 %vm1560_vm0, %v14880_v44 }
 0x78b   : > { %11044 = vmatpush3.bf16.msra.mxu1 %v3755_v16 }
 0x78c   : > { %11045 = vmatprep.subr.bf16.mxu1 %v3753_v49 }
 0x78f   : > { %v11966_v21 = vpop.eup %11965  ;;  %11046 = vmatpush3.bf16.msra.mxu1 %v3753_v49  ;;  %v18599_v49 = vpack.c.bf16 %v18597_v54, %v18598_v56 }
 0x790   : > { %v11968_v33 = vpop.eup %11967  ;;  %11047 = vmatprep.subr.bf16.mxu1 %v3751_v5  ;;  %v3448_v46 = vmul.f32 %v11966_v21, %v14744_v42  ;;  %v14899_v42 = vpop.permute.xlu0 %4345  ;;  %v18601_v21 = vld [vmem:[#allocation52_spill] sm:$0xff] }
 0x791   : > { %v3447_v11 = vmul.f32 %v11968_v33, %v14714_v24  ;;  %v11970_v1 = vpop.eup %11969  ;;  %v2598_v33 = vpack.c.bf16 %v18601_v21, %v18600_v51 }
 0x792   : > { %v11972_v29 = vpop.eup %11971  ;;  %v3450_v7 = vmul.f32 %v11970_v1, %v14738_v45  ;;  %v18595_v45 = vld [vmem:[#allocation54_spill] sm:$0xff] }
 0x793   : > { %11048 = vmatpush3.bf16.msra.mxu1 %v3751_v5  ;;  %v3465_v59 = vpack.c.bf16 %v3448_v46, %v3447_v11  ;;  %v3449_v24 = vmul.f32 %v11972_v29, %v14708_v20  ;;  %v2596_v16 = vpack.c.bf16 %v18596_v13, %v18595_v45  ;;  %v14920_v5 = vpop.permute.xlu1 %4559  ;;  %v18603_v46 = vld [vmem:[#allocation44_spill] sm:$0xff]  ;;  %v4475_v11 = vsel %vm1560_vm0, %v4453_v15, 0  ;;  %v18605_v1 = vld [vmem:[#allocation58_spill] sm:$0xff]  ;;  %v18612_v13 = vld [vmem:[#allocation55_spill] sm:$0xff] }
 0x794   : > { %11093 = vmatprep.subr.bf16.mxu1 %v11567_v34  ;;  %v14906_v43 = vpop.permute.xlu0 %4343  ;;  %v18607_v29 = vld [vmem:[#allocation56_spill] sm:$0xff] }
 0x795   : > { %v3466_v26 = vpack.c.bf16 %v3450_v7, %v3449_v24  ;;  %v18608_v7 = vld [vmem:[#allocation50_spill] sm:$0xff] }
 0x796   : > { %11050 = vmatmul.mubr.msk.bf16.vlgmr.msra.gmra.mxu1 %vm1917_vm1, %v3464_v61  ;;  %v18609_v24 = vpack.c.bf16 %v18607_v29, %v18608_v7 }
 0x797   : > { %11053 = vmatprep.mubr.msk.bf16.mxu1 %vm1917_vm1, %v3465_v59  ;;  %11094 = vmatpush3.bf16.msra.mxu1 %v11567_v34  ;;  %v14926_v50 = vpop.permute.xlu1 %4341  ;;  %v18602_v34 = vld [vmem:[#allocation53_spill] sm:$0xff] }
 0x798   : > { %11095 = vmatprep.subr.bf16.mxu1 %v11568_v0  ;;  %v14913_v20 = vpop.permute.xlu0 %4335  ;;  %v18604_v2 = vpack.c.bf16 %v18602_v34, %v18603_v46  ;;  %v18616_v34 = vld [vmem:[#allocation67_spill] sm:$0xff] }
 0x79b   : > { %11096 = vmatpush3.bf16.msra.mxu1 %v11568_v0  ;;  %v14937_v0 = vpop.permute.xlu1 %4557 }
 0x79c   : > { %11493 = vmatprep.subr.msk.bf16.mxu1 %vm1560_vm0, %v4455_v62  ;;  %v4451_v8 = vpop.permute.xlu0 %4450  ;;  %v18606_v62 = vld [vmem:[#allocation42_spill] sm:$0xff] }
 0x79d   : > { %v2600_v59 = vpack.c.bf16 %v18606_v62, %v18605_v1  ;;  %v18618_v1 = vld [vmem:[#allocation48_spill] sm:$0xff] }
 0x79e   : > { %11054 = vmatmul.mubr.msk.bf16.gmra.mxu1 %vm1917_vm1, %v3466_v26  ;;  %v4472_v26 = vsel %vm1560_vm0, %v4451_v8, 0 }
 0x79f   : > { %11097 = vmatprep.mubr.msk.bf16.mxu1 %vm1560_vm0, %v2594_v9  ;;  %v4443_v32 = vpop.permute.xlu1 %4442  ;;  %v18611_v9 = vld [vmem:[#allocation63_spill] sm:$0xff] }
 0x7a0   : > { %v14935_v61 = vpop.permute.xlu0 %4339  ;;  %v2602_v45 = vpack.c.bf16 %v18611_v9, %v18610_v55  ;;  %v18620_v9 = vld [vmem:[#allocation69_spill] sm:$0xff] }
 0x7a6   : > { %11098 = vmatmul.mubr.msk.bf16.vlgmr.msra.gmra.mxu1 %vm1560_vm0, %v18599_v49  ;;  %v4665_v49 = vpop.permute.xlu1 %4664 }
 0x7a7   : > { %11146 = vmatpush3.bf16.xpose.msra.mxu1 %v4478_v48  ;;  %11101 = vmatprep.mubr.msk.bf16.mxu1 %vm1560_vm0, %v2596_v16  ;;  %v18613_v16 = vld [vmem:[#allocation57_spill] sm:$0xff] }
 0x7a8   : > { %11494 = vmatprep.subr.msk.bf16.mxu1 %vm1560_vm0, %v4453_v15  ;;  %v4449_v15 = vpop.permute.xlu0 %4448  ;;  %v18614_v54 = vpack.c.bf16 %v18612_v13, %v18613_v16 }
 0x7a9   : > { %v4469_v56 = vsel %vm1560_vm0, %v4449_v15, 0 }
 0x7ac   : > { %v4441_v51 = vpop.permute.xlu0 %4440 }
 0x7ae   : > { %11102 = vmatmul.mubr.msk.bf16.gmra.mxu1 %vm1560_vm0, %v18604_v2 }
 0x7af   : > { %11148 = vmatpush3.bf16.xpose.msra.mxu1 %v4475_v11  ;;  %11105 = vmatprep.mubr.msk.bf16.mxu1 %vm1560_vm0, %v2598_v33  ;;  %v18615_v33 = vld [vmem:[#allocation65_spill] sm:$0xff]  ;;  %v18617_v11 = vld [vmem:[#allocation51_spill] sm:$0xff] }
 0x7b0   : > { %11495 = vmatprep.subr.msk.bf16.mxu1 %vm1560_vm0, %v4451_v8  ;;  %v2604_v46 = vpack.c.bf16 %v18616_v34, %v18615_v33  ;;  %v18619_v62 = vpack.c.bf16 %v18617_v11, %v18618_v1  ;;  %v4370_v34 = vsel %vm1560_vm0, %v14884_v41, 0 }
 0x7b6   : > { %11106 = vmatmul.mubr.msk.bf16.gmra.mxu1 %vm1560_vm0, %v18609_v24  ;;  %v14964_v24 = vpop.permute.xlu0 %4555 }
 0x7b7   : > { %11150 = vmatpush3.bf16.xpose.msra.mxu1 %v4472_v26  ;;  %11109 = vmatprep.mubr.msk.bf16.mxu1 %vm1560_vm0, %v2600_v59 }
 0x7b8   : > { %11496 = vmatprep.subr.msk.bf16.mxu1 %vm1560_vm0, %v4449_v15  ;;  %v4373_v15 = vsel %vm1560_vm0, %v14880_v44, 0 }
 0x7be   : > { %11110 = vmatmul.mubr.msk.bf16.gmra.mxu1 %vm1560_vm0, %v18614_v54  ;;  %v18622_v54 = vld [vmem:[#allocation66_spill] sm:$0xff] }
 0x7bf   : > { %11152 = vmatpush3.bf16.xpose.msra.mxu1 %v4469_v56  ;;  %11113 = vmatprep.mubr.msk.bf16.mxu1 %vm1560_vm0, %v2602_v45  ;;  %v18621_v45 = vld [vmem:[#allocation71_spill] sm:$0xff]  ;;  %v18623_v56 = vld [vmem:[#allocation64_spill] sm:$0xff] }
 0x7c0   : > { %11501 = vmatprep.subr.msk.bf16.mxu1 %vm1560_vm0, %v4665_v49  ;;  %v11003_v48 = vpop.f32.mrf.mxu0  ;;  %v2606_v13 = vpack.c.bf16 %v18621_v45, %v18620_v9  ;;  %v18631_v9 = vld [vmem:[#allocation72_spill] sm:$0xff] }
 0x7c2   : > { %v3529_v8 = vpop.f32.mrf.mxu0 }
 0x7c4   : > { %v11004_v21 = vpop.f32.mrf.mxu0 }
 0x7c5   : > { %v3840_v29 = vpack.c.bf16 %v11004_v21, %v11003_v48  ;;  %v18624_v48 = vpack.c.bf16 %v18622_v54, %v18623_v56  ;;  %v4445_v21 = vpop.permute.xlu0 %4444  ;;  %v4688_v54 = vsel %vm1560_vm0, %v4665_v49, 0 }
 0x7c6   : > { %v3532_v2 = vpop.f32.mrf.mxu0  ;;  %11114 = vmatmul.mubr.msk.bf16.gmra.mxu1 %vm1560_vm0, %v18619_v62 }
 0x7c7   : > { %v3839_v59 = vpack.c.bf16 %v3532_v2, %v3529_v8  ;;  %11117 = vmatprep.mubr.msk.bf16.mxu1 %vm1560_vm0, %v2604_v46  ;;  %v4447_v8 = vpop.permute.xlu1 %4446  ;;  %v18625_v46 = vld [vmem:[#allocation73_spill] sm:$0xff]  ;;  %v18626_v2 = vld [vmem:[#allocation75_spill] sm:$0xff] }
 0x7c8   : > { %v11007_v7 = vpop.f32.mrf.mxu0  ;;  %v2608_v11 = vpack.c.bf16 %v18626_v2, %v18625_v46 }
 0x7c9   : > { %11061 = vmatprep.mubr.msk.bf16.mxu0 %vm1560_vm0, %v3839_v59  ;;  %v14987_v62 = vpop.permute.xlu0 %4553  ;;  %v18627_v59 = vld [vmem:[#allocation70_spill] sm:$0xff] }
 0x7ca   : > { %v3545_v26 = vpop.f32.mrf.mxu0  ;;  %11062 = vmatmul.mubr.msk.bf16.vlgmr.msra.gmra.mxu0 %vm1560_vm0, %v3840_v29  ;;  %v18628_v29 = vld [vmem:[#allocation68_spill] sm:$0xff] }
 0x7cb   : > { %11130 = vmatpush3.bf16.xpose.msra.mxu0 %v4373_v15  ;;  %v4663_v1 = vpop.permute.xlu1 %4662 }
 0x7cc   : > { %11490 = vmatprep.subr.msk.bf16.mxu0 %vm1560_vm0, %v14884_v41  ;;  %v11008_v55 = vpop.f32.mrf.mxu0  ;;  %v4367_v41 = vsel %vm1560_vm0, %v14899_v42, 0 }
 0x7cd   : > { %v3842_v44 = vpack.c.bf16 %v11008_v55, %v11007_v7  ;;  %v18629_v7 = vpack.c.bf16 %v18627_v59, %v18628_v29  ;;  %v14998_v15 = vpop.permute.xlu0 %4545  ;;  %v18630_v55 = vld [vmem:[#allocation74_spill] sm:$0xff] }
 0x7ce   : > { %v3548_v16 = vpop.f32.mrf.mxu0  ;;  %11118 = vmatmul.mubr.msk.bf16.gmra.mxu1 %vm1560_vm0, %v18624_v48  ;;  %v18632_v45 = vpack.c.bf16 %v18630_v55, %v18631_v9 }
 0x7cf   : > { %v3841_v33 = vpack.c.bf16 %v3548_v16, %v3545_v26  ;;  %11121 = vmatprep.mubr.msk.bf16.mxu1 %vm1560_vm0, %v2606_v13  ;;  %v14996_v26 = vpop.permute.xlu1 %4547 }
 0x7d1   : > { %11065 = vmatprep.mubr.msk.bf16.mxu0 %vm1560_vm0, %v3841_v33  ;;  %v4661_v16 = vpop.permute.xlu0 %4660 }
 0x7d2   : > { %11066 = vmatmul.mubr.msk.bf16.gmra.mxu0 %vm1560_vm0, %v3842_v44  ;;  %v4682_v44 = vsel %vm1560_vm0, %v4661_v16, 0 }
 0x7d3   : > { %11132 = vmatpush3.bf16.xpose.msra.mxu0 %v4370_v34  ;;  %v15007_v13 = vpop.permute.xlu1 %4549 }
 0x7d4   : > { %11491 = vmatprep.subr.msk.bf16.mxu0 %vm1560_vm0, %v14899_v42  ;;  %v4364_v42 = vsel %vm1560_vm0, %v14906_v43, 0 }
 0x7d5   : > { %v15015_v48 = vpop.permute.xlu0 %4551 }
 0x7d6   : > { %11122 = vmatmul.mubr.msk.bf16.gmra.mxu1 %vm1560_vm0, %v18629_v7 }
 0x7d7   : > { %11125 = vmatprep.mubr.msk.bf16.mxu1 %vm1560_vm0, %v2608_v11  ;;  %v4659_v56 = vpop.permute.xlu1 %4658 }
 0x7d9   : > { %v4651_v33 = vpop.permute.xlu0 %4650 }
 0x7db   : > { %11134 = vmatpush3.bf16.xpose.msra.mxu0 %v4367_v41 }
 0x7dc   : > { %11492 = vmatprep.subr.msk.bf16.mxu0 %vm1560_vm0, %v14906_v43  ;;  %v4685_v43 = vsel %vm1560_vm0, %v4663_v1, 0 }
 0x7dd   : > { %v4655_v49 = vpop.permute.xlu0 %4654 }
 0x7de   : > { %11126 = vmatmul.mubr.msk.bf16.gmra.mxu1 %vm1560_vm0, %v18632_v45 }
 0x7df   : > { %11153 = vmatprep.mubr.msk.bf16.mxu1 %vm1560_vm0, %v4441_v51  ;;  %v4653_v51 = vpop.permute.xlu1 %4652 }
 0x7e1   : > { %v15027_v34 = vpop.permute.xlu0 %5129 }
 0x7e3   : > { %11136 = vmatpush3.bf16.xpose.msra.mxu0 %v4364_v42 }
 0x7e4   : > { %11497 = vmatprep.subr.msk.bf16.mxu0 %vm1560_vm0, %v14920_v5 }
 0x7e5   : > { %v15030_v2 = vpop.permute.xlu0 %5125 }
 0x7e6   : > { %11154 = vmatmul.mubr.msk.bf16.vlgmr.msra.gmra.mxu1 %vm1560_vm0, %v4443_v32  ;;  %v4657_v32 = vpop.permute.xlu1 %4656 }
 0x7e7   : > { %11178 = vmatpush3.bf16.xpose.msra.mxu1 %v4688_v54  ;;  %11157 = vmatprep.mubr.msk.bf16.mxu1 %vm1560_vm0, %v4445_v21 }
 0x7e8   : > { %11502 = vmatprep.subr.msk.bf16.mxu1 %vm1560_vm0, %v4663_v1 }
 0x7e9   : > { %v15032_v11 = vpop.permute.xlu0 %5123 }
 0x7ea   : > { %v15025_v21 = vpop.permute.xlu1 %5127 }
 0x7ed   : > { %v5215_v29 = vpop.permute.xlu0 %5214 }
 0x7ee   : > { %11158 = vmatmul.mubr.msk.bf16.gmra.mxu1 %vm1560_vm0, %v4447_v8  ;;  %v4679_v8 = vsel %vm1560_vm0, %v4659_v56, 0  ;;  %v5219_v46 = vpop.permute.xlu1 %5218 }
 0x7ef   : > { %11180 = vmatpush3.bf16.xpose.msra.mxu1 %v4685_v43  ;;  %11185 = vmatprep.mubr.msk.bf16.mxu1 %vm1560_vm0, %v4651_v33 }
 0x7f0   : > { %11503 = vmatprep.subr.msk.bf16.mxu1 %vm1560_vm0, %v4661_v16 }
 0x7f2   : > { %v5217_v1 = vpop.permute.xlu1 %5216 }
 0x7f6   : > { %v5213_v9 = vpop.permute.xlu1 %5212 }
 0x7f7   : > { %11182 = vmatpush3.bf16.xpose.msra.mxu1 %v4682_v44 }
 0x7f8   : > { %11504 = vmatprep.subr.msk.bf16.mxu1 %vm1560_vm0, %v4659_v56 }
 0x7ff   : > { %11184 = vmatpush3.bf16.xpose.msra.mxu1 %v4679_v8 }
 0x800   : > { %11209 = vmatprep.subr.bf16.mxu1 %v5219_v46 }
 0x804   : > { %v11035_v41 = vpop.f32.mrf.mxu0 }
 0x806   : > { %11186 = vmatmul.mubr.msk.bf16.vlgmr.msra.gmra.mxu1 %vm1560_vm0, %v4653_v51  ;;  %v3715_v16 = vpop.f32.mrf.mxu0 }
 0x807   : > { %11189 = vmatprep.mubr.msk.bf16.mxu1 %vm1560_vm0, %v4655_v49  ;;  %11210 = vmatpush3.bf16.msra.mxu1 %v5219_v46 }
 0x808   : > { %11211 = vmatprep.subr.bf16.mxu1 %v5217_v1  ;;  %v11036_v56 = vpop.f32.mrf.mxu0 }
 0x809   : > { %v11019_v59 = vpop.f32.mrf.mxu1 }
 0x80a   : > { %v3718_v43 = vpop.f32.mrf.mxu0 }
 0x80b   : > { %v3622_v7 = vpop.f32.mrf.mxu1  ;;  %11212 = vmatpush3.bf16.msra.mxu1 %v5217_v1 }
 0x80c   : > { %11213 = vmatprep.subr.bf16.mxu1 %v5215_v29 }
 0x80d   : > { %v11020_v55 = vpop.f32.mrf.mxu1 }
 0x80e   : > { %11190 = vmatmul.mubr.msk.bf16.gmra.mxu1 %vm1560_vm0, %v4657_v32  ;;  %v3844_v54 = vpack.c.bf16 %v11020_v55, %v11019_v59  ;;  %v3848_v55 = vpack.c.bf16 %v11036_v56, %v11035_v41 }
 0x80f   : > { %v3625_v45 = vpop.f32.mrf.mxu1  ;;  %11214 = vmatpush3.bf16.msra.mxu1 %v5215_v29  ;;  %v3847_v29 = vpack.c.bf16 %v3718_v43, %v3715_v16 }
 0x810   : > { %v3843_v42 = vpack.c.bf16 %v3625_v45, %v3622_v7  ;;  %11215 = vmatprep.subr.bf16.mxu1 %v5213_v9 }
 0x812   : > { %11069 = vmatprep.mubr.msk.bf16.mxu0 %vm1560_vm0, %v3843_v42 }
 0x813   : > { %11070 = vmatmul.mubr.msk.bf16.gmra.mxu0 %vm1560_vm0, %v3844_v54  ;;  %11216 = vmatpush3.bf16.msra.mxu1 %v5213_v9 }
 0x815   : > { %v11023_v51 = vpop.f32.mrf.mxu1 }
 0x817   : > { %v3638_v33 = vpop.f32.mrf.mxu1 }
 0x819   : > { %v11024_v49 = vpop.f32.mrf.mxu1  ;;  %v11039_v44 = vpop.f32.mrf.mxu0 }
 0x81a   : > { %v3846_v1 = vpack.c.bf16 %v11024_v49, %v11023_v51 }
 0x81b   : > { %v3641_v8 = vpop.f32.mrf.mxu1  ;;  %v3731_v46 = vpop.f32.mrf.mxu0 }
 0x81c   : > { %v3845_v32 = vpack.c.bf16 %v3641_v8, %v3638_v33 }
 0x81d   : > { %v11040_v7 = vpop.f32.mrf.mxu0 }
 0x81e   : > { %11073 = vmatprep.mubr.msk.bf16.mxu0 %vm1560_vm0, %v3845_v32  ;;  %v3850_v45 = vpack.c.bf16 %v11040_v7, %v11039_v44 }
 0x81f   : > { %11074 = vmatmul.mubr.msk.bf16.gmra.mxu0 %vm1560_vm0, %v3846_v1  ;;  %v3734_v59 = vpop.f32.mrf.mxu0 }
 0x820   : > { %11077 = vmatprep.mubr.msk.bf16.mxu0 %vm1560_vm0, %v3847_v29  ;;  %v3849_v9 = vpack.c.bf16 %v3734_v59, %v3731_v46 }
 0x827   : > { %11078 = vmatmul.mubr.msk.bf16.gmra.mxu0 %vm1560_vm0, %v3848_v55 }
 0x828   : > { %11081 = vmatprep.mubr.msk.bf16.mxu0 %vm1560_vm0, %v3849_v9  ;;  %v4583_v9 = vsel %vm1560_vm0, %v14920_v5, 0 }
 0x82f   : > { %11082 = vmatmul.mubr.msk.bf16.gmra.mxu0 %vm1560_vm0, %v3850_v45 }
 0x856   : > { %v11051_v42 = vpop.f32.mrf.mxu1 }
 0x858   : > { %v3808_v54 = vpop.f32.mrf.mxu1 }
 0x85a   : > { %v11052_v16 = vpop.f32.mrf.mxu1 }
 0x85b   : > { %v3852_v43 = vpack.c.bf16 %v11052_v16, %v11051_v42 }
 0x85c   : > { %v3811_v51 = vpop.f32.mrf.mxu1 }
 0x85d   : > { %v3851_v33 = vpack.c.bf16 %v3811_v51, %v3808_v54 }
 0x85e   : > { %v11055_v49 = vpop.f32.mrf.mxu1 }
 0x85f   : > { %11085 = vmatprep.mubr.msk.bf16.mxu0 %vm1560_vm0, %v3851_v33 }
 0x860   : > { %v3824_v8 = vpop.f32.mrf.mxu1  ;;  %11086 = vmatmul.mubr.msk.bf16.gmra.mxu0 %vm1560_vm0, %v3852_v43 }
 0x862   : > { %v11056_v41 = vpop.f32.mrf.mxu1 }
 0x863   : > { %v3854_v46 = vpack.c.bf16 %v11056_v41, %v11055_v49  ;;  %v4574_v49 = vsel %vm1560_vm0, %v14987_v62, 0 }
 0x864   : > { %v3827_v56 = vpop.f32.mrf.mxu1 }
 0x865   : > { %v3853_v32 = vpack.c.bf16 %v3827_v56, %v3824_v8 }
 0x866   : > { %v11099_v1 = vpop.f32.mrf.mxu1 }
 0x867   : > { %11089 = vmatprep.mubr.msk.bf16.mxu0 %vm1560_vm0, %v3853_v32 }
 0x868   : > { %11090 = vmatmul.mubr.msk.bf16.gmra.mxu0 %vm1560_vm0, %v3854_v46  ;;  %v4175_v44 = vpop.f32.mrf.mxu1 }
 0x869   : > { %11137 = vmatprep.mubr.msk.bf16.mxu0 %vm1560_vm0, %v14913_v20 }
 0x86a   : > { %v11100_v29 = vpop.f32.mrf.mxu1 }
 0x86c   : > { %v15051_v7 = vpop.f32.mrf.mxu1 }
 0x86d   : > { %18633 = vst [vmem:[#allocation12_spill] sm:$0xff] %v15051_v7  ;;  %v9926_v7 = vld [vmem:[%s18250_s1 + $0x248] sm:$0xff] }
 0x86e   : > { %v11103_v59 = vpop.f32.mrf.mxu1 }
 0x870   : > { %v4191_v55 = vpop.f32.mrf.mxu1  ;;  %11138 = vmatmul.mubr.msk.bf16.vlgmr.msra.gmra.mxu0 %vm1560_vm0, %v14909_v58  ;;  %v4580_v58 = vsel %vm1560_vm0, %v14937_v0, 0 }
 0x871   : > { %11162 = vmatpush3.bf16.xpose.msra.mxu0 %v4583_v9  ;;  %11141 = vmatprep.mubr.msk.bf16.mxu0 %vm1560_vm0, %v14935_v61 }
 0x872   : > { %11498 = vmatprep.subr.msk.bf16.mxu0 %vm1560_vm0, %v14937_v0  ;;  %v11104_v45 = vpop.f32.mrf.mxu1 }
 0x874   : > { %v15061_v20 = vpop.f32.mrf.mxu1 }
 0x875   : > { %18634 = vst [vmem:[#allocation37_spill] sm:$0xff] %v15061_v20 }
 0x876   : > { %v15063_v42 = vpop.f32.mrf.mxu1 }
 0x877   : > { %18635 = vst [vmem:[#allocation8_spill] sm:$0xff] %v15063_v42 }
 0x878   : > { %v15065_v54 = vpop.f32.mrf.mxu1  ;;  %11142 = vmatmul.mubr.msk.bf16.gmra.mxu0 %vm1560_vm0, %v14926_v50  ;;  %v4577_v50 = vsel %vm1560_vm0, %v14964_v24, 0 }
 0x879   : > { %18636 = vst [vmem:[#allocation6_spill] sm:$0xff] %v15065_v54  ;;  %11164 = vmatpush3.bf16.xpose.msra.mxu0 %v4580_v58  ;;  %11169 = vmatprep.mubr.msk.bf16.mxu0 %vm1560_vm0, %v14998_v15 }
 0x87a   : > { %11499 = vmatprep.subr.msk.bf16.mxu0 %vm1560_vm0, %v14964_v24  ;;  %v15075_v5 = vpop.f32.mrf.mxu1 }
 0x87b   : > { %18637 = vst [vmem:[#allocation4_spill] sm:$0xff] %v15075_v5 }
 0x87c   : > { %v15077_v61 = vpop.f32.mrf.mxu1 }
 0x87d   : > { %18638 = vst [vmem:[#allocation3_spill] sm:$0xff] %v15077_v61 }
 0x87e   : > { %v15079_v16 = vpop.f32.mrf.mxu1 }
 0x87f   : > { %18639 = vst [vmem:[#allocation10_spill] sm:$0xff] %v15079_v16 }
 0x880   : > { %v15081_v51 = vpop.f32.mrf.mxu1 }
 0x881   : > { %18640 = vst [vmem:[#allocation16_spill] sm:$0xff] %v15081_v51  ;;  %11166 = vmatpush3.bf16.xpose.msra.mxu0 %v4577_v50 }
 0x882   : > { %11500 = vmatprep.subr.msk.bf16.mxu0 %vm1560_vm0, %v14987_v62  ;;  %v15087_v0 = vpop.f32.mrf.mxu1 }
 0x883   : > { %18641 = vst [vmem:[#allocation23_spill] sm:$0xff] %v15087_v0 }
 0x884   : > { %v15089_v15 = vpop.f32.mrf.mxu1 }
 0x885   : > { %18642 = vst [vmem:[#allocation18_spill] sm:$0xff] %v15089_v15  ;;  %v9928_v15 = vld [vmem:[%s18250_s1 + $0x258] sm:$0xff] }
 0x886   : > { %v15091_v33 = vpop.f32.mrf.mxu1 }
 0x887   : > { %18643 = vst [vmem:[#allocation14_spill] sm:$0xff] %v15091_v33 }
 0x888   : > { %v15093_v43 = vpop.f32.mrf.mxu1 }
 0x889   : > { %18644 = vst [vmem:[#allocation33_spill] sm:$0xff] %v15093_v43  ;;  %11168 = vmatpush3.bf16.xpose.msra.mxu0 %v4574_v49 }
 0x88a   : > { %11193 = vmatprep.subr.bf16.mxu0 %v15027_v34  ;;  %v11063_v8 = vpop.f32.mrf.mxu0  ;;  %v15098_v24 = vpop.f32.mrf.mxu1 }
 0x88b   : > { %18645 = vst [vmem:[#allocation22_spill] sm:$0xff] %v15098_v24  ;;  %v15100_v41 = vadd.f32 %v11099_v1, %v11063_v8 }
 0x88c   : > { %v3954_v56 = vpop.f32.mrf.mxu0  ;;  %v15102_v32 = vpop.f32.mrf.mxu1 }
 0x88d   : > { %18646 = vst [vmem:[#allocation40_spill] sm:$0xff] %v15100_v41  ;;  %18647 = vst [vmem:[#allocation25_spill] sm:$0xff] %v15102_v32  ;;  %v15104_v46 = vadd.f32 %v4175_v44, %v3954_v56 }
 0x88e   : > { %v11064_v9 = vpop.f32.mrf.mxu0  ;;  %v15106_v58 = vpop.f32.mrf.mxu1 }
 0x88f   : > { %18648 = vst [vmem:[#allocation27_spill] sm:$0xff] %v15104_v46  ;;  %18649 = vst [vmem:[#allocation28_spill] sm:$0xff] %v15106_v58  ;;  %v15108_v50 = vadd.f32 %v11100_v29, %v11064_v9 }
 0x890   : > { %11170 = vmatmul.mubr.msk.bf16.vlgmr.msra.gmra.mxu0 %vm1560_vm0, %v14996_v26  ;;  %v15112_v62 = vpop.f32.mrf.mxu0  ;;  %v15114_v49 = vpop.f32.mrf.mxu1 }
 0x891   : > { %18650 = vst [vmem:[#allocation54_spill] sm:$0xff] %v15108_v50  ;;  %18651 = vst [vmem:[#allocation49_spill] sm:$0xff] %v15112_v62  ;;  %11173 = vmatprep.mubr.msk.bf16.mxu0 %vm1560_vm0, %v15007_v13  ;;  %11194 = vmatpush3.bf16.msra.mxu0 %v15027_v34 }
 0x892   : > { %18652 = vst [vmem:[#allocation19_spill] sm:$0xff] %v15114_v49  ;;  %11195 = vmatprep.subr.bf16.mxu0 %v15025_v21  ;;  %v11067_v1 = vpop.f32.mrf.mxu0  ;;  %v15120_v44 = vpop.f32.mrf.mxu1 }
 0x893   : > { %18653 = vst [vmem:[#allocation17_spill] sm:$0xff] %v15120_v44  ;;  %v15122_v8 = vadd.f32 %v11103_v59, %v11067_v1 }
 0x894   : > { %v3970_v29 = vpop.f32.mrf.mxu0  ;;  %v15124_v56 = vpop.f32.mrf.mxu1 }
 0x895   : > { %18654 = vst [vmem:[#allocation38_spill] sm:$0xff] %v15122_v8  ;;  %18655 = vst [vmem:[#allocation52_spill] sm:$0xff] %v15124_v56  ;;  %v15126_v26 = vadd.f32 %v4191_v55, %v3970_v29  ;;  %11196 = vmatpush3.bf16.msra.mxu0 %v15025_v21  ;;  %v15144_v21 = vpop.permute.xlu0 %5307 }
 0x896   : > { %11197 = vmatprep.subr.bf16.mxu0 %v15030_v2  ;;  %v11068_v9 = vpop.f32.mrf.mxu0  ;;  %v15130_v13 = vpop.f32.mrf.mxu1  ;;  %18662 = vst [vmem:[#allocation47_spill] sm:$0xff] %v15144_v21 }
 0x897   : > { %18656 = vst [vmem:[#allocation53_spill] sm:$0xff] %v15126_v26  ;;  %18657 = vst [vmem:[#allocation44_spill] sm:$0xff] %v15130_v13  ;;  %v15132_v34 = vadd.f32 %v11104_v45, %v11068_v9  ;;  %v9924_v26 = vld [vmem:[%s18250_s1 + $0x238] sm:$0xff] }
 0x898   : > { %11174 = vmatmul.mubr.msk.bf16.gmra.mxu0 %vm1560_vm0, %v15015_v48  ;;  %v15136_v32 = vpop.f32.mrf.mxu1 }
 0x899   : > { %18658 = vst [vmem:[#allocation58_spill] sm:$0xff] %v15132_v34  ;;  %18659 = vst [vmem:[#allocation42_spill] sm:$0xff] %v15136_v32  ;;  %11198 = vmatpush3.bf16.msra.mxu0 %v15030_v2  ;;  %v9927_v2 = vld [vmem:[%s18250_s1 + $0x250] sm:$0xff]  ;;  %v9942_v32 = vld [vmem:[%s18250_s1 + $0x2c8] sm:$0xff] }
 0x89a   : > { %11199 = vmatprep.subr.bf16.mxu0 %v15032_v11  ;;  %v15140_v59 = vpop.f32.mrf.mxu1 }
 0x89b   : > { %18660 = vst [vmem:[#allocation56_spill] sm:$0xff] %v15140_v59 }
 0x89c   : > { %v15142_v55 = vpop.f32.mrf.mxu1 }
 0x89d   : > { %18661 = vst [vmem:[#allocation50_spill] sm:$0xff] %v15142_v55  ;;  %11200 = vmatpush3.bf16.msra.mxu0 %v15032_v11  ;;  %v9925_v55 = vld [vmem:[%s18250_s1 + $0x240] sm:$0xff] }
 0x89e   : > { %11225 = vmatprep.subr.bf16.mxu0 %v15144_v21  ;;  %v15148_v45 = vpop.f32.mrf.mxu1 }
 0x89f   : > { %18663 = vst [vmem:[#allocation63_spill] sm:$0xff] %v15148_v45 }
 0x8a0   : > { %v15150_v1 = vpop.f32.mrf.mxu1 }
 0x8a1   : > { %18664 = vst [vmem:[#allocation55_spill] sm:$0xff] %v15150_v1 }
 0x8a2   : > { %v15152_v48 = vpop.f32.mrf.mxu1 }
 0x8a3   : > { %18665 = vst [vmem:[#allocation57_spill] sm:$0xff] %v15152_v48 }
 0x8a4   : > { %v15154_v29 = vpop.f32.mrf.mxu1 }
 0x8a5   : > { %18666 = vst [vmem:[#allocation65_spill] sm:$0xff] %v15154_v29 }
 0x8a6   : > { %v11155_v9 = vpop.f32.mrf.mxu1 }
 0x8a7   : > { %v15162_v11 = vadd.f32 %v11155_v9, %v9927_v2  ;;  %v9931_v9 = vld [vmem:[%s18250_s1 + $0x270] sm:$0xff] }
 0x8a8   : > { %v4514_v56 = vpop.f32.mrf.mxu1 }
 0x8a9   : > { %v15167_v61 = vadd.f32 %v9925_v55, %v4514_v56  ;;  %v4785_v29 = vsel %vm1917_vm1, %v15162_v11, -inf }
 0x8aa   : > { %4786 = vmax.xlane.f32.xlu0 %v4785_v29  ;;  %v11156_v20 = vpop.f32.mrf.mxu1 }
 0x8ab   : > { %v15174_v62 = vadd.f32 %v11156_v20, %v9928_v15  ;;  %v4779_v55 = vsel %vm1917_vm1, %v15167_v61, -inf  ;;  %v9929_v20 = vld [vmem:[%s18250_s1 + $0x260] sm:$0xff] }
 0x8ac   : > { %v4517_v2 = vpop.f32.mrf.mxu1 }
 0x8ad   : > { %v15179_v60 = vadd.f32 %v9926_v7, %v4517_v2  ;;  %v4788_v56 = vsel %vm1917_vm1, %v15174_v62, -inf  ;;  %v9932_v7 = vld [vmem:[%s18250_s1 + $0x278] sm:$0xff] }
 0x8ae   : > { %4789 = vmax.xlane.f32.xlu1 %v4788_v56  ;;  %4780 = vmax.xlane.f32.xlu0 %v4779_v55  ;;  %v11159_v29 = vpop.f32.mrf.mxu1 }
 0x8af   : > { %v15188_v15 = vadd.f32 %v11159_v29, %v9931_v9  ;;  %v4782_v48 = vsel %vm1917_vm1, %v15179_v60, -inf  ;;  %v9930_v9 = vld [vmem:[%s18250_s1 + $0x268] sm:$0xff] }
 0x8b0   : > { %v4530_v63 = vpop.f32.mrf.mxu1 }
 0x8b1   : > { %v15193_v2 = vadd.f32 %v9929_v20, %v4530_v63  ;;  %v4797_v56 = vsel %vm1917_vm1, %v15188_v15, -inf }
 0x8b2   : > { %4783 = vmax.xlane.f32.xlu1 %v4782_v48  ;;  %4798 = vmax.xlane.f32.xlu0 %v4797_v56  ;;  %v11160_v55 = vpop.f32.mrf.mxu1 }
 0x8b3   : > { %v15202_v29 = vadd.f32 %v11160_v55, %v9932_v7  ;;  %v4791_v20 = vsel %vm1917_vm1, %v15193_v2, -inf  ;;  %v9943_v7 = vld [vmem:[%s18250_s1 + $0x2d0] sm:$0xff] }
 0x8b4   : > { %v4533_v1 = vpop.f32.mrf.mxu1 }
 0x8b5   : > { %v15204_v45 = vadd.f32 %v9930_v9, %v4533_v1  ;;  %v4800_v63 = vsel %vm1917_vm1, %v15202_v29, -inf  ;;  %v9941_v1 = vld [vmem:[%s18250_s1 + $0x2c0] sm:$0xff] }
 0x8b6   : > { %4801 = vmax.xlane.f32.xlu1 %v4800_v63  ;;  %4792 = vmax.xlane.f32.xlu0 %v4791_v20  ;;  %v9944_v63 = vld [vmem:[%s18250_s1 + $0x2d8] sm:$0xff] }
 0x8b7   : > { %v4794_v48 = vsel %vm1917_vm1, %v15204_v45, -inf }
 0x8ba   : > { %4795 = vmax.xlane.f32.xlu1 %v4794_v48 }
 0x8c6   : > { %v11187_v56 = vpop.f32.mrf.mxu1 }
 0x8c7   : > { %v15218_v55 = vadd.f32 %v11187_v56, %v9943_v7  ;;  %v9947_v56 = vld [vmem:[%s18250_s1 + $0x2f0] sm:$0xff] }
 0x8c8   : > { %v4724_v9 = vpop.f32.mrf.mxu1 }
 0x8c9   : > { %v15223_v20 = vadd.f32 %v9941_v1, %v4724_v9  ;;  %v4833_v48 = vsel %vm1917_vm1, %v15218_v55, -inf }
 0x8ca   : > { %4834 = vmax.xlane.f32.xlu0 %v4833_v48  ;;  %v11188_v59 = vpop.f32.mrf.mxu1 }
 0x8cb   : > { %v15230_v13 = vadd.f32 %v11188_v59, %v9944_v63  ;;  %v4827_v9 = vsel %vm1917_vm1, %v15223_v20, -inf  ;;  %v9945_v59 = vld [vmem:[%s18250_s1 + $0x2e0] sm:$0xff] }
 0x8cc   : > { %v4727_v7 = vpop.f32.mrf.mxu1 }
 0x8cd   : > { %v15235_v44 = vadd.f32 %v9942_v32, %v4727_v7  ;;  %v4836_v1 = vsel %vm1917_vm1, %v15230_v13, -inf  ;;  %v9948_v32 = vld [vmem:[%s18250_s1 + $0x2f8] sm:$0xff] }
 0x8ce   : > { %4837 = vmax.xlane.f32.xlu1 %v4836_v1  ;;  %4828 = vmax.xlane.f32.xlu0 %v4827_v9  ;;  %v11191_v48 = vpop.f32.mrf.mxu1 }
 0x8cf   : > { %v15244_v63 = vadd.f32 %v11191_v48, %v9947_v56  ;;  %v4830_v58 = vsel %vm1917_vm1, %v15235_v44, -inf  ;;  %v9946_v56 = vld [vmem:[%s18250_s1 + $0x2e8] sm:$0xff] }
 0x8d0   : > { %v4740_v49 = vpop.f32.mrf.mxu1 }
 0x8d1   : > { %v15249_v7 = vadd.f32 %v9945_v59, %v4740_v49  ;;  %v4845_v1 = vsel %vm1917_vm1, %v15244_v63, -inf }
 0x8d2   : > { %4831 = vmax.xlane.f32.xlu1 %v4830_v58  ;;  %4846 = vmax.xlane.f32.xlu0 %v4845_v1  ;;  %v11192_v9 = vpop.f32.mrf.mxu1  ;;  %v15268_v1 = vpop.f32.mrf.mxu0 }
 0x8d3   : > { %v15258_v48 = vadd.f32 %v11192_v9, %v9948_v32  ;;  %v4839_v59 = vsel %vm1917_vm1, %v15249_v7, -inf  ;;  %18667 = vst [vmem:[#allocation67_spill] sm:$0xff] %v15268_v1 }
 0x8d4   : > { %v4743_v24 = vpop.f32.mrf.mxu1  ;;  %v15270_v33 = vpop.f32.mrf.mxu0 }
 0x8d5   : > { %v15260_v43 = vadd.f32 %v9946_v56, %v4743_v24  ;;  %v4848_v49 = vsel %vm1917_vm1, %v15258_v48, -inf  ;;  %18668 = vst [vmem:[#allocation51_spill] sm:$0xff] %v15270_v33 }
 0x8d6   : > { %4849 = vmax.xlane.f32.xlu1 %v4848_v49  ;;  %4840 = vmax.xlane.f32.xlu0 %v4839_v59  ;;  %v15272_v32 = vpop.f32.mrf.mxu0 }
 0x8d7   : > { %v4842_v58 = vsel %vm1917_vm1, %v15260_v43, -inf  ;;  %18669 = vst [vmem:[#allocation48_spill] sm:$0xff] %v15272_v32 }
 0x8d8   : > { %v15274_v24 = vpop.f32.mrf.mxu0 }
 0x8d9   : > { %18670 = vst [vmem:[#allocation69_spill] sm:$0xff] %v15274_v24 }
 0x8da   : > { %4843 = vmax.xlane.f32.xlu1 %v4842_v58  ;;  %v15276_v9 = vpop.f32.mrf.mxu0 }
 0x8db   : > { %18671 = vst [vmem:[#allocation71_spill] sm:$0xff] %v15276_v9 }
 0x8df   : > { %v15278_v56 = vpop.f32.mrf.mxu0 }
 0x8e0   : > { %18672 = vst [vmem:[#allocation66_spill] sm:$0xff] %v15278_v56 }
 0x8e1   : > { %v15280_v0 = vpop.f32.mrf.mxu0 }
 0x8e2   : > { %18673 = vst [vmem:[#allocation64_spill] sm:$0xff] %v15280_v0 }
 0x8e3   : > { %v15282_v49 = vpop.f32.mrf.mxu0 }
 0x8e4   : > { %18674 = vst [vmem:[#allocation73_spill] sm:$0xff] %v15282_v49 }
 0x8e5   : > { %v15284_v59 = vpop.f32.mrf.mxu0 }
 0x8e6   : > { %18675 = vst [vmem:[#allocation75_spill] sm:$0xff] %v15284_v59 }
 0x8e7   : > { %v15286_v51 = vpop.f32.mrf.mxu0 }
 0x8e8   : > { %18676 = vst [vmem:[#allocation70_spill] sm:$0xff] %v15286_v51 }
 0x8e9   : > { %v15288_v58 = vpop.f32.mrf.mxu0 }
 0x8ea   : > { %18677 = vst [vmem:[#allocation68_spill] sm:$0xff] %v15288_v58 }
 0x8eb   : > { %v15290_v1 = vpop.f32.mrf.mxu0 }
 0x8ec   : > { %18678 = vst [vmem:[#allocation74_spill] sm:$0xff] %v15290_v1 }
 0x8ed   : > { %v15292_v16 = vpop.f32.mrf.mxu0 }
 0x8ee   : > { %18679 = vst [vmem:[#allocation72_spill] sm:$0xff] %v15292_v16 }
 0x8ef   : > { %v15294_v5 = vpop.f32.mrf.mxu0 }
 0x8f0   : > { %18680 = vst [vmem:[#allocation76_spill] sm:$0xff] %v15294_v5 }
 0x8f1   : > { %v15296_v24 = vpop.f32.mrf.mxu0 }
 0x8f2   : > { %18681 = vst [vmem:[#allocation77_spill] sm:$0xff] %v15296_v24  ;;  %v9920_v24 = vld [vmem:[%s18250_s1 + $0x218] sm:$0xff] }
 0x8f3   : > { %v15298_v9 = vpop.f32.mrf.mxu0 }
 0x8f4   : > { %18682 = vst [vmem:[#allocation78_spill] sm:$0xff] %v15298_v9 }
 0x8f5   : > { %v15300_v56 = vpop.f32.mrf.mxu0 }
 0x8f6   : > { %18683 = vst [vmem:[#allocation79_spill] sm:$0xff] %v15300_v56  ;;  %v9919_v56 = vld [vmem:[%s18250_s1 + $0x210] sm:$0xff] }
 0x920   : > { %v15302_v0 = vpop.f32.mrf.mxu0 }
 0x921   : > { %18684 = vst [vmem:[#allocation80_spill] sm:$0xff] %v15302_v0  ;;  %v15326_v0 = vpop.permute.xlu1 %5305 }
 0x922   : > { %v15304_v49 = vpop.f32.mrf.mxu0  ;;  %18692 = vst [vmem:[#allocation88_spill] sm:$0xff] %v15326_v0 }
 0x923   : > { %18685 = vst [vmem:[#allocation81_spill] sm:$0xff] %v15304_v49  ;;  %v9917_v49 = vld [vmem:[%s18250_s1 + $0x200] sm:$0xff] }
 0x924   : > { %v15306_v59 = vpop.f32.mrf.mxu0 }
 0x925   : > { %18686 = vst [vmem:[#allocation82_spill] sm:$0xff] %v15306_v59 }
 0x926   : > { %v15308_v51 = vpop.f32.mrf.mxu0 }
 0x927   : > { %18687 = vst [vmem:[#allocation83_spill] sm:$0xff] %v15308_v51 }
 0x928   : > { %v15310_v58 = vpop.f32.mrf.mxu0 }
 0x929   : > { %18688 = vst [vmem:[#allocation84_spill] sm:$0xff] %v15310_v58 }
 0x92a   : > { %v15312_v1 = vpop.f32.mrf.mxu0 }
 0x92b   : > { %18689 = vst [vmem:[#allocation85_spill] sm:$0xff] %v15312_v1 }
 0x92c   : > { %v15314_v16 = vpop.f32.mrf.mxu0 }
 0x92d   : > { %18690 = vst [vmem:[#allocation86_spill] sm:$0xff] %v15314_v16 }
 0x92e   : > { %v15316_v5 = vpop.f32.mrf.mxu0 }
 0x92f   : > { %18691 = vst [vmem:[#allocation87_spill] sm:$0xff] %v15316_v5 }
 0x930   : > { %v11139_v9 = vpop.f32.mrf.mxu0 }
 0x931   : > { %v15324_v59 = vadd.f32 %v11139_v9, %v9919_v56  ;;  %v9918_v9 = vld [vmem:[%s18250_s1 + $0x208] sm:$0xff] }
 0x932   : > { %v4409_v51 = vpop.f32.mrf.mxu0 }
 0x933   : > { %v15328_v58 = vadd.f32 %v9917_v49, %v4409_v51  ;;  %v4787_v1 = vpop.xlane.xlu0 %4786  ;;  %v4761_v5 = vsel %vm1917_vm1, %v15324_v59, -inf }
 0x934   : > { %v4861_v16 = vsub.f32 %v15162_v11, %v4787_v1  ;;  %v11140_v54 = vpop.f32.mrf.mxu0  ;;  %4762 = vmax.xlane.f32.xlu0 %v4761_v5  ;;  %v9923_v11 = vld [vmem:[%s18250_s1 + $0x230] sm:$0xff] }
 0x935   : > { %v15339_v51 = vadd.f32 %v11140_v54, %v9920_v24  ;;  %v4755_v1 = vsel %vm1917_vm1, %v15328_v58, -inf }
 0x936   : > { %v4903_v56 = vmul.f32 1.442695, %v4861_v16  ;;  %v4412_v32 = vpop.f32.mrf.mxu0 }
 0x937   : > { %v15341_v49 = vadd.f32 %v9918_v9, %v4412_v32  ;;  %v4790_v42 = vpop.xlane.xlu1 %4789  ;;  %v4781_v33 = vpop.xlane.xlu0 %4780 }
 0x938   : > { %11973 = vpow2.f32 %v4903_v56  ;;  %v4862_v5 = vsub.f32 %v15174_v62, %v4790_v42  ;;  %v4859_v34 = vsub.f32 %v15167_v61, %v4781_v33  ;;  %v11143_v16 = vpop.f32.mrf.mxu0  ;;  %4756 = vmax.xlane.f32.xlu0 %v4755_v1  ;;  %v9921_v42 = vld [vmem:[%s18250_s1 + $0x220] sm:$0xff]  ;;  %v4764_v62 = vsel %vm1917_vm1, %v15339_v51, -inf  ;;  %v9922_v1 = vld [vmem:[%s18250_s1 + $0x228] sm:$0xff] }
 0x939   : > { %v4758_v54 = vsel %vm1917_vm1, %v15341_v49, -inf  ;;  %v15352_v24 = vadd.f32 %v11143_v16, %v9923_v11 }
 0x93a   : > { %v4899_v32 = vmul.f32 1.442695, %v4859_v34  ;;  %v4425_v9 = vpop.f32.mrf.mxu0  ;;  %4759 = vmax.xlane.f32.xlu1 %v4758_v54  ;;  %v4905_v8 = vmul.f32 1.442695, %v4862_v5 }
 0x93b   : > { %v4784_v61 = vpop.xlane.xlu1 %4783  ;;  %v4799_v33 = vpop.xlane.xlu0 %4798  ;;  %v15369_v16 = vadd.f32 %v9921_v42, %v4425_v9  ;;  %v4773_v46 = vsel %vm1917_vm1, %v15352_v24, -inf }
 0x93c   : > { %v4860_v34 = vsub.f32 %v15179_v60, %v4784_v61  ;;  %v4865_v56 = vsub.f32 %v15188_v15, %v4799_v33  ;;  %v11144_v11 = vpop.f32.mrf.mxu0  ;;  %4765 = vmax.xlane.f32.xlu0 %v4764_v62  ;;  %11975 = vpow2.f32 %v4899_v32 }
 0x93d   : > { %v15367_v5 = vadd.f32 %v11144_v11, %v9924_v26  ;;  %11977 = vpow2.f32 %v4905_v8 }
 0x93e   : > { %v4911_v54 = vmul.f32 1.442695, %v4865_v56  ;;  %v4428_v50 = vpop.f32.mrf.mxu0  ;;  %v4901_v60 = vmul.f32 1.442695, %v4860_v34 }
 0x93f   : > { %v15373_v61 = vadd.f32 %v9922_v1, %v4428_v50  ;;  %v4802_v15 = vpop.xlane.xlu1 %4801  ;;  %v4793_v33 = vpop.xlane.xlu0 %4792  ;;  %v4776_v62 = vsel %vm1917_vm1, %v15367_v5, -inf  ;;  %v4767_v50 = vsel %vm1917_vm1, %v15369_v16, -inf }
 0x940   : > { %v4863_v32 = vsub.f32 %v15193_v2, %v4793_v33  ;;  %4777 = vmax.xlane.f32.xlu1 %v4776_v62  ;;  %4774 = vmax.xlane.f32.xlu0 %v4773_v46  ;;  %11979 = vpow2.f32 %v4911_v54  ;;  %v4866_v26 = vsub.f32 %v15202_v29, %v4802_v15  ;;  %v9935_v62 = vld [vmem:[%s18250_s1 + $0x290] sm:$0xff] }
 0x941   : > { %11981 = vpow2.f32 %v4901_v60  ;;  %v4770_v8 = vsel %vm1917_vm1, %v15373_v61, -inf }
 0x942   : > { %v4907_v9 = vmul.f32 1.442695, %v4863_v32  ;;  %v4913_v46 = vmul.f32 1.442695, %v4866_v26 }
 0x943   : > { %v4796_v42 = vpop.xlane.xlu1 %4795 }
 0x944   : > { %v4864_v34 = vsub.f32 %v15204_v45, %v4796_v42  ;;  %4771 = vmax.xlane.f32.xlu1 %v4770_v8  ;;  %4768 = vmax.xlane.f32.xlu0 %v4767_v50  ;;  %11983 = vpow2.f32 %v4907_v9 }
 0x945   : > { %v15384_v56 = vpop.eup %11973 }
 0x946   : > { %v4909_v2 = vmul.f32 1.442695, %v4864_v34  ;;  %v4977_v29 = vsel %vm1917_vm1, %v15384_v56, 0.0 }
 0x948   : > { %11985 = vpow2.f32 %v4909_v2  ;;  %4978 = vadd.xlane.f32.xlu1 %v4977_v29  ;;  %v9936_v2 = vld [vmem:[%s18250_s1 + $0x298] sm:$0xff] }
 0x949   : > { %v15388_v11 = vpop.eup %11975  ;;  %11987 = vpow2.f32 %v4913_v46 }
 0x94a   : > { %v4971_v1 = vsel %vm1917_vm1, %v15388_v11, 0.0  ;;  %v15392_v54 = vpop.eup %11977 }
 0x94b   : > { %v4980_v15 = vsel %vm1917_vm1, %v15392_v54, 0.0 }
 0x94c   : > { %4972 = vadd.xlane.f32.xlu1 %v4971_v1 }
 0x94d   : > { %v15394_v45 = vpop.eup %11979 }
 0x94e   : > { %v4989_v60 = vsel %vm1917_vm1, %v15394_v45, 0.0  ;;  %v15400_v33 = vpop.eup %11981 }
 0x94f   : > { %4990 = vadd.xlane.f32.xlu0 %v4989_v60  ;;  %v4974_v34 = vsel %vm1917_vm1, %v15400_v33, 0.0 }
 0x950   : > { %v11171_v32 = vpop.f32.mrf.mxu0  ;;  %4981 = vadd.xlane.f32.xlu1 %v4980_v15 }
 0x951   : > { %v15405_v26 = vpop.eup %11983  ;;  %v15407_v42 = vadd.f32 %v11171_v32, %v9935_v62  ;;  %v9933_v32 = vld [vmem:[%s18250_s1 + $0x280] sm:$0xff] }
 0x952   : > { %v4619_v9 = vpop.f32.mrf.mxu0  ;;  %v4983_v50 = vsel %vm1917_vm1, %v15405_v26, 0.0 }
 0x953   : > { %v4835_v8 = vpop.xlane.xlu0 %4834  ;;  %4984 = vadd.xlane.f32.xlu0 %v4983_v50  ;;  %v4809_v50 = vsel %vm1917_vm1, %v15407_v42, -inf  ;;  %v15434_v25 = vadd.f32 %v9933_v32, %v4619_v9  ;;  %v9940_v9 = vld [vmem:[%s18250_s1 + $0x2b8] sm:$0xff]  ;;  %v9937_v32 = vld [vmem:[%s18250_s1 + $0x2a0] sm:$0xff] }
 0x954   : > { %v4877_v46 = vsub.f32 %v15218_v55, %v4835_v8  ;;  %v11172_v29 = vpop.f32.mrf.mxu0  ;;  %4975 = vadd.xlane.f32.xlu1 %v4974_v34  ;;  %v9934_v34 = vld [vmem:[%s18250_s1 + $0x288] sm:$0xff] }
 0x955   : > { %v15417_v1 = vpop.eup %11985  ;;  %v15426_v8 = vadd.f32 %v11172_v29, %v9936_v2 }
 0x956   : > { %v4622_v60 = vpop.f32.mrf.mxu0  ;;  %v4986_v15 = vsel %vm1917_vm1, %v15417_v1, 0.0  ;;  %v15421_v62 = vpop.eup %11987  ;;  %v4935_v55 = vmul.f32 1.442695, %v4877_v46 }
 0x957   : > { %v4829_v41 = vpop.xlane.xlu0 %4828  ;;  %4810 = vmax.xlane.f32.xlu0 %v4809_v50  ;;  %v4992_v46 = vsel %vm1917_vm1, %v15421_v62, 0.0  ;;  %v15438_v2 = vadd.f32 %v9934_v34, %v4622_v60 }
 0x958   : > { %v4875_v0 = vsub.f32 %v15223_v20, %v4829_v41  ;;  %v11175_v21 = vpop.f32.mrf.mxu0  ;;  %4987 = vadd.xlane.f32.xlu1 %v4986_v15  ;;  %11989 = vpow2.f32 %v4935_v55  ;;  %v4812_v41 = vsel %vm1917_vm1, %v15426_v8, -inf }
 0x959   : > { %v15449_v60 = vadd.f32 %v11175_v21, %v9939_v57  ;;  %v9938_v57 = vld [vmem:[%s18250_s1 + $0x2a8] sm:$0xff] }
 0x95a   : > { %v4635_v23 = vpop.f32.mrf.mxu0  ;;  %v4931_v29 = vmul.f32 1.442695, %v4875_v0  ;;  %v4803_v0 = vsel %vm1917_vm1, %v15434_v25, -inf }
 0x95b   : > { %v4847_v19 = vpop.xlane.xlu0 %4846  ;;  %4993 = vadd.xlane.f32.xlu0 %v4992_v46  ;;  %v15464_v46 = vadd.f32 %v9937_v32, %v4635_v23 }
 0x95c   : > { %v4881_v20 = vsub.f32 %v15244_v63, %v4847_v19  ;;  %v11176_v15 = vpop.f32.mrf.mxu0  ;;  %4813 = vmax.xlane.f32.xlu1 %v4812_v41  ;;  %11991 = vpow2.f32 %v4931_v29  ;;  %v4806_v63 = vsel %vm1917_vm1, %v15438_v2, -inf  ;;  %v4821_v29 = vsel %vm1917_vm1, %v15449_v60, -inf }
 0x95d   : > { %v15456_v50 = vadd.f32 %v11176_v15, %v9940_v9 }
 0x95e   : > { %v4943_v55 = vmul.f32 1.442695, %v4881_v20  ;;  %v4638_v34 = vpop.f32.mrf.mxu0 }
 0x95f   : > { %v4841_v19 = vpop.xlane.xlu0 %4840  ;;  %4804 = vmax.xlane.f32.xlu0 %v4803_v0  ;;  %v15468_v41 = vadd.f32 %v9938_v57, %v4638_v34  ;;  %v4824_v9 = vsel %vm1917_vm1, %v15456_v50, -inf  ;;  %v4838_v57 = vpop.xlane.xlu1 %4837 }
 0x960   : > { %v4879_v21 = vsub.f32 %v15249_v7, %v4841_v19  ;;  %4807 = vmax.xlane.f32.xlu1 %v4806_v63  ;;  %11993 = vpow2.f32 %v4943_v55  ;;  %v4815_v7 = vsel %vm1917_vm1, %v15464_v46, -inf }
 0x961   : > { %v4818_v23 = vsel %vm1917_vm1, %v15468_v41, -inf }
 0x962   : > { %v4939_v20 = vmul.f32 1.442695, %v4879_v21 }
 0x963   : > { %4822 = vmax.xlane.f32.xlu0 %v4821_v29  ;;  %v4832_v29 = vpop.xlane.xlu1 %4831 }
 0x964   : > { %4825 = vmax.xlane.f32.xlu1 %v4824_v9  ;;  %11995 = vpow2.f32 %v4939_v20  ;;  %v18696_v20 = vld [vmem:[#allocation13_spill] sm:$0xff] }
 0x965   : > { %v15476_v15 = vpop.eup %11989 }
 0x966   : > { %18693 = vst [vmem:[#allocation89_spill] sm:$0xff] %v15476_v15  ;;  %v5025_v0 = vsel %vm1917_vm1, %v15476_v15, 0.0 }
 0x967   : > { %4816 = vmax.xlane.f32.xlu0 %v4815_v7  ;;  %v4850_v9 = vpop.xlane.xlu1 %4849  ;;  %v4878_v7 = vsub.f32 %v15230_v13, %v4838_v57 }
 0x968   : > { %4819 = vmax.xlane.f32.xlu1 %v4818_v23 }
 0x969   : > { %v15480_v32 = vpop.eup %11991  ;;  %v4937_v23 = vmul.f32 1.442695, %v4878_v7 }
 0x96a   : > { %v5019_v55 = vsel %vm1917_vm1, %v15480_v32, 0.0 }
 0x96b   : > { %11997 = vpow2.f32 %v4937_v23 }
 0x96c   : > { %5026 = vadd.xlane.f32.xlu1 %v5025_v0  ;;  %v4876_v0 = vsub.f32 %v15235_v44, %v4832_v29 }
 0x96d   : > { %v15484_v19 = vpop.eup %11993 }
 0x96e   : > { %18694 = vst [vmem:[#allocation90_spill] sm:$0xff] %v15484_v19  ;;  %v5037_v63 = vsel %vm1917_vm1, %v15484_v19, 0.0  ;;  %v4933_v19 = vmul.f32 1.442695, %v4876_v0 }
 0x970   : > { %5020 = vadd.xlane.f32.xlu1 %v5019_v55  ;;  %v4844_v55 = vpop.xlane.xlu1 %4843  ;;  %11999 = vpow2.f32 %v4933_v19 }
 0x971   : > { %v15488_v34 = vpop.eup %11995 }
 0x972   : > { %18695 = vst [vmem:[#allocation91_spill] sm:$0xff] %v15488_v34  ;;  %v5031_v21 = vsel %vm1917_vm1, %v15488_v34, 0.0 }
 0x974   : > { %5038 = vadd.xlane.f32.xlu1 %v5037_v63  ;;  %v4880_v63 = vsub.f32 %v15260_v43, %v4844_v55 }
 0x976   : > { %v4941_v15 = vmul.f32 1.442695, %v4880_v63 }
 0x978   : > { %5032 = vadd.xlane.f32.xlu1 %v5031_v21  ;;  %12001 = vpow2.f32 %v4941_v15  ;;  %v15497_v34 = vpop.eup %11997 }
 0x979   : > { %18697 = vst [vmem:[#allocation92_spill] sm:$0xff] %v15497_v34  ;;  %v5028_v21 = vsel %vm1917_vm1, %v15497_v34, 0.0 }
 0x97d   : > { %5303 = vrot.lane.b32.xlu0 %v18696_v20, %s12591_s21  ;;  %v15501_v20 = vpop.eup %11999 }
 0x97e   : > { %v5022_v13 = vsel %vm1917_vm1, %v15501_v20, 0.0 }
 0x985   : > { %v15505_v44 = vpop.eup %12001 }
 0x986   : > { %18698 = vst [vmem:[#allocation93_spill] sm:$0xff] %v15505_v44  ;;  %v5034_v43 = vsel %vm1917_vm1, %v15505_v44, 0.0 }
 0x99c   : > { %5029 = vadd.xlane.f32.xlu0 %v5028_v21 }
 0x9a0   : > { %5023 = vadd.xlane.f32.xlu0 %v5022_v13 }
 0x9a4   : > { %5035 = vadd.xlane.f32.xlu0 %v5034_v43 }
 0x9bd   : > { %v4763_v19 = vpop.xlane.xlu0 %4762 }
 0x9be   : > { %v4853_v15 = vsub.f32 %v15324_v59, %v4763_v19 }
 0x9c0   : > { %v4887_v57 = vmul.f32 1.442695, %v4853_v15 }
 0x9c1   : > { %v4757_v29 = vpop.xlane.xlu0 %4756 }
 0x9c2   : > { %12003 = vpow2.f32 %v4887_v57  ;;  %v4851_v7 = vsub.f32 %v15328_v58, %v4757_v29  ;;  %v4882_v57 = vsub.f32 %v15258_v48, %v4850_v9 }
 0x9c3   : > { %v4760_v23 = vpop.xlane.xlu1 %4759 }
 0x9c4   : > { %v4883_v0 = vmul.f32 1.442695, %v4851_v7  ;;  %v4852_v55 = vsub.f32 %v15341_v49, %v4760_v23 }
 0x9c5   : > { %v4766_v63 = vpop.xlane.xlu0 %4765 }
 0x9c6   : > { %12005 = vpow2.f32 %v4883_v0  ;;  %v4854_v21 = vsub.f32 %v15339_v51, %v4766_v63  ;;  %v4885_v13 = vmul.f32 1.442695, %v4852_v55 }
 0x9c8   : > { %v4889_v34 = vmul.f32 1.442695, %v4854_v21 }
 0x9c9   : > { %v4778_v44 = vpop.xlane.xlu1 %4777  ;;  %v4775_v43 = vpop.xlane.xlu0 %4774 }
 0x9ca   : > { %12007 = vpow2.f32 %v4889_v34  ;;  %v4858_v59 = vsub.f32 %v15367_v5, %v4778_v44  ;;  %v4857_v19 = vsub.f32 %v15352_v24, %v4775_v43  ;;  %v4945_v5 = vmul.f32 1.442695, %v4882_v57 }
 0x9cb   : > { %12009 = vpow2.f32 %v4885_v13 }
 0x9cc   : > { %v4897_v15 = vmul.f32 1.442695, %v4858_v59  ;;  %v4895_v58 = vmul.f32 1.442695, %v4857_v19 }
 0x9cd   : > { %v4772_v29 = vpop.xlane.xlu1 %4771  ;;  %v4769_v49 = vpop.xlane.xlu0 %4768 }
 0x9ce   : > { %v4856_v7 = vsub.f32 %v15373_v61, %v4772_v29  ;;  %v4855_v51 = vsub.f32 %v15369_v16, %v4769_v49  ;;  %12011 = vpow2.f32 %v4895_v58 }
 0x9cf   : > { %v15518_v23 = vpop.eup %12003  ;;  %12013 = vpow2.f32 %v4897_v15 }
 0x9d0   : > { %v4893_v34 = vmul.f32 1.442695, %v4856_v7  ;;  %v4891_v0 = vmul.f32 1.442695, %v4855_v51  ;;  %v4953_v24 = vsel %vm1917_vm1, %v15518_v23, 0.0 }
 0x9d1   : > { %v4979_v44 = vpop.xlane.xlu1 %4978  ;;  %4954 = vadd.xlane.f32.xlu0 %v4953_v24 }
 0x9d2   : > { %12015 = vpow2.f32 %v4891_v0 }
 0x9d3   : > { %v15522_v55 = vpop.eup %12005  ;;  %12017 = vpow2.f32 %v4893_v34 }
 0x9d4   : > { %v4947_v48 = vsel %vm1917_vm1, %v15522_v55, 0.0  ;;  %12019 = vpow2.f32 %v4945_v5 }
 0x9d5   : > { %v4973_v16 = vpop.xlane.xlu1 %4972  ;;  %4948 = vadd.xlane.f32.xlu0 %v4947_v48 }
 0x9d7   : > { %v15526_v61 = vpop.eup %12007 }
 0x9d8   : > { %v4956_v9 = vsel %vm1917_vm1, %v15526_v61, 0.0  ;;  %v15530_v63 = vpop.eup %12009  ;;  %v4991_v21 = vpop.xlane.xlu0 %4990 }
 0x9d9   : > { %v4982_v13 = vpop.xlane.xlu1 %4981  ;;  %4957 = vadd.xlane.f32.xlu1 %v4956_v9  ;;  %v4950_v59 = vsel %vm1917_vm1, %v15530_v63, 0.0 }
 0x9da   : > { %12021 = vrcp.f32 %v4982_v13 }
 0x9db   : > { %v15532_v43 = vpop.eup %12011  ;;  %12023 = vrcp.f32 %v4973_v16 }
 0x9dc   : > { %v15536_v19 = vpop.eup %12013  ;;  %v4985_v15 = vpop.xlane.xlu0 %4984  ;;  %v4965_v57 = vsel %vm1917_vm1, %v15532_v43, 0.0  ;;  %12025 = vrcp.f32 %v4979_v44 }
 0x9dd   : > { %v4976_v58 = vpop.xlane.xlu1 %4975  ;;  %4951 = vadd.xlane.f32.xlu1 %v4950_v59  ;;  %4966 = vadd.xlane.f32.xlu0 %v4965_v57  ;;  %v4968_v49 = vsel %vm1917_vm1, %v15536_v19, 0.0 }
 0x9de   : > { %12027 = vrcp.f32 %v4976_v58 }
 0x9df   : > { %v15540_v29 = vpop.eup %12015  ;;  %12029 = vrcp.f32 %v4985_v15 }
 0x9e0   : > { %v15544_v7 = vpop.eup %12017  ;;  %v4811_v51 = vpop.xlane.xlu0 %4810  ;;  %v4959_v0 = vsel %vm1917_vm1, %v15540_v29, 0.0 }
 0x9e1   : > { %v4988_v34 = vpop.xlane.xlu1 %4987  ;;  %4969 = vadd.xlane.f32.xlu1 %v4968_v49  ;;  %v15548_v24 = vpop.eup %12019  ;;  %v4869_v5 = vsub.f32 %v15407_v42, %v4811_v51  ;;  %4960 = vadd.xlane.f32.xlu0 %v4959_v0  ;;  %v4962_v48 = vsel %vm1917_vm1, %v15544_v7, 0.0 }
 0x9e2   : > { %12031 = vrcp.f32 %v4988_v34  ;;  %v5040_v13 = vsel %vm1917_vm1, %v15548_v24, 0.0 }
 0x9e3   : > { %v4919_v44 = vmul.f32 1.442695, %v4869_v5  ;;  %12033 = vrcp.f32 %v4991_v21 }
 0x9e4   : > { %v4994_v16 = vpop.xlane.xlu0 %4993 }
 0x9e5   : > { %v4814_v9 = vpop.xlane.xlu1 %4813  ;;  %4963 = vadd.xlane.f32.xlu1 %v4962_v48  ;;  %12035 = vpow2.f32 %v4919_v44  ;;  %5041 = vadd.xlane.f32.xlu0 %v5040_v13 }
 0x9e6   : > { %v4870_v59 = vsub.f32 %v15426_v8, %v4814_v9  ;;  %12037 = vrcp.f32 %v4994_v16 }
 0x9e7   : > { %v12022_v42 = vpop.eup %12021 }
 0x9e8   : > { %v4921_v15 = vmul.f32 1.442695, %v4870_v59  ;;  %v12024_v57 = vpop.eup %12023  ;;  %v5086_v34 = vmul.f32 %v12022_v42, %v15392_v54 }
 0x9e9   : > { %v4808_v58 = vpop.xlane.xlu1 %4807  ;;  %v12026_v51 = vpop.eup %12025  ;;  %v5083_v44 = vmul.f32 %v12024_v57, %v15388_v11 }
 0x9ea   : > { %12039 = vpow2.f32 %v4921_v15  ;;  %v4868_v49 = vsub.f32 %v15438_v2, %v4808_v58  ;;  %v5085_v16 = vmul.f32 %v12026_v51, %v15384_v56  ;;  %v18699_v51 = vld [vmem:[#allocation62_spill] sm:$0xff] }
 0x9eb   : > { %v12028_v21 = vpop.eup %12027 }
 0x9ec   : > { %v4917_v0 = vmul.f32 1.442695, %v4868_v49  ;;  %v12030_v5 = vpop.eup %12029  ;;  %v5084_v8 = vmul.f32 %v12028_v21, %v15400_v33  ;;  %v5112_v15 = vpack.c.bf16 %v5086_v34, %v5085_v16 }
 0x9ed   : > { %v4826_v48 = vpop.xlane.xlu1 %4825  ;;  %v5087_v58 = vmul.f32 %v12030_v5, %v15405_v26  ;;  %v4805_v5 = vpop.xlane.xlu0 %4804 }
 0x9ee   : > { %v4874_v9 = vsub.f32 %v15456_v50, %v4826_v48  ;;  %12041 = vpow2.f32 %v4917_v0  ;;  %v5111_v59 = vpack.c.bf16 %v5084_v8, %v5083_v44  ;;  %v4867_v8 = vsub.f32 %v15434_v25, %v4805_v5 }
 0x9ef   : > { %v12032_v13 = vpop.eup %12031 }
 0x9f0   : > { %v4929_v2 = vmul.f32 1.442695, %v4874_v9  ;;  %v5088_v54 = vmul.f32 %v12032_v13, %v15417_v1  ;;  %11217 = vmatprep.mubr.msk.bf16.mxu1 %vm1917_vm1, %v5111_v59  ;;  %v12034_v49 = vpop.eup %12033  ;;  %v4915_v13 = vmul.f32 1.442695, %v4867_v8 }
 0x9f1   : > { %v4820_v42 = vpop.xlane.xlu1 %4819  ;;  %11218 = vmatmul.mubr.msk.bf16.vlgmr.msra.gmra.mxu1 %vm1917_vm1, %v5112_v15  ;;  %v5089_v21 = vmul.f32 %v12034_v49, %v15394_v45  ;;  %v4823_v45 = vpop.xlane.xlu0 %4822 }
 0x9f2   : > { %v4872_v11 = vsub.f32 %v15468_v41, %v4820_v42  ;;  %v5113_v56 = vpack.c.bf16 %v5088_v54, %v5087_v58  ;;  %v15567_v33 = vpop.eup %12035  ;;  %12043 = vpow2.f32 %v4929_v2  ;;  %v4873_v59 = vsub.f32 %v15449_v60, %v4823_v45  ;;  %v18712_v45 = vld [vmem:[#allocation29_spill] sm:$0xff] }
 0x9f3   : > { %v12038_v50 = vpop.eup %12037  ;;  %v5001_v26 = vsel %vm1917_vm1, %v15567_v33, 0.0 }
 0x9f4   : > { %v4925_v57 = vmul.f32 1.442695, %v4872_v11  ;;  %11221 = vmatprep.mubr.msk.bf16.mxu1 %vm1917_vm1, %v5113_v56  ;;  %5002 = vadd.xlane.f32.xlu0 %v5001_v26  ;;  %v5090_v1 = vmul.f32 %v12038_v50, %v15421_v62  ;;  %v4927_v58 = vmul.f32 1.442695, %v4873_v59 }
 0x9f5   : > { %v4817_v2 = vpop.xlane.xlu0 %4816 }
 0x9f6   : > { %5301 = vrot.lane.b32.xlu1 %v18699_v51, %s12591_s21  ;;  %12045 = vpow2.f32 %v4925_v57  ;;  %v5114_v0 = vpack.c.bf16 %v5090_v1, %v5089_v21  ;;  %v4871_v54 = vsub.f32 %v15464_v46, %v4817_v2  ;;  %v15608_v46 = vpop.xlane.xlu1 %5026  ;;  %v18714_v2 = vld [vmem:[#allocation36_spill] sm:$0xff] }
 0x9f7   : > { %v15576_v41 = vpop.eup %12039  ;;  %12047 = vpow2.f32 %v4915_v13 }
 0x9f8   : > { %v5004_v34 = vsel %vm1917_vm1, %v15576_v41, 0.0  ;;  %12049 = vpow2.f32 %v4927_v58  ;;  %v4923_v25 = vmul.f32 1.442695, %v4871_v54 }
 0x9f9   : > { %5005 = vadd.xlane.f32.xlu0 %v5004_v34  ;;  %11222 = vmatmul.mubr.msk.bf16.gmra.mxu1 %vm1917_vm1, %v5114_v0  ;;  %v15614_v57 = vpop.permute.xlu0 %5303  ;;  %v18701_v34 = vld [vmem:[#allocation43_spill] sm:$0xff] }
 0x9fa   : > { %12051 = vpow2.f32 %v4923_v25  ;;  %v5021_v26 = vpop.xlane.xlu1 %5020 }
 0x9fb   : > { %v15581_v48 = vpop.eup %12041  ;;  %12053 = vrcp.f32 %v5021_v26 }
 0x9fc   : > { %v4998_v62 = vsel %vm1917_vm1, %v15581_v48, 0.0 }
 0x9fd   : > { %4999 = vadd.xlane.f32.xlu0 %v4998_v62  ;;  %v18703_v62 = vld [vmem:[#allocation21_spill] sm:$0xff] }
 0x9ff   : > { %v15585_v44 = vpop.eup %12043 }
 0xa00   : > { %v5016_v16 = vsel %vm1917_vm1, %v15585_v44, 0.0 }
 0xa01   : > { %5017 = vadd.xlane.f32.xlu0 %v5016_v16  ;;  %v18713_v16 = vld [vmem:[#allocation32_spill] sm:$0xff] }
 0xa03   : > { %v15590_v9 = vpop.eup %12045 }
 0xa04   : > { %v5010_v15 = vsel %vm1917_vm1, %v15590_v9, 0.0  ;;  %v15596_v42 = vpop.eup %12047 }
 0xa05   : > { %5011 = vadd.xlane.f32.xlu0 %v5010_v15  ;;  %v4995_v49 = vsel %vm1917_vm1, %v15596_v42, 0.0  ;;  %v15600_v11 = vpop.eup %12049 }
 0xa06   : > { %v5013_v60 = vsel %vm1917_vm1, %v15600_v11, 0.0 }
 0xa07   : > { %v15606_v56 = vpop.eup %12051 }
 0xa08   : > { %v5007_v50 = vsel %vm1917_vm1, %v15606_v56, 0.0 }
 0xa1a   : > { %4996 = vadd.xlane.f32.xlu1 %v4995_v49 }
 0xa1b   : > { %5396 = vrot.lane.b32.xlu0 %v18570_v28, %s12591_s21 }
 0xa1e   : > { %5014 = vadd.xlane.f32.xlu1 %v5013_v60 }
 0xa1f   : > { %5800 = vrot.lane.b32.xlu0 %v18571_v4, %s12592_s28  ;;  %v18700_v4 = vld [vmem:[#allocation41_spill] sm:$0xff] }
 0xa22   : > { %5008 = vadd.xlane.f32.xlu1 %v5007_v50  ;;  %v18715_v50 = vld [vmem:[#allocation39_spill] sm:$0xff] }
 0xa23   : > { %5796 = vrot.lane.b32.xlu0 %v18572_v36, %s12592_s28  ;;  %v12054_v36 = vpop.eup %12053 }
 0xa24   : > { %v5099_v0 = vmul.f32 %v12054_v36, %v15480_v32  ;;  %v18706_v32 = vld [vmem:[#allocation11_spill] sm:$0xff] }
 0xa25   : > { %v15618_v1 = vpop.xlane.xlu0 %5029 }
 0xa27   : > { %5786 = vrot.lane.b32.xlu0 %v18574_v52, %s12592_s28 }
 0xa29   : > { %v5024_v21 = vpop.xlane.xlu0 %5023 }
 0xa2a   : > { %12055 = vrcp.f32 %v5024_v21 }
 0xa2b   : > { %5905 = vrot.lane.b32.xlu0 %v18566_v27, %s12592_s28 }
 0xa2f   : > { %5790 = vrot.lane.b32.xlu0 %v13313_v17, %s12592_s28  ;;  %v18702_v17 = vld [vmem:[#allocation46_spill] sm:$0xff] }
 0xa33   : > { %5394 = vrot.lane.b32.xlu1 %v18700_v4, %s12591_s21  ;;  %5901 = vrot.lane.b32.xlu0 %v18575_v35, %s12592_s28  ;;  %v18704_v35 = vld [vmem:[#allocation7_spill] sm:$0xff] }
 0xa37   : > { %5392 = vrot.lane.b32.xlu1 %v18701_v34, %s12591_s21  ;;  %v12056_v52 = vpop.eup %12055  ;;  %5891 = vrot.lane.b32.xlu0 %v18577_v10, %s12592_s28  ;;  %v18705_v10 = vld [vmem:[#allocation5_spill] sm:$0xff] }
 0xa38   : > { %v5100_v27 = vmul.f32 %v12056_v52, %v15501_v20 }
 0xa3a   : > { %v5119_v5 = vpack.c.bf16 %v5100_v27, %v5099_v0 }
 0xa3b   : > { %5390 = vrot.lane.b32.xlu1 %v18702_v17, %s12591_s21  ;;  %6010 = vrot.lane.b32.xlu0 %v18703_v62, %s12592_s28 }
 0xa3c   : > { %11249 = vmatprep.mubr.msk.bf16.mxu1 %vm1917_vm1, %v5119_v5 }
 0xa3f   : > { %5798 = vrot.lane.b32.xlu1 %v18704_v35, %s12592_s28  ;;  %5895 = vrot.lane.b32.xlu0 %v18581_v38, %s12592_s28  ;;  %v18707_v38 = vld [vmem:[#allocation15_spill] sm:$0xff] }
 0xa43   : > { %5794 = vrot.lane.b32.xlu1 %v18573_v31, %s12592_s28  ;;  %6006 = vrot.lane.b32.xlu0 %v18579_v3, %s12592_s28  ;;  %v15667_v31 = vpop.xlane.xlu1 %5038  ;;  %v18708_v3 = vld [vmem:[#allocation24_spill] sm:$0xff] }
 0xa47   : > { %5788 = vrot.lane.b32.xlu1 %v18705_v10, %s12592_s28  ;;  %5996 = vrot.lane.b32.xlu0 %v18583_v39, %s12592_s28  ;;  %v15669_v39 = vpop.xlane.xlu0 %5035 }
 0xa4b   : > { %5903 = vrot.lane.b32.xlu1 %v18706_v32, %s12592_s28  ;;  %6115 = vrot.lane.b32.xlu0 %v18495_v53, %s12592_s28 }
 0xa4f   : > { %5792 = vrot.lane.b32.xlu1 %v18707_v38, %s12592_s28  ;;  %6000 = vrot.lane.b32.xlu0 %v18503_v22, %s12592_s28  ;;  %v18719_v38 = vld [vmem:[#allocation30_spill] sm:$0xff] }
 0xa53   : > { %5899 = vrot.lane.b32.xlu1 %v13361_v14, %s12592_s28  ;;  %6111 = vrot.lane.b32.xlu0 %v18584_v47, %s12592_s28  ;;  %v15677_v14 = vpop.xlane.xlu1 %5032 }
 0xa57   : > { %5893 = vrot.lane.b32.xlu1 %v18493_v18, %s12592_s28  ;;  %6101 = vrot.lane.b32.xlu0 %v18586_v37, %s12592_s28 }
 0xa5a   : > { %v4955_v53 = vpop.xlane.xlu0 %4954 }
 0xa5b   : > { %6008 = vrot.lane.b32.xlu1 %v13420_v30, %s12592_s28  ;;  %6105 = vrot.lane.b32.xlu0 %v18587_v6, %s12592_s28  ;;  %v18709_v30 = vld [vmem:[#allocation31_spill] sm:$0xff]  ;;  %v18710_v6 = vld [vmem:[#allocation26_spill] sm:$0xff] }
 0xa5e   : > { %v4949_v18 = vpop.xlane.xlu0 %4948 }
 0xa5f   : > { %5897 = vrot.lane.b32.xlu1 %v18497_v12, %s12592_s28  ;;  %6580 = vrot.lane.b32.xlu0 %v18588_v40, %s12592_s28  ;;  %v18711_v12 = vld [vmem:[#allocation34_spill] sm:$0xff] }
 0xa62   : > { %v4958_v22 = vpop.xlane.xlu1 %4957 }
 0xa63   : > { %6004 = vrot.lane.b32.xlu1 %v18708_v3, %s12592_s28  ;;  %12057 = vrcp.f32 %v4958_v22  ;;  %6576 = vrot.lane.b32.xlu0 %v18709_v30, %s12592_s28 }
 0xa64   : > { %12059 = vrcp.f32 %v4949_v18 }
 0xa65   : > { %12061 = vrcp.f32 %v4955_v53 }
 0xa66   : > { %v4952_v47 = vpop.xlane.xlu1 %4951  ;;  %v4967_v37 = vpop.xlane.xlu0 %4966 }
 0xa67   : > { %12063 = vrcp.f32 %v4952_v47  ;;  %5998 = vrot.lane.b32.xlu1 %v18710_v6, %s12592_s28  ;;  %6574 = vrot.lane.b32.xlu0 %v18711_v12, %s12592_s28 }
 0xa6a   : > { %v4970_v40 = vpop.xlane.xlu1 %4969  ;;  %v4961_v20 = vpop.xlane.xlu0 %4960 }
 0xa6b   : > { %6113 = vrot.lane.b32.xlu1 %v18712_v45, %s12592_s28  ;;  %12065 = vrcp.f32 %v4970_v40 }
 0xa6c   : > { %12067 = vrcp.f32 %v4961_v20 }
 0xa6d   : > { %12069 = vrcp.f32 %v4967_v37 }
 0xa6e   : > { %v4964_v8 = vpop.xlane.xlu1 %4963  ;;  %v5042_v0 = vpop.xlane.xlu0 %5041 }
 0xa6f   : > { %12071 = vrcp.f32 %v4964_v8  ;;  %6002 = vrot.lane.b32.xlu1 %v18713_v16, %s12592_s28 }
 0xa70   : > { %v12058_v13 = vpop.eup %12057 }
 0xa71   : > { %v12060_v59 = vpop.eup %12059  ;;  %v5078_v54 = vmul.f32 %v12058_v13, %v15526_v61  ;;  %v18716_v61 = vld [vmem:[#allocation47_spill] sm:$0xff] }
 0xa72   : > { %v12062_v15 = vpop.eup %12061  ;;  %v5075_v25 = vmul.f32 %v12060_v59, %v15522_v55  ;;  %v18717_v55 = vld [vmem:[#allocation45_spill] sm:$0xff] }
 0xa73   : > { %6109 = vrot.lane.b32.xlu1 %v18714_v2, %s12592_s28  ;;  %v5077_v60 = vmul.f32 %v12062_v15, %v15518_v23  ;;  %v18718_v23 = vld [vmem:[#allocation88_spill] sm:$0xff] }
 0xa74   : > { %v12064_v58 = vpop.eup %12063 }
 0xa75   : > { %v5076_v49 = vmul.f32 %v12064_v58, %v15530_v63  ;;  %v5108_v21 = vpack.c.bf16 %v5078_v54, %v5077_v60 }
 0xa77   : > { %6103 = vrot.lane.b32.xlu1 %v18715_v50, %s12592_s28  ;;  %v5107_v26 = vpack.c.bf16 %v5076_v49, %v5075_v25 }
 0xa78   : > { %v12066_v36 = vpop.eup %12065 }
 0xa79   : > { %11201 = vmatprep.mubr.msk.bf16.mxu0 %vm1917_vm1, %v5107_v26  ;;  %v12068_v52 = vpop.eup %12067  ;;  %v5082_v5 = vmul.f32 %v12066_v36, %v15536_v19 }
 0xa7a   : > { %11202 = vmatmul.mubr.msk.bf16.vlgmr.msra.gmra.mxu0 %vm1917_vm1, %v5108_v21  ;;  %v12070_v27 = vpop.eup %12069  ;;  %v5079_v62 = vmul.f32 %v12068_v52, %v15540_v29  ;;  %v5302_v29 = vpop.permute.xlu1 %5301  ;;  %v18720_v21 = vld [vmem:[#allocation92_spill] sm:$0xff]  ;;  %v18721_v52 = vld [vmem:[#allocation93_spill] sm:$0xff] }
 0xa7b   : > { %11226 = vmatpush3.bf16.msra.mxu0 %v18716_v61  ;;  %6107 = vrot.lane.b32.xlu1 %v18717_v55, %s12592_s28  ;;  %v5081_v32 = vmul.f32 %v12070_v27, %v15532_v43  ;;  %v15723_v43 = vld [vmem:[%s18255_s6 + $0x28] sm:$0xff]   ;;  %v18722_v61 = vld [vmem:[#allocation89_spill] sm:$0xff] }
 0xa7c   : > { %v12072_v63 = vpop.eup %12071  ;;  %11227 = vmatprep.subr.bf16.mxu0 %v18718_v23 }
 0xa7d   : > { %v5080_v35 = vmul.f32 %v12072_v63, %v15544_v7  ;;  %v5003_v10 = vpop.xlane.xlu0 %5002  ;;  %v5110_v18 = vpack.c.bf16 %v5082_v5, %v5081_v32 }
 0xa7f   : > { %11228 = vmatpush3.bf16.msra.mxu0 %v18718_v23  ;;  %6578 = vrot.lane.b32.xlu1 %v18719_v38, %s12592_s28  ;;  %v5109_v53 = vpack.c.bf16 %v5080_v35, %v5079_v62  ;;  %v18723_v23 = vld [vmem:[#allocation91_spill] sm:$0xff] }
 0xa80   : > { %11229 = vmatprep.subr.bf16.mxu0 %v15614_v57 }
 0xa81   : > { %11205 = vmatprep.mubr.msk.bf16.mxu0 %vm1917_vm1, %v5109_v53 }
 0xa82   : > { %11206 = vmatmul.mubr.msk.bf16.gmra.mxu0 %vm1917_vm1, %v5110_v18  ;;  %v5006_v19 = vpop.xlane.xlu0 %5005 }
 0xa83   : > { %11230 = vmatpush3.bf16.msra.mxu0 %v15614_v57  ;;  %12073 = vrcp.f32 %v5006_v19 }
 0xa84   : > { %11231 = vmatprep.subr.bf16.mxu0 %v5302_v29 }
 0xa86   : > { %v5000_v7 = vpop.xlane.xlu0 %4999 }
 0xa87   : > { %11232 = vmatpush3.bf16.msra.mxu0 %v5302_v29  ;;  %12075 = vrcp.f32 %v5000_v7  ;;  %v18724_v7 = vld [vmem:[#allocation90_spill] sm:$0xff] }
 0xa88   : > { %11257 = vmatprep.subr.bf16.mxu0 %v15723_v43  ;;  %12077 = vrcp.f32 %v5003_v10 }
 0xa8a   : > { %v5018_v22 = vpop.xlane.xlu0 %5017 }
 0xa8e   : > { %v5012_v3 = vpop.xlane.xlu0 %5011 }
 0xa90   : > { %v12074_v8 = vpop.eup %12073 }
 0xa92   : > { %v5397_v30 = vpop.permute.xlu0 %5396 }
 0xa93   : > { %11241 = vmatprep.subr.bf16.mxu1 %v5397_v30 }
 0xa94   : > { %11242 = vmatpush3.bf16.msra.mxu1 %v5397_v30  ;;  %v12076_v16 = vpop.eup %12075 }
 0xa95   : > { %v12078_v59 = vpop.eup %12077  ;;  %v5092_v2 = vmul.f32 %v12076_v16, %v15581_v48 }
 0xa96   : > { %v15726_v47 = vpop.permute.xlu0 %5800  ;;  %v5093_v54 = vmul.f32 %v12078_v59, %v15567_v33 }
 0xa9a   : > { %v15728_v37 = vpop.permute.xlu0 %5796 }
 0xa9e   : > { %v15730_v57 = vpop.permute.xlu0 %5786 }
 0xaa2   : > { %v15732_v12 = vpop.permute.xlu0 %5905 }
 0xaa3   : > { %v4997_v6 = vpop.xlane.xlu1 %4996  ;;  %v5929_v16 = vsel %vm1560_vm0, %v15732_v12, 0 }
 0xaa4   : > { %12079 = vrcp.f32 %v4997_v6 }
 0xaa5   : > { %12081 = vrcp.f32 %v15608_v46 }
 0xaa6   : > { %12083 = vrcp.f32 %v15618_v1  ;;  %v15738_v20 = vpop.permute.xlu0 %5790 }
 0xaa7   : > { %12085 = vrcp.f32 %v15669_v39  ;;  %v5015_v40 = vpop.xlane.xlu1 %5014  ;;  %v5094_v39 = vmul.f32 %v12074_v8, %v15576_v41  ;;  %v11570_v41 = vld [vmem:[%s18255_s6 + $0x20] sm:$0xff]  }
 0xaa8   : > { %12087 = vrcp.f32 %v15677_v14 }
 0xaa9   : > { %12089 = vrcp.f32 %v5015_v40  ;;  %v5116_v50 = vpack.c.bf16 %v5094_v39, %v5093_v54 }
 0xaaa   : > { %12091 = vrcp.f32 %v5012_v3  ;;  %v15741_v46 = vpop.permute.xlu0 %5901 }
 0xaab   : > { %12093 = vrcp.f32 %v5018_v22  ;;  %v5009_v45 = vpop.xlane.xlu1 %5008 }
 0xaac   : > { %12095 = vrcp.f32 %v5009_v45 }
 0xaad   : > { %12097 = vrcp.f32 %v5042_v0 }
 0xaae   : > { %12099 = vrcp.f32 %v15667_v31 }
 0xaaf   : > { %v5395_v13 = vpop.permute.xlu1 %5394 }
 0xab0   : > { %11243 = vmatprep.subr.bf16.mxu1 %v5395_v13 }
 0xab1   : > { %v12080_v1 = vpop.eup %12079  ;;  %11244 = vmatpush3.bf16.msra.mxu1 %v5395_v13 }
 0xab2   : > { %v12082_v14 = vpop.eup %12081  ;;  %v5091_v15 = vmul.f32 %v12080_v1, %v15596_v42  ;;  %v15751_v42 = vpop.permute.xlu0 %5891 }
 0xab3   : > { %v12084_v58 = vpop.eup %12083  ;;  %v5393_v25 = vpop.permute.xlu1 %5392  ;;  %v5101_v55 = vmul.f32 %v12082_v14, %v18722_v61  ;;  %v5923_v14 = vsel %vm1560_vm0, %v15741_v46, 0 }
 0xab4   : > { %v12086_v49 = vpop.eup %12085  ;;  %11245 = vmatprep.subr.bf16.mxu1 %v5393_v25  ;;  %v5115_v60 = vpack.c.bf16 %v5092_v2, %v5091_v15  ;;  %v5102_v36 = vmul.f32 %v12084_v58, %v18720_v21 }
 0xab5   : > { %v12088_v31 = vpop.eup %12087  ;;  %11246 = vmatpush3.bf16.msra.mxu1 %v5393_v25  ;;  %v5104_v0 = vmul.f32 %v12086_v49, %v18721_v52  ;;  %v11219_v52 = vpop.f32.mrf.mxu1 }
 0xab6   : > { %v12090_v26 = vpop.eup %12089  ;;  %11233 = vmatprep.mubr.msk.bf16.mxu0 %vm1917_vm1, %v5115_v60  ;;  %v5103_v5 = vmul.f32 %v12088_v31, %v18723_v23  ;;  %v5120_v35 = vpack.c.bf16 %v5102_v36, %v5101_v55  ;;  %v15765_v19 = vpop.permute.xlu0 %6010 }
 0xab7   : > { %v12092_v48 = vpop.eup %12091  ;;  %v5391_v33 = vpop.permute.xlu1 %5390  ;;  %11234 = vmatmul.mubr.msk.bf16.vlgmr.msra.gmra.mxu0 %vm1917_vm1, %v5116_v50  ;;  %v5097_v62 = vmul.f32 %v12090_v26, %v15600_v11 }
 0xab8   : > { %v12094_v27 = vpop.eup %12093  ;;  %11258 = vmatpush3.bf16.msra.mxu0 %v15723_v43  ;;  %11247 = vmatprep.subr.bf16.mxu1 %v5391_v33  ;;  %v5096_v32 = vmul.f32 %v12092_v48, %v15590_v9  ;;  %v5121_v53 = vpack.c.bf16 %v5104_v0, %v5103_v5  ;;  %v5824_v9 = vsel %vm1560_vm0, %v15726_v47, 0  ;;  %v5270_v0 = vpop.f32.mrf.mxu1 }
 0xab9   : > { %v12096_v63 = vpop.eup %12095  ;;  %11248 = vmatpush3.bf16.msra.mxu1 %v5391_v33  ;;  %11259 = vmatprep.subr.bf16.mxu0 %v11570_v41  ;;  %v5098_v18 = vmul.f32 %v12094_v27, %v15585_v44 }
 0xaba   : > { %11505 = vmatprep.subr.msk.bf16.mxu1 %vm1560_vm0, %v15726_v47  ;;  %v5095_v10 = vmul.f32 %v12096_v63, %v15606_v56  ;;  %v12098_v38 = vpop.eup %12097  ;;  %v5818_v47 = vsel %vm1560_vm0, %v15728_v37, 0  ;;  %v5896_v13 = vpop.permute.xlu0 %5895 }
 0xabb   : > { %v5799_v29 = vpop.permute.xlu1 %5798  ;;  %v12100_v11 = vpop.eup %12099  ;;  %v5118_v56 = vpack.c.bf16 %v5098_v18, %v5097_v62  ;;  %v5106_v44 = vmul.f32 %v12098_v38, %v15548_v24 }
 0xabc   : > { %11260 = vmatpush3.bf16.msra.mxu0 %v11570_v41  ;;  %11250 = vmatmul.mubr.msk.bf16.vlgmr.msra.gmra.mxu1 %vm1917_vm1, %v5120_v35  ;;  %v5117_v43 = vpack.c.bf16 %v5096_v32, %v5095_v10  ;;  %v5105_v22 = vmul.f32 %v12100_v11, %v18724_v7  ;;  %v5821_v6 = vsel %vm1560_vm0, %v5799_v29, 0  ;;  %v11220_v61 = vpop.f32.mrf.mxu1 }
 0xabd   : > { %11513 = vmatprep.subr.msk.bf16.mxu0 %vm1560_vm0, %v15765_v19  ;;  %11253 = vmatprep.mubr.msk.bf16.mxu1 %vm1917_vm1, %v5121_v53  ;;  %v6034_v53 = vsel %vm1560_vm0, %v15765_v19, 0 }
 0xabe   : > { %11294 = vmatpush3.bf16.xpose.msra.mxu1 %v5824_v9  ;;  %11237 = vmatprep.mubr.msk.bf16.mxu0 %vm1917_vm1, %v5117_v43  ;;  %v5122_v30 = vpack.c.bf16 %v5106_v44, %v5105_v22  ;;  %v15802_v39 = vpop.permute.xlu0 %6006  ;;  %v5273_v23 = vpop.f32.mrf.mxu1  ;;  %v5484_v22 = vpack.c.bf16 %v11220_v61, %v11219_v52  ;;  %v10003_v52 = vld [vmem:[%s18250_s1 + $0x300] sm:$0xff] }
 0xabf   : > { %11506 = vmatprep.subr.msk.bf16.mxu1 %vm1560_vm0, %v5799_v29  ;;  %11238 = vmatmul.mubr.msk.bf16.gmra.mxu0 %vm1917_vm1, %v5118_v56  ;;  %v5795_v3 = vpop.permute.xlu1 %5794  ;;  %v5483_v56 = vpack.c.bf16 %v5273_v23, %v5270_v0  ;;  %v10004_v23 = vld [vmem:[%s18250_s1 + $0x308] sm:$0xff] }
 0xac0   : > { %v5815_v8 = vsel %vm1560_vm0, %v5795_v3, 0  ;;  %v11223_v32 = vpop.f32.mrf.mxu1 }
 0xac2   : > { %v5286_v29 = vpop.f32.mrf.mxu1 }
 0xac3   : > { %v5789_v24 = vpop.permute.xlu1 %5788 }
 0xac4   : > { %11254 = vmatmul.mubr.msk.bf16.gmra.mxu1 %vm1917_vm1, %v5122_v30  ;;  %v11224_v44 = vpop.f32.mrf.mxu1  ;;  %v6028_v30 = vsel %vm1560_vm0, %v15802_v39, 0 }
 0xac5   : > { %11301 = vmatprep.mubr.msk.bf16.mxu1 %vm1560_vm0, %v15730_v57 }
 0xac6   : > { %11296 = vmatpush3.bf16.xpose.msra.mxu1 %v5821_v6  ;;  %v5289_v19 = vpop.f32.mrf.mxu1  ;;  %v5486_v6 = vpack.c.bf16 %v11224_v44, %v11223_v32  ;;  %v10008_v44 = vld [vmem:[%s18250_s1 + $0x328] sm:$0xff] }
 0xac7   : > { %11507 = vmatprep.subr.msk.bf16.mxu1 %vm1560_vm0, %v15728_v37  ;;  %v5904_v40 = vpop.permute.xlu1 %5903 }
 0xac8   : > { %v5926_v59 = vsel %vm1560_vm0, %v5904_v40, 0 }
 0xacb   : > { %v5793_v45 = vpop.permute.xlu1 %5792 }
 0xace   : > { %11298 = vmatpush3.bf16.xpose.msra.mxu1 %v5818_v47 }
 0xacf   : > { %11508 = vmatprep.subr.msk.bf16.mxu1 %vm1560_vm0, %v5795_v3  ;;  %v5900_v57 = vpop.permute.xlu1 %5899  ;;  %v5485_v3 = vpack.c.bf16 %v5289_v19, %v5286_v29  ;;  %v10010_v29 = vld [vmem:[%s18250_s1 + $0x338] sm:$0xff] }
 0xad0   : > { %v5920_v58 = vsel %vm1560_vm0, %v5900_v57, 0 }
 0xad3   : > { %v5894_v37 = vpop.permute.xlu1 %5893 }
 0xad6   : > { %11300 = vmatpush3.bf16.xpose.msra.mxu1 %v5815_v8 }
 0xad7   : > { %11509 = vmatprep.subr.msk.bf16.mxu1 %vm1560_vm0, %v15732_v12  ;;  %v15798_v1 = vpop.permute.xlu1 %6008 }
 0xad8   : > { %v6031_v7 = vsel %vm1560_vm0, %v15798_v1, 0 }
 0xadb   : > { %v5898_v12 = vpop.permute.xlu1 %5897 }
 0xadd   : > { %11302 = vmatmul.mubr.msk.bf16.vlgmr.msra.gmra.mxu1 %vm1560_vm0, %v5789_v24 }
 0xade   : > { %11305 = vmatprep.mubr.msk.bf16.mxu1 %vm1560_vm0, %v15738_v20  ;;  %11310 = vmatpush3.bf16.xpose.msra.mxu1 %v5929_v16  ;;  %v15806_v20 = vpop.permute.xlu0 %5996 }
 0xadf   : > { %11510 = vmatprep.subr.msk.bf16.mxu1 %vm1560_vm0, %v5904_v40  ;;  %v15811_v15 = vpop.permute.xlu1 %6004 }
 0xae0   : > { %v6025_v24 = vsel %vm1560_vm0, %v15811_v15, 0 }
 0xae2   : > { %v6116_v2 = vpop.permute.xlu0 %6115 }
 0xae3   : > { %v15815_v54 = vpop.permute.xlu1 %5998  ;;  %v6139_v49 = vsel %vm1560_vm0, %v6116_v2, 0 }
 0xae5   : > { %11306 = vmatmul.mubr.msk.bf16.gmra.mxu1 %vm1560_vm0, %v5793_v45 }
 0xae6   : > { %11312 = vmatpush3.bf16.xpose.msra.mxu1 %v5926_v59  ;;  %11317 = vmatprep.mubr.msk.bf16.mxu1 %vm1560_vm0, %v15751_v42  ;;  %v15817_v25 = vpop.permute.xlu0 %6000 }
 0xae7   : > { %11511 = vmatprep.subr.msk.bf16.mxu1 %vm1560_vm0, %v15741_v46  ;;  %v6114_v46 = vpop.permute.xlu1 %6113 }
 0xae8   : > { %v6136_v50 = vsel %vm1560_vm0, %v6114_v46, 0 }
 0xaea   : > { %v6112_v60 = vpop.permute.xlu0 %6111 }
 0xaeb   : > { %v15827_v41 = vpop.permute.xlu1 %6002  ;;  %v6133_v26 = vsel %vm1560_vm0, %v6112_v60, 0 }
 0xaee   : > { %11314 = vmatpush3.bf16.xpose.msra.mxu1 %v5923_v14  ;;  %v6102_v31 = vpop.permute.xlu0 %6101 }
 0xaef   : > { %11512 = vmatprep.subr.msk.bf16.mxu1 %vm1560_vm0, %v5900_v57  ;;  %v6110_v21 = vpop.permute.xlu1 %6109 }
 0xaf0   : > { %v6130_v36 = vsel %vm1560_vm0, %v6110_v21, 0 }
 0xaf2   : > { %v6106_v48 = vpop.permute.xlu0 %6105 }
 0xaf3   : > { %v6104_v42 = vpop.permute.xlu1 %6103 }
 0xaf6   : > { %11316 = vmatpush3.bf16.xpose.msra.mxu1 %v5920_v58  ;;  %v6581_v47 = vpop.permute.xlu0 %6580 }
 0xaf7   : > { %11517 = vmatprep.subr.msk.bf16.mxu1 %vm1560_vm0, %v6116_v2  ;;  %v6108_v33 = vpop.permute.xlu1 %6107 }
 0xafd   : > { %11318 = vmatmul.mubr.msk.bf16.vlgmr.msra.gmra.mxu1 %vm1560_vm0, %v5894_v37 }
 0xafe   : > { %11321 = vmatprep.mubr.msk.bf16.mxu1 %vm1560_vm0, %v5896_v13  ;;  %11342 = vmatpush3.bf16.xpose.msra.mxu1 %v6139_v49 }
 0xaff   : > { %11518 = vmatprep.subr.msk.bf16.mxu1 %vm1560_vm0, %v6114_v46 }
 0xb05   : > { %11322 = vmatmul.mubr.msk.bf16.gmra.mxu1 %vm1560_vm0, %v5898_v12 }
 0xb06   : > { %11344 = vmatpush3.bf16.xpose.msra.mxu1 %v6136_v50  ;;  %11349 = vmatprep.mubr.msk.bf16.mxu1 %vm1560_vm0, %v6102_v31 }
 0xb07   : > { %11519 = vmatprep.subr.msk.bf16.mxu1 %vm1560_vm0, %v6112_v60 }
 0xb0e   : > { %11346 = vmatpush3.bf16.xpose.msra.mxu1 %v6133_v26 }
 0xb0f   : > { %11520 = vmatprep.subr.msk.bf16.mxu1 %vm1560_vm0, %v6110_v21 }
 0xb16   : > { %11348 = vmatpush3.bf16.xpose.msra.mxu1 %v6130_v36 }
 0xb1d   : > { %11350 = vmatmul.mubr.msk.bf16.vlgmr.msra.gmra.mxu1 %vm1560_vm0, %v6104_v42 }
 0xb1e   : > { %11353 = vmatprep.mubr.msk.bf16.mxu1 %vm1560_vm0, %v6106_v48  ;;  %v10005_v48 = vld [vmem:[%s18250_s1 + $0x310] sm:$0xff] }
 0xb25   : > { %11354 = vmatmul.mubr.msk.bf16.gmra.mxu1 %vm1560_vm0, %v6108_v33 }
 0xb3a   : > { %v11203_v27 = vpop.f32.mrf.mxu0 }
 0xb3c   : > { %v5181_v55 = vpop.f32.mrf.mxu0 }
 0xb3e   : > { %v11204_v63 = vpop.f32.mrf.mxu0 }
 0xb3f   : > { %v5480_v35 = vpack.c.bf16 %v11204_v63, %v11203_v27 }
 0xb40   : > { %v5184_v5 = vpop.f32.mrf.mxu0 }
 0xb41   : > { %v5479_v62 = vpack.c.bf16 %v5184_v5, %v5181_v55  ;;  %v6579_v5 = vpop.permute.xlu1 %6578 }
 0xb42   : > { %v11207_v10 = vpop.f32.mrf.mxu0 }
 0xb43   : > { %11261 = vmatprep.mubr.msk.bf16.mxu0 %vm1560_vm0, %v5479_v62 }
 0xb44   : > { %v5197_v38 = vpop.f32.mrf.mxu0  ;;  %11262 = vmatmul.mubr.msk.bf16.vlgmr.msra.gmra.mxu0 %vm1560_vm0, %v5480_v35  ;;  %v6577_v35 = vpop.permute.xlu0 %6576 }
 0xb45   : > { %11326 = vmatpush3.bf16.xpose.msra.mxu0 %v6034_v53 }
 0xb46   : > { %11514 = vmatprep.subr.msk.bf16.mxu0 %vm1560_vm0, %v15798_v1  ;;  %v11208_v18 = vpop.f32.mrf.mxu0 }
 0xb47   : > { %v5482_v9 = vpack.c.bf16 %v11208_v18, %v11207_v10 }
 0xb48   : > { %v5200_v43 = vpop.f32.mrf.mxu0 }
 0xb49   : > { %v5481_v11 = vpack.c.bf16 %v5200_v43, %v5197_v38 }
 0xb4b   : > { %11265 = vmatprep.mubr.msk.bf16.mxu0 %vm1560_vm0, %v5481_v11 }
 0xb4c   : > { %11266 = vmatmul.mubr.msk.bf16.gmra.mxu0 %vm1560_vm0, %v5482_v9  ;;  %v10007_v9 = vld [vmem:[%s18250_s1 + $0x320] sm:$0xff] }
 0xb4d   : > { %11328 = vmatpush3.bf16.xpose.msra.mxu0 %v6031_v7  ;;  %11269 = vmatprep.mubr.msk.bf16.mxu0 %vm1560_vm0, %v5483_v56  ;;  %v6575_v7 = vpop.permute.xlu0 %6574 }
 0xb4e   : > { %11515 = vmatprep.subr.msk.bf16.mxu0 %vm1560_vm0, %v15802_v39 }
 0xb54   : > { %11270 = vmatmul.mubr.msk.bf16.gmra.mxu0 %vm1560_vm0, %v5484_v22 }
 0xb55   : > { %11330 = vmatpush3.bf16.xpose.msra.mxu0 %v6028_v30  ;;  %11273 = vmatprep.mubr.msk.bf16.mxu0 %vm1560_vm0, %v5485_v3 }
 0xb56   : > { %11516 = vmatprep.subr.msk.bf16.mxu0 %vm1560_vm0, %v15811_v15 }
 0xb5c   : > { %11274 = vmatmul.mubr.msk.bf16.gmra.mxu0 %vm1560_vm0, %v5486_v6 }
 0xb5d   : > { %11332 = vmatpush3.bf16.xpose.msra.mxu0 %v6025_v24 }
 0xb5e   : > { %11357 = vmatprep.subr.bf16.mxu0 %v6581_v47 }
 0xb77   : > { %v11235_v40 = vpop.f32.mrf.mxu0 }
 0xb79   : > { %v5359_v45 = vpop.f32.mrf.mxu0 }
 0xb7b   : > { %v11236_v8 = vpop.f32.mrf.mxu0 }
 0xb7c   : > { %v11251_v57 = vpop.f32.mrf.mxu1  ;;  %v5488_v59 = vpack.c.bf16 %v11236_v8, %v11235_v40  ;;  %v10013_v40 = vld [vmem:[%s18250_s1 + $0x350] sm:$0xff]  ;;  %v10011_v8 = vld [vmem:[%s18250_s1 + $0x340] sm:$0xff] }
 0xb7d   : > { %v5362_v16 = vpop.f32.mrf.mxu0 }
 0xb7e   : > { %v5487_v37 = vpack.c.bf16 %v5362_v16, %v5359_v45  ;;  %v5448_v13 = vpop.f32.mrf.mxu1 }
 0xb7f   : > { %v11239_v1 = vpop.f32.mrf.mxu0 }
 0xb80   : > { %v11252_v39 = vpop.f32.mrf.mxu1  ;;  %11277 = vmatprep.mubr.msk.bf16.mxu0 %vm1560_vm0, %v5487_v37  ;;  %v10014_v37 = vld [vmem:[%s18250_s1 + $0x358] sm:$0xff] }
 0xb81   : > { %v5375_v12 = vpop.f32.mrf.mxu0  ;;  %11278 = vmatmul.mubr.msk.bf16.gmra.mxu0 %vm1560_vm0, %v5488_v59  ;;  %v5492_v21 = vpack.c.bf16 %v11252_v39, %v11251_v57  ;;  %v10012_v39 = vld [vmem:[%s18250_s1 + $0x348] sm:$0xff] }
 0xb82   : > { %v5451_v14 = vpop.f32.mrf.mxu1 }
 0xb83   : > { %v11240_v15 = vpop.f32.mrf.mxu0  ;;  %v5491_v31 = vpack.c.bf16 %v5451_v14, %v5448_v13 }
 0xb84   : > { %v11255_v2 = vpop.f32.mrf.mxu1  ;;  %v5490_v60 = vpack.c.bf16 %v11240_v15, %v11239_v1  ;;  %v10017_v15 = vld [vmem:[%s18250_s1 + $0x370] sm:$0xff] }
 0xb85   : > { %v5378_v58 = vpop.f32.mrf.mxu0 }
 0xb86   : > { %v5489_v49 = vpack.c.bf16 %v5378_v58, %v5375_v12  ;;  %v5464_v46 = vpop.f32.mrf.mxu1 }
 0xb88   : > { %11281 = vmatprep.mubr.msk.bf16.mxu0 %vm1560_vm0, %v5489_v49  ;;  %v11256_v50 = vpop.f32.mrf.mxu1 }
 0xb89   : > { %11282 = vmatmul.mubr.msk.bf16.gmra.mxu0 %vm1560_vm0, %v5490_v60  ;;  %v5494_v42 = vpack.c.bf16 %v11256_v50, %v11255_v2  ;;  %v10015_v60 = vld [vmem:[%s18250_s1 + $0x360] sm:$0xff] }
 0xb8a   : > { %11285 = vmatprep.mubr.msk.bf16.mxu0 %vm1560_vm0, %v5491_v31  ;;  %v5467_v26 = vpop.f32.mrf.mxu1 }
 0xb8b   : > { %v5493_v36 = vpack.c.bf16 %v5467_v26, %v5464_v46  ;;  %v10018_v26 = vld [vmem:[%s18250_s1 + $0x378] sm:$0xff] }
 0xb91   : > { %11286 = vmatmul.mubr.msk.bf16.gmra.mxu0 %vm1560_vm0, %v5492_v21 }
 0xb92   : > { %11289 = vmatprep.mubr.msk.bf16.mxu0 %vm1560_vm0, %v5493_v36 }
 0xb99   : > { %11290 = vmatmul.mubr.msk.bf16.gmra.mxu0 %vm1560_vm0, %v5494_v42 }
 0xb9a   : > { %11333 = vmatprep.mubr.msk.bf16.mxu0 %vm1560_vm0, %v15806_v20  ;;  %v10006_v20 = vld [vmem:[%s18250_s1 + $0x318] sm:$0xff] }
 0xb9d   : > { %v11303_v33 = vpop.f32.mrf.mxu1 }
 0xb9e   : > { %v15873_v0 = vadd.f32 %v11303_v33, %v10005_v48  ;;  %v10016_v33 = vld [vmem:[%s18250_s1 + $0x368] sm:$0xff] }
 0xb9f   : > { %v5860_v27 = vpop.f32.mrf.mxu1 }
 0xba0   : > { %v15875_v61 = vadd.f32 %v10003_v52, %v5860_v27  ;;  %v6212_v55 = vsel %vm1917_vm1, %v15873_v0, -inf }
 0xba1   : > { %6213 = vmax.xlane.f32.xlu0 %v6212_v55  ;;  %v11304_v63 = vpop.f32.mrf.mxu1  ;;  %11334 = vmatmul.mubr.msk.bf16.vlgmr.msra.gmra.mxu0 %vm1560_vm0, %v15815_v54  ;;  %v10009_v54 = vld [vmem:[%s18250_s1 + $0x330] sm:$0xff] }
 0xba2   : > { %11358 = vmatpush3.bf16.msra.mxu0 %v6581_v47  ;;  %11337 = vmatprep.mubr.msk.bf16.mxu0 %vm1560_vm0, %v15817_v25  ;;  %v15889_v10 = vadd.f32 %v11304_v63, %v10006_v20  ;;  %v6206_v38 = vsel %vm1917_vm1, %v15875_v61, -inf }
 0xba3   : > { %v5863_v62 = vpop.f32.mrf.mxu1  ;;  %11359 = vmatprep.subr.bf16.mxu0 %v6579_v5 }
 0xba4   : > { %v15891_v32 = vadd.f32 %v10004_v23, %v5863_v62  ;;  %v6215_v11 = vsel %vm1917_vm1, %v15889_v10, -inf }
 0xba5   : > { %6207 = vmax.xlane.f32.xlu0 %v6206_v38  ;;  %v11307_v53 = vpop.f32.mrf.mxu1 }
 0xba6   : > { %11360 = vmatpush3.bf16.msra.mxu0 %v6579_v5  ;;  %v6209_v25 = vsel %vm1917_vm1, %v15891_v32, -inf  ;;  %v15903_v43 = vadd.f32 %v11307_v53, %v10009_v54  ;;  %v10029_v5 = vld [vmem:[%s18250_s1 + $0x3d0] sm:$0xff]  ;;  %v10030_v53 = vld [vmem:[%s18250_s1 + $0x3d8] sm:$0xff] }
 0xba7   : > { %6210 = vmax.xlane.f32.xlu1 %v6209_v25  ;;  %v5876_v18 = vpop.f32.mrf.mxu1  ;;  %11361 = vmatprep.subr.bf16.mxu0 %v6577_v35 }
 0xba8   : > { %v15917_v3 = vadd.f32 %v10007_v9, %v5876_v18  ;;  %v6224_v6 = vsel %vm1917_vm1, %v15903_v43, -inf }
 0xba9   : > { %6216 = vmax.xlane.f32.xlu0 %v6215_v11  ;;  %v11308_v56 = vpop.f32.mrf.mxu1  ;;  %11338 = vmatmul.mubr.msk.bf16.gmra.mxu0 %vm1560_vm0, %v15827_v41  ;;  %v10028_v11 = vld [vmem:[%s18250_s1 + $0x3c8] sm:$0xff] }
 0xbaa   : > { %v15915_v19 = vadd.f32 %v11308_v56, %v10010_v29  ;;  %11362 = vmatpush3.bf16.msra.mxu0 %v6577_v35  ;;  %v6218_v47 = vsel %vm1917_vm1, %v15917_v3, -inf  ;;  %v10027_v35 = vld [vmem:[%s18250_s1 + $0x3c0] sm:$0xff] }
 0xbab   : > { %v5879_v22 = vpop.f32.mrf.mxu1  ;;  %11363 = vmatprep.subr.bf16.mxu0 %v6575_v7 }
 0xbac   : > { %v15919_v30 = vadd.f32 %v10008_v44, %v5879_v22  ;;  %v6227_v41 = vsel %vm1917_vm1, %v15915_v19, -inf }
 0xbad   : > { %6225 = vmax.xlane.f32.xlu0 %v6224_v6  ;;  %6228 = vmax.xlane.f32.xlu1 %v6227_v41  ;;  %v10033_v6 = vld [vmem:[%s18250_s1 + $0x3f0] sm:$0xff] }
 0xbae   : > { %11364 = vmatpush3.bf16.msra.mxu0 %v6575_v7  ;;  %v6221_v24 = vsel %vm1917_vm1, %v15919_v30, -inf }
 0xbb1   : > { %6222 = vmax.xlane.f32.xlu1 %v6221_v24  ;;  %6219 = vmax.xlane.f32.xlu0 %v6218_v47  ;;  %v10031_v24 = vld [vmem:[%s18250_s1 + $0x3e0] sm:$0xff] }
 0xbbd   : > { %v11319_v45 = vpop.f32.mrf.mxu1 }
 0xbbe   : > { %v15935_v57 = vadd.f32 %v11319_v45, %v10013_v40 }
 0xbbf   : > { %v5965_v16 = vpop.f32.mrf.mxu1 }
 0xbc0   : > { %v15940_v13 = vadd.f32 %v10011_v8, %v5965_v16  ;;  %v6236_v59 = vsel %vm1917_vm1, %v15935_v57, -inf  ;;  %v10034_v16 = vld [vmem:[%s18250_s1 + $0x3f8] sm:$0xff] }
 0xbc1   : > { %6237 = vmax.xlane.f32.xlu0 %v6236_v59  ;;  %v11320_v1 = vpop.f32.mrf.mxu1 }
 0xbc2   : > { %v15947_v12 = vadd.f32 %v11320_v1, %v10014_v37  ;;  %v6230_v49 = vsel %vm1917_vm1, %v15940_v13, -inf }
 0xbc3   : > { %v5968_v14 = vpop.f32.mrf.mxu1 }
 0xbc4   : > { %v15952_v2 = vadd.f32 %v10012_v39, %v5968_v14  ;;  %v6239_v58 = vsel %vm1917_vm1, %v15947_v12, -inf }
 0xbc5   : > { %6240 = vmax.xlane.f32.xlu1 %v6239_v58  ;;  %6231 = vmax.xlane.f32.xlu0 %v6230_v49  ;;  %v11323_v46 = vpop.f32.mrf.mxu1 }
 0xbc6   : > { %v15961_v31 = vadd.f32 %v11323_v46, %v10017_v15  ;;  %v6233_v36 = vsel %vm1917_vm1, %v15952_v2, -inf  ;;  %v10032_v15 = vld [vmem:[%s18250_s1 + $0x3e8] sm:$0xff] }
 0xbc7   : > { %v5981_v50 = vpop.f32.mrf.mxu1 }
 0xbc8   : > { %v15966_v21 = vadd.f32 %v10015_v60, %v5981_v50  ;;  %v6248_v42 = vsel %vm1917_vm1, %v15961_v31, -inf  ;;  %v18725_v50 = vld [vmem:[#allocation40_spill] sm:$0xff] }
 0xbc9   : > { %6234 = vmax.xlane.f32.xlu1 %v6233_v36  ;;  %6249 = vmax.xlane.f32.xlu0 %v6248_v42  ;;  %v11324_v48 = vpop.f32.mrf.mxu1  ;;  %v18726_v42 = vld [vmem:[#allocation27_spill] sm:$0xff] }
 0xbca   : > { %v15975_v52 = vadd.f32 %v11324_v48, %v10018_v26  ;;  %v6242_v63 = vsel %vm1917_vm1, %v15966_v21, -inf }
 0xbcb   : > { %v5984_v27 = vpop.f32.mrf.mxu1 }
 0xbcc   : > { %v15977_v55 = vadd.f32 %v10016_v33, %v5984_v27  ;;  %v6251_v20 = vsel %vm1917_vm1, %v15975_v52, -inf  ;;  %v18727_v27 = vld [vmem:[#allocation54_spill] sm:$0xff] }
 0xbcd   : > { %6252 = vmax.xlane.f32.xlu1 %v6251_v20  ;;  %6243 = vmax.xlane.f32.xlu0 %v6242_v63 }
 0xbce   : > { %v6245_v23 = vsel %vm1917_vm1, %v15977_v55, -inf }
 0xbd1   : > { %6246 = vmax.xlane.f32.xlu1 %v6245_v23 }
 0xbdd   : > { %v11351_v62 = vpop.f32.mrf.mxu1 }
 0xbde   : > { %v15991_v38 = vadd.f32 %v11351_v62, %v10029_v5  ;;  %v18728_v5 = vld [vmem:[#allocation38_spill] sm:$0xff] }
 0xbdf   : > { %v6175_v54 = vpop.f32.mrf.mxu1 }
 0xbe0   : > { %v15996_v25 = vadd.f32 %v10027_v35, %v6175_v54  ;;  %v6284_v18 = vsel %vm1917_vm1, %v15991_v38, -inf  ;;  %v18729_v54 = vld [vmem:[#allocation53_spill] sm:$0xff] }
 0xbe1   : > { %6285 = vmax.xlane.f32.xlu0 %v6284_v18  ;;  %v11352_v29 = vpop.f32.mrf.mxu1 }
 0xbe2   : > { %v16003_v9 = vadd.f32 %v11352_v29, %v10030_v53  ;;  %v6278_v22 = vsel %vm1917_vm1, %v15996_v25, -inf  ;;  %v18730_v29 = vld [vmem:[#allocation58_spill] sm:$0xff] }
 0xbe3   : > { %v6178_v56 = vpop.f32.mrf.mxu1 }
 0xbe4   : > { %v16005_v44 = vadd.f32 %v10028_v11, %v6178_v56  ;;  %v6287_v7 = vsel %vm1917_vm1, %v16003_v9, -inf }
 0xbe5   : > { %6288 = vmax.xlane.f32.xlu1 %v6287_v7  ;;  %6279 = vmax.xlane.f32.xlu0 %v6278_v22  ;;  %v11355_v41 = vpop.f32.mrf.mxu1  ;;  %v18731_v7 = vld [vmem:[#allocation51_spill] sm:$0xff]  ;;  %v18732_v22 = vld [vmem:[#allocation8_spill] sm:$0xff] }
 0xbe6   : > { %v16017_v40 = vadd.f32 %v11355_v41, %v10033_v6  ;;  %v6281_v8 = vsel %vm1917_vm1, %v16005_v44, -inf  ;;  %v4216_v6 = vadd.f32 %v18732_v22, %v18731_v7 }
 0xbe7   : > { %v6191_v47 = vpop.f32.mrf.mxu1 }
 0xbe8   : > { %v16019_v45 = vadd.f32 %v10031_v24, %v6191_v47  ;;  %v6296_v39 = vsel %vm1917_vm1, %v16017_v40, -inf  ;;  %v18733_v24 = vld [vmem:[#allocation48_spill] sm:$0xff]  ;;  %v18734_v47 = vld [vmem:[#allocation6_spill] sm:$0xff] }
 0xbe9   : > { %6282 = vmax.xlane.f32.xlu1 %v6281_v8  ;;  %v11356_v37 = vpop.f32.mrf.mxu1  ;;  %v4208_v8 = vadd.f32 %v18734_v47, %v18733_v24 }
 0xbea   : > { %v6290_v59 = vsel %vm1917_vm1, %v16019_v45, -inf  ;;  %v16028_v1 = vadd.f32 %v11356_v37, %v10034_v16 }
 0xbeb   : > { %6291 = vmax.xlane.f32.xlu0 %v6290_v59  ;;  %v6194_v14 = vpop.f32.mrf.mxu1  ;;  %v18736_v59 = vld [vmem:[#allocation69_spill] sm:$0xff] }
 0xbec   : > { %v16035_v58 = vadd.f32 %v10032_v15, %v6194_v14  ;;  %v6299_v49 = vsel %vm1917_vm1, %v16028_v1, -inf }
 0xbed   : > { %6297 = vmax.xlane.f32.xlu1 %v6296_v39  ;;  %v18737_v39 = vld [vmem:[#allocation4_spill] sm:$0xff] }
 0xbee   : > { %v6293_v46 = vsel %vm1917_vm1, %v16035_v58, -inf  ;;  %v4219_v14 = vadd.f32 %v18737_v39, %v18736_v59 }
 0xbf1   : > { %6300 = vmax.xlane.f32.xlu1 %v6299_v49 }
 0xbf5   : > { %6294 = vmax.xlane.f32.xlu1 %v6293_v46 }
 0xc04   : > { %v11263_v60 = vpop.f32.mrf.mxu0 }
 0xc05   : > { %v16042_v26 = vadd.f32 %v11263_v60, %v18725_v50  ;;  %v18741_v50 = vld [vmem:[#allocation66_spill] sm:$0xff] }
 0xc06   : > { %v5594_v36 = vpop.f32.mrf.mxu0 }
 0xc07   : > { %v16045_v48 = vadd.f32 %v5594_v36, %v18726_v42  ;;  %v18742_v36 = vld [vmem:[#allocation10_spill] sm:$0xff] }
 0xc08   : > { %v11264_v33 = vpop.f32.mrf.mxu0  ;;  %v4232_v42 = vadd.f32 %v18742_v36, %v18741_v50 }
 0xc09   : > { %v16048_v20 = vadd.f32 %v11264_v33, %v18727_v27  ;;  %v18743_v27 = vld [vmem:[#allocation64_spill] sm:$0xff] }
 0xc0a   : > { %v16050_v63 = vpop.f32.mrf.mxu0 }
 0xc0c   : > { %v11267_v23 = vpop.f32.mrf.mxu0 }
 0xc0d   : > { %v16053_v62 = vadd.f32 %v11267_v23, %v18728_v5  ;;  %v18744_v23 = vld [vmem:[#allocation16_spill] sm:$0xff] }
 0xc0e   : > { %v5610_v35 = vpop.f32.mrf.mxu0  ;;  %v4224_v5 = vadd.f32 %v18744_v23, %v18743_v27 }
 0xc0f   : > { %v16056_v53 = vadd.f32 %v5610_v35, %v18729_v54 }
 0xc10   : > { %v11268_v18 = vpop.f32.mrf.mxu0 }
 0xc11   : > { %v16059_v11 = vadd.f32 %v11268_v18, %v18730_v29  ;;  %v18746_v18 = vld [vmem:[#allocation73_spill] sm:$0xff]  ;;  %v18747_v29 = vld [vmem:[#allocation23_spill] sm:$0xff] }
 0xc12   : > { %v16061_v56 = vpop.f32.mrf.mxu0  ;;  %v4235_v7 = vadd.f32 %v18747_v29, %v18746_v18 }
 0xc14   : > { %v11271_v41 = vpop.f32.mrf.mxu0 }
 0xc15   : > { %v16067_v16 = vadd.f32 %v11271_v41, %v4216_v6 }
 0xc16   : > { %v5626_v37 = vpop.f32.mrf.mxu0 }
 0xc17   : > { %18735 = vst [vmem:[#allocation62_spill] sm:$0xff] %v16067_v16  ;;  %v16071_v15 = vadd.f32 %v5626_v37, %v4208_v8 }
 0xc18   : > { %v11272_v49 = vpop.f32.mrf.mxu0 }
 0xc19   : > { %18738 = vst [vmem:[#allocation41_spill] sm:$0xff] %v16071_v15  ;;  %v16073_v46 = vadd.f32 %v11272_v49, %v4219_v14 }
 0xc1a   : > { %v16075_v60 = vpop.f32.mrf.mxu0 }
 0xc1b   : > { %18739 = vst [vmem:[#allocation43_spill] sm:$0xff] %v16073_v46  ;;  %18740 = vst [vmem:[#allocation46_spill] sm:$0xff] %v16075_v60 }
 0xc1c   : > { %v11275_v33 = vpop.f32.mrf.mxu0 }
 0xc1d   : > { %v16081_v35 = vadd.f32 %v11275_v33, %v4232_v42 }
 0xc1e   : > { %v5642_v54 = vpop.f32.mrf.mxu0 }
 0xc1f   : > { %18745 = vst [vmem:[#allocation21_spill] sm:$0xff] %v16081_v35  ;;  %v16085_v22 = vadd.f32 %v5642_v54, %v4224_v5 }
 0xc20   : > { %v11276_v6 = vpop.f32.mrf.mxu0 }
 0xc21   : > { %18748 = vst [vmem:[#allocation7_spill] sm:$0xff] %v16085_v22  ;;  %v16087_v41 = vadd.f32 %v11276_v6, %v4235_v7 }
 0xc22   : > { %v16100_v6 = vpop.f32.mrf.mxu0 }
 0xc23   : > { %18749 = vst [vmem:[#allocation5_spill] sm:$0xff] %v16087_v41  ;;  %18750 = vst [vmem:[#allocation11_spill] sm:$0xff] %v16100_v6  ;;  %v18796_v6 = vld [vmem:[#allocation20_spill] sm:$0xff] }
 0xc2a   : > { %v6214_v24 = vpop.xlane.xlu0 %6213 }
 0xc2b   : > { %v6304_v47 = vsub.f32 %v15873_v0, %v6214_v24  ;;  %v18751_v24 = vld [vmem:[#allocation70_spill] sm:$0xff] }
 0xc2d   : > { %v6338_v8 = vmul.f32 1.442695, %v6304_v47  ;;  %v18752_v47 = vld [vmem:[#allocation14_spill] sm:$0xff] }
 0xc2e   : > { %v6208_v37 = vpop.xlane.xlu0 %6207 }
 0xc2f   : > { %12101 = vpow2.f32 %v6338_v8  ;;  %v6302_v59 = vsub.f32 %v15875_v61, %v6208_v37  ;;  %v4248_v8 = vadd.f32 %v18752_v47, %v18751_v24 }
 0xc30   : > { %v6211_v39 = vpop.xlane.xlu1 %6210 }
 0xc31   : > { %v6334_v14 = vmul.f32 1.442695, %v6302_v59  ;;  %v6303_v49 = vsub.f32 %v15891_v32, %v6211_v39  ;;  %v18753_v39 = vld [vmem:[#allocation68_spill] sm:$0xff] }
 0xc32   : > { %v6217_v50 = vpop.xlane.xlu0 %6216 }
 0xc33   : > { %12103 = vpow2.f32 %v6334_v14  ;;  %v6305_v36 = vsub.f32 %v15889_v10, %v6217_v50  ;;  %v6336_v42 = vmul.f32 1.442695, %v6303_v49  ;;  %v18754_v14 = vld [vmem:[#allocation33_spill] sm:$0xff] }
 0xc34   : > { %v4240_v49 = vadd.f32 %v18754_v14, %v18753_v39 }
 0xc35   : > { %v6340_v33 = vmul.f32 1.442695, %v6305_v36 }
 0xc36   : > { %v6226_v27 = vpop.xlane.xlu0 %6225  ;;  %v6229_v0 = vpop.xlane.xlu1 %6228 }
 0xc37   : > { %12105 = vpow2.f32 %v6340_v33  ;;  %v6308_v23 = vsub.f32 %v15903_v43, %v6226_v27  ;;  %v6309_v32 = vsub.f32 %v15915_v19, %v6229_v0  ;;  %v18756_v33 = vld [vmem:[#allocation74_spill] sm:$0xff] }
 0xc38   : > { %12107 = vpow2.f32 %v6336_v42  ;;  %v18757_v27 = vld [vmem:[#allocation22_spill] sm:$0xff] }
 0xc39   : > { %v6346_v5 = vmul.f32 1.442695, %v6308_v23  ;;  %v6348_v37 = vmul.f32 1.442695, %v6309_v32  ;;  %v4251_v23 = vadd.f32 %v18757_v27, %v18756_v33  ;;  %v18766_v33 = vld [vmem:[#allocation78_spill] sm:$0xff]  ;;  %v18767_v27 = vld [vmem:[#allocation17_spill] sm:$0xff] }
 0xc3a   : > { %v6220_v54 = vpop.xlane.xlu0 %6219  ;;  %v6223_v7 = vpop.xlane.xlu1 %6222 }
 0xc3b   : > { %v6306_v61 = vsub.f32 %v15917_v3, %v6220_v54  ;;  %12109 = vpow2.f32 %v6346_v5  ;;  %v6307_v3 = vsub.f32 %v15919_v30, %v6223_v7  ;;  %v18762_v7 = vld [vmem:[#allocation28_spill] sm:$0xff] }
 0xc3c   : > { %v16095_v18 = vpop.eup %12101 }
 0xc3d   : > { %v6342_v29 = vmul.f32 1.442695, %v6306_v61  ;;  %v6404_v10 = vsel %vm1917_vm1, %v16095_v18, 0.0  ;;  %v6344_v30 = vmul.f32 1.442695, %v6307_v3  ;;  %v18763_v3 = vld [vmem:[#allocation77_spill] sm:$0xff] }
 0xc3e   : > { %6405 = vadd.xlane.f32.xlu0 %v6404_v10  ;;  %v18761_v10 = vld [vmem:[#allocation76_spill] sm:$0xff] }
 0xc3f   : > { %12111 = vpow2.f32 %v6342_v29  ;;  %v4264_v24 = vadd.f32 %v18762_v7, %v18761_v10 }
 0xc40   : > { %v16102_v43 = vpop.eup %12103  ;;  %12113 = vpow2.f32 %v6348_v37 }
 0xc41   : > { %v11279_v59 = vpop.f32.mrf.mxu0  ;;  %v6398_v19 = vsel %vm1917_vm1, %v16102_v43, 0.0  ;;  %12115 = vpow2.f32 %v6344_v30 }
 0xc42   : > { %v16111_v50 = vadd.f32 %v11279_v59, %v4248_v8  ;;  %6399 = vadd.xlane.f32.xlu0 %v6398_v19  ;;  %v18764_v59 = vld [vmem:[#allocation19_spill] sm:$0xff] }
 0xc43   : > { %v5658_v36 = vpop.f32.mrf.mxu0  ;;  %v4256_v19 = vadd.f32 %v18764_v59, %v18763_v3 }
 0xc44   : > { %18755 = vst [vmem:[#allocation15_spill] sm:$0xff] %v16111_v50  ;;  %v16113_v42 = vpop.eup %12105  ;;  %v16117_v0 = vadd.f32 %v5658_v36, %v4240_v49 }
 0xc45   : > { %v11280_v5 = vpop.f32.mrf.mxu0  ;;  %v6407_v54 = vsel %vm1917_vm1, %v16113_v42, 0.0  ;;  %v16121_v61 = vpop.eup %12107 }
 0xc46   : > { %18758 = vst [vmem:[#allocation24_spill] sm:$0xff] %v16117_v0  ;;  %v16123_v32 = vadd.f32 %v11280_v5, %v4251_v23  ;;  %6408 = vadd.xlane.f32.xlu1 %v6407_v54  ;;  %v6401_v8 = vsel %vm1917_vm1, %v16121_v61, 0.0  ;;  %v4267_v23 = vadd.f32 %v18767_v27, %v18766_v33 }
 0xc47   : > { %v16125_v29 = vpop.f32.mrf.mxu0 }
 0xc48   : > { %18759 = vst [vmem:[#allocation31_spill] sm:$0xff] %v16123_v32  ;;  %18760 = vst [vmem:[#allocation26_spill] sm:$0xff] %v16125_v29  ;;  %v16131_v37 = vpop.eup %12109  ;;  %v18793_v29 = vld [vmem:[#allocation9_spill] sm:$0xff] }
 0xc49   : > { %v11283_v47 = vpop.f32.mrf.mxu0  ;;  %v6416_v10 = vsel %vm1917_vm1, %v16131_v37, 0.0 }
 0xc4a   : > { %v16135_v39 = vadd.f32 %v11283_v47, %v4264_v24  ;;  %6402 = vadd.xlane.f32.xlu1 %v6401_v8  ;;  %v6238_v14 = vpop.xlane.xlu0 %6237 }
 0xc4b   : > { %v6312_v49 = vsub.f32 %v15935_v57, %v6238_v14  ;;  %v5674_v36 = vpop.f32.mrf.mxu0  ;;  %v18772_v14 = vld [vmem:[#allocation44_spill] sm:$0xff] }
 0xc4c   : > { %18765 = vst [vmem:[#allocation34_spill] sm:$0xff] %v16135_v39  ;;  %v16140_v30 = vadd.f32 %v5674_v36, %v4256_v19  ;;  %v16144_v7 = vpop.eup %12111  ;;  %v18771_v19 = vld [vmem:[#allocation80_spill] sm:$0xff] }
 0xc4d   : > { %v6354_v5 = vmul.f32 1.442695, %v6312_v49  ;;  %v11284_v54 = vpop.f32.mrf.mxu0  ;;  %v4280_v49 = vadd.f32 %v18772_v14, %v18771_v19  ;;  %v6410_v27 = vsel %vm1917_vm1, %v16144_v7, 0.0  ;;  %v18777_v19 = vld [vmem:[#allocation56_spill] sm:$0xff] }
 0xc4e   : > { %18768 = vst [vmem:[#allocation29_spill] sm:$0xff] %v16140_v30  ;;  %v16146_v3 = vadd.f32 %v11284_v54, %v4267_v23  ;;  %v6241_v24 = vpop.xlane.xlu1 %6240  ;;  %6417 = vadd.xlane.f32.xlu1 %v6416_v10  ;;  %v6232_v47 = vpop.xlane.xlu0 %6231  ;;  %v18773_v54 = vld [vmem:[#allocation81_spill] sm:$0xff]  ;;  %v18774_v10 = vld [vmem:[#allocation42_spill] sm:$0xff] }
 0xc4f   : > { %12117 = vpow2.f32 %v6354_v5  ;;  %v6313_v57 = vsub.f32 %v15947_v12, %v6241_v24  ;;  %v6310_v8 = vsub.f32 %v15940_v13, %v6232_v47  ;;  %v16150_v59 = vpop.f32.mrf.mxu0  ;;  %v16156_v23 = vpop.eup %12113  ;;  %v18776_v47 = vld [vmem:[#allocation82_spill] sm:$0xff] }
 0xc50   : > { %18769 = vst [vmem:[#allocation32_spill] sm:$0xff] %v16146_v3  ;;  %18770 = vst [vmem:[#allocation36_spill] sm:$0xff] %v16150_v59  ;;  %v4272_v3 = vadd.f32 %v18774_v10, %v18773_v54  ;;  %v6419_v32 = vsel %vm1917_vm1, %v16156_v23, 0.0  ;;  %v16169_v54 = vpop.eup %12115 }
 0xc51   : > { %v6350_v36 = vmul.f32 1.442695, %v6310_v8  ;;  %v11287_v33 = vpop.f32.mrf.mxu0  ;;  %v6356_v5 = vmul.f32 1.442695, %v6313_v57  ;;  %v4283_v8 = vadd.f32 %v18777_v19, %v18776_v47  ;;  %v6413_v10 = vsel %vm1917_vm1, %v16169_v54, 0.0 }
 0xc52   : > { %v16160_v39 = vadd.f32 %v11287_v33, %v4280_v49  ;;  %v6235_v12 = vpop.xlane.xlu1 %6234  ;;  %6411 = vadd.xlane.f32.xlu1 %v6410_v27  ;;  %v18781_v33 = vld [vmem:[#allocation84_spill] sm:$0xff]  ;;  %v18782_v27 = vld [vmem:[#allocation63_spill] sm:$0xff]  ;;  %v6250_v47 = vpop.xlane.xlu0 %6249 }
 0xc53   : > { %v6311_v13 = vsub.f32 %v15952_v2, %v6235_v12  ;;  %v5690_v24 = vpop.f32.mrf.mxu0  ;;  %12119 = vpow2.f32 %v6350_v36  ;;  %v4296_v36 = vadd.f32 %v18782_v27, %v18781_v33  ;;  %v18783_v12 = vld [vmem:[#allocation85_spill] sm:$0xff] }
 0xc54   : > { %18775 = vst [vmem:[#allocation39_spill] sm:$0xff] %v16160_v39  ;;  %v16165_v14 = vadd.f32 %v5690_v24, %v4272_v3  ;;  %12121 = vpow2.f32 %v6356_v5  ;;  %v6316_v39 = vsub.f32 %v15961_v31, %v6250_v47  ;;  %v10021_v31 = vld [vmem:[%s18250_s1 + $0x390] sm:$0xff] }
 0xc55   : > { %v6352_v59 = vmul.f32 1.442695, %v6311_v13  ;;  %v11288_v30 = vpop.f32.mrf.mxu0  ;;  %v18784_v13 = vld [vmem:[#allocation55_spill] sm:$0xff] }
 0xc56   : > { %18778 = vst [vmem:[#allocation47_spill] sm:$0xff] %v16165_v14  ;;  %v16171_v57 = vadd.f32 %v11288_v30, %v4283_v8  ;;  %v6253_v49 = vpop.xlane.xlu1 %6252  ;;  %6420 = vadd.xlane.f32.xlu1 %v6419_v32  ;;  %v4288_v24 = vadd.f32 %v18784_v13, %v18783_v12  ;;  %v18786_v8 = vld [vmem:[#allocation86_spill] sm:$0xff]  ;;  %v6362_v12 = vmul.f32 1.442695, %v6316_v39 }
 0xc57   : > { %12123 = vpow2.f32 %v6352_v59  ;;  %v16173_v2 = vpop.f32.mrf.mxu0  ;;  %v6317_v13 = vsub.f32 %v15975_v52, %v6253_v49 }
 0xc58   : > { %18779 = vst [vmem:[#allocation45_spill] sm:$0xff] %v16171_v57  ;;  %18780 = vst [vmem:[#allocation88_spill] sm:$0xff] %v16173_v2  ;;  %v18787_v57 = vld [vmem:[#allocation57_spill] sm:$0xff] }
 0xc59   : > { %v11291_v3 = vpop.f32.mrf.mxu0  ;;  %v4299_v33 = vadd.f32 %v18787_v57, %v18786_v8  ;;  %v6364_v52 = vmul.f32 1.442695, %v6317_v13 }
 0xc5a   : > { %v16181_v19 = vadd.f32 %v11291_v3, %v4296_v36  ;;  %v6247_v30 = vpop.xlane.xlu1 %6246  ;;  %6414 = vadd.xlane.f32.xlu1 %v6413_v10 }
 0xc5b   : > { %v6315_v32 = vsub.f32 %v15977_v55, %v6247_v30  ;;  %v5706_v59 = vpop.f32.mrf.mxu0  ;;  %v10022_v30 = vld [vmem:[%s18250_s1 + $0x398] sm:$0xff] }
 0xc5c   : > { %18785 = vst [vmem:[#allocation30_spill] sm:$0xff] %v16181_v19  ;;  %v16184_v5 = vpop.eup %12117  ;;  %v16188_v27 = vadd.f32 %v5706_v59, %v4288_v24  ;;  %v10019_v59 = vld [vmem:[%s18250_s1 + $0x380] sm:$0xff] }
 0xc5d   : > { %v6360_v2 = vmul.f32 1.442695, %v6315_v32  ;;  %v11292_v14 = vpop.f32.mrf.mxu0  ;;  %v6428_v36 = vsel %vm1917_vm1, %v16184_v5, 0.0 }
 0xc5e   : > { %18788 = vst [vmem:[#allocation92_spill] sm:$0xff] %v16188_v27  ;;  %v16193_v3 = vadd.f32 %v11292_v14, %v4299_v33  ;;  %6429 = vadd.xlane.f32.xlu1 %v6428_v36 }
 0xc5f   : > { %v16195_v10 = vpop.f32.mrf.mxu0  ;;  %12125 = vpow2.f32 %v6360_v2 }
 0xc60   : > { %18789 = vst [vmem:[#allocation93_spill] sm:$0xff] %v16193_v3  ;;  %18790 = vst [vmem:[#allocation89_spill] sm:$0xff] %v16195_v10  ;;  %v16197_v55 = vpop.eup %12119  ;;  %12127 = vpow2.f32 %v6362_v12  ;;  %v10020_v12 = vld [vmem:[%s18250_s1 + $0x388] sm:$0xff] }
 0xc61   : > { %v11335_v57 = vpop.f32.mrf.mxu0  ;;  %v6422_v24 = vsel %vm1917_vm1, %v16197_v55, 0.0  ;;  %v16205_v47 = vpop.eup %12121  ;;  %12129 = vpow2.f32 %v6364_v52 }
 0xc62   : > { %6423 = vadd.xlane.f32.xlu1 %v6422_v24  ;;  %v16212_v49 = vadd.f32 %v11335_v57, %v10021_v31  ;;  %v6431_v33 = vsel %vm1917_vm1, %v16205_v47, 0.0 }
 0xc63   : > { %v6070_v14 = vpop.f32.mrf.mxu0 }
 0xc64   : > { %v16210_v39 = vpop.eup %12123  ;;  %v16228_v57 = vadd.f32 %v10019_v59, %v6070_v14  ;;  %v6260_v31 = vsel %vm1917_vm1, %v16212_v49, -inf }
 0xc65   : > { %v11336_v2 = vpop.f32.mrf.mxu0  ;;  %v6425_v32 = vsel %vm1917_vm1, %v16210_v39, 0.0 }
 0xc66   : > { %v16219_v8 = vadd.f32 %v11336_v2, %v10022_v30  ;;  %6426 = vadd.xlane.f32.xlu0 %v6425_v32  ;;  %6432 = vadd.xlane.f32.xlu1 %v6431_v33  ;;  %v6254_v30 = vsel %vm1917_vm1, %v16228_v57, -inf }
 0xc67   : > { %v6073_v36 = vpop.f32.mrf.mxu0 }
 0xc68   : > { %v6263_v13 = vsel %vm1917_vm1, %v16219_v8, -inf  ;;  %v16232_v24 = vadd.f32 %v10020_v12, %v6073_v36  ;;  %v18791_v12 = vld [vmem:[#allocation35_spill] sm:$0xff] }
 0xc6a   : > { %6261 = vmax.xlane.f32.xlu0 %v6260_v31  ;;  %6264 = vmax.xlane.f32.xlu1 %v6263_v13  ;;  %v6257_v32 = vsel %vm1917_vm1, %v16232_v24, -inf  ;;  %v6244_v13 = vpop.xlane.xlu0 %6243 }
 0xc6b   : > { %v6314_v31 = vsub.f32 %v15966_v21, %v6244_v13  ;;  %v10024_v13 = vld [vmem:[%s18250_s1 + $0x3a8] sm:$0xff] }
 0xc6c   : > { %v16236_v2 = vpop.eup %12125 }
 0xc6d   : > { %v6437_v14 = vsel %vm1917_vm1, %v16236_v2, 0.0  ;;  %v16242_v52 = vpop.eup %12127 }
 0xc6e   : > { %6255 = vmax.xlane.f32.xlu0 %v6254_v30  ;;  %6258 = vmax.xlane.f32.xlu1 %v6257_v32  ;;  %v6440_v59 = vsel %vm1917_vm1, %v16242_v52, 0.0  ;;  %v16246_v33 = vpop.eup %12129  ;;  %v6358_v30 = vmul.f32 1.442695, %v6314_v31  ;;  %v18792_v32 = vld [vmem:[#allocation59_spill] sm:$0xff]  ;;  %v10025_v31 = vld [vmem:[%s18250_s1 + $0x3b0] sm:$0xff] }
 0xc6f   : > { %v6443_v36 = vsel %vm1917_vm1, %v16246_v33, 0.0 }
 0xc70   : > { %12131 = vpow2.f32 %v6358_v30 }
 0xc72   : > { %6438 = vadd.xlane.f32.xlu0 %v6437_v14  ;;  %v11339_v14 = vpop.f32.mrf.mxu0 }
 0xc74   : > { %v6086_v3 = vpop.f32.mrf.mxu0 }
 0xc76   : > { %6441 = vadd.xlane.f32.xlu0 %v6440_v59  ;;  %v10026_v59 = vld [vmem:[%s18250_s1 + $0x3b8] sm:$0xff] }
 0xc7a   : > { %6444 = vadd.xlane.f32.xlu0 %v6443_v36  ;;  %v11340_v36 = vpop.f32.mrf.mxu0 }
 0xc7b   : > { %v16260_v10 = vadd.f32 %v11340_v36, %v10026_v59  ;;  %v16274_v59 = vadd.f32 %v11339_v14, %v10025_v31  ;;  %v10023_v36 = vld [vmem:[%s18250_s1 + $0x3a0] sm:$0xff]  ;;  %v16289_v31 = vpop.xlane.xlu0 %6285 }
 0xc7c   : > { %v6089_v21 = vpop.f32.mrf.mxu0 }
 0xc7d   : > { %v16255_v19 = vpop.eup %12131  ;;  %v16270_v30 = vadd.f32 %v10024_v13, %v6089_v21  ;;  %v6272_v21 = vsel %vm1917_vm1, %v16274_v59, -inf }
 0xc7f   : > { %6669 = vrot.lane.b32.xlu1 %v18791_v12, %s12592_s28  ;;  %v6434_v12 = vsel %vm1917_vm1, %v16255_v19, 0.0  ;;  %v6269_v27 = vsel %vm1917_vm1, %v16270_v30, -inf }
 0xc90   : > { %6667 = vrot.lane.b32.xlu0 %v18792_v32, %s12592_s28  ;;  %v6275_v32 = vsel %vm1917_vm1, %v16260_v10, -inf }
 0xca3   : > { %6435 = vadd.xlane.f32.xlu1 %v6434_v12  ;;  %v16281_v12 = vadd.f32 %v10023_v36, %v6086_v3  ;;  %v18794_v3 = vld [vmem:[#allocation13_spill] sm:$0xff] }
 0xca5   : > { %v6266_v13 = vsel %vm1917_vm1, %v16281_v12, -inf }
 0xca7   : > { %6276 = vmax.xlane.f32.xlu1 %v6275_v32  ;;  %v16287_v32 = vpop.xlane.xlu1 %6288 }
 0xcab   : > { %6270 = vmax.xlane.f32.xlu1 %v6269_v27  ;;  %v6283_v14 = vpop.xlane.xlu1 %6282  ;;  %v16293_v27 = vpop.xlane.xlu0 %6279 }
 0xcac   : > { %v6327_v50 = vsub.f32 %v16005_v44, %v6283_v14 }
 0xcae   : > { %v6384_v22 = vmul.f32 1.442695, %v6327_v50 }
 0xcaf   : > { %6273 = vmax.xlane.f32.xlu0 %v6272_v21  ;;  %v6298_v0 = vpop.xlane.xlu1 %6297  ;;  %v6292_v36 = vpop.xlane.xlu0 %6291 }
 0xcb0   : > { %12133 = vpow2.f32 %v6384_v22  ;;  %v6330_v46 = vsub.f32 %v16019_v45, %v6292_v36 }
 0xcb2   : > { %v6390_v14 = vmul.f32 1.442695, %v6330_v46 }
 0xcb3   : > { %6267 = vmax.xlane.f32.xlu0 %v6266_v13  ;;  %v16297_v21 = vpop.xlane.xlu1 %6300  ;;  %v18795_v13 = vld [vmem:[#allocation60_spill] sm:$0xff] }
 0xcb7   : > { %v6295_v41 = vpop.xlane.xlu1 %6294 }
 0xcbc   : > { %6665 = vrot.lane.b32.xlu1 %v18793_v29, %s12592_s28 }
 0xcbd   : > { %v16309_v45 = vpop.eup %12133 }
 0xcc0   : > { %6754 = vrot.lane.b32.xlu1 %v18794_v3, %s12592_s28  ;;  %v18797_v3 = vld [vmem:[#allocation61_spill] sm:$0xff] }
 0xcc7   : > { %v6406_v35 = vpop.xlane.xlu0 %6405 }
 0xcc9   : > { %6663 = vrot.lane.b32.xlu0 %v18795_v13, %s12592_s28  ;;  %v6331_v13 = vsub.f32 %v16035_v58, %v6295_v41 }
 0xccb   : > { %v6400_v29 = vpop.xlane.xlu0 %6399  ;;  %v6392_v15 = vmul.f32 1.442695, %v6331_v13 }
 0xccd   : > { %6758 = vrot.lane.b32.xlu0 %v18796_v6, %s12592_s28  ;;  %v6332_v6 = vsub.f32 %v16017_v40, %v6298_v0  ;;  %v6473_v0 = vsel %vm1917_vm1, %v16309_v45, 0.0 }
 0xccf   : > { %v6409_v16 = vpop.xlane.xlu1 %6408  ;;  %v6394_v22 = vmul.f32 1.442695, %v6332_v6 }
 0xcd0   : > { %12135 = vrcp.f32 %v6409_v16 }
 0xcd1   : > { %6756 = vrot.lane.b32.xlu0 %v18797_v3, %s12592_s28  ;;  %12137 = vrcp.f32 %v6400_v29 }
 0xcd2   : > { %12139 = vrcp.f32 %v6406_v35 }
 0xcd3   : > { %v6403_v44 = vpop.xlane.xlu1 %6402 }
 0xcd4   : > { %12141 = vrcp.f32 %v6403_v44 }
 0xcd5   : > { %12143 = vpow2.f32 %v6390_v14 }
 0xcd6   : > { %12145 = vpow2.f32 %v6392_v15 }
 0xcd7   : > { %v6418_v50 = vpop.xlane.xlu1 %6417  ;;  %12147 = vpow2.f32 %v6394_v22 }
 0xcdb   : > { %v6412_v60 = vpop.xlane.xlu1 %6411 }
 0xcdd   : > { %v12136_v16 = vpop.eup %12135 }
 0xcde   : > { %v12138_v36 = vpop.eup %12137  ;;  %v6529_v46 = vmul.f32 %v12136_v16, %v16113_v42 }
 0xcdf   : > { %v6421_v3 = vpop.xlane.xlu1 %6420  ;;  %v12140_v29 = vpop.eup %12139  ;;  %v6526_v58 = vmul.f32 %v12138_v36, %v16102_v43 }
 0xce0   : > { %12149 = vrcp.f32 %v6421_v3  ;;  %v6528_v41 = vmul.f32 %v12140_v29, %v16095_v18 }
 0xce1   : > { %v12142_v35 = vpop.eup %12141  ;;  %12151 = vrcp.f32 %v6412_v60 }
 0xce2   : > { %v6527_v40 = vmul.f32 %v12142_v35, %v16121_v61  ;;  %12153 = vrcp.f32 %v6418_v50  ;;  %v16317_v14 = vpop.eup %12143  ;;  %v6559_v13 = vpack.c.bf16 %v6529_v46, %v6528_v41 }
 0xce3   : > { %v6415_v15 = vpop.xlane.xlu1 %6414  ;;  %v6482_v18 = vsel %vm1917_vm1, %v16317_v14, 0.0  ;;  %v16325_v43 = vpop.eup %12145 }
 0xce4   : > { %12155 = vrcp.f32 %v6415_v15  ;;  %v6558_v44 = vpack.c.bf16 %v6527_v40, %v6526_v58  ;;  %6474 = vadd.xlane.f32.xlu1 %v6473_v0  ;;  %v6485_v61 = vsel %vm1917_vm1, %v16325_v43, 0.0  ;;  %v16329_v50 = vpop.eup %12147 }
 0xce5   : > { %v6488_v29 = vsel %vm1917_vm1, %v16329_v50, 0.0 }
 0xce6   : > { %11365 = vmatprep.mubr.msk.bf16.mxu0 %vm1917_vm1, %v6558_v44 }
 0xce7   : > { %v16320_v60 = vpop.xlane.xlu1 %6429  ;;  %11366 = vmatmul.mubr.msk.bf16.vlgmr.msra.gmra.mxu0 %vm1917_vm1, %v6559_v13 }
 0xce8   : > { %6483 = vadd.xlane.f32.xlu1 %v6482_v18 }
 0xceb   : > { %v6424_v42 = vpop.xlane.xlu1 %6423 }
 0xcec   : > { %6486 = vadd.xlane.f32.xlu1 %v6485_v61  ;;  %12157 = vrcp.f32 %v6424_v42 }
 0xced   : > { %v12150_v6 = vpop.eup %12149 }
 0xcee   : > { %v12152_v22 = vpop.eup %12151  ;;  %v6533_v46 = vmul.f32 %v12150_v6, %v16156_v23 }
 0xcef   : > { %v6427_v16 = vpop.xlane.xlu0 %6426  ;;  %v12154_v36 = vpop.eup %12153  ;;  %v6530_v58 = vmul.f32 %v12152_v22, %v16144_v7 }
 0xcf0   : > { %v6433_v3 = vpop.xlane.xlu1 %6432  ;;  %12159 = vrcp.f32 %v6427_v16  ;;  %6489 = vadd.xlane.f32.xlu1 %v6488_v29  ;;  %v6532_v15 = vmul.f32 %v12154_v36, %v16131_v37 }
 0xcf1   : > { %v12156_v35 = vpop.eup %12155 }
 0xcf2   : > { %v6531_v40 = vmul.f32 %v12156_v35, %v16169_v54  ;;  %v6561_v18 = vpack.c.bf16 %v6533_v46, %v6532_v15 }
 0xcf3   : > { %v6262_v41 = vpop.xlane.xlu0 %6261 }
 0xcf4   : > { %v6265_v0 = vpop.xlane.xlu1 %6264  ;;  %v6320_v44 = vsub.f32 %v16212_v49, %v6262_v41  ;;  %v6560_v13 = vpack.c.bf16 %v6531_v40, %v6530_v58 }
 0xcf5   : > { %v6321_v42 = vsub.f32 %v16219_v8, %v6265_v0 }
 0xcf6   : > { %v6370_v61 = vmul.f32 1.442695, %v6320_v44  ;;  %11369 = vmatprep.mubr.msk.bf16.mxu0 %vm1917_vm1, %v6560_v13 }
 0xcf7   : > { %11370 = vmatmul.mubr.msk.bf16.gmra.mxu0 %vm1917_vm1, %v6561_v18  ;;  %v6256_v23 = vpop.xlane.xlu0 %6255  ;;  %v6372_v37 = vmul.f32 1.442695, %v6321_v42  ;;  %v6326_v42 = vsub.f32 %v15996_v25, %v16293_v27 }
 0xcf8   : > { %12161 = vpow2.f32 %v6370_v61  ;;  %v6259_v7 = vpop.xlane.xlu1 %6258  ;;  %v6318_v54 = vsub.f32 %v16228_v57, %v6256_v23  ;;  %v6328_v23 = vsub.f32 %v15991_v38, %v16289_v31 }
 0xcf9   : > { %v6319_v6 = vsub.f32 %v16232_v24, %v6259_v7  ;;  %v12158_v16 = vpop.eup %12157  ;;  %v6382_v7 = vmul.f32 1.442695, %v6326_v42 }
 0xcfa   : > { %v6366_v22 = vmul.f32 1.442695, %v6318_v54  ;;  %v6534_v35 = vmul.f32 %v12158_v16, %v16197_v55 }
 0xcfb   : > { %v6368_v49 = vmul.f32 1.442695, %v6319_v6  ;;  %v6439_v36 = vpop.xlane.xlu0 %6438  ;;  %v6386_v6 = vmul.f32 1.442695, %v6328_v23 }
 0xcfc   : > { %12163 = vpow2.f32 %v6366_v22  ;;  %v6670_v29 = vpop.permute.xlu1 %6669 }
 0xcfd   : > { %v12160_v8 = vpop.eup %12159  ;;  %12165 = vpow2.f32 %v6368_v49  ;;  %11373 = vmatprep.subr.bf16.mxu0 %v6670_v29 }
 0xcfe   : > { %12167 = vpow2.f32 %v6372_v37  ;;  %11374 = vmatpush3.bf16.msra.mxu0 %v6670_v29  ;;  %v6535_v46 = vmul.f32 %v12160_v8, %v16210_v39  ;;  %v6329_v37 = vsub.f32 %v16003_v9, %v16287_v32 }
 0xcff   : > { %v6442_v58 = vpop.xlane.xlu0 %6441  ;;  %12169 = vrcp.f32 %v6433_v3 }
 0xd00   : > { %v6562_v57 = vpack.c.bf16 %v6535_v46, %v6534_v35  ;;  %v6388_v22 = vmul.f32 1.442695, %v6329_v37 }
 0xd02   : > { %11381 = vmatprep.mubr.msk.bf16.mxu0 %vm1917_vm1, %v6562_v57 }
 0xd03   : > { %v6445_v24 = vpop.xlane.xlu0 %6444 }
 0xd05   : > { %v16346_v40 = vpop.eup %12161 }
 0xd06   : > { %v6452_v41 = vsel %vm1917_vm1, %v16346_v40, 0.0 }
 0xd07   : > { %6453 = vadd.xlane.f32.xlu0 %v6452_v41  ;;  %v6668_v15 = vpop.permute.xlu0 %6667 }
 0xd08   : > { %11375 = vmatprep.subr.bf16.mxu0 %v6668_v15 }
 0xd09   : > { %v16350_v0 = vpop.eup %12163  ;;  %11376 = vmatpush3.bf16.msra.mxu0 %v6668_v15 }
 0xd0a   : > { %v16352_v44 = vpop.eup %12165  ;;  %v6446_v55 = vsel %vm1917_vm1, %v16350_v0, 0.0 }
 0xd0b   : > { %v16356_v39 = vpop.eup %12167  ;;  %v6449_v13 = vsel %vm1917_vm1, %v16352_v44, 0.0  ;;  %6447 = vadd.xlane.f32.xlu0 %v6446_v55 }
 0xd0c   : > { %6450 = vadd.xlane.f32.xlu1 %v6449_v13  ;;  %v6455_v18 = vsel %vm1917_vm1, %v16356_v39, 0.0  ;;  %v12170_v3 = vpop.eup %12169 }
 0xd0d   : > { %v6537_v29 = vmul.f32 %v12170_v3, %v16205_v47 }
 0xd0f   : > { %6456 = vadd.xlane.f32.xlu0 %v6455_v18 }
 0xd25   : > { %6752 = vrot.lane.b32.xlu0 %v18699_v51, %s12592_s28 }
 0xd2c   : > { %v6436_v61 = vpop.xlane.xlu1 %6435 }
 0xd2d   : > { %12171 = vrcp.f32 %v6436_v61 }
 0xd2e   : > { %12173 = vrcp.f32 %v16320_v60 }
 0xd2f   : > { %12175 = vrcp.f32 %v6439_v36 }
 0xd30   : > { %v6277_v54 = vpop.xlane.xlu1 %6276  ;;  %12177 = vpow2.f32 %v6382_v7 }
 0xd31   : > { %12179 = vpow2.f32 %v6386_v6  ;;  %v6325_v31 = vsub.f32 %v16260_v10, %v6277_v54 }
 0xd32   : > { %12181 = vrcp.f32 %v6445_v24 }
 0xd33   : > { %12183 = vrcp.f32 %v6442_v58  ;;  %v6380_v8 = vmul.f32 1.442695, %v6325_v31 }
 0xd34   : > { %v6271_v51 = vpop.xlane.xlu1 %6270  ;;  %12185 = vpow2.f32 %v6388_v22 }
 0xd35   : > { %v6323_v35 = vsub.f32 %v16270_v30, %v6271_v51 }
 0xd37   : > { %v6376_v30 = vmul.f32 1.442695, %v6323_v35 }
 0xd38   : > { %v6274_v25 = vpop.xlane.xlu0 %6273  ;;  %v6666_v27 = vpop.permute.xlu1 %6665 }
 0xd39   : > { %v6324_v38 = vsub.f32 %v16274_v59, %v6274_v25  ;;  %11377 = vmatprep.subr.bf16.mxu0 %v6666_v27 }
 0xd3a   : > { %11378 = vmatpush3.bf16.msra.mxu0 %v6666_v27  ;;  %v12172_v49 = vpop.eup %12171 }
 0xd3b   : > { %v6378_v60 = vmul.f32 1.442695, %v6324_v38  ;;  %v12174_v32 = vpop.eup %12173  ;;  %v6538_v10 = vmul.f32 %v12172_v49, %v16255_v19 }
 0xd3c   : > { %v6268_v16 = vpop.xlane.xlu0 %6267  ;;  %v12176_v36 = vpop.eup %12175  ;;  %v6536_v57 = vmul.f32 %v12174_v32, %v16184_v5 }
 0xd3d   : > { %12187 = vpow2.f32 %v6378_v60  ;;  %v6322_v9 = vsub.f32 %v16281_v12, %v6268_v16  ;;  %v16376_v46 = vpop.eup %12177  ;;  %v6333_v12 = vsub.f32 %v16028_v1, %v16297_v21  ;;  %v6539_v24 = vmul.f32 %v12176_v36, %v16236_v2  ;;  %v6755_v7 = vpop.permute.xlu1 %6754 }
 0xd3e   : > { %v16383_v47 = vpop.eup %12179  ;;  %v6563_v41 = vpack.c.bf16 %v6537_v29, %v6536_v57  ;;  %v6470_v15 = vsel %vm1917_vm1, %v16376_v46, 0.0 }
 0xd3f   : > { %v6374_v59 = vmul.f32 1.442695, %v6322_v9  ;;  %v12182_v55 = vpop.eup %12181  ;;  %v6564_v5 = vpack.c.bf16 %v6539_v24, %v6538_v10  ;;  %v6396_v1 = vmul.f32 1.442695, %v6333_v12  ;;  %v6476_v2 = vsel %vm1917_vm1, %v16383_v47, 0.0 }
 0xd40   : > { %v6664_v58 = vpop.permute.xlu0 %6663  ;;  %v12184_v13 = vpop.eup %12183  ;;  %v6541_v21 = vmul.f32 %v12182_v55, %v16246_v33  ;;  %v11572_v55 = vld [vmem:[%s18255_s6 + $0x30] sm:$0xff]  }
 0xd41   : > { %12189 = vpow2.f32 %v6374_v59  ;;  %11379 = vmatprep.subr.bf16.mxu0 %v6664_v58  ;;  %v16392_v18 = vpop.eup %12185  ;;  %v6540_v61 = vmul.f32 %v12184_v13, %v16242_v52 }
 0xd42   : > { %11380 = vmatpush3.bf16.msra.mxu0 %v6664_v58  ;;  %12191 = vpow2.f32 %v6380_v8  ;;  %v6479_v54 = vsel %vm1917_vm1, %v16392_v18, 0.0 }
 0xd43   : > { %12193 = vpow2.f32 %v6376_v30  ;;  %v6565_v33 = vpack.c.bf16 %v6541_v21, %v6540_v61 }
 0xd44   : > { %6471 = vadd.xlane.f32.xlu0 %v6470_v15  ;;  %v6759_v19 = vpop.permute.xlu0 %6758  ;;  %12195 = vpow2.f32 %v6396_v1 }
 0xd45   : > { %11382 = vmatmul.mubr.msk.bf16.vlgmr.msra.gmra.mxu0 %vm1917_vm1, %v6563_v41  ;;  %11389 = vmatprep.subr.bf16.mxu1 %v6759_v19 }
 0xd46   : > { %11385 = vmatprep.mubr.msk.bf16.mxu0 %vm1917_vm1, %v6564_v5  ;;  %11390 = vmatpush3.bf16.msra.mxu1 %v6759_v19 }
 0xd48   : > { %6477 = vadd.xlane.f32.xlu0 %v6476_v2  ;;  %v6757_v42 = vpop.permute.xlu0 %6756 }
 0xd49   : > { %11391 = vmatprep.subr.bf16.mxu1 %v6757_v42 }
 0xd4a   : > { %v16395_v23 = vpop.eup %12187  ;;  %11392 = vmatpush3.bf16.msra.mxu1 %v6757_v42 }
 0xd4b   : > { %11393 = vmatprep.subr.bf16.mxu1 %v6755_v7  ;;  %v6464_v6 = vsel %vm1917_vm1, %v16395_v23, 0.0 }
 0xd4c   : > { %6480 = vadd.xlane.f32.xlu0 %v6479_v54  ;;  %6465 = vadd.xlane.f32.xlu1 %v6464_v6 }
 0xd4d   : > { %11386 = vmatmul.mubr.msk.bf16.gmra.mxu0 %vm1917_vm1, %v6565_v33 }
 0xd4e   : > { %v16402_v37 = vpop.eup %12189  ;;  %11394 = vmatpush3.bf16.msra.mxu1 %v6755_v7 }
 0xd4f   : > { %v6458_v52 = vsel %vm1917_vm1, %v16402_v37, 0.0  ;;  %v16406_v51 = vpop.eup %12191 }
 0xd50   : > { %6459 = vadd.xlane.f32.xlu1 %v6458_v52  ;;  %v6467_v22 = vsel %vm1917_vm1, %v16406_v51, 0.0  ;;  %v16410_v25 = vpop.eup %12193 }
 0xd51   : > { %v6461_v27 = vsel %vm1917_vm1, %v16410_v25, 0.0  ;;  %v16414_v38 = vpop.eup %12195 }
 0xd52   : > { %v6491_v31 = vsel %vm1917_vm1, %v16414_v38, 0.0 }
 0xd54   : > { %6468 = vadd.xlane.f32.xlu1 %v6467_v22 }
 0xd58   : > { %6462 = vadd.xlane.f32.xlu1 %v6461_v27 }
 0xd5c   : > { %6492 = vadd.xlane.f32.xlu1 %v6491_v31 }
 0xd62   : > { %6847 = vrot.lane.b32.xlu0 %v18570_v28, %s12592_s28 }
 0xd66   : > { %6845 = vrot.lane.b32.xlu0 %v18700_v4, %s12592_s28 }
 0xd6a   : > { %6841 = vrot.lane.b32.xlu0 %v18702_v17, %s12592_s28 }
 0xd6d   : > { %6843 = vrot.lane.b32.xlu1 %v18701_v34, %s12592_s28  ;;  %v6475_v60 = vpop.xlane.xlu1 %6474 }
 0xd71   : > { %v6484_v3 = vpop.xlane.xlu1 %6483 }
 0xd72   : > { %12197 = vrcp.f32 %v6484_v3 }
 0xd75   : > { %v6487_v16 = vpop.xlane.xlu1 %6486 }
 0xd76   : > { %12199 = vrcp.f32 %v6487_v16 }
 0xd79   : > { %v6490_v36 = vpop.xlane.xlu1 %6489 }
 0xd7f   : > { %v12198_v49 = vpop.eup %12197 }
 0xd80   : > { %v16427_v32 = vmul.f32 %v12198_v49, %v16317_v14  ;;  %v11571_v14 = vld [vmem:[%s18255_s6 + $0x38] sm:$0xff]  }
 0xd83   : > { %v12200_v9 = vpop.eup %12199 }
 0xd84   : > { %v16430_v28 = vmul.f32 %v12200_v9, %v16325_v43 }
 0xd86   : > { %v6572_v4 = vpack.c.bf16 %v16430_v28, %v16427_v32  ;;  %v18798_v28 = vmov 0  }
 0xd90   : > { %v6454_v17 = vpop.xlane.xlu0 %6453 }
 0xd94   : > { %v6448_v29 = vpop.xlane.xlu0 %6447 }
 0xd95   : > { %v6451_v34 = vpop.xlane.xlu1 %6450  ;;  %12201 = vrcp.f32 %v6448_v29 }
 0xd96   : > { %12203 = vrcp.f32 %v6451_v34 }
 0xd97   : > { %12205 = vrcp.f32 %v6454_v17 }
 0xd98   : > { %v6457_v8 = vpop.xlane.xlu0 %6456 }
 0xd99   : > { %12207 = vrcp.f32 %v6457_v8 }
 0xd9a   : > { %12209 = vrcp.f32 %v6475_v60 }
 0xd9c   : > { %v6753_v35 = vpop.permute.xlu0 %6752 }
 0xd9d   : > { %11395 = vmatprep.subr.bf16.mxu1 %v6753_v35 }
 0xd9e   : > { %11396 = vmatpush3.bf16.msra.mxu1 %v6753_v35 }
 0xd9f   : > { %11421 = vmatprep.subr.bf16.mxu1 %v11571_v14 }
 0xda2   : > { %v12202_v43 = vpop.eup %12201 }
 0xda3   : > { %v12204_v59 = vpop.eup %12203  ;;  %v6542_v58 = vmul.f32 %v12202_v43, %v16350_v0 }
 0xda4   : > { %v12206_v10 = vpop.eup %12205  ;;  %v6543_v57 = vmul.f32 %v12204_v59, %v16352_v44 }
 0xda5   : > { %v6544_v41 = vmul.f32 %v12206_v10, %v16346_v40 }
 0xda6   : > { %v12208_v12 = vpop.eup %12207  ;;  %v6566_v24 = vpack.c.bf16 %v6543_v57, %v6542_v58 }
 0xda7   : > { %v6545_v30 = vmul.f32 %v12208_v12, %v16356_v39  ;;  %v12210_v5 = vpop.eup %12209  ;;  %v11367_v54 = vpop.f32.mrf.mxu0 }
 0xda8   : > { %11397 = vmatprep.mubr.msk.bf16.mxu1 %vm1917_vm1, %v6566_v24  ;;  %v6551_v21 = vmul.f32 %v12210_v5, %v16309_v45 }
 0xda9   : > { %v6567_v15 = vpack.c.bf16 %v6545_v30, %v6544_v41  ;;  %v6632_v33 = vpop.f32.mrf.mxu0 }
 0xdab   : > { %11398 = vmatmul.mubr.msk.bf16.vlgmr.msra.gmra.mxu1 %vm1917_vm1, %v6567_v15 }
 0xdac   : > { %11422 = vmatpush3.bf16.msra.mxu1 %v11571_v14 }
 0xdad   : > { %11423 = vmatprep.subr.bf16.mxu1 %v11572_v55 }
 0xdb0   : > { %11424 = vmatpush3.bf16.msra.mxu1 %v11572_v55 }
 0xdcd   : > { %v6472_v0 = vpop.xlane.xlu0 %6471 }
 0xdce   : > { %12211 = vrcp.f32 %v6472_v0 }
 0xdd1   : > { %v6478_v44 = vpop.xlane.xlu0 %6477 }
 0xdd5   : > { %v6466_v19 = vpop.xlane.xlu1 %6465  ;;  %v6481_v40 = vpop.xlane.xlu0 %6480 }
 0xdd6   : > { %12213 = vrcp.f32 %v6481_v40 }
 0xdd7   : > { %12215 = vrcp.f32 %v6478_v44 }
 0xdd9   : > { %v6460_v39 = vpop.xlane.xlu1 %6459  ;;  %v6848_v13 = vpop.permute.xlu0 %6847 }
 0xdda   : > { %11405 = vmatprep.subr.bf16.mxu0 %v6848_v13 }
 0xddb   : > { %v12212_v1 = vpop.eup %12211  ;;  %11406 = vmatpush3.bf16.msra.mxu0 %v6848_v13 }
 0xddc   : > { %v6550_v2 = vmul.f32 %v12212_v1, %v16376_v46  ;;  %v11368_v46 = vpop.f32.mrf.mxu0 }
 0xddd   : > { %v6469_v42 = vpop.xlane.xlu1 %6468  ;;  %v6846_v61 = vpop.permute.xlu0 %6845  ;;  %v6931_v32 = vpack.c.bf16 %v11368_v46, %v11367_v54 }
 0xdde   : > { %11407 = vmatprep.subr.bf16.mxu0 %v6846_v61  ;;  %v6570_v7 = vpack.c.bf16 %v6551_v21, %v6550_v2  ;;  %12217 = vrcp.f32 %v6469_v42  ;;  %v6635_v31 = vpop.f32.mrf.mxu0 }
 0xddf   : > { %11408 = vmatpush3.bf16.msra.mxu0 %v6846_v61  ;;  %12219 = vrcp.f32 %v6460_v39 }
 0xde0   : > { %11413 = vmatprep.mubr.msk.bf16.mxu0 %vm1917_vm1, %v6570_v7  ;;  %12221 = vrcp.f32 %v6466_v19  ;;  %v11371_v9 = vpop.f32.mrf.mxu0 }
 0xde1   : > { %v6463_v6 = vpop.xlane.xlu1 %6462  ;;  %v6842_v60 = vpop.permute.xlu0 %6841 }
 0xde2   : > { %12223 = vrcp.f32 %v6463_v6  ;;  %v6648_v43 = vpop.f32.mrf.mxu0 }
 0xde3   : > { %12225 = vrcp.f32 %v6490_v36  ;;  %v12214_v45 = vpop.eup %12213 }
 0xde4   : > { %v12216_v27 = vpop.eup %12215  ;;  %v6553_v16 = vmul.f32 %v12214_v45, %v16392_v18 }
 0xde5   : > { %v6493_v52 = vpop.xlane.xlu1 %6492  ;;  %v6552_v29 = vmul.f32 %v12216_v27, %v16383_v47 }
 0xde6   : > { %12227 = vrcp.f32 %v6493_v52 }
 0xde7   : > { %v6571_v8 = vpack.c.bf16 %v6553_v16, %v6552_v29  ;;  %v18799_v29 = vld [vmem:[#allocation49_spill] sm:$0xff] }
 0xde9   : > { %v6844_v22 = vpop.permute.xlu1 %6843 }
 0xdea   : > { %11409 = vmatprep.subr.bf16.mxu0 %v6844_v22 }
 0xdeb   : > { %11410 = vmatpush3.bf16.msra.mxu0 %v6844_v22  ;;  %v12218_v3 = vpop.eup %12217 }
 0xdec   : > { %11411 = vmatprep.subr.bf16.mxu0 %v6842_v60  ;;  %v12220_v49 = vpop.eup %12219  ;;  %v6549_v34 = vmul.f32 %v12218_v3, %v16406_v51  ;;  %v6930_v51 = vpack.c.bf16 %v6635_v31, %v6632_v33 }
 0xded   : > { %v12222_v17 = vpop.eup %12221  ;;  %v6546_v14 = vmul.f32 %v12220_v49, %v16402_v37 }
 0xdee   : > { %v6548_v59 = vmul.f32 %v12222_v17, %v16395_v23 }
 0xdef   : > { %v12224_v36 = vpop.eup %12223  ;;  %11412 = vmatpush3.bf16.msra.mxu0 %v6842_v60 }
 0xdf0   : > { %v6547_v35 = vmul.f32 %v12224_v36, %v16410_v25  ;;  %v12226_v58 = vpop.eup %12225  ;;  %v6569_v47 = vpack.c.bf16 %v6549_v34, %v6548_v59  ;;  %v11372_v25 = vpop.f32.mrf.mxu0  ;;  %v18800_v36 = vld [vmem:[#allocation12_spill] sm:$0xff]  ;;  %v12549_v59 = vld [vmem:[%s12684_s18] sm:$0xff] }
 0xdf1   : > { %v6556_v23 = vmul.f32 %v12226_v58, %v16329_v50  ;;  %v4179_v34 = vadd.f32 %v18800_v36, %v18799_v29 }
 0xdf2   : > { %11414 = vmatmul.mubr.msk.bf16.vlgmr.msra.gmra.mxu0 %vm1917_vm1, %v6571_v8  ;;  %v6568_v18 = vpack.c.bf16 %v6547_v35, %v6546_v14  ;;  %v6651_v12 = vpop.f32.mrf.mxu0 }
 0xdf3   : > { %v12228_v10 = vpop.eup %12227  ;;  %11417 = vmatprep.mubr.msk.bf16.mxu0 %vm1917_vm1, %v6572_v4  ;;  %v6932_v4 = vpack.c.bf16 %v6651_v12, %v6648_v43  ;;  %v5722_v43 = vadd.f32 %v16050_v63, %v4179_v34  ;;  %v12551_v12 = vld [vmem:[%s12684_s18 + $0x10] sm:$0xff]  ;;  %v18814_v34 = vld [vmem:[#allocation62_spill] sm:$0xff] }
 0xdf4   : > { %11401 = vmatprep.mubr.msk.bf16.mxu1 %vm1917_vm1, %v6568_v18  ;;  %v6557_v37 = vmul.f32 %v12228_v10, %v16414_v38  ;;  %v6933_v38 = vpack.c.bf16 %v11372_v25, %v11371_v9 }
 0xdf5   : > { %11402 = vmatmul.mubr.msk.bf16.gmra.mxu1 %vm1917_vm1, %v6569_v47  ;;  %v16488_v47 = vld [vmem:[%s18256_s7] ss:$0 sm:$0xff] }
 0xdf6   : > { %11425 = vmatprep.mubr.msk.bf16.mxu1 %vm1560_vm0, %v6930_v51  ;;  %v6573_v57 = vpack.c.bf16 %v6557_v37, %v6556_v23  ;;  %v12550_v51 = vld [vmem:[%s12684_s18 + $0x20] sm:$0xff] }
 0xdfa   : > { %11418 = vmatmul.mubr.msk.bf16.gmra.mxu0 %vm1917_vm1, %v6573_v57 }
 0xdfb   : > { %7967 = vmatprep.mubr.bf16.mxu0 %v18798_v28 }
 0xdfd   : > { %11426 = vmatmul.mubr.msk.bf16.vlgmr.msra.gmra.mxu1 %vm1560_vm0, %v6931_v32 }
 0xdfe   : > { %11429 = vmatprep.mubr.msk.bf16.mxu1 %vm1560_vm0, %v6932_v4  ;;  %v18801_v4 = vld [vmem:[#allocation67_spill] sm:$0xff] }
 0xe05   : > { %v11383_v24 = vpop.f32.mrf.mxu0  ;;  %11430 = vmatmul.mubr.msk.bf16.gmra.mxu1 %vm1560_vm0, %v6933_v38  ;;  %v18802_v38 = vld [vmem:[#allocation37_spill] sm:$0xff] }
 0xe07   : > { %v6721_v41 = vpop.f32.mrf.mxu0 }
 0xe09   : > { %v11384_v30 = vpop.f32.mrf.mxu0 }
 0xe0a   : > { %v6935_v55 = vpack.c.bf16 %v11384_v30, %v11383_v24  ;;  %v4195_v24 = vadd.f32 %v18802_v38, %v18801_v4  ;;  %v18820_v38 = vld [vmem:[#allocation7_spill] sm:$0xff] }
 0xe0b   : > { %v6724_v15 = vpop.f32.mrf.mxu0 }
 0xe0c   : > { %v6934_v50 = vpack.c.bf16 %v6724_v15, %v6721_v41 }
 0xe0d   : > { %v11387_v0 = vpop.f32.mrf.mxu0 }
 0xe0e   : > { %11433 = vmatprep.mubr.msk.bf16.mxu1 %vm1560_vm0, %v6934_v50 }
 0xe0f   : > { %v6737_v44 = vpop.f32.mrf.mxu0  ;;  %11434 = vmatmul.mubr.msk.bf16.gmra.mxu1 %vm1560_vm0, %v6935_v55 }
 0xe11   : > { %v11388_v19 = vpop.f32.mrf.mxu0 }
 0xe12   : > { %v6937_v39 = vpack.c.bf16 %v11388_v19, %v11387_v0 }
 0xe13   : > { %v6740_v40 = vpop.f32.mrf.mxu0 }
 0xe14   : > { %v6936_v5 = vpack.c.bf16 %v6740_v40, %v6737_v44  ;;  %v5726_v44 = vadd.f32 %v16061_v56, %v4195_v24 }
 0xe16   : > { %11437 = vmatprep.mubr.msk.bf16.mxu1 %vm1560_vm0, %v6936_v5 }
 0xe17   : > { %11438 = vmatmul.mubr.msk.bf16.gmra.mxu1 %vm1560_vm0, %v6937_v39  ;;  %v12554_v39 = vld [vmem:[%s12684_s18 + $0x70] sm:$0xff] }
 0xe6b   : > { %v11399_v13 = vpop.f32.mrf.mxu1 }
 0xe6d   : > { %v6810_v1 = vpop.f32.mrf.mxu1 }
 0xe6f   : > { %v11400_v2 = vpop.f32.mrf.mxu1 }
 0xe70   : > { %v6939_v61 = vpack.c.bf16 %v11400_v2, %v11399_v13 }
 0xe71   : > { %v6813_v21 = vpop.f32.mrf.mxu1 }
 0xe72   : > { %v6938_v42 = vpack.c.bf16 %v6813_v21, %v6810_v1 }
 0xe74   : > { %11441 = vmatprep.mubr.msk.bf16.mxu1 %vm1560_vm0, %v6938_v42 }
 0xe75   : > { %11442 = vmatmul.mubr.msk.bf16.gmra.mxu1 %vm1560_vm0, %v6939_v61  ;;  %v12555_v61 = vld [vmem:[%s12684_s18 + $0x50] sm:$0xff] }
 0xeb2   : > { %v11415_v7 = vpop.f32.mrf.mxu0 }
 0xeb4   : > { %v6899_v54 = vpop.f32.mrf.mxu0 }
 0xeb5   : > { %v11403_v6 = vpop.f32.mrf.mxu1 }
 0xeb6   : > { %v11416_v33 = vpop.f32.mrf.mxu0 }
 0xeb7   : > { %v6826_v52 = vpop.f32.mrf.mxu1  ;;  %v6943_v23 = vpack.c.bf16 %v11416_v33, %v11415_v7  ;;  %v18808_v33 = vld [vmem:[#allocation71_spill] sm:$0xff] }
 0xeb8   : > { %v6902_v46 = vpop.f32.mrf.mxu0 }
 0xeb9   : > { %v11404_v45 = vpop.f32.mrf.mxu1  ;;  %v6942_v49 = vpack.c.bf16 %v6902_v46, %v6899_v54 }
 0xeba   : > { %v11419_v22 = vpop.f32.mrf.mxu0  ;;  %v6941_v3 = vpack.c.bf16 %v11404_v45, %v11403_v6 }
 0xebb   : > { %v6829_v27 = vpop.f32.mrf.mxu1 }
 0xebc   : > { %v6940_v31 = vpack.c.bf16 %v6829_v27, %v6826_v52  ;;  %v6915_v60 = vpop.f32.mrf.mxu0  ;;  %v18809_v52 = vld [vmem:[#allocation3_spill] sm:$0xff]  ;;  %v12556_v27 = vld [vmem:[%s12684_s18 + $0x60] sm:$0xff] }
 0xebd   : > { %v11427_v16 = vpop.f32.mrf.mxu1  ;;  %v4211_v46 = vadd.f32 %v18809_v52, %v18808_v33 }
 0xebe   : > { %11445 = vmatprep.mubr.msk.bf16.mxu1 %vm1560_vm0, %v6940_v31  ;;  %v11420_v9 = vpop.f32.mrf.mxu0  ;;  %v7174_v8 = vadd.f32 %v11427_v16, %v16042_v26 }
 0xebf   : > { %v7045_v17 = vpop.f32.mrf.mxu1  ;;  %11446 = vmatmul.mubr.msk.bf16.gmra.mxu1 %vm1560_vm0, %v6941_v3  ;;  %v6945_v21 = vpack.c.bf16 %v11420_v9, %v11419_v22  ;;  %v18810_v22 = vld [vmem:[#allocation46_spill] sm:$0xff]  ;;  %v18813_v9 = vld [vmem:[#allocation43_spill] sm:$0xff] }
 0xec0   : > { %v7172_v14 = vadd.f32 %v7045_v17, %v16045_v48  ;;  %11449 = vmatprep.mubr.msk.bf16.mxu1 %vm1560_vm0, %v6942_v49  ;;  %v6918_v18 = vpop.f32.mrf.mxu0  ;;  %v7206_v26 = vadd.f32 %v12550_v51, %v7174_v8  ;;  %v18817_v51 = vld [vmem:[#allocation18_spill] sm:$0xff] }
 0xec1   : > { %v11428_v35 = vpop.f32.mrf.mxu1  ;;  %v6944_v57 = vpack.c.bf16 %v6918_v18, %v6915_v60  ;;  %v18811_v60 = vld [vmem:[#allocation41_spill] sm:$0xff] }
 0xec2   : > { %v7204_v58 = vadd.f32 %v12549_v59, %v7172_v14  ;;  %v7175_v48 = vadd.f32 %v11428_v35, %v16048_v20  ;;  %v12552_v20 = vld [vmem:[%s12684_s18 + $0x30] sm:$0xff]  ;;  %v16504_v50 = vadd.f32 %v16488_v47, %v7206_v26  ;;  %v12557_v14 = vld [vmem:[%s12684_s18 + $0x8] sm:$0xff] }
 0xec3   : > { %v7048_v10 = vpop.f32.mrf.mxu1 }
 0xec4   : > { %v7173_v37 = vadd.f32 %v7048_v10, %v5722_v43  ;;  %v16493_v25 = vadd.f32 %v16488_v47, %v7204_v58  ;;  %v7207_v30 = vadd.f32 %v12552_v20, %v7175_v48  ;;  %18803 = vst [vmem:[#allocation91_spill] sm:$0xff] %v16504_v50  ;;  %v12558_v43 = vld [vmem:[%s12684_s18 + $0x18] sm:$0xff]  ;;  %v18816_v10 = vld [vmem:[#allocation75_spill] sm:$0xff] }
 0xec5   : > { %v11431_v63 = vpop.f32.mrf.mxu1  ;;  %v4227_v26 = vadd.f32 %v18817_v51, %v18816_v10  ;;  %v12559_v48 = vld [vmem:[%s12684_s18 + $0x38] sm:$0xff]  ;;  %v12567_v51 = vld [vmem:[%s12684_s18 + $0x90] sm:$0xff] }
 0xec6   : > { %v7205_v32 = vadd.f32 %v12551_v12, %v7173_v37  ;;  %7277 = vadd.xlane.f32.xlu0 %v16493_v25  ;;  %v16516_v2 = vadd.f32 %v16488_v47, %v7207_v30  ;;  %v7178_v42 = vadd.f32 %v11431_v63, %v16053_v62  ;;  %v5730_v62 = vadd.f32 %v18810_v22, %v4211_v46  ;;  %v18822_v30 = vld [vmem:[#allocation5_spill] sm:$0xff]  ;;  %v18830_v22 = vld [vmem:[#allocation72_spill] sm:$0xff] }
 0xec7   : > { %v7061_v41 = vpop.f32.mrf.mxu1  ;;  %11450 = vmatmul.mubr.msk.bf16.gmra.mxu1 %vm1560_vm0, %v6943_v23 }
 0xec8   : > { %v7176_v15 = vadd.f32 %v7061_v41, %v16056_v53  ;;  %11453 = vmatprep.mubr.msk.bf16.mxu1 %vm1560_vm0, %v6944_v57  ;;  %v16507_v55 = vadd.f32 %v16488_v47, %v7205_v32  ;;  %v12553_v53 = vld [vmem:[%s12684_s18 + $0x40] sm:$0xff]  ;;  %18805 = vst [vmem:[#allocation40_spill] sm:$0xff] %v16516_v2  ;;  %v7210_v31 = vadd.f32 %v12556_v27, %v7178_v42  ;;  %v18819_v57 = vld [vmem:[#allocation11_spill] sm:$0xff] }
 0xec9   : > { %v11432_v0 = vpop.f32.mrf.mxu1  ;;  %v5734_v12 = vadd.f32 %v18819_v57, %v4227_v26  ;;  %v12560_v32 = vld [vmem:[%s12684_s18 + $0x28] sm:$0xff] }
 0xeca   : > { %18804 = vst [vmem:[#allocation90_spill] sm:$0xff] %v16507_v55  ;;  %v7179_v19 = vadd.f32 %v11432_v0, %v16059_v11  ;;  %7281 = vadd.xlane.f32.xlu0 %v16504_v50  ;;  %7279 = vadd.xlane.f32.xlu1 %v16507_v55  ;;  %v7208_v5 = vadd.f32 %v12553_v53, %v7176_v15  ;;  %v12561_v53 = vld [vmem:[%s12684_s18 + $0x48] sm:$0xff] }
 0xecb   : > { %v7064_v40 = vpop.f32.mrf.mxu1  ;;  %v16545_v58 = vadd.f32 %v16488_v47, %v7210_v31  ;;  %v18832_v31 = vld [vmem:[#allocation15_spill] sm:$0xff] }
 0xecc   : > { %v7211_v13 = vadd.f32 %v12554_v39, %v7179_v19  ;;  %v7177_v1 = vadd.f32 %v7064_v40, %v5726_v44  ;;  %v16527_v54 = vadd.f32 %v16488_v47, %v7208_v5  ;;  %v18824_v19 = vld [vmem:[#allocation21_spill] sm:$0xff] }
 0xecd   : > { %18815 = vst [vmem:[#allocation53_spill] sm:$0xff] %v16545_v58  ;;  %v12562_v39 = vld [vmem:[%s12684_s18 + $0x58] sm:$0xff] }
 0xece   : > { %7283 = vadd.xlane.f32.xlu0 %v16516_v2  ;;  %v16520_v11 = vadd.f32 %v16488_v47, %v7211_v13  ;;  %v7209_v7 = vadd.f32 %v12555_v61, %v7177_v1  ;;  %18807 = vst [vmem:[#allocation54_spill] sm:$0xff] %v16527_v54  ;;  %v12564_v61 = vld [vmem:[%s12684_s18 + $0x68] sm:$0xff] }
 0xecf   : > { %v11435_v56 = vpop.f32.mrf.mxu1  ;;  %11454 = vmatmul.mubr.msk.bf16.gmra.mxu1 %vm1560_vm0, %v6945_v21  ;;  %v12563_v21 = vld [vmem:[%s12684_s18 + $0x78] sm:$0xff] }
 0xed0   : > { %18806 = vst [vmem:[#allocation27_spill] sm:$0xff] %v16520_v11  ;;  %7291 = vadd.xlane.f32.xlu1 %v16520_v11  ;;  %8160 = vmatprep.mubr.bf16.mxu1 %v18798_v28  ;;  %v16537_v16 = vadd.f32 %v16488_v47, %v7209_v7  ;;  %v7182_v8 = vadd.f32 %v11435_v56, %v18814_v34 }
 0xed1   : > { %v7077_v6 = vpop.f32.mrf.mxu1 }
 0xed2   : > { %7285 = vadd.xlane.f32.xlu0 %v16527_v54  ;;  %v7180_v3 = vadd.f32 %v7077_v6, %v18811_v60  ;;  %18812 = vst [vmem:[#allocation38_spill] sm:$0xff] %v16537_v16  ;;  %v7214_v4 = vadd.f32 %v12560_v32, %v7182_v8 }
 0xed3   : > { %v11436_v45 = vpop.f32.mrf.mxu1 }
 0xed4   : > { %v7183_v17 = vadd.f32 %v11436_v45, %v18813_v9  ;;  %v7212_v35 = vadd.f32 %v12557_v14, %v7180_v3  ;;  %v16571_v1 = vadd.f32 %v16488_v47, %v7214_v4  ;;  %v18833_v3 = vld [vmem:[#allocation24_spill] sm:$0xff]  ;;  %v12566_v14 = vld [vmem:[%s12684_s18 + $0xa0] sm:$0xff] }
 0xed5   : > { %v7080_v49 = vpop.f32.mrf.mxu1 }
 0xed6   : > { %v7181_v29 = vadd.f32 %v7080_v49, %v5730_v62  ;;  %7287 = vadd.xlane.f32.xlu0 %v16537_v16  ;;  %v7215_v37 = vadd.f32 %v12559_v48, %v7183_v17  ;;  %v16559_v41 = vadd.f32 %v16488_v47, %v7212_v35  ;;  %18825 = vst [vmem:[#allocation48_spill] sm:$0xff] %v16571_v1  ;;  %v18831_v62 = vld [vmem:[#allocation25_spill] sm:$0xff]  ;;  %v18834_v17 = vld [vmem:[#allocation26_spill] sm:$0xff]  ;;  %v12568_v48 = vld [vmem:[%s12684_s18 + $0xb0] sm:$0xff] }
 0xed7   : > { %v11439_v36 = vpop.f32.mrf.mxu1  ;;  %v4243_v27 = vadd.f32 %v18831_v62, %v18830_v22  ;;  %v11593_v22 = vld [vmem:[%s18259_s10 + $0x84] ss:$16 sps:$4 sm:$0xff]   ;;  %v11596_v62 = vld [vmem:[%s18259_s10 + $0x8c] ss:$16 sps:$4 sm:$0xff]  }
 0xed8   : > { %v7213_v59 = vadd.f32 %v12558_v43, %v7181_v29  ;;  %18821 = vst [vmem:[#allocation51_spill] sm:$0xff] %v16559_v41  ;;  %v16564_v44 = vadd.f32 %v16488_v47, %v7215_v37  ;;  %v7186_v40 = vadd.f32 %v11439_v36, %v18824_v19  ;;  %v12565_v36 = vld [vmem:[%s12684_s18 + $0x80] sm:$0xff]  ;;  %v18835_v43 = vld [vmem:[#allocation31_spill] sm:$0xff] }
 0xed9   : > { %v7093_v18 = vpop.f32.mrf.mxu1  ;;  %v5738_v29 = vadd.f32 %v18834_v17, %v4243_v27  ;;  %v11575_v19 = vld [vmem:[%s18259_s10 + $0xe4] ss:$16 sps:$4 sm:$0xff]   ;;  %v11591_v27 = vld [vmem:[%s18259_s10 + $0x80] ss:$16 sps:$4 sm:$0xff]  }
 0xeda   : > { %7289 = vadd.xlane.f32.xlu0 %v16545_v58  ;;  %v16552_v23 = vadd.f32 %v16488_v47, %v7213_v59  ;;  %v7184_v24 = vadd.f32 %v7093_v18, %v18820_v38  ;;  %18823 = vst [vmem:[#allocation8_spill] sm:$0xff] %v16564_v44  ;;  %v7218_v7 = vadd.f32 %v12564_v61, %v7186_v40  ;;  %v11576_v40 = vld [vmem:[%s18259_s10 + $0xe8] ss:$16 sps:$4 sm:$0xff]   ;;  %v11587_v61 = vld [vmem:[%s18259_s10 + $0xa4] ss:$16 sps:$4 sm:$0xff]  }
 0xedb   : > { %v11440_v63 = vpop.f32.mrf.mxu1  ;;  %7935 = vmatprep.subr.bf16.mxu0 %v11575_v19  ;;  %v11605_v17 = vld [vmem:[%s18259_s10 + $0x44] ss:$16 sps:$4 sm:$0xff]   ;;  %v18842_v19 = vld [vmem:[#allocation29_spill] sm:$0xff] }
 0xedc   : > { %18818 = vst [vmem:[#allocation58_spill] sm:$0xff] %v16552_v23  ;;  %7295 = vadd.xlane.f32.xlu1 %v16552_v23  ;;  %v7187_v15 = vadd.f32 %v11440_v63, %v18822_v30  ;;  %v7216_v5 = vadd.f32 %v12561_v53, %v7184_v24  ;;  %v16589_v52 = vadd.f32 %v16488_v47, %v7218_v7  ;;  %v11578_v53 = vld [vmem:[%s18259_s10 + $0xec] ss:$16 sps:$4 sm:$0xff]  }
 0xedd   : > { %v7096_v20 = vpop.f32.mrf.mxu1  ;;  %8128 = vmatprep.subr.bf16.mxu1 %v11578_v53  ;;  %v11590_v7 = vld [vmem:[%s18259_s10 + $0xac] ss:$16 sps:$4 sm:$0xff]  }
 0xede   : > { %v7185_v0 = vadd.f32 %v7096_v20, %v5734_v12  ;;  %7293 = vadd.xlane.f32.xlu0 %v16559_v41  ;;  %v7219_v56 = vadd.f32 %v12563_v21, %v7187_v15  ;;  %v16581_v6 = vadd.f32 %v16488_v47, %v7216_v5  ;;  %18829 = vst [vmem:[#allocation66_spill] sm:$0xff] %v16589_v52  ;;  %v11579_v21 = vld [vmem:[%s18259_s10 + $0xc0] ss:$16 sps:$4 sm:$0xff]  }
 0xedf   : > { %8129 = vmatpush1.bf16.msra.mxu1 %v11576_v40 }
 0xee0   : > { %v7217_v13 = vadd.f32 %v12562_v39, %v7185_v0  ;;  %7299 = vadd.xlane.f32.xlu1 %v16564_v44  ;;  %18827 = vst [vmem:[#allocation69_spill] sm:$0xff] %v16581_v6  ;;  %v16585_v33 = vadd.f32 %v16488_v47, %v7219_v56  ;;  %v11573_v0 = vld [vmem:[%s18259_s10 + $0xe0] ss:$16 sps:$4 sm:$0xff]   ;;  %v11581_v39 = vld [vmem:[%s18259_s10 + $0xc4] ss:$16 sps:$4 sm:$0xff]  }
 0xee1   : > { %7936 = vmatpush1.bf16.msra.mxu0 %v11573_v0  ;;  %v11582_v56 = vld [vmem:[%s18259_s10 + $0xc8] ss:$16 sps:$4 sm:$0xff]  }
 0xee2   : > { %7297 = vadd.xlane.f32.xlu0 %v16571_v1  ;;  %v16576_v42 = vadd.f32 %v16488_v47, %v7217_v13  ;;  %18828 = vst [vmem:[#allocation4_spill] sm:$0xff] %v16585_v33  ;;  %v11584_v13 = vld [vmem:[%s18259_s10 + $0xcc] ss:$16 sps:$4 sm:$0xff]   ;;  %7937 = vmatprep.subr.bf16.mxu0 %v11581_v39  ;;  %v18843_v39 = vld [vmem:[#allocation36_spill] sm:$0xff] }
 0xee3   : > { %8130 = vmatprep.subr.bf16.mxu1 %v11584_v13 }
 0xee4   : > { %18826 = vst [vmem:[#allocation6_spill] sm:$0xff] %v16576_v42  ;;  %7303 = vadd.xlane.f32.xlu1 %v16576_v42  ;;  %8131 = vmatpush1.bf16.msra.mxu1 %v11582_v56 }
 0xee5   : > { %7938 = vmatpush1.bf16.msra.mxu0 %v11579_v21  ;;  %8132 = vmatprep.subr.bf16.mxu1 %v11590_v7  ;;  %v12569_v21 = vld [vmem:[%s12684_s18 + $0xc0] sm:$0xff] }
 0xee6   : > { %7301 = vadd.xlane.f32.xlu0 %v16581_v6  ;;  %7939 = vmatprep.subr.bf16.mxu0 %v11587_v61 }
 0xee8   : > { %7307 = vadd.xlane.f32.xlu1 %v16585_v33 }
 0xeea   : > { %7305 = vadd.xlane.f32.xlu0 %v16589_v52 }
 0xf35   : > { %v11443_v46 = vpop.f32.mrf.mxu1 }
 0xf36   : > { %v7190_v60 = vadd.f32 %v11443_v46, %v18832_v31  ;;  %v11585_v46 = vld [vmem:[%s18259_s10 + $0xa0] ss:$16 sps:$4 sm:$0xff]   ;;  %v11594_v31 = vld [vmem:[%s18259_s10 + $0x88] ss:$16 sps:$4 sm:$0xff]  }
 0xf37   : > { %v7109_v45 = vpop.f32.mrf.mxu1  ;;  %7940 = vmatpush1.bf16.msra.mxu0 %v11585_v46 }
 0xf38   : > { %v7188_v49 = vadd.f32 %v7109_v45, %v18833_v3  ;;  %v7222_v35 = vadd.f32 %v12566_v14, %v7190_v60  ;;  %v11588_v45 = vld [vmem:[%s18259_s10 + $0xa8] ss:$16 sps:$4 sm:$0xff]   ;;  %7941 = vmatprep.subr.bf16.mxu0 %v11593_v22  ;;  %v11599_v60 = vld [vmem:[%s18259_s10 + $0x64] ss:$16 sps:$4 sm:$0xff]   ;;  %v11602_v3 = vld [vmem:[%s18259_s10 + $0x6c] ss:$16 sps:$4 sm:$0xff]  }
 0xf39   : > { %v11444_v9 = vpop.f32.mrf.mxu1  ;;  %8133 = vmatpush1.bf16.msra.mxu1 %v11588_v45  ;;  %v11614_v14 = vld [vmem:[%s18259_s10 + $0x2c] ss:$16 sps:$4 sm:$0xff]   ;;  %v18844_v45 = vld [vmem:[#allocation34_spill] sm:$0xff] }
 0xf3a   : > { %v7220_v34 = vadd.f32 %v12565_v36, %v7188_v49  ;;  %v7191_v59 = vadd.f32 %v11444_v9, %v18835_v43  ;;  %v16607_v63 = vadd.f32 %v16488_v47, %v7222_v35  ;;  %8134 = vmatprep.subr.bf16.mxu1 %v11596_v62  ;;  %v11597_v49 = vld [vmem:[%s18259_s10 + $0x60] ss:$16 sps:$4 sm:$0xff]   ;;  %v11600_v9 = vld [vmem:[%s18259_s10 + $0x68] ss:$16 sps:$4 sm:$0xff]  }
 0xf3b   : > { %v7112_v8 = vpop.f32.mrf.mxu1  ;;  %7942 = vmatpush1.bf16.msra.mxu0 %v11591_v27  ;;  %v11603_v36 = vld [vmem:[%s18259_s10 + $0x40] ss:$16 sps:$4 sm:$0xff]  }
 0xf3c   : > { %v7189_v18 = vadd.f32 %v7112_v8, %v5738_v29  ;;  %v16601_v10 = vadd.f32 %v16488_v47, %v7220_v34  ;;  %v7223_v37 = vadd.f32 %v12568_v48, %v7191_v59  ;;  %18837 = vst [vmem:[#allocation64_spill] sm:$0xff] %v16607_v63  ;;  %7943 = vmatprep.subr.bf16.mxu0 %v11599_v60  ;;  %v11608_v29 = vld [vmem:[%s18259_s10 + $0x4c] ss:$16 sps:$4 sm:$0xff]   ;;  %v11606_v34 = vld [vmem:[%s18259_s10 + $0x48] ss:$16 sps:$4 sm:$0xff]   ;;  %v12570_v60 = vld [vmem:[%s12684_s18 + $0xd0] sm:$0xff] }
 0xf3d   : > { %8135 = vmatpush1.bf16.msra.mxu1 %v11594_v31  ;;  %v11611_v8 = vld [vmem:[%s18259_s10 + $0x24] ss:$16 sps:$4 sm:$0xff]   ;;  %v11609_v43 = vld [vmem:[%s18259_s10 + $0x20] ss:$16 sps:$4 sm:$0xff]   ;;  %v11612_v59 = vld [vmem:[%s18259_s10 + $0x28] ss:$16 sps:$4 sm:$0xff]  }
 0xf3e   : > { %18836 = vst [vmem:[#allocation10_spill] sm:$0xff] %v16601_v10  ;;  %v7221_v26 = vadd.f32 %v12567_v51, %v7189_v18  ;;  %7309 = vadd.xlane.f32.xlu0 %v16601_v10  ;;  %v16615_v12 = vadd.f32 %v16488_v47, %v7223_v37  ;;  %8136 = vmatprep.subr.bf16.mxu1 %v11602_v3  ;;  %v11617_v18 = vld [vmem:[%s18259_s10 + $0x4] ss:$16 sps:$4 sm:$0xff]   ;;  %v11615_v51 = vld [vmem:[%s18259_s10] ss:$16 sps:$4 sm:$0xff]  }
 0xf3f   : > { %7944 = vmatpush1.bf16.msra.mxu0 %v11597_v49  ;;  %v11620_v48 = vld [vmem:[%s18259_s10 + $0xc] ss:$16 sps:$4 sm:$0xff]  }
 0xf40   : > { %v16610_v57 = vadd.f32 %v16488_v47, %v7221_v26  ;;  %18839 = vst [vmem:[#allocation73_spill] sm:$0xff] %v16615_v12  ;;  %7945 = vmatprep.subr.bf16.mxu0 %v11605_v17  ;;  %v11618_v26 = vld [vmem:[%s18259_s10 + $0x8] ss:$16 sps:$4 sm:$0xff]  }
 0xf41   : > { %8137 = vmatpush1.bf16.msra.mxu1 %v11600_v9 }
 0xf42   : > { %18838 = vst [vmem:[#allocation16_spill] sm:$0xff] %v16610_v57  ;;  %7313 = vadd.xlane.f32.xlu0 %v16607_v63  ;;  %7311 = vadd.xlane.f32.xlu1 %v16610_v57 }
 0xf43   : > { %8138 = vmatprep.subr.bf16.mxu1 %v11608_v29  ;;  %7946 = vmatpush1.bf16.msra.mxu0 %v11603_v36 }
 0xf44   : > { %7947 = vmatprep.subr.bf16.mxu0 %v11611_v8 }
 0xf45   : > { %8139 = vmatpush1.bf16.msra.mxu1 %v11606_v34  ;;  %v12571_v34 = vld [vmem:[%s12684_s18 + $0xe0] sm:$0xff] }
 0xf46   : > { %7315 = vadd.xlane.f32.xlu1 %v16615_v12  ;;  %8140 = vmatprep.subr.bf16.mxu1 %v11614_v14  ;;  %v18846_v14 = vld [vmem:[#allocation32_spill] sm:$0xff] }
 0xf47   : > { %7948 = vmatpush1.bf16.msra.mxu0 %v11609_v43 }
 0xf48   : > { %7949 = vmatprep.subr.bf16.mxu0 %v11617_v18  ;;  %v18848_v18 = vld [vmem:[#allocation83_spill] sm:$0xff] }
 0xf49   : > { %8141 = vmatpush1.bf16.msra.mxu1 %v11612_v59 }
 0xf4a   : > { %8142 = vmatprep.subr.bf16.mxu1 %v11620_v48 }
 0xf4b   : > { %7950 = vmatpush1.bf16.msra.mxu0 %v11615_v51  ;;  %v18849_v51 = vld [vmem:[#allocation50_spill] sm:$0xff] }
 0xf4d   : > { %8143 = vmatpush1.bf16.msra.mxu1 %v11618_v26  ;;  %v4275_v26 = vadd.f32 %v18849_v51, %v18848_v18 }
 0xf4f   : > { %v7278_v32 = vpop.xlane.xlu0 %7277 }
 0xf50   : > { %v7341_v4 = vmul.f32 0.0078125, %v7278_v32 }
 0xf52   : > { %v16619_v38 = vsub.f32 %v16493_v25, %v7341_v4 }
 0xf53   : > { %v7280_v24 = vpop.xlane.xlu1 %7279  ;;  %v7282_v35 = vpop.xlane.xlu0 %7281 }
 0xf54   : > { %v7342_v20 = vmul.f32 0.0078125, %v7280_v24  ;;  %v7405_v30 = vmul.f32 %v16619_v38, %v16619_v38  ;;  %v7343_v4 = vmul.f32 0.0078125, %v7282_v35 }
 0xf56   : > { %v16624_v15 = vsub.f32 %v16507_v55, %v7342_v20  ;;  %7437 = vadd.xlane.f32.xlu0 %v7405_v30  ;;  %v18840_v20 = vld [vmem:[#allocation79_spill] sm:$0xff]  ;;  %v18841_v30 = vld [vmem:[#allocation52_spill] sm:$0xff]  ;;  %v16730_v61 = vsub.f32 %v16504_v50, %v7343_v4 }
 0xf57   : > { %v7284_v37 = vpop.xlane.xlu0 %7283  ;;  %v4259_v0 = vadd.f32 %v18841_v30, %v18840_v20 }
 0xf58   : > { %v7406_v5 = vmul.f32 %v16624_v15, %v16624_v15  ;;  %v7344_v46 = vmul.f32 0.0078125, %v7284_v37  ;;  %v7407_v29 = vmul.f32 %v16730_v61, %v16730_v61 }
 0xf59   : > { %v5742_v13 = vadd.f32 %v18843_v39, %v4259_v0 }
 0xf5a   : > { %7439 = vadd.xlane.f32.xlu1 %v7406_v5  ;;  %v16741_v36 = vsub.f32 %v16516_v2, %v7344_v46 }
 0xf5b   : > { %v7286_v53 = vpop.xlane.xlu0 %7285 }
 0xf5c   : > { %v7345_v49 = vmul.f32 0.0078125, %v7286_v53  ;;  %v7408_v0 = vmul.f32 %v16741_v36, %v16741_v36  ;;  %v18852_v53 = vld [vmem:[#allocation88_spill] sm:$0xff] }
 0xf5e   : > { %v16752_v48 = vsub.f32 %v16527_v54, %v7345_v49 }
 0xf5f   : > { %v7288_v9 = vpop.xlane.xlu0 %7287 }
 0xf60   : > { %v7346_v37 = vmul.f32 0.0078125, %v7288_v9 }
 0xf62   : > { %v16764_v39 = vsub.f32 %v16537_v16, %v7346_v37  ;;  %v12575_v37 = vld [vmem:[%s12684_s18 + $0xa8] sm:$0xff] }
 0xf7f   : > { %v11447_v32 = vpop.f32.mrf.mxu1 }
 0xf80   : > { %v7194_v22 = vadd.f32 %v11447_v32, %v18844_v45  ;;  %v12572_v32 = vld [vmem:[%s12684_s18 + $0xf0] sm:$0xff] }
 0xf81   : > { %v7125_v24 = vpop.f32.mrf.mxu1 }
 0xf82   : > { %v7192_v40 = vadd.f32 %v7125_v24, %v18842_v19  ;;  %v7226_v8 = vadd.f32 %v12571_v34, %v7194_v22  ;;  %v18850_v24 = vld [vmem:[#allocation47_spill] sm:$0xff]  ;;  %v7290_v19 = vpop.xlane.xlu0 %7289  ;;  %v12574_v34 = vld [vmem:[%s12684_s18 + $0x98] sm:$0xff] }
 0xf83   : > { %v11448_v5 = vpop.f32.mrf.mxu1 }
 0xf84   : > { %v7224_v56 = vadd.f32 %v12569_v21, %v7192_v40  ;;  %v7195_v35 = vadd.f32 %v11448_v5, %v18846_v14  ;;  %v16757_v30 = vadd.f32 %v16488_v47, %v7226_v8  ;;  %v5746_v5 = vadd.f32 %v18852_v53, %v4275_v26  ;;  %v7292_v21 = vpop.xlane.xlu1 %7291 }
 0xf85   : > { %v7128_v7 = vpop.f32.mrf.mxu1 }
 0xf86   : > { %v7193_v62 = vadd.f32 %v7128_v7, %v5742_v13  ;;  %v16734_v27 = vadd.f32 %v16488_v47, %v7224_v56  ;;  %v7227_v4 = vadd.f32 %v12572_v32, %v7195_v35  ;;  %18851 = vst [vmem:[#allocation14_spill] sm:$0xff] %v16757_v30  ;;  %v7409_v13 = vmul.f32 %v16752_v48, %v16752_v48  ;;  %v12573_v7 = vld [vmem:[%s12684_s18 + $0x88] sm:$0xff]  ;;  %v7294_v9 = vpop.xlane.xlu0 %7293 }
 0xf87   : > { %v11451_v31 = vpop.f32.mrf.mxu1  ;;  %v7347_v56 = vmul.f32 0.0078125, %v7290_v19  ;;  %v7349_v51 = vmul.f32 0.0078125, %v7294_v9  ;;  %v18858_v19 = vld [vmem:[#allocation87_spill] sm:$0xff]  ;;  %v18862_v9 = vld [vmem:[#allocation89_spill] sm:$0xff] }
 0xf88   : > { %18845 = vst [vmem:[#allocation23_spill] sm:$0xff] %v16734_v27  ;;  %v7225_v3 = vadd.f32 %v12570_v60, %v7193_v62  ;;  %7317 = vadd.xlane.f32.xlu0 %v16734_v27  ;;  %v16770_v22 = vadd.f32 %v16488_v47, %v7227_v4  ;;  %v7348_v60 = vmul.f32 0.0078125, %v7292_v21  ;;  %v7296_v26 = vpop.xlane.xlu1 %7295  ;;  %v18856_v4 = vld [vmem:[#allocation45_spill] sm:$0xff] }
 0xf89   : > { %v7141_v17 = vpop.f32.mrf.mxu1  ;;  %v16776_v49 = vsub.f32 %v16545_v58, %v7347_v56  ;;  %v12576_v56 = vld [vmem:[%s12684_s18 + $0xb8] sm:$0xff] }
 0xf8a   : > { %v16746_v43 = vadd.f32 %v16488_v47, %v7225_v3  ;;  %v7196_v20 = vadd.f32 %v7141_v17, %v18850_v24  ;;  %18853 = vst [vmem:[#allocation68_spill] sm:$0xff] %v16770_v22  ;;  %v7410_v3 = vmul.f32 %v16764_v39, %v16764_v39  ;;  %v18854_v17 = vld [vmem:[#allocation39_spill] sm:$0xff]  ;;  %v16785_v18 = vsub.f32 %v16520_v11, %v7348_v60  ;;  %v7298_v21 = vpop.xlane.xlu0 %7297 }
 0xf8b   : > { %v11452_v59 = vpop.f32.mrf.mxu1 }
 0xf8c   : > { %18847 = vst [vmem:[#allocation70_spill] sm:$0xff] %v16746_v43  ;;  %7319 = vadd.xlane.f32.xlu1 %v16746_v43  ;;  %7441 = vadd.xlane.f32.xlu0 %v7407_v29  ;;  %v7228_v46 = vadd.f32 %v12573_v7, %v7196_v20  ;;  %v7198_v29 = vadd.f32 %v11451_v31, %v18854_v17 }
 0xf8d   : > { %v7144_v40 = vpop.f32.mrf.mxu1  ;;  %v7199_v24 = vadd.f32 %v11452_v59, %v18856_v4  ;;  %v7411_v20 = vmul.f32 %v16776_v49, %v16776_v49  ;;  %v16800_v59 = vsub.f32 %v16559_v41, %v7349_v51  ;;  %v12577_v51 = vld [vmem:[%s12684_s18 + $0xc8] sm:$0xff] }
 0xf8e   : > { %v7197_v45 = vadd.f32 %v7144_v40, %v5746_v5  ;;  %v16781_v14 = vadd.f32 %v16488_v47, %v7228_v46  ;;  %v7230_v32 = vadd.f32 %v12575_v37, %v7198_v29  ;;  %v18859_v40 = vld [vmem:[#allocation65_spill] sm:$0xff]  ;;  %v7350_v5 = vmul.f32 0.0078125, %v7296_v26  ;;  %v18860_v46 = vld [vmem:[#allocation92_spill] sm:$0xff] }
 0xf8f   : > { %v11455_v62 = vpop.f32.mrf.mxu1  ;;  %v4291_v53 = vadd.f32 %v18859_v40, %v18858_v19  ;;  %v7231_v7 = vadd.f32 %v12576_v56, %v7199_v24  ;;  %v7302_v24 = vpop.xlane.xlu0 %7301  ;;  %v18864_v40 = vld [vmem:[#allocation30_spill] sm:$0xff] }
 0xf90   : > { %7321 = vadd.xlane.f32.xlu0 %v16757_v30  ;;  %7443 = vadd.xlane.f32.xlu1 %v7408_v0  ;;  %v7229_v8 = vadd.f32 %v12574_v34, %v7197_v45  ;;  %18855 = vst [vmem:[#allocation33_spill] sm:$0xff] %v16781_v14  ;;  %v16805_v60 = vadd.f32 %v16488_v47, %v7230_v32  ;;  %v7351_v34 = vmul.f32 0.0078125, %v7298_v21 }
 0xf91   : > { %v7157_v35 = vpop.f32.mrf.mxu1  ;;  %v5750_v17 = vadd.f32 %v18862_v9, %v4291_v53  ;;  %v16810_v29 = vsub.f32 %v16552_v23, %v7350_v5  ;;  %v7413_v32 = vmul.f32 %v16800_v59, %v16800_v59  ;;  %v7202_v53 = vadd.f32 %v11455_v62, %v18864_v40  ;;  %v12578_v5 = vld [vmem:[%s12684_s18 + $0xd8] sm:$0xff] }
 0xf92   : > { %v16790_v31 = vadd.f32 %v16488_v47, %v7229_v8  ;;  %v7200_v45 = vadd.f32 %v7157_v35, %v18860_v46  ;;  %18861 = vst [vmem:[#allocation22_spill] sm:$0xff] %v16805_v60  ;;  %v7300_v8 = vpop.xlane.xlu1 %7299  ;;  %v16814_v35 = vadd.f32 %v16488_v47, %v7231_v7  ;;  %v16822_v19 = vsub.f32 %v16571_v1, %v7351_v34  ;;  %v18866_v9 = vld [vmem:[#allocation93_spill] sm:$0xff] }
 0xf93   : > { %v11456_v0 = vpop.f32.mrf.mxu1  ;;  %v7352_v4 = vmul.f32 0.0078125, %v7300_v8  ;;  %v7353_v46 = vmul.f32 0.0078125, %v7302_v24  ;;  %v7306_v8 = vpop.xlane.xlu0 %7305 }
 0xf94   : > { %7323 = vadd.xlane.f32.xlu1 %v16770_v22  ;;  %7445 = vadd.xlane.f32.xlu0 %v7409_v13  ;;  %18857 = vst [vmem:[#allocation74_spill] sm:$0xff] %v16790_v31  ;;  %v7412_v13 = vmul.f32 %v16785_v18, %v16785_v18  ;;  %v7232_v26 = vadd.f32 %v12577_v51, %v7200_v45  ;;  %18863 = vst [vmem:[#allocation76_spill] sm:$0xff] %v16814_v35  ;;  %v12579_v45 = vld [vmem:[%s12684_s18 + $0xe8] sm:$0xff] }
 0xf95   : > { %v16831_v56 = vsub.f32 %v16564_v44, %v7352_v4  ;;  %v7415_v34 = vmul.f32 %v16822_v19, %v16822_v19  ;;  %v12580_v4 = vld [vmem:[%s12684_s18 + $0xf8] sm:$0xff] }
 0xf96   : > { %v16827_v21 = vadd.f32 %v16488_v47, %v7232_v26  ;;  %v7304_v7 = vpop.xlane.xlu1 %7303 }
 0xf97   : > { %v7354_v51 = vmul.f32 0.0078125, %v7304_v7  ;;  %v7416_v26 = vmul.f32 %v16831_v56, %v16831_v56 }
 0xf98   : > { %7325 = vadd.xlane.f32.xlu0 %v16781_v14  ;;  %7447 = vadd.xlane.f32.xlu1 %v7410_v3  ;;  %v7160_v3 = vpop.f32.mrf.mxu1  ;;  %18865 = vst [vmem:[#allocation28_spill] sm:$0xff] %v16827_v21 }
 0xf99   : > { %v7201_v37 = vadd.f32 %v7160_v3, %v5750_v17  ;;  %v7234_v3 = vadd.f32 %v12579_v45, %v7202_v53  ;;  %v7203_v17 = vadd.f32 %v11456_v0, %v18866_v9  ;;  %v16852_v40 = vsub.f32 %v16576_v42, %v7354_v51 }
 0xf9b   : > { %v7235_v0 = vadd.f32 %v12580_v4, %v7203_v17  ;;  %v16848_v24 = vadd.f32 %v16488_v47, %v7234_v3  ;;  %v7418_v45 = vmul.f32 %v16852_v40, %v16852_v40 }
 0xf9c   : > { %7327 = vadd.xlane.f32.xlu1 %v16790_v31  ;;  %7449 = vadd.xlane.f32.xlu0 %v7411_v20  ;;  %v7414_v20 = vmul.f32 %v16810_v29, %v16810_v29 }
 0xf9d   : > { %18868 = vst [vmem:[#allocation19_spill] sm:$0xff] %v16848_v24 }
 0xfa0   : > { %7451 = vadd.xlane.f32.xlu1 %v7412_v13  ;;  %7329 = vadd.xlane.f32.xlu0 %v16805_v60  ;;  %v7233_v13 = vadd.f32 %v12578_v5, %v7201_v37  ;;  %v16844_v37 = vsub.f32 %v16581_v6, %v7353_v46 }
 0xfa2   : > { %v16836_v62 = vadd.f32 %v16488_v47, %v7233_v13  ;;  %v16858_v13 = vadd.f32 %v16488_v47, %v7235_v0  ;;  %v7417_v7 = vmul.f32 %v16844_v37, %v16844_v37 }
 0xfa4   : > { %7331 = vadd.xlane.f32.xlu1 %v16814_v35  ;;  %7453 = vadd.xlane.f32.xlu0 %v7413_v32  ;;  %18867 = vst [vmem:[#allocation77_spill] sm:$0xff] %v16836_v62  ;;  %v7355_v32 = vmul.f32 0.0078125, %v7306_v8  ;;  %18869 = vst [vmem:[#allocation78_spill] sm:$0xff] %v16858_v13 }
 0xfa6   : > { %v16855_v5 = vsub.f32 %v16589_v52, %v7355_v32 }
 0xfa8   : > { %7455 = vadd.xlane.f32.xlu1 %v7414_v20  ;;  %7333 = vadd.xlane.f32.xlu0 %v16827_v21  ;;  %v7308_v20 = vpop.xlane.xlu1 %7307  ;;  %v7419_v3 = vmul.f32 %v16855_v5, %v16855_v5 }
 0xfa9   : > { %v7356_v53 = vmul.f32 0.0078125, %v7308_v20 }
 0xfab   : > { %v16864_v46 = vsub.f32 %v16585_v33, %v7356_v53 }
 0xfac   : > { %7335 = vadd.xlane.f32.xlu1 %v16836_v62  ;;  %7457 = vadd.xlane.f32.xlu0 %v7415_v34 }
 0xfad   : > { %v7420_v47 = vmul.f32 %v16864_v46, %v16864_v46 }
 0xfb0   : > { %7459 = vadd.xlane.f32.xlu1 %v7416_v26  ;;  %7337 = vadd.xlane.f32.xlu0 %v16848_v24 }
 0xfb4   : > { %7339 = vadd.xlane.f32.xlu1 %v16858_v13  ;;  %7461 = vadd.xlane.f32.xlu0 %v7417_v7 }
 0xfb8   : > { %7463 = vadd.xlane.f32.xlu1 %v7418_v45  ;;  %7465 = vadd.xlane.f32.xlu0 %v7419_v3 }
 0xfbc   : > { %7467 = vadd.xlane.f32.xlu1 %v7420_v47 }
 0xfc7   : > { %v7310_v9 = vpop.xlane.xlu0 %7309 }
 0xfc8   : > { %v7357_v17 = vmul.f32 0.0078125, %v7310_v9 }
 0xfca   : > { %v16873_v34 = vsub.f32 %v16601_v10, %v7357_v17 }
 0xfcb   : > { %v7312_v8 = vpop.xlane.xlu1 %7311  ;;  %v7314_v51 = vpop.xlane.xlu0 %7313 }
 0xfcc   : > { %v7358_v26 = vmul.f32 0.0078125, %v7312_v8  ;;  %v7359_v32 = vmul.f32 0.0078125, %v7314_v51  ;;  %v7421_v4 = vmul.f32 %v16873_v34, %v16873_v34 }
 0xfce   : > { %v16878_v0 = vsub.f32 %v16610_v57, %v7358_v26  ;;  %v16881_v20 = vsub.f32 %v16607_v63, %v7359_v32  ;;  %7469 = vadd.xlane.f32.xlu0 %v7421_v4 }
 0xfcf   : > { %v7316_v53 = vpop.xlane.xlu1 %7315 }
 0xfd0   : > { %v7360_v7 = vmul.f32 0.0078125, %v7316_v53  ;;  %v7422_v45 = vmul.f32 %v16878_v0, %v16878_v0  ;;  %v7423_v3 = vmul.f32 %v16881_v20, %v16881_v20 }
 0xfd2   : > { %v16888_v47 = vsub.f32 %v16615_v12, %v7360_v7  ;;  %7471 = vadd.xlane.f32.xlu1 %v7422_v45  ;;  %7473 = vadd.xlane.f32.xlu0 %v7423_v3  ;;  %v16896_v7 = vld [vmem:[%s18257_s8] ss:$0 sm:$0xff] }
 0xfd4   : > { %v7424_v9 = vmul.f32 %v16888_v47, %v16888_v47 }
 0xfd6   : > { %7475 = vadd.xlane.f32.xlu1 %v7424_v9 }
 0xfdf   : > { %v7438_v17 = vpop.xlane.xlu0 %7437 }
 0xfe0   : > { %v7501_v8 = vmul.f32 0.0078125, %v7438_v17  ;;  %v16903_v17 = vld [vmem:[%s18258_s9] ss:$0 sm:$0xff] }
 0xfe2   : > { %v7533_v51 = vadd.f32 1e-05, %v7501_v8 }
 0xfe3   : > { %v7440_v26 = vpop.xlane.xlu1 %7439 }
 0xfe4   : > { %12229 = vrsqrt.f32 %v7533_v51  ;;  %v7502_v32 = vmul.f32 0.0078125, %v7440_v26 }
 0xfe6   : > { %v7534_v4 = vadd.f32 1e-05, %v7502_v32 }
 0xfe8   : > { %12231 = vrsqrt.f32 %v7534_v4 }
 0xff1   : > { %v12230_v53 = vpop.eup %12229 }
 0xff2   : > { %v7597_v63 = vmul.f32 %v12230_v53, %v16619_v38 }
 0xff4   : > { %v7635_v3 = vmul.f32 %v16896_v7, %v7597_v63 }
 0xff5   : > { %v12232_v45 = vpop.eup %12231 }
 0xff6   : > { %v7598_v9 = vmul.f32 %v12232_v45, %v16624_v15  ;;  %v7673_v51 = vadd.f32 %v16903_v17, %v7635_v3 }
 0xff8   : > { %v7636_v8 = vmul.f32 %v16896_v7, %v7598_v9 }
 0xffa   : > { %v7674_v38 = vadd.f32 %v16903_v17, %v7636_v8 }
 0xffc   : > { %v7705_v26 = vpack.c.bf16 %v7674_v38, %v7673_v51 }
 0xffe   : > { %7968 = vmatmul.mubr.bf16.vlgmr.msra.gmra.mxu0 %v7705_v26  ;;  %8161 = vmatmul.mubr.bf16.vlgmr.msra.gmra.mxu1 %v7705_v26 }
 0xfff   : > { %7977 = vmatprep.mubr.bf16.mxu0 %v18798_v28  ;;  %8170 = vmatprep.mubr.bf16.mxu1 %v18798_v28 }
0x1011   : > { %v7318_v63 = vpop.xlane.xlu0 %7317 }
0x1012   : > { %v7361_v15 = vmul.f32 0.0078125, %v7318_v63 }
0x1014   : > { %v16911_v32 = vsub.f32 %v16734_v27, %v7361_v15 }
0x1015   : > { %v7320_v4 = vpop.xlane.xlu1 %7319  ;;  %v7442_v53 = vpop.xlane.xlu0 %7441 }
0x1016   : > { %v7362_v45 = vmul.f32 0.0078125, %v7320_v4  ;;  %v7503_v9 = vmul.f32 0.0078125, %v7442_v53  ;;  %v7425_v3 = vmul.f32 %v16911_v32, %v16911_v32 }
0x1018   : > { %v16916_v8 = vsub.f32 %v16746_v43, %v7362_v45  ;;  %v7535_v51 = vadd.f32 1e-05, %v7503_v9  ;;  %7477 = vadd.xlane.f32.xlu0 %v7425_v3 }
0x1019   : > { %v7444_v38 = vpop.xlane.xlu1 %7443  ;;  %v7322_v26 = vpop.xlane.xlu0 %7321 }
0x101a   : > { %12233 = vrsqrt.f32 %v7535_v51  ;;  %v7504_v12 = vmul.f32 0.0078125, %v7444_v38  ;;  %v7363_v63 = vmul.f32 0.0078125, %v7322_v26  ;;  %v7426_v15 = vmul.f32 %v16916_v8, %v16916_v8 }
0x101c   : > { %v7536_v27 = vadd.f32 1e-05, %v7504_v12  ;;  %v16921_v4 = vsub.f32 %v16757_v30, %v7363_v63  ;;  %7479 = vadd.xlane.f32.xlu1 %v7426_v15 }
0x101d   : > { %v7324_v53 = vpop.xlane.xlu1 %7323  ;;  %v7446_v57 = vpop.xlane.xlu0 %7445 }
0x101e   : > { %12235 = vrsqrt.f32 %v7536_v27  ;;  %v7364_v45 = vmul.f32 0.0078125, %v7324_v53  ;;  %v7505_v43 = vmul.f32 0.0078125, %v7446_v57  ;;  %v7427_v9 = vmul.f32 %v16921_v4, %v16921_v4 }
0x1020   : > { %v16926_v3 = vsub.f32 %v16770_v22, %v7364_v45  ;;  %v7537_v51 = vadd.f32 1e-05, %v7505_v43  ;;  %7481 = vadd.xlane.f32.xlu0 %v7427_v9 }
0x1021   : > { %v7448_v38 = vpop.xlane.xlu1 %7447  ;;  %v7326_v26 = vpop.xlane.xlu0 %7325 }
0x1022   : > { %12237 = vrsqrt.f32 %v7537_v51  ;;  %v7506_v12 = vmul.f32 0.0078125, %v7448_v38  ;;  %v7365_v63 = vmul.f32 0.0078125, %v7326_v26  ;;  %v7428_v15 = vmul.f32 %v16926_v3, %v16926_v3 }
0x1024   : > { %v7538_v30 = vadd.f32 1e-05, %v7506_v12  ;;  %v16931_v27 = vsub.f32 %v16781_v14, %v7365_v63  ;;  %7483 = vadd.xlane.f32.xlu1 %v7428_v15 }
0x1025   : > { %v7328_v57 = vpop.xlane.xlu1 %7327  ;;  %v7450_v53 = vpop.xlane.xlu0 %7449 }
0x1026   : > { %12239 = vrsqrt.f32 %v7538_v30  ;;  %v7366_v45 = vmul.f32 0.0078125, %v7328_v57  ;;  %v7507_v22 = vmul.f32 0.0078125, %v7450_v53  ;;  %v7429_v43 = vmul.f32 %v16931_v27, %v16931_v27 }
0x1027   : > { %v12234_v9 = vpop.eup %12233 }
0x1028   : > { %v16936_v51 = vsub.f32 %v16790_v31, %v7366_v45  ;;  %v7539_v38 = vadd.f32 1e-05, %v7507_v22  ;;  %7485 = vadd.xlane.f32.xlu0 %v7429_v43  ;;  %v7599_v63 = vmul.f32 %v12234_v9, %v16730_v61 }
0x1029   : > { %v7452_v26 = vpop.xlane.xlu1 %7451  ;;  %v7330_v12 = vpop.xlane.xlu0 %7329 }
0x102a   : > { %12241 = vrsqrt.f32 %v7539_v38  ;;  %v7508_v15 = vmul.f32 0.0078125, %v7452_v26  ;;  %v7367_v14 = vmul.f32 0.0078125, %v7330_v12  ;;  %v7430_v30 = vmul.f32 %v16936_v51, %v16936_v51 }
0x102b   : > { %v12236_v57 = vpop.eup %12235  ;;  %v7637_v31 = vmul.f32 %v16896_v7, %v7599_v63 }
0x102c   : > { %v7540_v53 = vadd.f32 1e-05, %v7508_v15  ;;  %v16942_v10 = vsub.f32 %v16805_v60, %v7367_v14  ;;  %7487 = vadd.xlane.f32.xlu1 %v7430_v30  ;;  %v7600_v45 = vmul.f32 %v12236_v57, %v16741_v36 }
0x102d   : > { %v7332_v22 = vpop.xlane.xlu1 %7331  ;;  %v7454_v43 = vpop.xlane.xlu0 %7453  ;;  %v7675_v57 = vadd.f32 %v16903_v17, %v7637_v31 }
0x102e   : > { %12243 = vrsqrt.f32 %v7540_v53  ;;  %v7368_v61 = vmul.f32 0.0078125, %v7332_v22  ;;  %v7509_v9 = vmul.f32 0.0078125, %v7454_v43  ;;  %v7431_v38 = vmul.f32 %v16942_v10, %v16942_v10 }
0x102f   : > { %v12238_v26 = vpop.eup %12237  ;;  %v7638_v12 = vmul.f32 %v16896_v7, %v7600_v45 }
0x1030   : > { %v16950_v15 = vsub.f32 %v16814_v35, %v7368_v61  ;;  %v7541_v14 = vadd.f32 1e-05, %v7509_v9  ;;  %7489 = vadd.xlane.f32.xlu0 %v7431_v38  ;;  %v7601_v53 = vmul.f32 %v12238_v26, %v16752_v48 }
0x1031   : > { %v7456_v30 = vpop.xlane.xlu1 %7455  ;;  %v7334_v36 = vpop.xlane.xlu0 %7333  ;;  %v7676_v63 = vadd.f32 %v16903_v17, %v7638_v12 }
0x1032   : > { %12245 = vrsqrt.f32 %v7541_v14  ;;  %v7510_v22 = vmul.f32 0.0078125, %v7456_v30  ;;  %v7369_v43 = vmul.f32 0.0078125, %v7334_v36  ;;  %v7432_v60 = vmul.f32 %v16950_v15, %v16950_v15 }
0x1033   : > { %v12240_v45 = vpop.eup %12239  ;;  %v7706_v33 = vpack.c.bf16 %v7676_v63, %v7675_v57  ;;  %v7639_v48 = vmul.f32 %v16896_v7, %v7601_v53 }
0x1034   : > { %v7542_v61 = vadd.f32 1e-05, %v7510_v22  ;;  %v16958_v9 = vsub.f32 %v16827_v21, %v7369_v43  ;;  %7491 = vadd.xlane.f32.xlu1 %v7432_v60  ;;  %v7602_v38 = vmul.f32 %v12240_v45, %v16764_v39 }
0x1035   : > { %7978 = vmatmul.mubr.bf16.gmra.mxu0 %v7706_v33  ;;  %8171 = vmatmul.mubr.bf16.gmra.mxu1 %v7706_v33  ;;  %v7336_v31 = vpop.xlane.xlu1 %7335  ;;  %v7458_v12 = vpop.xlane.xlu0 %7457  ;;  %v7677_v53 = vadd.f32 %v16903_v17, %v7639_v48 }
0x1036   : > { %12247 = vrsqrt.f32 %v7542_v61  ;;  %v7370_v26 = vmul.f32 0.0078125, %v7336_v31  ;;  %v7511_v14 = vmul.f32 0.0078125, %v7458_v12  ;;  %v7433_v30 = vmul.f32 %v16958_v9, %v16958_v9  ;;  %7987 = vmatprep.mubr.bf16.mxu0 %v18798_v28  ;;  %8180 = vmatprep.mubr.bf16.mxu1 %v18798_v28 }
0x1037   : > { %v12242_v36 = vpop.eup %12241  ;;  %v7640_v60 = vmul.f32 %v16896_v7, %v7602_v38 }
0x1038   : > { %v16968_v39 = vsub.f32 %v16836_v62, %v7370_v26  ;;  %v7543_v33 = vadd.f32 1e-05, %v7511_v14  ;;  %7493 = vadd.xlane.f32.xlu0 %v7433_v30  ;;  %v7603_v43 = vmul.f32 %v12242_v36, %v16776_v49 }
0x1039   : > { %v7460_v57 = vpop.xlane.xlu1 %7459  ;;  %v7338_v63 = vpop.xlane.xlu0 %7337  ;;  %v7678_v22 = vadd.f32 %v16903_v17, %v7640_v60 }
0x103a   : > { %12249 = vrsqrt.f32 %v7543_v33  ;;  %v7512_v45 = vmul.f32 0.0078125, %v7460_v57  ;;  %v7371_v61 = vmul.f32 0.0078125, %v7338_v63  ;;  %v7434_v31 = vmul.f32 %v16968_v39, %v16968_v39 }
0x103b   : > { %v12244_v38 = vpop.eup %12243  ;;  %v7707_v12 = vpack.c.bf16 %v7678_v22, %v7677_v53  ;;  %v7641_v49 = vmul.f32 %v16896_v7, %v7603_v43 }
0x103c   : > { %v7544_v26 = vadd.f32 1e-05, %v7512_v45  ;;  %v16976_v14 = vsub.f32 %v16848_v24, %v7371_v61  ;;  %7495 = vadd.xlane.f32.xlu1 %v7434_v31  ;;  %v7604_v30 = vmul.f32 %v12244_v38, %v16785_v18 }
0x103d   : > { %7988 = vmatmul.mubr.bf16.gmra.mxu0 %v7707_v12  ;;  %8181 = vmatmul.mubr.bf16.gmra.mxu1 %v7707_v12  ;;  %v7340_v48 = vpop.xlane.xlu1 %7339  ;;  %v7462_v60 = vpop.xlane.xlu0 %7461  ;;  %v7679_v31 = vadd.f32 %v16903_v17, %v7641_v49 }
0x103e   : > { %12251 = vrsqrt.f32 %v7544_v26  ;;  %v7372_v36 = vmul.f32 0.0078125, %v7340_v48  ;;  %v7513_v33 = vmul.f32 0.0078125, %v7462_v60  ;;  %v7435_v57 = vmul.f32 %v16976_v14, %v16976_v14  ;;  %7997 = vmatprep.mubr.bf16.mxu0 %v18798_v28  ;;  %8190 = vmatprep.mubr.bf16.mxu1 %v18798_v28 }
0x103f   : > { %v12246_v63 = vpop.eup %12245  ;;  %v7642_v53 = vmul.f32 %v16896_v7, %v7604_v30 }
0x1040   : > { %v16986_v18 = vsub.f32 %v16858_v13, %v7372_v36  ;;  %v7545_v22 = vadd.f32 1e-05, %v7513_v33  ;;  %7497 = vadd.xlane.f32.xlu0 %v7435_v57  ;;  %v7605_v43 = vmul.f32 %v12246_v63, %v16800_v59 }
0x1041   : > { %v7464_v45 = vpop.xlane.xlu1 %7463  ;;  %v7466_v61 = vpop.xlane.xlu0 %7465  ;;  %v7680_v38 = vadd.f32 %v16903_v17, %v7642_v53 }
0x1042   : > { %12253 = vrsqrt.f32 %v7545_v22  ;;  %v7514_v12 = vmul.f32 0.0078125, %v7464_v45  ;;  %v7515_v26 = vmul.f32 0.0078125, %v7466_v61  ;;  %v7436_v48 = vmul.f32 %v16986_v18, %v16986_v18 }
0x1043   : > { %v12248_v30 = vpop.eup %12247  ;;  %v7708_v60 = vpack.c.bf16 %v7680_v38, %v7679_v31  ;;  %v7643_v59 = vmul.f32 %v16896_v7, %v7605_v43 }
0x1044   : > { %v7546_v36 = vadd.f32 1e-05, %v7514_v12  ;;  %7499 = vadd.xlane.f32.xlu1 %v7436_v48  ;;  %v7606_v33 = vmul.f32 %v12248_v30, %v16810_v29  ;;  %v7547_v57 = vadd.f32 1e-05, %v7515_v26 }
0x1045   : > { %7998 = vmatmul.mubr.bf16.gmra.mxu0 %v7708_v60  ;;  %8191 = vmatmul.mubr.bf16.gmra.mxu1 %v7708_v60  ;;  %v7468_v49 = vpop.xlane.xlu1 %7467  ;;  %v7681_v61 = vadd.f32 %v16903_v17, %v7643_v59 }
0x1046   : > { %12255 = vrsqrt.f32 %v7546_v36  ;;  %v7516_v63 = vmul.f32 0.0078125, %v7468_v49  ;;  %8007 = vmatprep.mubr.bf16.mxu0 %v18798_v28  ;;  %8200 = vmatprep.mubr.bf16.mxu1 %v18798_v28  ;;  %v7644_v53 = vmul.f32 %v16896_v7, %v7606_v33 }
0x1047   : > { %v12250_v22 = vpop.eup %12249  ;;  %12257 = vrsqrt.f32 %v7547_v57  ;;  %v11622_v57 = vld [vmem:[%s18261_s12 + $0xf8] sm:$0xff]  }
0x1048   : > { %v7548_v45 = vadd.f32 1e-05, %v7516_v63  ;;  %v7682_v29 = vadd.f32 %v16903_v17, %v7644_v53  ;;  %v7607_v43 = vmul.f32 %v12250_v22, %v16822_v19  ;;  %v11623_v53 = vld [vmem:[%s18261_s12 + $0x38] sm:$0xff]   ;;  %10641 = vmatprep.subr.bf16.mxu1 %v11622_v57  ;;  %v11630_v57 = vld [vmem:[%s18261_s12 + $0xe8] sm:$0xff]  }
0x104a   : > { %12259 = vrsqrt.f32 %v7548_v45  ;;  %v7709_v31 = vpack.c.bf16 %v7682_v29, %v7681_v61  ;;  %v7645_v26 = vmul.f32 %v16896_v7, %v7607_v43  ;;  %v11625_v29 = vld [vmem:[%s18261_s12 + $0x70] sm:$0xff]  }
0x104b   : > { %v12252_v38 = vpop.eup %12251  ;;  %v11626_v43 = vld [vmem:[%s18261_s12 + $0xf0] sm:$0xff]  }
0x104c   : > { %v7608_v12 = vmul.f32 %v12252_v38, %v16831_v56  ;;  %v7683_v60 = vadd.f32 %v16903_v17, %v7645_v26  ;;  %v11621_v56 = vld [vmem:[%s18261_s12 + $0x78] sm:$0xff]  }
0x104d   : > { %8008 = vmatmul.mubr.bf16.gmra.mxu0 %v7709_v31  ;;  %8201 = vmatmul.mubr.bf16.gmra.mxu1 %v7709_v31 }
0x104e   : > { %8017 = vmatprep.mubr.bf16.mxu0 %v18798_v28  ;;  %8210 = vmatprep.mubr.bf16.mxu1 %v18798_v28  ;;  %v7646_v48 = vmul.f32 %v16896_v7, %v7608_v12 }
0x104f   : > { %v12254_v30 = vpop.eup %12253  ;;  %10529 = vmatprep.subr.bf16.mxu0 %v11621_v56  ;;  %v11629_v56 = vld [vmem:[%s18261_s12 + $0x68] sm:$0xff]  }
0x1050   : > { %v7684_v19 = vadd.f32 %v16903_v17, %v7646_v48  ;;  %v7609_v36 = vmul.f32 %v12254_v30, %v16844_v37  ;;  %v11624_v37 = vld [vmem:[%s18261_s12 + $0xb8] sm:$0xff]   ;;  %10530 = vmatpush3.bf16.msra.mxu0 %v11623_v53  ;;  %v11627_v48 = vld [vmem:[%s18261_s12 + $0x30] sm:$0xff]   ;;  %v11632_v53 = vld [vmem:[%s18261_s12 + $0xa8] sm:$0xff]  }
0x1051   : > { %10642 = vmatpush3.bf16.msra.mxu1 %v11624_v37  ;;  %v11628_v30 = vld [vmem:[%s18261_s12 + $0xb0] sm:$0xff]   ;;  %10531 = vmatprep.subr.bf16.mxu0 %v11625_v29 }
0x1052   : > { %v7710_v33 = vpack.c.bf16 %v7684_v19, %v7683_v60  ;;  %v7647_v63 = vmul.f32 %v16896_v7, %v7609_v36  ;;  %10643 = vmatprep.subr.bf16.mxu1 %v11626_v43 }
0x1053   : > { %v12256_v59 = vpop.eup %12255 }
0x1054   : > { %v7610_v49 = vmul.f32 %v12256_v59, %v16852_v40  ;;  %v12258_v22 = vpop.eup %12257  ;;  %v7685_v38 = vadd.f32 %v16903_v17, %v7647_v63  ;;  %10532 = vmatpush3.bf16.msra.mxu0 %v11627_v48 }
0x1055   : > { %8018 = vmatmul.mubr.bf16.gmra.mxu0 %v7710_v33  ;;  %8211 = vmatmul.mubr.bf16.gmra.mxu1 %v7710_v33  ;;  %v7611_v60 = vmul.f32 %v12258_v22, %v16855_v5  ;;  %v11631_v5 = vld [vmem:[%s18261_s12 + $0x28] sm:$0xff]   ;;  %v11633_v22 = vld [vmem:[%s18261_s12 + $0x60] sm:$0xff]  }
0x1056   : > { %8027 = vmatprep.mubr.bf16.mxu0 %v18798_v28  ;;  %8220 = vmatprep.mubr.bf16.mxu1 %v18798_v28  ;;  %v7648_v45 = vmul.f32 %v16896_v7, %v7610_v49 }
0x1057   : > { %v12260_v40 = vpop.eup %12259  ;;  %v7470_v61 = vpop.xlane.xlu0 %7469  ;;  %10644 = vmatpush3.bf16.msra.mxu1 %v11628_v30  ;;  %v7649_v37 = vmul.f32 %v16896_v7, %v7611_v60  ;;  %10533 = vmatprep.subr.bf16.mxu0 %v11629_v56  ;;  %v11637_v60 = vld [vmem:[%s18261_s12 + $0x58] sm:$0xff]   ;;  %v11643_v56 = vld [vmem:[%s18261_s12 + $0x10] sm:$0xff]  }
0x1058   : > { %v7517_v31 = vmul.f32 0.0078125, %v7470_v61  ;;  %v7686_v12 = vadd.f32 %v16903_v17, %v7648_v45  ;;  %v7612_v26 = vmul.f32 %v12260_v40, %v16864_v46  ;;  %v11634_v45 = vld [vmem:[%s18261_s12 + $0xe0] sm:$0xff]   ;;  %10645 = vmatprep.subr.bf16.mxu1 %v11630_v57  ;;  %10534 = vmatpush3.bf16.msra.mxu0 %v11631_v5  ;;  %v11644_v57 = vld [vmem:[%s18261_s12 + $0x90] sm:$0xff]   ;;  %v11645_v5 = vld [vmem:[%s18261_s12 + $0x48] sm:$0xff]  }
0x1059   : > { %10535 = vmatprep.subr.bf16.mxu0 %v11633_v22  ;;  %v11648_v22 = vld [vmem:[%s18261_s12 + $0x88] sm:$0xff]  }
0x105a   : > { %v7549_v19 = vadd.f32 1e-05, %v7517_v31  ;;  %v7711_v36 = vpack.c.bf16 %v7686_v12, %v7685_v38  ;;  %v7650_v46 = vmul.f32 %v16896_v7, %v7612_v26  ;;  %v11635_v38 = vld [vmem:[%s18261_s12 + $0x20] sm:$0xff]   ;;  %v7687_v26 = vadd.f32 %v16903_v17, %v7649_v37  ;;  %v11647_v37 = vld [vmem:[%s18261_s12 + $0x8] sm:$0xff]  }
0x105b   : > { %v7472_v33 = vpop.xlane.xlu1 %7471  ;;  %v7474_v59 = vpop.xlane.xlu0 %7473  ;;  %10646 = vmatpush3.bf16.msra.mxu1 %v11632_v53  ;;  %v11636_v12 = vld [vmem:[%s18261_s12 + $0xa0] sm:$0xff]   ;;  %v11646_v53 = vld [vmem:[%s18261_s12 + $0xc8] sm:$0xff]  }
0x105c   : > { %12261 = vrsqrt.f32 %v7549_v19  ;;  %v7518_v49 = vmul.f32 0.0078125, %v7472_v33  ;;  %v7519_v63 = vmul.f32 0.0078125, %v7474_v59  ;;  %v7688_v43 = vadd.f32 %v16903_v17, %v7650_v46  ;;  %10647 = vmatprep.subr.bf16.mxu1 %v11634_v45  ;;  %v11638_v19 = vld [vmem:[%s18261_s12 + $0xd8] sm:$0xff]   ;;  %10536 = vmatpush3.bf16.msra.mxu0 %v11635_v38  ;;  %v11641_v59 = vld [vmem:[%s18261_s12 + $0x50] sm:$0xff]   ;;  %v11651_v38 = vld [vmem:[%s18261_s12] sm:$0xff]  }
0x105d   : > { %8028 = vmatmul.mubr.bf16.gmra.mxu0 %v7711_v36  ;;  %8221 = vmatmul.mubr.bf16.gmra.mxu1 %v7711_v36  ;;  %v11639_v36 = vld [vmem:[%s18261_s12 + $0x18] sm:$0xff]   ;;  %v11642_v46 = vld [vmem:[%s18261_s12 + $0xd0] sm:$0xff]  }
0x105e   : > { %v7550_v40 = vadd.f32 1e-05, %v7518_v49  ;;  %v7551_v61 = vadd.f32 1e-05, %v7519_v63  ;;  %8037 = vmatprep.mubr.bf16.mxu0 %v18798_v28  ;;  %8230 = vmatprep.mubr.bf16.mxu1 %v18798_v28  ;;  %v7712_v30 = vpack.c.bf16 %v7688_v43, %v7687_v26  ;;  %v11640_v33 = vld [vmem:[%s18261_s12 + $0x98] sm:$0xff]  }
0x105f   : > { %v7476_v29 = vpop.xlane.xlu1 %7475  ;;  %10648 = vmatpush3.bf16.msra.mxu1 %v11636_v12  ;;  %10537 = vmatprep.subr.bf16.mxu0 %v11637_v60  ;;  %v11652_v12 = vld [vmem:[%s18261_s12 + $0x80] sm:$0xff]  }
0x1060   : > { %12263 = vrsqrt.f32 %v7550_v40  ;;  %v7520_v31 = vmul.f32 0.0078125, %v7476_v29  ;;  %10649 = vmatprep.subr.bf16.mxu1 %v11638_v19  ;;  %10538 = vmatpush3.bf16.msra.mxu0 %v11639_v36  ;;  %v11650_v40 = vld [vmem:[%s18261_s12 + $0xc0] sm:$0xff]  }
0x1061   : > { %12265 = vrsqrt.f32 %v7551_v61  ;;  %10539 = vmatprep.subr.bf16.mxu0 %v11641_v59 }
0x1062   : > { %v7552_v48 = vadd.f32 1e-05, %v7520_v31 }
0x1063   : > { %10650 = vmatpush3.bf16.msra.mxu1 %v11640_v33 }
0x1064   : > { %12267 = vrsqrt.f32 %v7552_v48  ;;  %10651 = vmatprep.subr.bf16.mxu1 %v11642_v46  ;;  %10540 = vmatpush3.bf16.msra.mxu0 %v11643_v56 }
0x1065   : > { %8038 = vmatmul.mubr.bf16.gmra.mxu0 %v7712_v30  ;;  %8231 = vmatmul.mubr.bf16.gmra.mxu1 %v7712_v30 }
0x1066   : > { %8047 = vmatprep.mubr.bf16.mxu0 %v18798_v28  ;;  %8240 = vmatprep.mubr.bf16.mxu1 %v18798_v28 }
0x1067   : > { %10652 = vmatpush3.bf16.msra.mxu1 %v11644_v57  ;;  %10541 = vmatprep.subr.bf16.mxu0 %v11645_v5 }
0x1068   : > { %10653 = vmatprep.subr.bf16.mxu1 %v11646_v53  ;;  %10542 = vmatpush3.bf16.msra.mxu0 %v11647_v37 }
0x1069   : > { %v12262_v49 = vpop.eup %12261 }
0x106a   : > { %v7613_v63 = vmul.f32 %v12262_v49, %v16873_v34  ;;  %v11649_v34 = vld [vmem:[%s18261_s12 + $0x40] sm:$0xff]  }
0x106b   : > { %10654 = vmatpush3.bf16.msra.mxu1 %v11648_v22  ;;  %10543 = vmatprep.subr.bf16.mxu0 %v11649_v34 }
0x106c   : > { %v7651_v29 = vmul.f32 %v16896_v7, %v7613_v63  ;;  %10655 = vmatprep.subr.bf16.mxu1 %v11650_v40  ;;  %10544 = vmatpush3.bf16.msra.mxu0 %v11651_v38 }
0x106d   : > { %v12264_v45 = vpop.eup %12263 }
0x106e   : > { %v7614_v61 = vmul.f32 %v12264_v45, %v16878_v0  ;;  %v12266_v43 = vpop.eup %12265  ;;  %v7689_v0 = vadd.f32 %v16903_v17, %v7651_v29 }
0x106f   : > { %v7615_v30 = vmul.f32 %v12266_v43, %v16881_v20  ;;  %10656 = vmatpush3.bf16.msra.mxu1 %v11652_v12 }
0x1070   : > { %v7652_v31 = vmul.f32 %v16896_v7, %v7614_v61 }
0x1071   : > { %v12268_v26 = vpop.eup %12267  ;;  %v7653_v33 = vmul.f32 %v16896_v7, %v7615_v30 }
0x1072   : > { %v7690_v48 = vadd.f32 %v16903_v17, %v7652_v31  ;;  %v7616_v60 = vmul.f32 %v12268_v26, %v16888_v47 }
0x1073   : > { %v7691_v46 = vadd.f32 %v16903_v17, %v7653_v33 }
0x1074   : > { %v7713_v19 = vpack.c.bf16 %v7690_v48, %v7689_v0  ;;  %v7654_v36 = vmul.f32 %v16896_v7, %v7616_v60 }
0x1076   : > { %8048 = vmatmul.mubr.bf16.gmra.mxu0 %v7713_v19  ;;  %8241 = vmatmul.mubr.bf16.gmra.mxu1 %v7713_v19  ;;  %v7692_v59 = vadd.f32 %v16903_v17, %v7654_v36 }
0x1077   : > { %8057 = vmatprep.mubr.bf16.mxu0 %v18798_v28  ;;  %8250 = vmatprep.mubr.bf16.mxu1 %v18798_v28 }
0x1078   : > { %v7714_v20 = vpack.c.bf16 %v7692_v59, %v7691_v46 }
0x107e   : > { %8058 = vmatmul.mubr.bf16.gmra.mxu0 %v7714_v20  ;;  %8251 = vmatmul.mubr.bf16.gmra.mxu1 %v7714_v20 }
0x107f   : > { %8067 = vmatprep.mubr.bf16.mxu0 %v18798_v28  ;;  %8260 = vmatprep.mubr.bf16.mxu1 %v18798_v28 }
0x10a1   : > { %v7478_v47 = vpop.xlane.xlu0 %7477 }
0x10a2   : > { %v7521_v56 = vmul.f32 0.0078125, %v7478_v47 }
0x10a4   : > { %v7553_v57 = vadd.f32 1e-05, %v7521_v56 }
0x10a5   : > { %v7480_v49 = vpop.xlane.xlu1 %7479 }
0x10a6   : > { %12269 = vrsqrt.f32 %v7553_v57  ;;  %v7522_v63 = vmul.f32 0.0078125, %v7480_v49 }
0x10a8   : > { %v7554_v5 = vadd.f32 1e-05, %v7522_v63 }
0x10a9   : > { %v7482_v53 = vpop.xlane.xlu0 %7481 }
0x10aa   : > { %12271 = vrsqrt.f32 %v7554_v5  ;;  %v7523_v37 = vmul.f32 0.0078125, %v7482_v53 }
0x10ac   : > { %v7555_v22 = vadd.f32 1e-05, %v7523_v37 }
0x10ad   : > { %v7484_v45 = vpop.xlane.xlu1 %7483 }
0x10ae   : > { %v7524_v34 = vmul.f32 0.0078125, %v7484_v45  ;;  %12273 = vrsqrt.f32 %v7555_v22 }
0x10b0   : > { %v7556_v40 = vadd.f32 1e-05, %v7524_v34 }
0x10b1   : > { %v7486_v61 = vpop.xlane.xlu0 %7485 }
0x10b2   : > { %12275 = vrsqrt.f32 %v7556_v40  ;;  %v7525_v29 = vmul.f32 0.0078125, %v7486_v61 }
0x10b3   : > { %v12270_v43 = vpop.eup %12269 }
0x10b4   : > { %v7557_v31 = vadd.f32 1e-05, %v7525_v29  ;;  %v7617_v38 = vmul.f32 %v12270_v43, %v16911_v32 }
0x10b5   : > { %v7488_v12 = vpop.xlane.xlu1 %7487 }
0x10b6   : > { %v7526_v26 = vmul.f32 0.0078125, %v7488_v12  ;;  %12277 = vrsqrt.f32 %v7557_v31  ;;  %v7655_v60 = vmul.f32 %v16896_v7, %v7617_v38  ;;  %v18870_v12 = vld [vmem:[#allocation2_spill] sm:$0xff] }
0x10b7   : > { %v12272_v0 = vpop.eup %12271 }
0x10b8   : > { %v7558_v48 = vadd.f32 1e-05, %v7526_v26  ;;  %v7618_v30 = vmul.f32 %v12272_v0, %v16916_v8  ;;  %v7693_v46 = vadd.f32 %v16903_v17, %v7655_v60  ;;  %v7769_v26 = vsub.s32 3, %v18870_v12 }
0x10b9   : > { %v7490_v19 = vpop.xlane.xlu0 %7489  ;;  %v18871_v60 = vsub.s32 1, %v18870_v12 }
0x10ba   : > { %12279 = vrsqrt.f32 %v7558_v48  ;;  %v7527_v36 = vmul.f32 0.0078125, %v7490_v19  ;;  %v7656_v33 = vmul.f32 %v16896_v7, %v7618_v30 }
0x10bb   : > { %v12274_v32 = vpop.eup %12273 }
0x10bc   : > { %v7559_v59 = vadd.f32 1e-05, %v7527_v36  ;;  %v7694_v20 = vadd.f32 %v16903_v17, %v7656_v33  ;;  %v7619_v22 = vmul.f32 %v12274_v32, %v16921_v4 }
0x10bd   : > { %v7492_v47 = vpop.xlane.xlu1 %7491 }
0x10be   : > { %12281 = vrsqrt.f32 %v7559_v59  ;;  %v7528_v56 = vmul.f32 0.0078125, %v7492_v47  ;;  %v17144_v57 = vpop.f32.mrf.mxu0  ;;  %v17146_v49 = vpop.f32.mrf.mxu1  ;;  %v7715_v8 = vpack.c.bf16 %v7694_v20, %v7693_v46  ;;  %v7657_v31 = vmul.f32 %v16896_v7, %v7619_v22 }
0x10bf   : > { %v12276_v63 = vpop.eup %12275 }
0x10c0   : > { %v7560_v5 = vadd.f32 1e-05, %v7528_v56  ;;  %v7971_v53 = vpop.f32.mrf.mxu0  ;;  %8068 = vmatmul.mubr.bf16.gmra.mxu0 %v7715_v8  ;;  %v8164_v37 = vpop.f32.mrf.mxu1  ;;  %8261 = vmatmul.mubr.bf16.gmra.mxu1 %v7715_v8  ;;  %v7620_v45 = vmul.f32 %v12276_v63, %v16926_v3  ;;  %v7753_v3 = vld [vmem:[%s18260_s11] sm:$0xf]  ;;  %v7695_v46 = vadd.f32 %v16903_v17, %v7657_v31 }
0x10c1   : > { %v7494_v34 = vpop.xlane.xlu0 %7493  ;;  %8077 = vmatprep.mubr.bf16.mxu0 %v18798_v28  ;;  %8270 = vmatprep.mubr.bf16.mxu1 %v18798_v28  ;;  %v17160_v19 = vrot.slane %v7753_v3, %v18871_v60  ;;  %v17165_v32 = vrot.slane %v7753_v3, %v7769_v26 }
0x10c2   : > { %12283 = vrsqrt.f32 %v7560_v5  ;;  %v7529_v40 = vmul.f32 0.0078125, %v7494_v34  ;;  %v7973_v61 = vpop.f32.mrf.mxu0  ;;  %v7658_v29 = vmul.f32 %v16896_v7, %v7620_v45  ;;  %v8166_v43 = vpop.f32.mrf.mxu1 }
0x10c3   : > { %v12278_v38 = vpop.eup %12277 }
0x10c4   : > { %v7561_v0 = vadd.f32 1e-05, %v7529_v40  ;;  %v7975_v48 = vpop.f32.mrf.mxu0  ;;  %v7696_v33 = vadd.f32 %v16903_v17, %v7658_v29  ;;  %v8168_v59 = vpop.f32.mrf.mxu1  ;;  %v7621_v20 = vmul.f32 %v12278_v38, %v16931_v27  ;;  %v17176_v29 = vadd.f32 %v7971_v53, %v17160_v19 }
0x10c5   : > { %v7496_v4 = vpop.xlane.xlu1 %7495  ;;  %v17168_v47 = vadd.f32 %v7975_v48, %v17160_v19  ;;  %v17172_v34 = vadd.f32 %v8168_v59, %v17165_v32  ;;  %v17180_v38 = vadd.f32 %v8164_v37, %v17165_v32  ;;  %v18872_v37 = vsub.s32 0, %v18870_v12 }
0x10c6   : > { %v7530_v36 = vmul.f32 0.0078125, %v7496_v4  ;;  %12285 = vrsqrt.f32 %v7561_v0  ;;  %v7716_v63 = vpack.c.bf16 %v7696_v33, %v7695_v46  ;;  %v7659_v40 = vmul.f32 %v16896_v7, %v7621_v20 }
0x10c7   : > { %v12280_v30 = vpop.eup %12279  ;;  %v8454_v26 = vmul.f32 0.70710677, %v17168_v47  ;;  %v17190_v60 = vrot.slane %v7753_v3, %v18872_v37  ;;  %v8456_v59 = vmul.f32 0.70710677, %v17172_v34  ;;  %v8450_v46 = vmul.f32 0.70710677, %v17176_v29 }
0x10c8   : > { %v7562_v56 = vadd.f32 1e-05, %v7530_v36  ;;  %v7622_v22 = vmul.f32 %v12280_v30, %v16936_v51  ;;  %8078 = vmatmul.mubr.bf16.gmra.mxu0 %v7716_v63  ;;  %8271 = vmatmul.mubr.bf16.gmra.mxu1 %v7716_v63  ;;  %v7697_v4 = vadd.f32 %v16903_v17, %v7659_v40  ;;  %v18873_v36 = vsub.s32 2, %v18870_v12 }
0x10c9   : > { %v7498_v8 = vpop.xlane.xlu0 %7497  ;;  %8087 = vmatprep.mubr.bf16.mxu0 %v18798_v28  ;;  %8280 = vmatprep.mubr.bf16.mxu1 %v18798_v28  ;;  %v17201_v63 = vadd.f32 %v7973_v61, %v17190_v60 }
0x10ca   : > { %v7531_v5 = vmul.f32 0.0078125, %v7498_v8  ;;  %v7660_v31 = vmul.f32 %v16896_v7, %v7622_v22  ;;  %12287 = vrsqrt.f32 %v7562_v56  ;;  %v17194_v33 = vrot.slane %v7753_v3, %v18873_v36 }
0x10cb   : > { %v12282_v45 = vpop.eup %12281  ;;  %v8452_v8 = vmul.f32 0.70710677, %v17180_v38  ;;  %v17210_v22 = vadd.f32 %v17144_v57, %v17190_v60 }
0x10cc   : > { %v7563_v27 = vadd.f32 1e-05, %v7531_v5  ;;  %v7623_v0 = vmul.f32 %v12282_v45, %v16942_v10  ;;  %v7698_v48 = vadd.f32 %v16903_v17, %v7660_v31  ;;  %v17204_v5 = vadd.f32 %v8166_v43, %v17194_v33 }
0x10cd   : > { %v7500_v51 = vpop.xlane.xlu1 %7499  ;;  %v8453_v45 = vmul.f32 0.70710677, %v17201_v63 }
0x10ce   : > { %12289 = vrsqrt.f32 %v7563_v27  ;;  %v7532_v53 = vmul.f32 0.0078125, %v7500_v51  ;;  %v7717_v20 = vpack.c.bf16 %v7698_v48, %v7697_v4  ;;  %v7661_v12 = vmul.f32 %v16896_v7, %v7623_v0 }
0x10cf   : > { %v12284_v30 = vpop.eup %12283  ;;  %12291 = verf.f32 %v8454_v26  ;;  %v8455_v57 = vmul.f32 0.70710677, %v17204_v5 }
0x10d0   : > { %v7564_v10 = vadd.f32 1e-05, %v7532_v53  ;;  %v7624_v56 = vmul.f32 %v12284_v30, %v16950_v15  ;;  %v17214_v15 = vadd.f32 %v17146_v49, %v17194_v33  ;;  %8088 = vmatmul.mubr.bf16.gmra.mxu0 %v7717_v20  ;;  %8281 = vmatmul.mubr.bf16.gmra.mxu1 %v7717_v20  ;;  %v7699_v40 = vadd.f32 %v16903_v17, %v7661_v12 }
0x10d1   : > { %8097 = vmatprep.mubr.bf16.mxu0 %v18798_v28  ;;  %8290 = vmatprep.mubr.bf16.mxu1 %v18798_v28  ;;  %v8449_v49 = vmul.f32 0.70710677, %v17210_v22 }
0x10d2   : > { %12293 = vrsqrt.f32 %v7564_v10  ;;  %v7662_v3 = vmul.f32 %v16896_v7, %v7624_v56  ;;  %v8451_v31 = vmul.f32 0.70710677, %v17214_v15 }
0x10d3   : > { %12295 = verf.f32 %v8456_v59  ;;  %v12286_v43 = vpop.eup %12285 }
0x10d4   : > { %12297 = verf.f32 %v8450_v46  ;;  %v7700_v61 = vadd.f32 %v16903_v17, %v7662_v3  ;;  %v7625_v27 = vmul.f32 %v12286_v43, %v16958_v9 }
0x10d5   : > { %12299 = verf.f32 %v8452_v8 }
0x10d6   : > { %v7718_v26 = vpack.c.bf16 %v7700_v61, %v7699_v40  ;;  %12301 = verf.f32 %v8453_v45  ;;  %v7663_v4 = vmul.f32 %v16896_v7, %v7625_v27  ;;  %v8328_v40 = vmul.f32 0.5, %v17172_v34 }
0x10d7   : > { %v12288_v51 = vpop.eup %12287  ;;  %12303 = verf.f32 %v8455_v57  ;;  %v8326_v57 = vmul.f32 0.5, %v17168_v47  ;;  %v8322_v27 = vmul.f32 0.5, %v17176_v29  ;;  %v8321_v29 = vmul.f32 0.5, %v17210_v22 }
0x10d8   : > { %12305 = verf.f32 %v8449_v49  ;;  %v7626_v53 = vmul.f32 %v12288_v51, %v16968_v39  ;;  %8098 = vmatmul.mubr.bf16.gmra.mxu0 %v7718_v26  ;;  %8291 = vmatmul.mubr.bf16.gmra.mxu1 %v7718_v26  ;;  %v7701_v36 = vadd.f32 %v16903_v17, %v7663_v4 }
0x10d9   : > { %12307 = verf.f32 %v8451_v31  ;;  %8107 = vmatprep.mubr.bf16.mxu0 %v18798_v28  ;;  %8300 = vmatprep.mubr.bf16.mxu1 %v18798_v28  ;;  %v8324_v31 = vmul.f32 0.5, %v17180_v38  ;;  %v8323_v38 = vmul.f32 0.5, %v17214_v15 }
0x10da   : > { %v7664_v9 = vmul.f32 %v16896_v7, %v7626_v53 }
0x10db   : > { %v12290_v0 = vpop.eup %12289 }
0x10dc   : > { %v12292_v48 = vpop.eup %12291  ;;  %v7627_v30 = vmul.f32 %v12290_v0, %v16976_v14  ;;  %v7702_v59 = vadd.f32 %v16903_v17, %v7664_v9 }
0x10dd   : > { %v8710_v3 = vadd.f32 1.0, %v12292_v48 }
0x10de   : > { %v7719_v20 = vpack.c.bf16 %v7702_v59, %v7701_v36  ;;  %v7665_v8 = vmul.f32 %v16896_v7, %v7627_v30  ;;  %v8327_v59 = vmul.f32 0.5, %v17204_v5 }
0x10df   : > { %v12294_v37 = vpop.eup %12293  ;;  %v8838_v26 = vmul.f32 %v8710_v3, %v8326_v57 }
0x10e0   : > { %v12296_v39 = vpop.eup %12295  ;;  %v7628_v46 = vmul.f32 %v12294_v37, %v16986_v18  ;;  %8108 = vmatmul.mubr.bf16.gmra.mxu0 %v7719_v20  ;;  %8301 = vmatmul.mubr.bf16.gmra.mxu1 %v7719_v20  ;;  %v7703_v49 = vadd.f32 %v16903_v17, %v7665_v8 }
0x10e1   : > { %v12298_v10 = vpop.eup %12297  ;;  %v8712_v61 = vadd.f32 1.0, %v12296_v39  ;;  %8117 = vmatprep.mubr.bf16.mxu0 %v18798_v28  ;;  %8310 = vmatprep.mubr.bf16.mxu1 %v18798_v28 }
0x10e2   : > { %v12300_v56 = vpop.eup %12299  ;;  %v7666_v12 = vmul.f32 %v16896_v7, %v7628_v46  ;;  %v8706_v43 = vadd.f32 1.0, %v12298_v10 }
0x10e3   : > { %v8708_v45 = vadd.f32 1.0, %v12300_v56  ;;  %v12302_v18 = vpop.eup %12301  ;;  %v8840_v51 = vmul.f32 %v8712_v61, %v8328_v40 }
0x10e4   : > { %v7704_v14 = vadd.f32 %v16903_v17, %v7666_v12  ;;  %v12304_v7 = vpop.eup %12303  ;;  %v8834_v47 = vmul.f32 %v8706_v43, %v8322_v27  ;;  %v8709_v34 = vadd.f32 1.0, %v12302_v18  ;;  %v8325_v17 = vmul.f32 0.5, %v17201_v63 }
0x10e5   : > { %v12306_v0 = vpop.eup %12305  ;;  %v8836_v9 = vmul.f32 %v8708_v45, %v8324_v31  ;;  %v8711_v48 = vadd.f32 1.0, %v12304_v7 }
0x10e6   : > { %v7720_v53 = vpack.c.bf16 %v7704_v14, %v7703_v49  ;;  %v12308_v4 = vpop.eup %12307  ;;  %v8962_v30 = vpack.c.bf16 %v8838_v26, %v8834_v47  ;;  %v8705_v28 = vadd.f32 1.0, %v12306_v0  ;;  %v8837_v39 = vmul.f32 %v8709_v34, %v8325_v17 }
0x10e7   : > { %v8964_v37 = vpack.c.bf16 %v8840_v51, %v8836_v9  ;;  %v8707_v36 = vadd.f32 1.0, %v12308_v4  ;;  %v8839_v46 = vmul.f32 %v8711_v48, %v8327_v59 }
0x10e8   : > { %8118 = vmatmul.mubr.bf16.gmra.mxu0 %v7720_v53  ;;  %8311 = vmatmul.mubr.bf16.gmra.mxu1 %v7720_v53  ;;  %v8833_v10 = vmul.f32 %v8705_v28, %v8321_v29 }
0x10e9   : > { %9320 = vmatprep.mubr.bf16.mxu0 %v8962_v30  ;;  %9481 = vmatprep.mubr.bf16.mxu1 %v8964_v37  ;;  %v8835_v20 = vmul.f32 %v8707_v36, %v8323_v38 }
0x10ea   : > { %v8961_v56 = vpack.c.bf16 %v8837_v39, %v8833_v10 }
0x10eb   : > { %v8963_v8 = vpack.c.bf16 %v8839_v46, %v8835_v20 }
0x10f0   : > { %9321 = vmatmul.mubr.bf16.vlgmr.msra.gmra.mxu0 %v8961_v56  ;;  %9482 = vmatmul.mubr.bf16.vlgmr.msra.gmra.mxu1 %v8963_v8 }
0x10f5   : > { %v7979_v12 = vpop.f32.mrf.mxu0  ;;  %v8172_v63 = vpop.f32.mrf.mxu1 }
0x10f6   : > { %v7980_v5 = vadd.f32 %v7979_v12, %v17190_v60  ;;  %v8173_v3 = vadd.f32 %v8172_v63, %v17194_v33 }
0x10f7   : > { %v7981_v61 = vpop.f32.mrf.mxu0  ;;  %v8174_v14 = vpop.f32.mrf.mxu1 }
0x10f8   : > { %v8457_v43 = vmul.f32 0.70710677, %v7980_v5  ;;  %v7982_v22 = vadd.f32 %v7981_v61, %v17160_v19  ;;  %v8175_v15 = vadd.f32 %v8174_v14, %v17165_v32  ;;  %v8459_v40 = vmul.f32 0.70710677, %v8173_v3 }
0x10f9   : > { %v7983_v45 = vpop.f32.mrf.mxu0  ;;  %v8176_v57 = vpop.f32.mrf.mxu1 }
0x10fa   : > { %v7984_v18 = vadd.f32 %v7983_v45, %v17190_v60  ;;  %v8177_v49 = vadd.f32 %v8176_v57, %v17194_v33  ;;  %v8458_v7 = vmul.f32 0.70710677, %v7982_v22  ;;  %v8460_v26 = vmul.f32 0.70710677, %v8175_v15 }
0x10fb   : > { %v7985_v27 = vpop.f32.mrf.mxu0  ;;  %v8178_v31 = vpop.f32.mrf.mxu1  ;;  %12309 = verf.f32 %v8457_v43 }
0x10fc   : > { %v8461_v51 = vmul.f32 0.70710677, %v7984_v18  ;;  %v7986_v0 = vadd.f32 %v7985_v27, %v17160_v19  ;;  %v8179_v53 = vadd.f32 %v8178_v31, %v17165_v32  ;;  %12311 = verf.f32 %v8459_v40 }
0x10fd   : > { %v7989_v4 = vpop.f32.mrf.mxu0  ;;  %v8182_v47 = vpop.f32.mrf.mxu1  ;;  %v8463_v9 = vmul.f32 0.70710677, %v8177_v49  ;;  %12313 = verf.f32 %v8458_v7  ;;  %v8329_v31 = vmul.f32 0.5, %v7980_v5 }
0x10fe   : > { %v7990_v34 = vadd.f32 %v7989_v4, %v17190_v60  ;;  %v8183_v48 = vadd.f32 %v8182_v47, %v17194_v33  ;;  %v8462_v30 = vmul.f32 0.70710677, %v7986_v0  ;;  %12315 = verf.f32 %v8460_v26 }
0x10ff   : > { %v7991_v37 = vpop.f32.mrf.mxu0  ;;  %v8184_v28 = vpop.f32.mrf.mxu1  ;;  %v8464_v36 = vmul.f32 0.70710677, %v8179_v53  ;;  %12317 = verf.f32 %v8461_v51  ;;  %v17264_v26 = vmul.f32 0.5, %v8173_v3  ;;  %v17266_v51 = vmul.f32 0.5, %v7982_v22 }
0x1100   : > { %v8465_v17 = vmul.f32 0.70710677, %v7990_v34  ;;  %v7992_v59 = vadd.f32 %v7991_v37, %v17160_v19  ;;  %12319 = verf.f32 %v8463_v9  ;;  %v8467_v39 = vmul.f32 0.70710677, %v8183_v48 }
0x1101   : > { %v7993_v29 = vpop.f32.mrf.mxu0  ;;  %v8186_v38 = vpop.f32.mrf.mxu1  ;;  %v8185_v46 = vadd.f32 %v8184_v28, %v17165_v32  ;;  %12321 = verf.f32 %v8462_v30  ;;  %v17268_v4 = vmul.f32 0.5, %v8175_v15  ;;  %v17270_v37 = vmul.f32 0.5, %v7984_v18 }
0x1102   : > { %v7994_v10 = vadd.f32 %v7993_v29, %v17190_v60  ;;  %v8466_v20 = vmul.f32 0.70710677, %v7992_v59  ;;  %v8187_v56 = vadd.f32 %v8186_v38, %v17194_v33  ;;  %12323 = verf.f32 %v8464_v36 }
0x1103   : > { %v7995_v8 = vpop.f32.mrf.mxu0  ;;  %v8188_v12 = vpop.f32.mrf.mxu1  ;;  %12325 = verf.f32 %v8465_v17  ;;  %v8468_v43 = vmul.f32 0.70710677, %v8185_v46  ;;  %v17272_v28 = vmul.f32 0.5, %v8177_v49  ;;  %v17275_v29 = vmul.f32 0.5, %v7986_v0 }
0x1104   : > { %v8469_v63 = vmul.f32 0.70710677, %v7994_v10  ;;  %12327 = verf.f32 %v8467_v39  ;;  %v8471_v45 = vmul.f32 0.70710677, %v8187_v56  ;;  %v7996_v57 = vadd.f32 %v7995_v8, %v17160_v19 }
0x1105   : > { %v7999_v61 = vpop.f32.mrf.mxu0  ;;  %v8192_v14 = vpop.f32.mrf.mxu1  ;;  %12329 = verf.f32 %v8466_v20  ;;  %v8189_v27 = vadd.f32 %v8188_v12, %v17165_v32  ;;  %v17280_v39 = vmul.f32 0.5, %v8179_v53  ;;  %v17282_v18 = vmul.f32 0.5, %v7990_v34 }
0x1106   : > { %12331 = verf.f32 %v8469_v63  ;;  %v8000_v36 = vadd.f32 %v7999_v61, %v17190_v60  ;;  %v8470_v5 = vmul.f32 0.70710677, %v7996_v57  ;;  %v8193_v3 = vadd.f32 %v8192_v14, %v17194_v33 }
0x1107   : > { %v8001_v40 = vpop.f32.mrf.mxu0  ;;  %v8194_v7 = vpop.f32.mrf.mxu1  ;;  %12333 = verf.f32 %v8468_v43  ;;  %v17284_v49 = vmul.f32 0.5, %v8183_v48  ;;  %v8472_v20 = vmul.f32 0.70710677, %v8189_v27  ;;  %v17286_v63 = vmul.f32 0.5, %v7992_v59 }
0x1108   : > { %v12310_v30 = vpop.eup %12309  ;;  %12335 = verf.f32 %v8471_v45  ;;  %v17288_v0 = vmul.f32 0.5, %v8185_v46  ;;  %v17290_v61 = vmul.f32 0.5, %v7994_v10  ;;  %v17296_v53 = vmul.f32 0.5, %v8187_v56 }
0x1109   : > { %v8003_v47 = vpop.f32.mrf.mxu0  ;;  %v8196_v9 = vpop.f32.mrf.mxu1  ;;  %v8713_v12 = vadd.f32 1.0, %v12310_v30  ;;  %v8473_v34 = vmul.f32 0.70710677, %v8000_v36  ;;  %v8002_v48 = vadd.f32 %v8001_v40, %v17160_v19  ;;  %v17300_v30 = vmul.f32 0.5, %v7996_v57 }
0x110a   : > { %v12312_v17 = vpop.eup %12311  ;;  %v8004_v13 = vadd.f32 %v8003_v47, %v17190_v60  ;;  %12337 = verf.f32 %v8470_v5  ;;  %v8475_v59 = vmul.f32 0.70710677, %v8193_v3  ;;  %v8195_v46 = vadd.f32 %v8194_v7, %v17165_v32 }
0x110b   : > { %v8005_v22 = vpop.f32.mrf.mxu0  ;;  %v17278_v15 = vpop.f32.mrf.mxu1  ;;  %v8715_v35 = vadd.f32 1.0, %v12312_v17  ;;  %12339 = verf.f32 %v8472_v20  ;;  %v17307_v40 = vmul.f32 %v8713_v12, %v8329_v31  ;;  %v17309_v6 = vmul.f32 0.5, %v8189_v27 }
0x110c   : > { %v12314_v38 = vpop.eup %12313  ;;  %v17311_v57 = vmul.f32 0.5, %v8000_v36  ;;  %12341 = verf.f32 %v8473_v34  ;;  %v8474_v23 = vmul.f32 0.70710677, %v8002_v48  ;;  %v8477_v41 = vmul.f32 0.70710677, %v8004_v13 }
0x110d   : > { %v12316_v8 = vpop.eup %12315  ;;  %v17292_v14 = vpop.f32.mrf.mxu0  ;;  %v8714_v56 = vadd.f32 1.0, %v12314_v38  ;;  %v17313_v17 = vmul.f32 0.5, %v8193_v3  ;;  %12343 = verf.f32 %v8475_v59  ;;  %v8476_v38 = vmul.f32 0.70710677, %v8195_v46 }
0x110e   : > { %v17294_v43 = vpop.f32.mrf.mxu1  ;;  %v12318_v45 = vpop.eup %12317  ;;  %v8716_v52 = vadd.f32 1.0, %v12316_v8  ;;  %v8197_v31 = vadd.f32 %v8196_v9, %v17194_v33  ;;  %v17321_v8 = vmul.f32 %v8715_v35, %v17264_v26  ;;  %v8006_v3 = vadd.f32 %v8005_v22, %v17160_v19 }
0x110f   : > { %v12320_v24 = vpop.eup %12319  ;;  %v17303_v10 = vpop.f32.mrf.mxu0  ;;  %v8717_v47 = vadd.f32 1.0, %v12318_v45  ;;  %v17333_v9 = vmul.f32 0.5, %v8002_v48  ;;  %12345 = verf.f32 %v8477_v41 }
0x1110   : > { %v17305_v62 = vpop.f32.mrf.mxu1  ;;  %v12322_v21 = vpop.eup %12321  ;;  %v8719_v1 = vadd.f32 1.0, %v12320_v24  ;;  %v17324_v24 = vmul.f32 %v8714_v56, %v17266_v51  ;;  %v17327_v12 = vmul.f32 %v8716_v52, %v17268_v4  ;;  %v8479_v59 = vmul.f32 0.70710677, %v8197_v31 }
0x1111   : > { %v12324_v42 = vpop.eup %12323  ;;  %v8013_v5 = vpop.f32.mrf.mxu0  ;;  %v17331_v34 = vmul.f32 %v8717_v47, %v17270_v37  ;;  %v8718_v51 = vadd.f32 1.0, %v12322_v21  ;;  %12347 = verf.f32 %v8474_v23  ;;  %v8199_v52 = vadd.f32 %v17278_v15, %v17165_v32 }
0x1112   : > { %v8206_v44 = vpop.f32.mrf.mxu1  ;;  %v12326_v7 = vpop.eup %12325  ;;  %v17340_v26 = vmul.f32 %v8719_v1, %v17272_v28  ;;  %v8720_v22 = vadd.f32 1.0, %v12324_v42  ;;  %v17344_v56 = vmul.f32 0.5, %v8195_v46  ;;  %12349 = verf.f32 %v8476_v38 }
0x1113   : > { %v12328_v11 = vpop.eup %12327  ;;  %v17316_v20 = vpop.f32.mrf.mxu0  ;;  %v8721_v37 = vadd.f32 1.0, %v12326_v7  ;;  %v8478_v54 = vmul.f32 0.70710677, %v8006_v3  ;;  %v17348_v28 = vmul.f32 0.5, %v8004_v13  ;;  %12351 = verf.f32 %v8479_v59 }
0x1114   : > { %v17318_v27 = vpop.f32.mrf.mxu1  ;;  %v12330_v36 = vpop.eup %12329  ;;  %v8723_v48 = vadd.f32 1.0, %v12328_v11  ;;  %v8010_v23 = vadd.f32 %v17292_v14, %v17190_v60  ;;  %v8846_v11 = vmul.f32 %v8718_v51, %v17275_v29  ;;  %v8480_v7 = vmul.f32 0.70710677, %v8199_v52 }
0x1115   : > { %v12332_v45 = vpop.eup %12331  ;;  %v17335_v58 = vpop.f32.mrf.mxu0  ;;  %v8722_v47 = vadd.f32 1.0, %v12330_v36  ;;  %v8848_v38 = vmul.f32 %v8720_v22, %v17280_v39  ;;  %v17361_v13 = vmul.f32 %v8721_v37, %v17282_v18  ;;  %v8203_v14 = vadd.f32 %v17294_v43, %v17194_v33 }
0x1116   : > { %v17337_v35 = vpop.f32.mrf.mxu1  ;;  %v12334_v4 = vpop.eup %12333  ;;  %v8725_v16 = vadd.f32 1.0, %v12332_v45  ;;  %v17366_v59 = vmul.f32 %v8723_v48, %v17284_v49  ;;  %12353 = verf.f32 %v8478_v54  ;;  %v8481_v39 = vmul.f32 0.70710677, %v8010_v23 }
0x1117   : > { %v12336_v41 = vpop.eup %12335  ;;  %v17352_v21 = vpop.f32.mrf.mxu0  ;;  %v8724_v46 = vadd.f32 1.0, %v12334_v4  ;;  %v17369_v1 = vmul.f32 %v8722_v47, %v17286_v63  ;;  %v8012_v18 = vadd.f32 %v17303_v10, %v17160_v19  ;;  %v8014_v4 = vadd.f32 %v8013_v5, %v17190_v60 }
0x1118   : > { %v17354_v42 = vpop.f32.mrf.mxu1  ;;  %v8727_v36 = vadd.f32 1.0, %v12336_v41  ;;  %v12338_v45 = vpop.eup %12337  ;;  %v17372_v29 = vmul.f32 %v8725_v16, %v17290_v61  ;;  %v17378_v43 = vadd.f32 %v8206_v44, %v17194_v33  ;;  %v17387_v16 = vmul.f32 0.5, %v8197_v31 }
0x1119   : > { %v12340_v51 = vpop.eup %12339  ;;  %v17380_v22 = vpop.f32.mrf.mxu0  ;;  %v17385_v63 = vmul.f32 %v8724_v46, %v17288_v0  ;;  %12355 = verf.f32 %v8480_v7  ;;  %v8205_v54 = vadd.f32 %v17305_v62, %v17165_v32  ;;  %v17394_v5 = vmul.f32 0.5, %v8006_v3 }
0x111a   : > { %v17382_v49 = vpop.f32.mrf.mxu1  ;;  %v12342_v61 = vpop.eup %12341  ;;  %v17392_v10 = vmul.f32 %v8727_v36, %v17296_v53  ;;  %v17396_v44 = vmul.f32 0.5, %v8199_v52  ;;  %v8483_v37 = vmul.f32 0.70710677, %v8203_v14  ;;  %v8726_v48 = vadd.f32 1.0, %v12338_v45 }
0x111b   : > { %v12344_v41 = vpop.eup %12343  ;;  %v8728_v31 = vadd.f32 1.0, %v12340_v51  ;;  %v8485_v47 = vmul.f32 0.70710677, %v8014_v4  ;;  %12357 = verf.f32 %v8481_v39  ;;  %v8482_v46 = vmul.f32 0.70710677, %v8012_v18  ;;  %v8025_v7 = vpop.f32.mrf.mxu0 }
0x111c   : > { %v8487_v62 = vmul.f32 0.70710677, %v17378_v43  ;;  %v8016_v53 = vadd.f32 %v17316_v20, %v17160_v19  ;;  %v17403_v3 = vpop.f32.mrf.mxu1  ;;  %v12346_v52 = vpop.eup %12345  ;;  %v8729_v36 = vadd.f32 1.0, %v12342_v61  ;;  %v8484_v15 = vmul.f32 0.70710677, %v8205_v54 }
0x111d   : > { %12359 = verf.f32 %v8485_v47  ;;  %v8966_v2 = vpack.c.bf16 %v8846_v11, %v17324_v24  ;;  %v8731_v45 = vadd.f32 1.0, %v12344_v41  ;;  %v8209_v51 = vadd.f32 %v17318_v27, %v17165_v32 }
0x111e   : > { %v12348_v0 = vpop.eup %12347  ;;  %12361 = verf.f32 %v8483_v37  ;;  %v8968_v39 = vpack.c.bf16 %v8848_v38, %v17327_v12  ;;  %v8971_v20 = vpack.c.bf16 %v17392_v10, %v17366_v59  ;;  %v17412_v55 = vmul.f32 %v8726_v48, %v17300_v30  ;;  %v17422_v12 = vpop.f32.mrf.mxu0 }
0x111f   : > { %v12350_v50 = vpop.eup %12349  ;;  %v17414_v61 = vmul.f32 0.5, %v8010_v23  ;;  %12363 = verf.f32 %v8487_v62  ;;  %9328 = vmatprep.mubr.bf16.mxu0 %v8966_v2  ;;  %v17417_v24 = vmul.f32 %v8728_v31, %v17309_v6  ;;  %v8733_v11 = vadd.f32 1.0, %v12346_v52  ;;  %v17424_v38 = vpop.f32.mrf.mxu1 }
0x1120   : > { %12365 = verf.f32 %v8482_v46  ;;  %v8486_v37 = vmul.f32 0.70710677, %v8016_v53  ;;  %9489 = vmatprep.mubr.bf16.mxu1 %v8968_v39  ;;  %v18874_v27 = vpack.c.bf16 %v17331_v34, %v17307_v40  ;;  %v12352_v30 = vpop.eup %12351  ;;  %v8730_v23 = vadd.f32 1.0, %v12348_v0 }
0x1121   : > { %v17426_v41 = vmul.f32 0.5, %v8203_v14  ;;  %12367 = verf.f32 %v8484_v15  ;;  %v8020_v2 = vadd.f32 %v17335_v58, %v17190_v60  ;;  %v18875_v6 = vpack.c.bf16 %v17340_v26, %v17321_v8  ;;  %v17452_v26 = vpop.f32.mrf.mxu1 }
0x1122   : > { %9329 = vmatmul.mubr.bf16.gmra.mxu0 %v18874_v27  ;;  %v17434_v48 = vmul.f32 %v8729_v36, %v17311_v57  ;;  %v17437_v40 = vmul.f32 %v8731_v45, %v17313_v17  ;;  %v8732_v34 = vadd.f32 1.0, %v12350_v50  ;;  %v8488_v31 = vmul.f32 0.70710677, %v8209_v51  ;;  %v8031_v50 = vpop.f32.mrf.mxu0 }
0x1123   : > { %9490 = vmatmul.mubr.bf16.gmra.mxu1 %v18875_v6  ;;  %v17439_v47 = vmul.f32 0.5, %v8012_v18  ;;  %v17441_v14 = vmul.f32 0.5, %v8205_v54  ;;  %v17443_v15 = vmul.f32 0.5, %v8014_v4  ;;  %v8213_v58 = vadd.f32 %v17337_v35, %v17194_v33  ;;  %v12354_v0 = vpop.eup %12353 }
0x1124   : > { %v17448_v8 = vmul.f32 %v8733_v11, %v17348_v28  ;;  %v8735_v57 = vadd.f32 1.0, %v12352_v30  ;;  %12369 = verf.f32 %v8486_v37  ;;  %v8022_v17 = vadd.f32 %v17352_v21, %v17160_v19  ;;  %v8033_v39 = vpop.f32.mrf.mxu0  ;;  %v17481_v11 = vpop.f32.mrf.mxu1 }
0x1125   : > { %v17455_v18 = vmul.f32 %v8730_v23, %v17333_v9  ;;  %v17458_v4 = vmul.f32 0.5, %v17378_v43  ;;  %v8489_v54 = vmul.f32 0.70710677, %v8020_v2  ;;  %v8024_v35 = vadd.f32 %v17380_v22, %v17190_v60 }
0x1126   : > { %v12356_v28 = vpop.eup %12355  ;;  %v17463_v46 = vmul.f32 %v8732_v34, %v17344_v56  ;;  %v17465_v62 = vmul.f32 0.5, %v8016_v53  ;;  %12371 = verf.f32 %v8488_v31  ;;  %v17468_v21 = vadd.f32 %v8025_v7, %v17160_v19 }
0x1127   : > { %v8734_v52 = vadd.f32 1.0, %v12354_v0  ;;  %v17470_v9 = vmul.f32 0.5, %v8209_v51  ;;  %v8491_v36 = vmul.f32 0.70710677, %v8213_v58  ;;  %v8215_v43 = vadd.f32 %v17354_v42, %v17165_v32 }
0x1128   : > { %v8973_v22 = vpack.c.bf16 %v17448_v8, %v17434_v48  ;;  %v17477_v45 = vmul.f32 %v8735_v57, %v17387_v16  ;;  %v17479_v56 = vmul.f32 0.5, %v8020_v2  ;;  %v8490_v53 = vmul.f32 0.70710677, %v8022_v17  ;;  %v12358_v7 = vpop.eup %12357 }
0x1129   : > { %v8736_v37 = vadd.f32 1.0, %v12356_v28  ;;  %12373 = verf.f32 %v8489_v54  ;;  %v8493_v51 = vmul.f32 0.70710677, %v8024_v35  ;;  %v8217_v27 = vadd.f32 %v17382_v49, %v17194_v33  ;;  %v8035_v54 = vpop.f32.mrf.mxu0 }
0x112a   : > { %v12360_v42 = vpop.eup %12359  ;;  %v17485_v30 = vmul.f32 0.5, %v8213_v58  ;;  %v8494_v23 = vmul.f32 0.70710677, %v17468_v21  ;;  %v8219_v16 = vadd.f32 %v17403_v3, %v17165_v32  ;;  %v8970_v2 = vpack.c.bf16 %v17412_v55, %v17369_v1  ;;  %v8228_v55 = vpop.f32.mrf.mxu1 }
0x112b   : > { %v12362_v6 = vpop.eup %12361  ;;  %v17493_v34 = vmul.f32 %v8734_v52, %v17394_v5  ;;  %12375 = verf.f32 %v8491_v36  ;;  %v8492_v31 = vmul.f32 0.70710677, %v8215_v43  ;;  %v8972_v49 = vpack.c.bf16 %v17417_v24, %v17385_v63 }
0x112c   : > { %v12364_v0 = vpop.eup %12363  ;;  %v8975_v58 = vpack.c.bf16 %v17477_v45, %v17437_v40  ;;  %v17499_v57 = vmul.f32 0.5, %v8022_v17  ;;  %12377 = verf.f32 %v8490_v53  ;;  %v8496_v3 = vmul.f32 0.70710677, %v8219_v16  ;;  %9336 = vmatprep.mubr.bf16.mxu0 %v8970_v2 }
0x112d   : > { %v12366_v1 = vpop.eup %12365  ;;  %v17502_v5 = vmul.f32 %v8736_v37, %v17396_v44  ;;  %v8741_v28 = vadd.f32 1.0, %v12360_v42  ;;  %12379 = verf.f32 %v8493_v51  ;;  %v8495_v52 = vmul.f32 0.70710677, %v8217_v27  ;;  %9497 = vmatprep.mubr.bf16.mxu1 %v8972_v49  ;;  %v8232_v42 = vpop.f32.mrf.mxu1 }
0x112e   : > { %v18876_v63 = vpack.c.bf16 %v17372_v29, %v17361_v13  ;;  %v12368_v24 = vpop.eup %12367  ;;  %v8737_v17 = vadd.f32 1.0, %v12358_v7  ;;  %v17507_v36 = vmul.f32 0.5, %v8215_v43  ;;  %12381 = verf.f32 %v8494_v23  ;;  %9498 = vmatmul.mubr.bf16.gmra.mxu1 %v8971_v20  ;;  %v8039_v7 = vpop.f32.mrf.mxu0 }
0x112f   : > { %v8030_v53 = vadd.f32 %v17422_v12, %v17190_v60  ;;  %v8739_v44 = vadd.f32 1.0, %v12362_v6  ;;  %v8743_v37 = vadd.f32 1.0, %v12364_v0  ;;  %12383 = verf.f32 %v8492_v31 }
0x1130   : > { %9337 = vmatmul.mubr.bf16.gmra.mxu0 %v18876_v63  ;;  %v17515_v51 = vadd.f32 %v8031_v50, %v17160_v19  ;;  %v8738_v13 = vadd.f32 1.0, %v12366_v1  ;;  %v17517_v29 = vmul.f32 0.5, %v8024_v35  ;;  %12385 = verf.f32 %v8496_v3  ;;  %v8041_v0 = vpop.f32.mrf.mxu0  ;;  %v8234_v3 = vpop.f32.mrf.mxu1 }
0x1131   : > { %v8223_v43 = vadd.f32 %v17424_v38, %v17194_v33  ;;  %v12370_v12 = vpop.eup %12369  ;;  %v8740_v23 = vadd.f32 1.0, %v12368_v24  ;;  %v17522_v59 = vmul.f32 %v8741_v28, %v17443_v15  ;;  %v17524_v10 = vmul.f32 0.5, %v8217_v27 }
0x1132   : > { %12387 = verf.f32 %v8495_v52  ;;  %v17527_v20 = vmul.f32 %v8737_v17, %v17414_v61  ;;  %v17530_v50 = vmul.f32 0.5, %v17468_v21  ;;  %v8497_v35 = vmul.f32 0.70710677, %v8030_v53 }
0x1133   : > { %v8225_v38 = vadd.f32 %v17452_v26, %v17165_v32  ;;  %v12372_v2 = vpop.eup %12371  ;;  %v17535_v6 = vmul.f32 %v8743_v37, %v17458_v4  ;;  %v8498_v15 = vmul.f32 0.70710677, %v17515_v51  ;;  %v17539_v27 = vadd.f32 %v8033_v39, %v17190_v60  ;;  %v8236_v37 = vpop.f32.mrf.mxu1 }
0x1134   : > { %v17542_v31 = vadd.f32 %v8035_v54, %v17160_v19  ;;  %v17545_v61 = vmul.f32 %v8739_v44, %v17426_v41  ;;  %v17548_v21 = vmul.f32 %v8738_v13, %v17439_v47  ;;  %v8742_v49 = vadd.f32 1.0, %v12370_v12 }
0x1135   : > { %v8499_v26 = vmul.f32 0.70710677, %v8223_v43  ;;  %v17551_v4 = vmul.f32 %v8740_v23, %v17441_v14  ;;  %v8977_v39 = vpack.c.bf16 %v17522_v59, %v17527_v20  ;;  %v17555_v1 = vmul.f32 0.5, %v8219_v16 }
0x1136   : > { %v8227_v54 = vadd.f32 %v17481_v11, %v17194_v33  ;;  %v12374_v41 = vpop.eup %12373  ;;  %v8744_v28 = vadd.f32 1.0, %v12372_v2  ;;  %v17559_v52 = vmul.f32 0.5, %v8030_v53  ;;  %12389 = verf.f32 %v8497_v35  ;;  %v8043_v53 = vpop.f32.mrf.mxu0 }
0x1137   : > { %v8500_v47 = vmul.f32 0.70710677, %v8225_v38  ;;  %v8979_v63 = vpack.c.bf16 %v17535_v6, %v17545_v61  ;;  %12391 = verf.f32 %v8498_v15  ;;  %v8501_v14 = vmul.f32 0.70710677, %v17539_v27 }
0x1138   : > { %v8502_v24 = vmul.f32 0.70710677, %v17542_v31  ;;  %v12376_v17 = vpop.eup %12375  ;;  %v17566_v16 = vmul.f32 %v8742_v49, %v17465_v62  ;;  %v17568_v44 = vmul.f32 0.5, %v8223_v43  ;;  %12393 = verf.f32 %v8499_v26 }
0x1139   : > { %v17571_v11 = vadd.f32 %v8228_v55, %v17165_v32  ;;  %v12378_v13 = vpop.eup %12377  ;;  %v8745_v12 = vadd.f32 1.0, %v12374_v41  ;;  %v8503_v23 = vmul.f32 0.70710677, %v8227_v54  ;;  %v8974_v35 = vpack.c.bf16 %v17493_v34, %v17455_v18 }
0x113a   : > { %12395 = verf.f32 %v8502_v24  ;;  %v12380_v2 = vpop.eup %12379  ;;  %v17576_v15 = vmul.f32 %v8744_v28, %v17470_v9  ;;  %v8976_v55 = vpack.c.bf16 %v17502_v5, %v17463_v46  ;;  %v8747_v49 = vadd.f32 1.0, %v12376_v17  ;;  %v8045_v5 = vpop.f32.mrf.mxu0 }
0x113b   : > { %12397 = verf.f32 %v8500_v47  ;;  %v8504_v62 = vmul.f32 0.70710677, %v17571_v11  ;;  %v12382_v43 = vpop.eup %12381  ;;  %9344 = vmatprep.mubr.bf16.mxu0 %v8974_v35  ;;  %v17582_v26 = vadd.f32 %v8039_v7, %v17190_v60  ;;  %v17585_v41 = vadd.f32 %v8232_v42, %v17194_v33  ;;  %v8238_v7 = vpop.f32.mrf.mxu1 }
0x113c   : > { %12399 = verf.f32 %v8501_v14  ;;  %v12384_v18 = vpop.eup %12383  ;;  %v8746_v34 = vadd.f32 1.0, %v12378_v13  ;;  %v17588_v9 = vmul.f32 0.5, %v17515_v51  ;;  %9505 = vmatprep.mubr.bf16.mxu1 %v8976_v55  ;;  %9345 = vmatmul.mubr.bf16.gmra.mxu0 %v8973_v22  ;;  %v17594_v46 = vadd.f32 %v8041_v0, %v17160_v19  ;;  %v8049_v24 = vpop.f32.mrf.mxu0 }
0x113d   : > { %12401 = verf.f32 %v8504_v62  ;;  %v12386_v28 = vpop.eup %12385  ;;  %v17597_v42 = vmul.f32 %v8745_v12, %v17479_v56  ;;  %v17599_v47 = vmul.f32 0.5, %v8225_v38  ;;  %v8505_v51 = vmul.f32 0.70710677, %v17582_v26  ;;  %9506 = vmatmul.mubr.bf16.gmra.mxu1 %v8975_v58  ;;  %v17609_v56 = vpop.f32.mrf.mxu1 }
0x113e   : > { %12403 = verf.f32 %v8503_v23  ;;  %v8749_v8 = vadd.f32 1.0, %v12380_v2  ;;  %v8750_v22 = vadd.f32 1.0, %v12382_v43  ;;  %v8507_v0 = vmul.f32 0.70710677, %v17585_v41 }
0x113f   : > { %v12388_v48 = vpop.eup %12387  ;;  %v17607_v14 = vadd.f32 %v8234_v3, %v17165_v32  ;;  %v17612_v38 = vmul.f32 %v8747_v49, %v17485_v30  ;;  %v8506_v17 = vmul.f32 0.70710677, %v17594_v46  ;;  %v17616_v13 = vadd.f32 %v8043_v53, %v17190_v60  ;;  %v8244_v62 = vpop.f32.mrf.mxu1 }
0x1140   : > { %v17619_v40 = vadd.f32 %v8236_v37, %v17194_v33  ;;  %v8874_v45 = vmul.f32 %v8746_v34, %v17499_v57  ;;  %v8752_v58 = vadd.f32 1.0, %v12386_v28  ;;  %v17623_v3 = vmul.f32 0.5, %v17539_v27  ;;  %v8051_v57 = vpop.f32.mrf.mxu0 }
0x1141   : > { %v17625_v12 = vmul.f32 0.5, %v8227_v54  ;;  %v8748_v23 = vadd.f32 1.0, %v12384_v18  ;;  %v8751_v35 = vadd.f32 1.0, %v12388_v48  ;;  %12405 = verf.f32 %v8505_v51 }
0x1142   : > { %v8508_v30 = vmul.f32 0.70710677, %v17607_v14  ;;  %v17629_v2 = vmul.f32 %v8749_v8, %v17517_v29  ;;  %v8878_v53 = vmul.f32 %v8750_v22, %v17530_v50  ;;  %12407 = verf.f32 %v8507_v0 }
0x1143   : > { %v8509_v37 = vmul.f32 0.70710677, %v17616_v13  ;;  %v12390_v55 = vpop.eup %12389  ;;  %12409 = verf.f32 %v8506_v17  ;;  %v8511_v27 = vmul.f32 0.70710677, %v17619_v40  ;;  %v17635_v54 = vadd.f32 %v8045_v5, %v17160_v19 }
0x1144   : > { %v17638_v43 = vadd.f32 %v8238_v7, %v17165_v32  ;;  %v12392_v49 = vpop.eup %12391  ;;  %v8880_v29 = vmul.f32 %v8752_v58, %v17555_v1  ;;  %v8978_v50 = vpack.c.bf16 %v17566_v16, %v17548_v21  ;;  %v8980_v18 = vpack.c.bf16 %v17576_v15, %v17551_v4  ;;  %v8053_v21 = vpop.f32.mrf.mxu0 }
0x1145   : > { %12411 = verf.f32 %v8509_v37  ;;  %v12394_v34 = vpop.eup %12393  ;;  %v8879_v28 = vmul.f32 %v8751_v35, %v17524_v10  ;;  %v8374_v51 = vmul.f32 0.5, %v17542_v31  ;;  %v8510_v5 = vmul.f32 0.70710677, %v17635_v54  ;;  %v8246_v4 = vpop.f32.mrf.mxu1 }
0x1146   : > { %12413 = verf.f32 %v8508_v30  ;;  %v8876_v48 = vmul.f32 %v8748_v23, %v17507_v36  ;;  %v8376_v1 = vmul.f32 0.5, %v17571_v11  ;;  %v8512_v8 = vmul.f32 0.70710677, %v17638_v43  ;;  %9352 = vmatprep.mubr.bf16.mxu0 %v8978_v50  ;;  %9513 = vmatprep.mubr.bf16.mxu1 %v8980_v18 }
0x1147   : > { %v12396_v7 = vpop.eup %12395  ;;  %12415 = verf.f32 %v8511_v27  ;;  %v8754_v15 = vadd.f32 1.0, %v12392_v49  ;;  %9353 = vmatmul.mubr.bf16.gmra.mxu0 %v8977_v39  ;;  %9514 = vmatmul.mubr.bf16.gmra.mxu1 %v8979_v63  ;;  %v8982_v36 = vpack.c.bf16 %v8878_v53, %v8874_v45  ;;  %v8981_v11 = vpack.c.bf16 %v17629_v2, %v17597_v42  ;;  %v8248_v45 = vpop.f32.mrf.mxu1 }
0x1148   : > { %v12398_v16 = vpop.eup %12397  ;;  %v8758_v10 = vadd.f32 1.0, %v12396_v7  ;;  %12417 = verf.f32 %v8510_v5  ;;  %v8984_v22 = vpack.c.bf16 %v8880_v29, %v8876_v48  ;;  %v17660_v0 = vadd.f32 %v8049_v24, %v17190_v60  ;;  %v8055_v24 = vpop.f32.mrf.mxu0 }
0x1149   : > { %v12400_v31 = vpop.eup %12399  ;;  %12419 = verf.f32 %v8512_v8  ;;  %v8983_v58 = vpack.c.bf16 %v8879_v28, %v17612_v38  ;;  %v17664_v59 = vmul.f32 0.5, %v17582_v26  ;;  %9360 = vmatprep.mubr.bf16.mxu0 %v8982_v36  ;;  %v17667_v20 = vadd.f32 %v8051_v57, %v17160_v19 }
0x114a   : > { %v12402_v17 = vpop.eup %12401  ;;  %v8886_v23 = vmul.f32 %v8758_v10, %v8374_v51  ;;  %v8753_v61 = vadd.f32 1.0, %v12390_v55  ;;  %v8755_v39 = vadd.f32 1.0, %v12394_v34  ;;  %v17670_v42 = vmul.f32 0.5, %v17585_v41  ;;  %9521 = vmatprep.mubr.bf16.mxu1 %v8984_v22  ;;  %v8252_v34 = vpop.f32.mrf.mxu1 }
0x114b   : > { %v12404_v6 = vpop.eup %12403  ;;  %v8760_v63 = vadd.f32 1.0, %v12402_v17  ;;  %v8882_v38 = vmul.f32 %v8754_v15, %v17588_v9  ;;  %v8756_v35 = vadd.f32 1.0, %v12398_v16  ;;  %v8757_v30 = vadd.f32 1.0, %v12400_v31 }
0x114c   : > { %v8513_v26 = vmul.f32 0.70710677, %v17660_v0  ;;  %v17676_v2 = vadd.f32 %v17609_v56, %v17194_v33  ;;  %v8514_v53 = vmul.f32 0.70710677, %v17667_v20  ;;  %v17680_v37 = vadd.f32 %v8244_v62, %v17165_v32  ;;  %v8059_v62 = vpop.f32.mrf.mxu0  ;;  %v8254_v15 = vpop.f32.mrf.mxu1 }
0x114d   : > { %v17683_v41 = vadd.f32 %v8053_v21, %v17190_v60  ;;  %v8759_v57 = vadd.f32 1.0, %v12404_v6  ;;  %v8888_v55 = vmul.f32 %v8760_v63, %v8376_v1  ;;  %v17686_v9 = vadd.f32 %v8246_v4, %v17194_v33 }
0x114e   : > { %v8986_v27 = vpack.c.bf16 %v8886_v23, %v8882_v38  ;;  %v12406_v49 = vpop.eup %12405  ;;  %v8881_v29 = vmul.f32 %v8753_v61, %v17559_v52  ;;  %v8378_v56 = vmul.f32 0.5, %v17594_v46  ;;  %v8381_v50 = vmul.f32 0.5, %v17616_v13  ;;  %v8256_v38 = vpop.f32.mrf.mxu1 }
0x114f   : > { %v8516_v18 = vmul.f32 0.70710677, %v17680_v37  ;;  %v12408_v28 = vpop.eup %12407  ;;  %v8884_v51 = vmul.f32 %v8756_v35, %v17599_v47  ;;  %v8885_v5 = vmul.f32 %v8757_v30, %v17623_v3  ;;  %9361 = vmatmul.mubr.bf16.gmra.mxu0 %v8981_v11  ;;  %9522 = vmatmul.mubr.bf16.gmra.mxu1 %v8983_v58  ;;  %12421 = verf.f32 %v8513_v26 }
0x1150   : > { %v8517_v7 = vmul.f32 0.70710677, %v17683_v41  ;;  %v12410_v48 = vpop.eup %12409  ;;  %v8883_v52 = vmul.f32 %v8755_v39, %v17568_v44  ;;  %v8383_v46 = vmul.f32 0.5, %v17619_v40  ;;  %v8515_v13 = vmul.f32 0.70710677, %v17676_v2  ;;  %9368 = vmatprep.mubr.bf16.mxu0 %v8986_v27  ;;  %v8061_v40 = vpop.f32.mrf.mxu0 }
0x1151   : > { %12423 = verf.f32 %v8514_v53  ;;  %v8887_v8 = vmul.f32 %v8759_v57, %v17625_v12  ;;  %v8519_v47 = vmul.f32 0.70710677, %v17686_v9  ;;  %v8988_v3 = vpack.c.bf16 %v8888_v55, %v8884_v51 }
0x1152   : > { %v12412_v1 = vpop.eup %12411  ;;  %12425 = verf.f32 %v8517_v7  ;;  %v8382_v4 = vmul.f32 0.5, %v17635_v54  ;;  %v17702_v16 = vadd.f32 %v8055_v24, %v17160_v19  ;;  %v17705_v44 = vadd.f32 %v8248_v45, %v17165_v32 }
0x1153   : > { %v12414_v21 = vpop.eup %12413  ;;  %12427 = verf.f32 %v8516_v18  ;;  %v8985_v36 = vpack.c.bf16 %v8885_v5, %v8881_v29  ;;  %v8762_v31 = vadd.f32 1.0, %v12410_v48  ;;  %v8384_v12 = vmul.f32 0.5, %v17638_v43  ;;  %9529 = vmatprep.mubr.bf16.mxu1 %v8988_v3  ;;  %v8063_v43 = vpop.f32.mrf.mxu0 }
0x1154   : > { %v12416_v10 = vpop.eup %12415  ;;  %12429 = verf.f32 %v8519_v47  ;;  %v8765_v22 = vadd.f32 1.0, %v12412_v1  ;;  %v8518_v54 = vmul.f32 0.70710677, %v17702_v16  ;;  %v17710_v17 = vadd.f32 %v8059_v62, %v17190_v60 }
0x1155   : > { %v12418_v11 = vpop.eup %12417  ;;  %12431 = verf.f32 %v8515_v13  ;;  %v8987_v23 = vpack.c.bf16 %v8887_v8, %v8883_v52  ;;  %v8761_v6 = vadd.f32 1.0, %v12406_v49  ;;  %v8520_v39 = vmul.f32 0.70710677, %v17705_v44  ;;  %v8065_v1 = vpop.f32.mrf.mxu0 }
0x1156   : > { %v12420_v58 = vpop.eup %12419  ;;  %v8766_v61 = vadd.f32 1.0, %v12418_v11  ;;  %v8763_v63 = vadd.f32 1.0, %v12408_v28  ;;  %v8764_v24 = vadd.f32 1.0, %v12414_v21  ;;  %12433 = verf.f32 %v8518_v54  ;;  %v8258_v8 = vpop.f32.mrf.mxu1 }
0x1157   : > { %v8768_v45 = vadd.f32 1.0, %v12420_v58  ;;  %v8890_v35 = vmul.f32 %v8762_v31, %v8378_v56  ;;  %v8767_v30 = vadd.f32 1.0, %v12416_v10  ;;  %12435 = verf.f32 %v8520_v39  ;;  %9369 = vmatmul.mubr.bf16.gmra.mxu0 %v8985_v36  ;;  %9530 = vmatmul.mubr.bf16.gmra.mxu1 %v8987_v23 }
0x1158   : > { %v8894_v26 = vmul.f32 %v8766_v61, %v8382_v4  ;;  %v8893_v53 = vmul.f32 %v8765_v22, %v8381_v50  ;;  %v8521_v57 = vmul.f32 0.70710677, %v17710_v17  ;;  %v17715_v55 = vadd.f32 %v8252_v34, %v17194_v33 }
0x1159   : > { %v17718_v27 = vadd.f32 %v8061_v40, %v17160_v19  ;;  %v17721_v49 = vadd.f32 %v8254_v15, %v17165_v32  ;;  %v17724_v29 = vadd.f32 %v8063_v43, %v17190_v60  ;;  %v17727_v56 = vadd.f32 %v8256_v38, %v17194_v33 }
0x115a   : > { %v8990_v18 = vpack.c.bf16 %v8894_v26, %v8890_v35  ;;  %v8380_v50 = vmul.f32 0.5, %v17607_v14  ;;  %v8896_v62 = vmul.f32 %v8768_v45, %v8384_v12  ;;  %v8889_v34 = vmul.f32 %v8761_v6, %v17664_v59 }
0x115b   : > { %v8522_v28 = vmul.f32 0.70710677, %v17718_v27  ;;  %v8891_v51 = vmul.f32 %v8763_v63, %v17670_v42  ;;  %v8895_v5 = vmul.f32 %v8767_v30, %v8383_v46  ;;  %12437 = verf.f32 %v8521_v57 }
0x115c   : > { %9376 = vmatprep.mubr.bf16.mxu0 %v8990_v18  ;;  %v12422_v7 = vpop.eup %12421  ;;  %v8892_v48 = vmul.f32 %v8764_v24, %v8380_v50  ;;  %v8524_v52 = vmul.f32 0.70710677, %v17721_v49  ;;  %v8525_v13 = vmul.f32 0.70710677, %v17724_v29  ;;  %v8989_v14 = vpack.c.bf16 %v8893_v53, %v8889_v34 }
0x115d   : > { %v8523_v3 = vmul.f32 0.70710677, %v17715_v55  ;;  %12439 = verf.f32 %v8522_v28  ;;  %v8527_v59 = vmul.f32 0.70710677, %v17727_v56  ;;  %v8991_v4 = vpack.c.bf16 %v8895_v5, %v8891_v51 }
0x115e   : > { %v12424_v47 = vpop.eup %12423  ;;  %12441 = verf.f32 %v8525_v13  ;;  %v8992_v42 = vpack.c.bf16 %v8896_v62, %v8892_v48  ;;  %v17738_v40 = vadd.f32 %v8065_v1, %v17160_v19  ;;  %v17741_v15 = vadd.f32 %v8258_v8, %v17165_v32 }
0x115f   : > { %v12426_v21 = vpop.eup %12425  ;;  %12443 = verf.f32 %v8527_v59  ;;  %9377 = vmatmul.mubr.bf16.gmra.mxu0 %v8989_v14  ;;  %v8385_v36 = vmul.f32 0.5, %v17660_v0  ;;  %v8386_v12 = vmul.f32 0.5, %v17667_v20  ;;  %v8770_v54 = vadd.f32 1.0, %v12424_v47 }
0x1160   : > { %v12428_v46 = vpop.eup %12427  ;;  %12445 = verf.f32 %v8524_v52  ;;  %9537 = vmatprep.mubr.bf16.mxu1 %v8992_v42  ;;  %v8773_v11 = vadd.f32 1.0, %v12426_v21  ;;  %v8526_v22 = vmul.f32 0.70710677, %v17738_v40  ;;  %v8389_v58 = vmul.f32 0.5, %v17683_v41 }
0x1161   : > { %v12430_v10 = vpop.eup %12429  ;;  %12447 = verf.f32 %v8523_v3  ;;  %9538 = vmatmul.mubr.bf16.gmra.mxu1 %v8991_v4  ;;  %v8528_v6 = vmul.f32 0.70710677, %v17741_v15  ;;  %v8769_v39 = vadd.f32 1.0, %v12422_v7  ;;  %v8772_v63 = vadd.f32 1.0, %v12428_v46 }
0x1162   : > { %v12432_v31 = vpop.eup %12431  ;;  %v8775_v23 = vadd.f32 1.0, %v12430_v10  ;;  %v8391_v0 = vmul.f32 0.5, %v17686_v9  ;;  %12449 = verf.f32 %v8526_v22  ;;  %v8390_v20 = vmul.f32 0.5, %v17702_v16 }
0x1163   : > { %v12434_v61 = vpop.eup %12433  ;;  %v8771_v45 = vadd.f32 1.0, %v12432_v31  ;;  %12451 = verf.f32 %v8528_v6  ;;  %v8388_v38 = vmul.f32 0.5, %v17680_v37  ;;  %v8901_v35 = vmul.f32 %v8773_v11, %v8389_v58 }
0x1164   : > { %v12436_v24 = vpop.eup %12435  ;;  %v8774_v43 = vadd.f32 1.0, %v12434_v61  ;;  %v8392_v41 = vmul.f32 0.5, %v17705_v44  ;;  %v8387_v26 = vmul.f32 0.5, %v17676_v2  ;;  %v8898_v53 = vmul.f32 %v8770_v54, %v8386_v12 }
0x1165   : > { %v8776_v30 = vadd.f32 1.0, %v12436_v24  ;;  %v8903_v57 = vmul.f32 %v8775_v23, %v8391_v0  ;;  %v8897_v50 = vmul.f32 %v8769_v39, %v8385_v36  ;;  %v8900_v9 = vmul.f32 %v8772_v63, %v8388_v38 }
0x1166   : > { %v8902_v18 = vmul.f32 %v8774_v43, %v8390_v20  ;;  %v8899_v28 = vmul.f32 %v8771_v45, %v8387_v26  ;;  %v8393_v1 = vmul.f32 0.5, %v17710_v17  ;;  %v8394_v59 = vmul.f32 0.5, %v17718_v27 }
0x1167   : > { %v8904_v62 = vmul.f32 %v8776_v30, %v8392_v41  ;;  %v8993_v16 = vpack.c.bf16 %v8901_v35, %v8897_v50  ;;  %v8397_v42 = vmul.f32 0.5, %v17724_v29  ;;  %v8399_v10 = vmul.f32 0.5, %v17727_v56 }
0x1168   : > { %v8994_v34 = vpack.c.bf16 %v8902_v18, %v8898_v53  ;;  %v12438_v51 = vpop.eup %12437  ;;  %v8995_v48 = vpack.c.bf16 %v8903_v57, %v8899_v28  ;;  %v8398_v36 = vmul.f32 0.5, %v17738_v40  ;;  %v8396_v12 = vmul.f32 0.5, %v17721_v49 }
0x1169   : > { %v8996_v5 = vpack.c.bf16 %v8904_v62, %v8900_v9  ;;  %v8777_v3 = vadd.f32 1.0, %v12438_v51  ;;  %v8400_v17 = vmul.f32 0.5, %v17741_v15  ;;  %v8395_v54 = vmul.f32 0.5, %v17715_v55 }
0x116a   : > { %v12440_v7 = vpop.eup %12439  ;;  %9384 = vmatprep.mubr.bf16.mxu0 %v8994_v34 }
0x116b   : > { %v12442_v37 = vpop.eup %12441  ;;  %9545 = vmatprep.mubr.bf16.mxu1 %v8996_v5  ;;  %9385 = vmatmul.mubr.bf16.gmra.mxu0 %v8993_v16  ;;  %v8778_v8 = vadd.f32 1.0, %v12440_v7  ;;  %v8905_v6 = vmul.f32 %v8777_v3, %v8393_v1 }
0x116c   : > { %v12444_v44 = vpop.eup %12443  ;;  %9546 = vmatmul.mubr.bf16.gmra.mxu1 %v8995_v48  ;;  %v8781_v13 = vadd.f32 1.0, %v12442_v37 }
0x116d   : > { %v12446_v2 = vpop.eup %12445  ;;  %v8783_v47 = vadd.f32 1.0, %v12444_v44  ;;  %v8906_v58 = vmul.f32 %v8778_v8, %v8394_v59 }
0x116e   : > { %v12448_v52 = vpop.eup %12447  ;;  %v8780_v21 = vadd.f32 1.0, %v12446_v2  ;;  %v8909_v11 = vmul.f32 %v8781_v13, %v8397_v42 }
0x116f   : > { %v12450_v14 = vpop.eup %12449  ;;  %v8779_v4 = vadd.f32 1.0, %v12448_v52  ;;  %v8911_v27 = vmul.f32 %v8783_v47, %v8399_v10 }
0x1170   : > { %v12452_v46 = vpop.eup %12451  ;;  %v8782_v31 = vadd.f32 1.0, %v12450_v14  ;;  %v8908_v29 = vmul.f32 %v8780_v21, %v8396_v12  ;;  %v8997_v56 = vpack.c.bf16 %v8909_v11, %v8905_v6 }
0x1171   : > { %v8784_v22 = vadd.f32 1.0, %v12452_v46  ;;  %v8907_v39 = vmul.f32 %v8779_v4, %v8395_v54 }
0x1172   : > { %v8910_v23 = vmul.f32 %v8782_v31, %v8398_v36 }
0x1173   : > { %v8912_v61 = vmul.f32 %v8784_v22, %v8400_v17  ;;  %v8999_v40 = vpack.c.bf16 %v8911_v27, %v8907_v39 }
0x1174   : > { %v8998_v63 = vpack.c.bf16 %v8910_v23, %v8906_v58 }
0x1175   : > { %v9000_v0 = vpack.c.bf16 %v8912_v61, %v8908_v29 }
0x1176   : > { %9392 = vmatprep.mubr.bf16.mxu0 %v8998_v63 }
0x1177   : > { %9553 = vmatprep.mubr.bf16.mxu1 %v9000_v0  ;;  %9393 = vmatmul.mubr.bf16.gmra.mxu0 %v8997_v56 }
0x1178   : > { %9554 = vmatmul.mubr.bf16.gmra.mxu1 %v8999_v40 }
0x1180   : > { %v8069_v49 = vpop.f32.mrf.mxu0  ;;  %v8262_v15 = vpop.f32.mrf.mxu1 }
0x1181   : > { %v8070_v55 = vadd.f32 %v8069_v49, %v17190_v60  ;;  %v8263_v38 = vadd.f32 %v8262_v15, %v17194_v33 }
0x1182   : > { %v8071_v24 = vpop.f32.mrf.mxu0  ;;  %v8264_v45 = vpop.f32.mrf.mxu1 }
0x1183   : > { %v8072_v41 = vadd.f32 %v8071_v24, %v17160_v19  ;;  %v8529_v30 = vmul.f32 0.70710677, %v8070_v55  ;;  %v8531_v18 = vmul.f32 0.70710677, %v8263_v38  ;;  %v8265_v50 = vadd.f32 %v8264_v45, %v17165_v32 }
0x1184   : > { %v8073_v20 = vpop.f32.mrf.mxu0  ;;  %v8266_v43 = vpop.f32.mrf.mxu1  ;;  %v8401_v54 = vmul.f32 0.5, %v8070_v55  ;;  %v8403_v29 = vmul.f32 0.5, %v8263_v38 }
0x1185   : > { %v8074_v35 = vadd.f32 %v8073_v20, %v17190_v60  ;;  %v8267_v26 = vadd.f32 %v8266_v43, %v17194_v33  ;;  %v8530_v62 = vmul.f32 0.70710677, %v8072_v41  ;;  %12453 = verf.f32 %v8529_v30 }
0x1186   : > { %v8075_v53 = vpop.f32.mrf.mxu0  ;;  %v8268_v57 = vpop.f32.mrf.mxu1  ;;  %12455 = verf.f32 %v8531_v18  ;;  %v8532_v7 = vmul.f32 0.70710677, %v8265_v50  ;;  %v8402_v56 = vmul.f32 0.5, %v8072_v41  ;;  %v17779_v0 = vmul.f32 0.5, %v8265_v50 }
0x1187   : > { %v8533_v9 = vmul.f32 0.70710677, %v8074_v35  ;;  %v8076_v28 = vadd.f32 %v8075_v53, %v17160_v19  ;;  %v8535_v34 = vmul.f32 0.70710677, %v8267_v26  ;;  %v8269_v5 = vadd.f32 %v8268_v57, %v17165_v32 }
0x1188   : > { %v8079_v51 = vpop.f32.mrf.mxu0  ;;  %v8272_v16 = vpop.f32.mrf.mxu1  ;;  %v8405_v40 = vmul.f32 0.5, %v8074_v35  ;;  %v8407_v45 = vmul.f32 0.5, %v8267_v26 }
0x1189   : > { %12457 = verf.f32 %v8533_v9  ;;  %v8534_v44 = vmul.f32 0.70710677, %v8076_v28  ;;  %v8080_v2 = vadd.f32 %v8079_v51, %v17190_v60  ;;  %v8273_v52 = vadd.f32 %v8272_v16, %v17194_v33 }
0x118a   : > { %v8081_v48 = vpop.f32.mrf.mxu0  ;;  %v8274_v37 = vpop.f32.mrf.mxu1  ;;  %12459 = verf.f32 %v8530_v62  ;;  %v8536_v8 = vmul.f32 0.70710677, %v8269_v5  ;;  %v17783_v55 = vmul.f32 0.5, %v8076_v28  ;;  %v17785_v20 = vmul.f32 0.5, %v8269_v5 }
0x118b   : > { %12461 = verf.f32 %v8535_v34  ;;  %v8082_v14 = vadd.f32 %v8081_v48, %v17160_v19  ;;  %v8537_v21 = vmul.f32 0.70710677, %v8080_v2  ;;  %v8539_v46 = vmul.f32 0.70710677, %v8273_v52 }
0x118c   : > { %v8083_v13 = vpop.f32.mrf.mxu0  ;;  %v8276_v1 = vpop.f32.mrf.mxu1  ;;  %12463 = verf.f32 %v8532_v7  ;;  %v8275_v36 = vadd.f32 %v8274_v37, %v17165_v32  ;;  %v17787_v38 = vmul.f32 0.5, %v8080_v2  ;;  %v17789_v30 = vmul.f32 0.5, %v8273_v52 }
0x118d   : > { %v8084_v47 = vadd.f32 %v8083_v13, %v17190_v60  ;;  %12465 = verf.f32 %v8534_v44  ;;  %v8277_v42 = vadd.f32 %v8276_v1, %v17194_v33  ;;  %v8538_v12 = vmul.f32 0.70710677, %v8082_v14 }
0x118e   : > { %v8085_v3 = vpop.f32.mrf.mxu0  ;;  %v8278_v59 = vpop.f32.mrf.mxu1  ;;  %12467 = verf.f32 %v8536_v8  ;;  %v8540_v61 = vmul.f32 0.70710677, %v8275_v36  ;;  %v17800_v34 = vmul.f32 0.5, %v8082_v14  ;;  %v17802_v51 = vmul.f32 0.5, %v8275_v36 }
0x118f   : > { %v8541_v31 = vmul.f32 0.70710677, %v8084_v47  ;;  %12469 = verf.f32 %v8537_v21  ;;  %v8543_v22 = vmul.f32 0.70710677, %v8277_v42  ;;  %v8086_v58 = vadd.f32 %v8085_v3, %v17160_v19 }
0x1190   : > { %v8089_v4 = vpop.f32.mrf.mxu0  ;;  %v8282_v10 = vpop.f32.mrf.mxu1  ;;  %12471 = verf.f32 %v8539_v46  ;;  %v17777_v39 = vadd.f32 %v8278_v59, %v17165_v32  ;;  %v17808_v37 = vmul.f32 0.5, %v8084_v47  ;;  %v17810_v44 = vmul.f32 0.5, %v8277_v42 }
0x1191   : > { %12473 = verf.f32 %v8541_v31  ;;  %v8542_v41 = vmul.f32 0.70710677, %v8086_v58  ;;  %v8090_v53 = vadd.f32 %v8089_v4, %v17190_v60  ;;  %v17798_v9 = vadd.f32 %v8282_v10, %v17194_v33 }
0x1192   : > { %v8091_v11 = vpop.f32.mrf.mxu0  ;;  %v8284_v17 = vpop.f32.mrf.mxu1  ;;  %12475 = verf.f32 %v8538_v12  ;;  %v8544_v26 = vmul.f32 0.70710677, %v17777_v39 }
0x1193   : > { %v12454_v6 = vpop.eup %12453  ;;  %12477 = verf.f32 %v8543_v22  ;;  %v8092_v2 = vadd.f32 %v8091_v11, %v17160_v19  ;;  %v8545_v1 = vmul.f32 0.70710677, %v8090_v53  ;;  %v8547_v47 = vmul.f32 0.70710677, %v17798_v9 }
0x1194   : > { %v8093_v27 = vpop.f32.mrf.mxu0  ;;  %v8286_v23 = vpop.f32.mrf.mxu1  ;;  %v8785_v50 = vadd.f32 1.0, %v12454_v6  ;;  %12479 = verf.f32 %v8540_v61  ;;  %v8285_v21 = vadd.f32 %v8284_v17, %v17165_v32 }
0x1195   : > { %v12456_v63 = vpop.eup %12455  ;;  %12481 = verf.f32 %v8542_v41  ;;  %v17814_v8 = vadd.f32 %v8093_v27, %v17190_v60  ;;  %v17829_v36 = vadd.f32 %v8286_v23, %v17194_v33  ;;  %v8546_v27 = vmul.f32 0.70710677, %v8092_v2 }
0x1196   : > { %v8095_v49 = vpop.f32.mrf.mxu0  ;;  %v17781_v15 = vpop.f32.mrf.mxu1  ;;  %v8787_v62 = vadd.f32 1.0, %v12456_v63  ;;  %v17820_v59 = vmul.f32 %v8785_v50, %v8401_v54  ;;  %12483 = verf.f32 %v8544_v26  ;;  %v17837_v54 = vmul.f32 0.5, %v8086_v58 }
0x1197   : > { %v12458_v24 = vpop.eup %12457  ;;  %12485 = verf.f32 %v8545_v1  ;;  %v8096_v61 = vadd.f32 %v8095_v49, %v17160_v19  ;;  %v8548_v58 = vmul.f32 0.70710677, %v8285_v21  ;;  %v8551_v49 = vmul.f32 0.70710677, %v17829_v36 }
0x1198   : > { %v12460_v43 = vpop.eup %12459  ;;  %v17792_v35 = vpop.f32.mrf.mxu0  ;;  %v8789_v28 = vadd.f32 1.0, %v12458_v24  ;;  %v17824_v46 = vmul.f32 %v8787_v62, %v8403_v29  ;;  %v8549_v29 = vmul.f32 0.70710677, %v17814_v8  ;;  %12487 = verf.f32 %v8547_v47 }
0x1199   : > { %v17794_v57 = vpop.f32.mrf.mxu1  ;;  %v12462_v18 = vpop.eup %12461  ;;  %v8786_v48 = vadd.f32 1.0, %v12460_v43  ;;  %12489 = verf.f32 %v8546_v27  ;;  %v17871_v47 = vmul.f32 0.5, %v17798_v9 }
0x119a   : > { %v17804_v16 = vpop.f32.mrf.mxu0  ;;  %v12464_v7 = vpop.eup %12463  ;;  %v8791_v13 = vadd.f32 1.0, %v12462_v18  ;;  %v17826_v10 = vmul.f32 %v8789_v28, %v8405_v40  ;;  %v17855_v18 = vmul.f32 0.5, %v8090_v53  ;;  %12491 = verf.f32 %v8549_v29 }
0x119b   : > { %v17806_v5 = vpop.f32.mrf.mxu1  ;;  %v12466_v52 = vpop.eup %12465  ;;  %v8788_v4 = vadd.f32 1.0, %v12464_v7  ;;  %v17835_v11 = vmul.f32 %v8786_v48, %v8402_v56  ;;  %v17848_v56 = vmul.f32 0.5, %v17777_v39  ;;  %12493 = verf.f32 %v8548_v58 }
0x119c   : > { %v17816_v14 = vpop.f32.mrf.mxu0  ;;  %v12468_v42 = vpop.eup %12467  ;;  %v8790_v22 = vadd.f32 1.0, %v12466_v52  ;;  %v17839_v6 = vmul.f32 %v8791_v13, %v8407_v45  ;;  %v9001_v41 = vpack.c.bf16 %v17826_v10, %v17820_v59  ;;  %v8550_v52 = vmul.f32 0.70710677, %v8096_v61 }
0x119d   : > { %v17818_v3 = vpop.f32.mrf.mxu1  ;;  %v12470_v17 = vpop.eup %12469  ;;  %v8792_v24 = vadd.f32 1.0, %v12468_v42  ;;  %v17851_v45 = vmul.f32 %v8788_v4, %v17779_v0  ;;  %v8289_v0 = vadd.f32 %v17781_v15, %v17165_v32  ;;  %v17875_v4 = vmul.f32 0.5, %v8092_v2 }
0x119e   : > { %v17831_v31 = vpop.f32.mrf.mxu0  ;;  %v12472_v40 = vpop.eup %12471  ;;  %v8918_v39 = vmul.f32 %v8790_v22, %v17783_v55  ;;  %v8793_v28 = vadd.f32 1.0, %v12470_v17  ;;  %v9003_v48 = vpack.c.bf16 %v17839_v6, %v17824_v46  ;;  %v17877_v10 = vmul.f32 0.5, %v8285_v21 }
0x119f   : > { %v17833_v12 = vpop.f32.mrf.mxu1  ;;  %v12474_v43 = vpop.eup %12473  ;;  %v8795_v53 = vadd.f32 1.0, %v12472_v40  ;;  %v8920_v1 = vmul.f32 %v8792_v24, %v17785_v20  ;;  %12495 = verf.f32 %v8551_v49  ;;  %v8552_v17 = vmul.f32 0.70710677, %v8289_v0 }
0x11a0   : > { %v17843_v23 = vpop.f32.mrf.mxu0  ;;  %v12476_v62 = vpop.eup %12475  ;;  %v8797_v59 = vadd.f32 1.0, %v12474_v43  ;;  %v17880_v22 = vmul.f32 %v8793_v28, %v17787_v38  ;;  %v8100_v20 = vadd.f32 %v17792_v35, %v17190_v60  ;;  %v17890_v40 = vmul.f32 0.5, %v17814_v8 }
0x11a1   : > { %v17845_v63 = vpop.f32.mrf.mxu1  ;;  %v12478_v7 = vpop.eup %12477  ;;  %v8794_v15 = vadd.f32 1.0, %v12476_v62  ;;  %v17887_v29 = vmul.f32 %v8795_v53, %v17789_v30  ;;  %12497 = verf.f32 %v8550_v52  ;;  %v8102_v2 = vadd.f32 %v17804_v16, %v17160_v19 }
0x11a2   : > { %v17858_v50 = vpop.f32.mrf.mxu0  ;;  %v12480_v42 = vpop.eup %12479  ;;  %v8799_v27 = vadd.f32 1.0, %v12478_v7  ;;  %v17895_v24 = vmul.f32 %v8797_v59, %v17808_v37  ;;  %v8295_v35 = vadd.f32 %v17806_v5, %v17165_v32  ;;  %v9002_v58 = vpack.c.bf16 %v8918_v39, %v17835_v11 }
0x11a3   : > { %v17860_v26 = vpop.f32.mrf.mxu1  ;;  %v12482_v21 = vpop.eup %12481  ;;  %v8796_v38 = vadd.f32 1.0, %v12480_v42  ;;  %v17903_v8 = vmul.f32 %v8794_v15, %v17800_v34  ;;  %v17906_v49 = vmul.f32 0.5, %v17829_v36  ;;  %v17908_v16 = vmul.f32 0.5, %v8096_v61 }
0x11a4   : > { %v17867_v13 = vpop.f32.mrf.mxu0  ;;  %v12484_v30 = vpop.eup %12483  ;;  %v17912_v37 = vadd.f32 %v17794_v57, %v17194_v33  ;;  %v17915_v62 = vmul.f32 %v8799_v27, %v17810_v44  ;;  %12499 = verf.f32 %v8552_v17  ;;  %v8553_v5 = vmul.f32 0.70710677, %v8100_v20  ;;  %9400 = vmatprep.mubr.bf16.mxu0 %v9002_v58 }
0x11a5   : > { %v17873_v55 = vpop.f32.mrf.mxu1  ;;  %v17919_v11 = vadd.f32 %v17831_v31, %v17160_v19  ;;  %v8798_v36 = vadd.f32 1.0, %v12482_v21  ;;  %v17923_v39 = vmul.f32 0.5, %v8289_v0  ;;  %v8554_v61 = vmul.f32 0.70710677, %v8102_v2  ;;  %9401 = vmatmul.mubr.bf16.gmra.mxu0 %v9001_v41  ;;  %v12486_v44 = vpop.eup %12485 }
0x11a6   : > { %v17884_v9 = vpop.f32.mrf.mxu0  ;;  %v17927_v57 = vadd.f32 %v17833_v12, %v17165_v32  ;;  %v17930_v28 = vmul.f32 %v8796_v38, %v17802_v51  ;;  %v9005_v31 = vpack.c.bf16 %v17895_v24, %v17880_v22  ;;  %v8800_v7 = vadd.f32 1.0, %v12484_v30  ;;  %v12488_v59 = vpop.eup %12487 }
0x11a7   : > { %v17900_v43 = vpop.f32.mrf.mxu1  ;;  %v8556_v53 = vmul.f32 0.70710677, %v8295_v35  ;;  %v17936_v0 = vmul.f32 0.5, %v8100_v20  ;;  %v8555_v42 = vmul.f32 0.70710677, %v17912_v37  ;;  %v8104_v12 = vadd.f32 %v17816_v14, %v17190_v60  ;;  %v12490_v20 = vpop.eup %12489 }
0x11a8   : > { %v17921_v34 = vpop.f32.mrf.mxu0  ;;  %v9004_v41 = vpack.c.bf16 %v8920_v1, %v17851_v45  ;;  %v9007_v51 = vpack.c.bf16 %v17915_v62, %v17887_v29  ;;  %12501 = verf.f32 %v8553_v5  ;;  %v8297_v15 = vadd.f32 %v17818_v3, %v17194_v33  ;;  %v12492_v45 = vpop.eup %12491 }
0x11a9   : > { %v17934_v52 = vpop.f32.mrf.mxu1  ;;  %v8558_v27 = vmul.f32 0.70710677, %v17919_v11  ;;  %v8926_v21 = vmul.f32 %v8798_v36, %v17837_v54  ;;  %v8801_v38 = vadd.f32 1.0, %v12486_v44  ;;  %12503 = verf.f32 %v8554_v61  ;;  %v12494_v54 = vpop.eup %12493 }
0x11aa   : > { %v17947_v17 = vpop.f32.mrf.mxu0  ;;  %v8560_v14 = vmul.f32 0.70710677, %v17927_v57  ;;  %9561 = vmatprep.mubr.bf16.mxu1 %v9004_v41  ;;  %v8928_v1 = vmul.f32 %v8800_v7, %v17848_v56  ;;  %v8803_v58 = vadd.f32 1.0, %v12488_v59  ;;  %12505 = verf.f32 %v8556_v53 }
0x11ab   : > { %9562 = vmatmul.mubr.bf16.gmra.mxu1 %v9003_v48  ;;  %v17957_v3 = vadd.f32 %v17858_v50, %v17160_v19  ;;  %v17959_v30 = vpop.f32.mrf.mxu1  ;;  %12507 = verf.f32 %v8555_v42  ;;  %v17961_v5 = vmul.f32 0.5, %v8102_v2  ;;  %v8557_v36 = vmul.f32 0.70710677, %v8104_v12 }
0x11ac   : > { %v17965_v56 = vadd.f32 %v17860_v26, %v17165_v32  ;;  %v12496_v61 = vpop.eup %12495  ;;  %v8802_v44 = vadd.f32 1.0, %v12490_v20  ;;  %v17967_v7 = vmul.f32 0.5, %v8295_v35  ;;  %v8559_v46 = vmul.f32 0.70710677, %v8297_v15  ;;  %v17969_v6 = vpop.f32.mrf.mxu0 }
0x11ad   : > { %12509 = verf.f32 %v8558_v27  ;;  %v17972_v50 = vmul.f32 %v8801_v38, %v17855_v18  ;;  %v8805_v48 = vadd.f32 1.0, %v12492_v45  ;;  %v17974_v53 = vmul.f32 0.5, %v8104_v12  ;;  %v17984_v41 = vpop.f32.mrf.mxu1 }
0x11ae   : > { %12511 = verf.f32 %v8560_v14  ;;  %v12498_v2 = vpop.eup %12497  ;;  %v17977_v59 = vmul.f32 %v8803_v58, %v17871_v47  ;;  %v8804_v26 = vadd.f32 1.0, %v12494_v54  ;;  %v8562_v42 = vmul.f32 0.70710677, %v17957_v3 }
0x11af   : > { %v17982_v35 = vadd.f32 %v17884_v9, %v17160_v19  ;;  %v8807_v27 = vadd.f32 1.0, %v12496_v61  ;;  %12513 = verf.f32 %v8557_v36  ;;  %v17986_v18 = vmul.f32 0.5, %v8297_v15  ;;  %v8125_v9 = vpop.f32.mrf.mxu0 }
0x11b0   : > { %v8564_v12 = vmul.f32 0.70710677, %v17965_v56  ;;  %v17990_v20 = vmul.f32 %v8802_v44, %v17875_v4  ;;  %12515 = verf.f32 %v8559_v46  ;;  %v17993_v47 = vmul.f32 0.5, %v17919_v11 }
0x11b1   : > { %v17997_v38 = vadd.f32 %v17843_v23, %v17190_v60  ;;  %v12500_v14 = vpop.eup %12499  ;;  %v18000_v45 = vmul.f32 %v8805_v48, %v17890_v40  ;;  %v8806_v15 = vadd.f32 1.0, %v12498_v2  ;;  %v18004_v58 = vadd.f32 %v17845_v63, %v17194_v33  ;;  %v8318_v40 = vpop.f32.mrf.mxu1 }
0x11b2   : > { %v18008_v4 = vadd.f32 %v17867_v13, %v17190_v60  ;;  %12517 = verf.f32 %v8562_v42  ;;  %v8566_v11 = vmul.f32 0.70710677, %v17982_v35  ;;  %v18013_v23 = vadd.f32 %v17900_v43, %v17165_v32  ;;  %v18026_v46 = vpop.f32.mrf.mxu0 }
0x11b3   : > { %v9006_v54 = vpack.c.bf16 %v8926_v21, %v17903_v8  ;;  %v18017_v36 = vmul.f32 %v8807_v27, %v17906_v49  ;;  %12519 = verf.f32 %v8564_v12  ;;  %v18021_v63 = vadd.f32 %v17873_v55, %v17194_v33 }
0x11b4   : > { %v9008_v13 = vpack.c.bf16 %v8928_v1, %v17930_v28  ;;  %v8808_v61 = vadd.f32 1.0, %v12500_v14  ;;  %v8561_v44 = vmul.f32 0.70710677, %v17997_v38  ;;  %12521 = verf.f32 %v8566_v11 }
0x11b5   : > { %v8568_v43 = vmul.f32 0.70710677, %v18013_v23  ;;  %9408 = vmatprep.mubr.bf16.mxu0 %v9006_v54  ;;  %v12502_v8 = vpop.eup %12501  ;;  %v18029_v49 = vmul.f32 %v8804_v26, %v17877_v10  ;;  %v18032_v21 = vmul.f32 0.5, %v17927_v57  ;;  %v8563_v55 = vmul.f32 0.70710677, %v18004_v58  ;;  %v18054_v57 = vpop.f32.mrf.mxu1 }
0x11b6   : > { %9569 = vmatprep.mubr.bf16.mxu1 %v9008_v13  ;;  %v18037_v28 = vadd.f32 %v17921_v34, %v17190_v60  ;;  %9409 = vmatmul.mubr.bf16.gmra.mxu0 %v9005_v31  ;;  %v12504_v1 = vpop.eup %12503  ;;  %v8565_v48 = vmul.f32 0.70710677, %v18008_v4  ;;  %v18048_v10 = vadd.f32 %v17947_v17, %v17160_v19  ;;  %v18052_v34 = vadd.f32 %v17959_v30, %v17165_v32  ;;  %v10546_v26 = vpop.f32.mrf.mxu0 }
0x11b7   : > { %12523 = verf.f32 %v8568_v43  ;;  %9570 = vmatmul.mubr.bf16.gmra.mxu1 %v9007_v51  ;;  %v12506_v22 = vpop.eup %12505  ;;  %v9009_v24 = vpack.c.bf16 %v18000_v45, %v17972_v50  ;;  %v18059_v31 = vmul.f32 %v8806_v15, %v17908_v16  ;;  %v8567_v29 = vmul.f32 0.70710677, %v18021_v63  ;;  %v10658_v11 = vpop.f32.mrf.mxu1 }
0x11b8   : > { %v18064_v62 = vadd.f32 %v17934_v52, %v17194_v33  ;;  %v12508_v51 = vpop.eup %12507  ;;  %v9011_v17 = vpack.c.bf16 %v18017_v36, %v17977_v59  ;;  %v18069_v30 = vmul.f32 %v8808_v61, %v17923_v39  ;;  %12525 = verf.f32 %v8561_v44 }
0x11b9   : > { %v8569_v2 = vmul.f32 0.70710677, %v18037_v28  ;;  %v8810_v16 = vadd.f32 1.0, %v12504_v1  ;;  %12527 = verf.f32 %v8563_v55  ;;  %v18073_v27 = vmul.f32 0.5, %v17957_v3 }
0x11ba   : > { %v12510_v42 = vpop.eup %12509  ;;  %v8570_v52 = vmul.f32 0.70710677, %v18048_v10  ;;  %v8812_v14 = vadd.f32 1.0, %v12506_v22  ;;  %12529 = verf.f32 %v8565_v48  ;;  %v8572_v15 = vmul.f32 0.70710677, %v18052_v34 }
0x11bb   : > { %v12512_v12 = vpop.eup %12511  ;;  %v18079_v39 = vadd.f32 %v17969_v6, %v17190_v60  ;;  %12531 = verf.f32 %v8567_v29  ;;  %v8571_v54 = vmul.f32 0.70710677, %v18064_v62  ;;  %v18084_v13 = vadd.f32 %v17984_v41, %v17194_v33  ;;  %v10548_v6 = vpop.f32.mrf.mxu0 }
0x11bc   : > { %v18087_v3 = vadd.f32 %v8125_v9, %v17160_v19  ;;  %v12514_v61 = vpop.eup %12513  ;;  %v18089_v44 = vadd.f32 1.0, %v12502_v8  ;;  %12533 = verf.f32 %v8569_v2  ;;  %v18093_v60 = vadd.f32 %v8318_v40, %v17165_v32  ;;  %v10660_v9 = vpop.f32.mrf.mxu1 }
0x11bd   : > { %v8573_v43 = vmul.f32 0.70710677, %v18079_v39  ;;  %v12516_v55 = vpop.eup %12515  ;;  %v18095_v1 = vadd.f32 1.0, %v12508_v51  ;;  %v8814_v48 = vadd.f32 1.0, %v12510_v42  ;;  %v8816_v22 = vadd.f32 1.0, %v12512_v12 }
0x11be   : > { %12535 = verf.f32 %v8570_v52  ;;  %v8938_v33 = vmul.f32 %v8810_v16, %v17961_v5  ;;  %v8940_v19 = vmul.f32 %v8812_v14, %v17967_v7  ;;  %v8438_v41 = vmul.f32 0.5, %v17982_v35  ;;  %v10549_v16 = vpop.f32.mrf.mxu0  ;;  %v18111_v14 = vld [vmem:[%s18262_s13] ss:$0 sm:$0xff] }
0x11bf   : > { %12537 = verf.f32 %v8572_v15  ;;  %v12518_v8 = vpop.eup %12517  ;;  %v8813_v29 = vadd.f32 1.0, %v12514_v61  ;;  %v8575_v32 = vmul.f32 0.70710677, %v18084_v13  ;;  %v8574_v40 = vmul.f32 0.70710677, %v18087_v3  ;;  %v10661_v61 = vpop.f32.mrf.mxu1 }
0x11c0   : > { %12539 = verf.f32 %v8571_v54  ;;  %v12520_v51 = vpop.eup %12519  ;;  %v8815_v2 = vadd.f32 1.0, %v12516_v55  ;;  %v8440_v42 = vmul.f32 0.5, %v18013_v23  ;;  %v8576_v5 = vmul.f32 0.70710677, %v18093_v60 }
0x11c1   : > { %12541 = verf.f32 %v8573_v43  ;;  %v12522_v7 = vpop.eup %12521  ;;  %v8942_v35 = vmul.f32 %v8814_v48, %v17993_v47  ;;  %v8944_v52 = vmul.f32 %v8816_v22, %v18032_v21  ;;  %v9010_v12 = vpack.c.bf16 %v18059_v31, %v17990_v20 }
0x11c2   : > { %12543 = verf.f32 %v8574_v40  ;;  %v8822_v15 = vadd.f32 1.0, %v12522_v7  ;;  %v9012_v23 = vpack.c.bf16 %v18069_v30, %v18029_v49  ;;  %v10547_v54 = vadd.f32 %v10546_v26, %v18026_v46 }
0x11c3   : > { %12545 = verf.f32 %v8576_v5  ;;  %v8818_v43 = vadd.f32 1.0, %v12518_v8  ;;  %v8820_v21 = vadd.f32 1.0, %v12520_v51  ;;  %9416 = vmatprep.mubr.bf16.mxu0 %v9010_v12  ;;  %v10550_v55 = vadd.f32 %v10549_v16, %v10548_v6 }
0x11c4   : > { %v12524_v47 = vpop.eup %12523  ;;  %12547 = verf.f32 %v8575_v32  ;;  %v8950_v20 = vmul.f32 %v8822_v15, %v8438_v41  ;;  %9577 = vmatprep.mubr.bf16.mxu1 %v9012_v23  ;;  %9417 = vmatmul.mubr.bf16.gmra.mxu0 %v9009_v24  ;;  %v9323_v48 = vadd.f32 %v10547_v54, %v18111_v14  ;;  %v10659_v49 = vadd.f32 %v10658_v11, %v18054_v57 }
0x11c5   : > { %v8824_v31 = vadd.f32 1.0, %v12524_v47  ;;  %v12526_v46 = vpop.eup %12525  ;;  %9578 = vmatmul.mubr.bf16.gmra.mxu1 %v9011_v17  ;;  %v9326_v30 = vadd.f32 %v10550_v55, %v18111_v14  ;;  %v10662_v26 = vadd.f32 %v10661_v61, %v10660_v9  ;;  %v9014_v6 = vpack.c.bf16 %v8942_v35, %v8938_v33  ;;  %v18877_v33 = vld [vmem:[#allocation90_spill] sm:$0xff] }
0x11c6   : > { %v9016_v22 = vpack.c.bf16 %v8944_v52, %v8940_v19  ;;  %v12528_v41 = vpop.eup %12527  ;;  %v8941_v8 = vmul.f32 %v8813_v29, %v17974_v53  ;;  %v8436_v50 = vmul.f32 0.5, %v17965_v56  ;;  %v9484_v24 = vadd.f32 %v10659_v49, %v9323_v48 }
0x11c7   : > { %v8952_v45 = vmul.f32 %v8824_v31, %v8440_v42  ;;  %v12530_v32 = vpop.eup %12529  ;;  %v8427_v57 = vmul.f32 0.5, %v17912_v37  ;;  %v8943_v11 = vmul.f32 %v8815_v2, %v17986_v18  ;;  %v8946_v59 = vmul.f32 %v8818_v43, %v18073_v27  ;;  %9424 = vmatprep.mubr.bf16.mxu0 %v9014_v6 }
0x11c8   : > { %v9487_v36 = vadd.f32 %v10662_v26, %v9326_v30  ;;  %9585 = vmatprep.mubr.bf16.mxu1 %v9016_v22  ;;  %v12532_v56 = vpop.eup %12531  ;;  %v8937_v53 = vmul.f32 %v18089_v44, %v17936_v0  ;;  %v8948_v37 = vmul.f32 %v8820_v21, %v8436_v50  ;;  %v9610_v18 = vadd.f32 %v9484_v24, %v16493_v25 }
0x11c9   : > { %v12534_v17 = vpop.eup %12533  ;;  %v8939_v27 = vmul.f32 %v18095_v1, %v8427_v57  ;;  %v9018_v9 = vpack.c.bf16 %v8950_v20, %v8946_v59  ;;  %v8821_v51 = vadd.f32 1.0, %v12530_v32  ;;  %v8823_v16 = vadd.f32 1.0, %v12532_v56 }
0x11ca   : > { %v9611_v19 = vadd.f32 %v9487_v36, %v18877_v33  ;;  %v9013_v40 = vpack.c.bf16 %v8941_v8, %v8937_v53  ;;  %9642 = vst [vmem:[%s18135_s25] sm:$0xff] %v9610_v18  ;;  %v9020_v2 = vpack.c.bf16 %v8952_v45, %v8948_v37  ;;  %v8817_v0 = vadd.f32 1.0, %v12526_v46 }
0x11cb   : > { %v12536_v29 = vpop.eup %12535  ;;  %v9015_v5 = vpack.c.bf16 %v8943_v11, %v8939_v27  ;;  %v8437_v44 = vmul.f32 0.5, %v18008_v4  ;;  %v8819_v35 = vadd.f32 1.0, %v12528_v41  ;;  %v8439_v1 = vmul.f32 0.5, %v18021_v63 }
0x11cc   : > { %v12538_v42 = vpop.eup %12537  ;;  %9643 = vst [vmem:[%s18135_s25 + $0x10] sm:$0xff] %v9611_v19  ;;  %9425 = vmatmul.mubr.bf16.gmra.mxu0 %v9013_v40  ;;  %v8826_v52 = vadd.f32 1.0, %v12536_v29  ;;  %v8433_v15 = vmul.f32 0.5, %v17997_v38  ;;  %v8435_v23 = vmul.f32 0.5, %v18004_v58  ;;  %v8442_v4 = vmul.f32 0.5, %v18048_v10 }
0x11cd   : > { %v12540_v7 = vpop.eup %12539  ;;  %9586 = vmatmul.mubr.bf16.gmra.mxu1 %v9015_v5  ;;  %9432 = vmatprep.mubr.bf16.mxu0 %v9018_v9  ;;  %v8949_v54 = vmul.f32 %v8821_v51, %v8437_v44  ;;  %v8828_v61 = vadd.f32 1.0, %v12538_v42  ;;  %v8951_v43 = vmul.f32 %v8823_v16, %v8439_v1  ;;  %v8446_v21 = vmul.f32 0.5, %v18087_v3  ;;  %v18878_v51 = vld [vmem:[#allocation91_spill] sm:$0xff] }
0x11ce   : > { %v12542_v25 = vpop.eup %12541  ;;  %9593 = vmatprep.mubr.bf16.mxu1 %v9020_v2  ;;  %v8945_v63 = vmul.f32 %v8817_v0, %v8433_v15  ;;  %v8444_v31 = vmul.f32 0.5, %v18052_v34  ;;  %v8448_v48 = vmul.f32 0.5, %v18093_v60  ;;  %v8947_v38 = vmul.f32 %v8819_v35, %v8435_v23 }
0x11cf   : > { %v12544_v12 = vpop.eup %12543  ;;  %v8954_v46 = vmul.f32 %v8826_v52, %v8442_v4  ;;  %v8829_v6 = vadd.f32 1.0, %v12542_v25  ;;  %v8825_v50 = vadd.f32 1.0, %v12534_v17  ;;  %v8445_v3 = vmul.f32 0.5, %v18079_v39 }
0x11d0   : > { %v12546_v47 = vpop.eup %12545  ;;  %v8830_v55 = vadd.f32 1.0, %v12544_v12  ;;  %v9017_v30 = vpack.c.bf16 %v8949_v54, %v8945_v63  ;;  %v8956_v26 = vmul.f32 %v8828_v61, %v8444_v31  ;;  %v9019_v41 = vpack.c.bf16 %v8951_v43, %v8947_v38 }
0x11d1   : > { %v12548_v20 = vpop.eup %12547  ;;  %v8832_v49 = vadd.f32 1.0, %v12546_v47  ;;  %v8827_v24 = vadd.f32 1.0, %v12540_v7  ;;  %v8447_v34 = vmul.f32 0.5, %v18084_v13  ;;  %v8441_v60 = vmul.f32 0.5, %v18037_v28  ;;  %v18879_v7 = vld [vmem:[#allocation40_spill] sm:$0xff] }
0x11d2   : > { %v8958_v58 = vmul.f32 %v8830_v55, %v8446_v21  ;;  %v8831_v8 = vadd.f32 1.0, %v12548_v20  ;;  %v8957_v32 = vmul.f32 %v8829_v6, %v8445_v3  ;;  %v8443_v57 = vmul.f32 0.5, %v18064_v62  ;;  %v18880_v21 = vld [vmem:[#allocation54_spill] sm:$0xff] }
0x11d3   : > { %v8960_v22 = vmul.f32 %v8832_v49, %v8448_v48  ;;  %v8953_v59 = vmul.f32 %v8825_v50, %v8441_v60  ;;  %v18881_v48 = vld [vmem:[#allocation38_spill] sm:$0xff] }
0x11d4   : > { %v9022_v10 = vpack.c.bf16 %v8958_v58, %v8954_v46  ;;  %9433 = vmatmul.mubr.bf16.gmra.mxu0 %v9017_v30  ;;  %v8959_v11 = vmul.f32 %v8831_v8, %v8447_v34  ;;  %v8955_v36 = vmul.f32 %v8827_v24, %v8443_v57  ;;  %v18882_v24 = vld [vmem:[#allocation53_spill] sm:$0xff] }
0x11d5   : > { %v9024_v45 = vpack.c.bf16 %v8960_v22, %v8956_v26  ;;  %9594 = vmatmul.mubr.bf16.gmra.mxu1 %v9019_v41  ;;  %v9021_v56 = vpack.c.bf16 %v8957_v32, %v8953_v59 }
0x11d6   : > { %9440 = vmatprep.mubr.bf16.mxu0 %v9022_v10  ;;  %v9023_v37 = vpack.c.bf16 %v8959_v11, %v8955_v36  ;;  %v18883_v36 = vld [vmem:[#allocation27_spill] sm:$0xff] }
0x11d7   : > { %9601 = vmatprep.mubr.bf16.mxu1 %v9024_v45 }
0x11dc   : > { %9441 = vmatmul.mubr.bf16.gmra.mxu0 %v9021_v56 }
0x11dd   : > { %9602 = vmatmul.mubr.bf16.gmra.mxu1 %v9023_v37 }
0x11e2   : > { %v10551_v53 = vpop.f32.mrf.mxu0 }
0x11e3   : > { %v10663_v39 = vpop.f32.mrf.mxu1 }
0x11e4   : > { %v10552_v18 = vpop.f32.mrf.mxu0 }
0x11e5   : > { %v10553_v13 = vadd.f32 %v10552_v18, %v10551_v53  ;;  %v10664_v17 = vpop.f32.mrf.mxu1 }
0x11e6   : > { %v10554_v27 = vpop.f32.mrf.mxu0  ;;  %v10665_v33 = vadd.f32 %v10664_v17, %v10663_v39 }
0x11e7   : > { %v9331_v28 = vadd.f32 %v10553_v13, %v18111_v14  ;;  %v10666_v19 = vpop.f32.mrf.mxu1 }
0x11e8   : > { %v10555_v62 = vpop.f32.mrf.mxu0 }
0x11e9   : > { %v9492_v9 = vadd.f32 %v10665_v33, %v9331_v28  ;;  %v10556_v29 = vadd.f32 %v10555_v62, %v10554_v27  ;;  %v10667_v40 = vpop.f32.mrf.mxu1 }
0x11ea   : > { %v10668_v5 = vadd.f32 %v10667_v40, %v10666_v19  ;;  %v18884_v40 = vld [vmem:[#allocation51_spill] sm:$0xff] }
0x11eb   : > { %v9612_v2 = vadd.f32 %v9492_v9, %v18878_v51  ;;  %v9334_v42 = vadd.f32 %v10556_v29, %v18111_v14 }
0x11ed   : > { %9644 = vst [vmem:[%s18135_s25 + $0x20] sm:$0xff] %v9612_v2  ;;  %v9495_v16 = vadd.f32 %v10668_v5, %v9334_v42 }
0x11ee   : > { %v10669_v25 = vpop.f32.mrf.mxu1 }
0x11ef   : > { %v9613_v0 = vadd.f32 %v9495_v16, %v18879_v7 }
0x11f0   : > { %v10557_v44 = vpop.f32.mrf.mxu0  ;;  %v10670_v52 = vpop.f32.mrf.mxu1 }
0x11f1   : > { %9645 = vst [vmem:[%s18135_s25 + $0x30] sm:$0xff] %v9613_v0  ;;  %v10671_v23 = vadd.f32 %v10670_v52, %v10669_v25 }
0x11f2   : > { %v10558_v35 = vpop.f32.mrf.mxu0  ;;  %v10672_v54 = vpop.f32.mrf.mxu1 }
0x11f3   : > { %v10559_v1 = vadd.f32 %v10558_v35, %v10557_v44  ;;  %v18885_v35 = vld [vmem:[#allocation58_spill] sm:$0xff] }
0x11f4   : > { %v10560_v12 = vpop.f32.mrf.mxu0  ;;  %v10673_v4 = vpop.f32.mrf.mxu1 }
0x11f5   : > { %v9339_v15 = vadd.f32 %v10559_v1, %v18111_v14  ;;  %v10674_v63 = vadd.f32 %v10673_v4, %v10672_v54  ;;  %v18886_v4 = vld [vmem:[#allocation48_spill] sm:$0xff] }
0x11f6   : > { %v10561_v61 = vpop.f32.mrf.mxu0 }
0x11f7   : > { %v9500_v47 = vadd.f32 %v10671_v23, %v9339_v15  ;;  %v10562_v43 = vadd.f32 %v10561_v61, %v10560_v12 }
0x11f9   : > { %v9614_v55 = vadd.f32 %v9500_v47, %v18880_v21  ;;  %v9342_v20 = vadd.f32 %v10562_v43, %v18111_v14 }
0x11fb   : > { %9646 = vst [vmem:[%s18135_s25 + $0x40] sm:$0xff] %v9614_v55  ;;  %v9503_v31 = vadd.f32 %v10674_v63, %v9342_v20 }
0x11fc   : > { %v10563_v38 = vpop.f32.mrf.mxu0 }
0x11fd   : > { %v9615_v49 = vadd.f32 %v9503_v31, %v18881_v48  ;;  %v10675_v46 = vpop.f32.mrf.mxu1 }
0x11fe   : > { %v10564_v58 = vpop.f32.mrf.mxu0 }
0x11ff   : > { %9647 = vst [vmem:[%s18135_s25 + $0x50] sm:$0xff] %v9615_v49  ;;  %v10565_v30 = vadd.f32 %v10564_v58, %v10563_v38  ;;  %v10676_v26 = vpop.f32.mrf.mxu1  ;;  %v18887_v58 = vld [vmem:[#allocation8_spill] sm:$0xff] }
0x1200   : > { %v10566_v6 = vpop.f32.mrf.mxu0  ;;  %v10677_v41 = vadd.f32 %v10676_v26, %v10675_v46 }
0x1201   : > { %v9347_v22 = vadd.f32 %v10565_v30, %v18111_v14  ;;  %v10678_v8 = vpop.f32.mrf.mxu1 }
0x1202   : > { %v10567_v10 = vpop.f32.mrf.mxu0 }
0x1203   : > { %v9508_v50 = vadd.f32 %v10677_v41, %v9347_v22  ;;  %v10568_v3 = vadd.f32 %v10567_v10, %v10566_v6  ;;  %v10679_v45 = vpop.f32.mrf.mxu1 }
0x1204   : > { %v10680_v32 = vadd.f32 %v10679_v45, %v10678_v8 }
0x1205   : > { %v9616_v34 = vadd.f32 %v9508_v50, %v18882_v24  ;;  %v9350_v60 = vadd.f32 %v10568_v3, %v18111_v14  ;;  %v18888_v3 = vld [vmem:[#allocation69_spill] sm:$0xff] }
0x1207   : > { %9648 = vst [vmem:[%s18135_s25 + $0x60] sm:$0xff] %v9616_v34  ;;  %v9511_v57 = vadd.f32 %v10680_v32, %v9350_v60  ;;  %v10569_v11 = vpop.f32.mrf.mxu0  ;;  %v10681_v59 = vpop.f32.mrf.mxu1 }
0x1209   : > { %v9617_v56 = vadd.f32 %v9511_v57, %v18883_v36  ;;  %v10570_v53 = vpop.f32.mrf.mxu0  ;;  %v10682_v37 = vpop.f32.mrf.mxu1 }
0x120a   : > { %v10571_v39 = vadd.f32 %v10570_v53, %v10569_v11  ;;  %v10683_v27 = vadd.f32 %v10682_v37, %v10681_v59 }
0x120b   : > { %9649 = vst [vmem:[%s18135_s25 + $0x70] sm:$0xff] %v9617_v56  ;;  %v10572_v18 = vpop.f32.mrf.mxu0  ;;  %v10684_v13 = vpop.f32.mrf.mxu1  ;;  %v18889_v56 = vld [vmem:[#allocation6_spill] sm:$0xff] }
0x120c   : > { %v9355_v17 = vadd.f32 %v10571_v39, %v18111_v14 }
0x120d   : > { %v10573_v28 = vpop.f32.mrf.mxu0  ;;  %v10685_v33 = vpop.f32.mrf.mxu1 }
0x120e   : > { %v9516_v19 = vadd.f32 %v10683_v27, %v9355_v17  ;;  %v10574_v62 = vadd.f32 %v10573_v28, %v10572_v18  ;;  %v10686_v42 = vadd.f32 %v10685_v33, %v10684_v13  ;;  %v18890_v33 = vld [vmem:[#allocation66_spill] sm:$0xff] }
0x120f   : > { %v10575_v9 = vpop.f32.mrf.mxu0  ;;  %v10687_v29 = vpop.f32.mrf.mxu1 }
0x1210   : > { %v9618_v51 = vadd.f32 %v9516_v19, %v18884_v40  ;;  %v9358_v2 = vadd.f32 %v10574_v62, %v18111_v14 }
0x1211   : > { %v10576_v5 = vpop.f32.mrf.mxu0  ;;  %v10688_v16 = vpop.f32.mrf.mxu1 }
0x1212   : > { %9650 = vst [vmem:[%s18135_s25 + $0x8] sm:$0xff] %v9618_v51  ;;  %v9519_v7 = vadd.f32 %v10686_v42, %v9358_v2  ;;  %v10577_v0 = vadd.f32 %v10576_v5, %v10575_v9  ;;  %v10689_v12 = vadd.f32 %v10688_v16, %v10687_v29  ;;  %v18891_v51 = vld [vmem:[#allocation4_spill] sm:$0xff] }
0x1213   : > { %v10578_v44 = vpop.f32.mrf.mxu0  ;;  %v10690_v25 = vpop.f32.mrf.mxu1 }
0x1214   : > { %v9619_v1 = vadd.f32 %v9519_v7, %v18885_v35  ;;  %v9363_v52 = vadd.f32 %v10577_v0, %v18111_v14 }
0x1215   : > { %v10579_v15 = vpop.f32.mrf.mxu0  ;;  %v10691_v23 = vpop.f32.mrf.mxu1 }
0x1216   : > { %9651 = vst [vmem:[%s18135_s25 + $0x18] sm:$0xff] %v9619_v1  ;;  %v9524_v54 = vadd.f32 %v10689_v12, %v9363_v52  ;;  %v10580_v61 = vadd.f32 %v10579_v15, %v10578_v44  ;;  %v10692_v20 = vadd.f32 %v10691_v23, %v10690_v25  ;;  %v18892_v23 = vld [vmem:[#allocation10_spill] sm:$0xff] }
0x1217   : > { %v10581_v47 = vpop.f32.mrf.mxu0  ;;  %v10693_v43 = vpop.f32.mrf.mxu1 }
0x1218   : > { %v9620_v21 = vadd.f32 %v9524_v54, %v18886_v4  ;;  %v9366_v55 = vadd.f32 %v10580_v61, %v18111_v14  ;;  %v18893_v4 = vld [vmem:[#allocation16_spill] sm:$0xff] }
0x1219   : > { %v10582_v63 = vpop.f32.mrf.mxu0  ;;  %v10694_v31 = vpop.f32.mrf.mxu1 }
0x121a   : > { %9652 = vst [vmem:[%s18135_s25 + $0x28] sm:$0xff] %v9620_v21  ;;  %v9527_v48 = vadd.f32 %v10692_v20, %v9366_v55  ;;  %v10583_v49 = vadd.f32 %v10582_v63, %v10581_v47  ;;  %v10695_v6 = vadd.f32 %v10694_v31, %v10693_v43 }
0x121b   : > { %v10584_v38 = vpop.f32.mrf.mxu0  ;;  %v10696_v46 = vpop.f32.mrf.mxu1 }
0x121c   : > { %v9621_v30 = vadd.f32 %v9527_v48, %v18887_v58  ;;  %v9371_v26 = vadd.f32 %v10583_v49, %v18111_v14 }
0x121d   : > { %v10585_v22 = vpop.f32.mrf.mxu0  ;;  %v10697_v41 = vpop.f32.mrf.mxu1 }
0x121e   : > { %9653 = vst [vmem:[%s18135_s25 + $0x38] sm:$0xff] %v9621_v30  ;;  %v9532_v8 = vadd.f32 %v10695_v6, %v9371_v26  ;;  %v10586_v10 = vadd.f32 %v10585_v22, %v10584_v38  ;;  %v10698_v34 = vadd.f32 %v10697_v41, %v10696_v46  ;;  %v18894_v41 = vld [vmem:[#allocation64_spill] sm:$0xff] }
0x121f   : > { %v10587_v50 = vpop.f32.mrf.mxu0 }
0x1220   : > { %v9622_v45 = vadd.f32 %v9532_v8, %v18888_v3  ;;  %v9374_v24 = vadd.f32 %v10586_v10, %v18111_v14 }
0x1221   : > { %v10699_v60 = vpop.f32.mrf.mxu1  ;;  %v10588_v32 = vpop.f32.mrf.mxu0 }
0x1222   : > { %9654 = vst [vmem:[%s18135_s25 + $0x48] sm:$0xff] %v9622_v45  ;;  %v9535_v57 = vadd.f32 %v10698_v34, %v9374_v24  ;;  %v10589_v11 = vadd.f32 %v10588_v32, %v10587_v50  ;;  %v18895_v45 = vld [vmem:[#allocation73_spill] sm:$0xff] }
0x1223   : > { %v10700_v59 = vpop.f32.mrf.mxu1  ;;  %v10590_v36 = vpop.f32.mrf.mxu0 }
0x1224   : > { %v9623_v53 = vadd.f32 %v9535_v57, %v18889_v56  ;;  %v9379_v37 = vadd.f32 %v10589_v11, %v18111_v14  ;;  %v10701_v39 = vadd.f32 %v10700_v59, %v10699_v60 }
0x1225   : > { %v10702_v18 = vpop.f32.mrf.mxu1  ;;  %v10591_v13 = vpop.f32.mrf.mxu0 }
0x1226   : > { %9655 = vst [vmem:[%s18135_s25 + $0x58] sm:$0xff] %v9623_v53  ;;  %v9540_v17 = vadd.f32 %v10701_v39, %v9379_v37  ;;  %v10592_v27 = vadd.f32 %v10591_v13, %v10590_v36 }
0x1227   : > { %v10703_v28 = vpop.f32.mrf.mxu1 }
0x1228   : > { %v9624_v19 = vadd.f32 %v9540_v17, %v18890_v33  ;;  %v9382_v62 = vadd.f32 %v10592_v27, %v18111_v14  ;;  %v10704_v9 = vadd.f32 %v10703_v28, %v10702_v18  ;;  %v18896_v27 = vld [vmem:[#allocation23_spill] sm:$0xff] }
0x122a   : > { %9656 = vst [vmem:[%s18135_s25 + $0x68] sm:$0xff] %v9624_v19  ;;  %v9543_v29 = vadd.f32 %v10704_v9, %v9382_v62  ;;  %v18897_v62 = vld [vmem:[#allocation70_spill] sm:$0xff] }
0x122b   : > { %v10593_v40 = vpop.f32.mrf.mxu0 }
0x122c   : > { %v9625_v2 = vadd.f32 %v9543_v29, %v18891_v51  ;;  %v10705_v42 = vpop.f32.mrf.mxu1 }
0x122d   : > { %v10594_v5 = vpop.f32.mrf.mxu0 }
0x122e   : > { %9657 = vst [vmem:[%s18135_s25 + $0x78] sm:$0xff] %v9625_v2  ;;  %v10595_v16 = vadd.f32 %v10594_v5, %v10593_v40  ;;  %v10706_v7 = vpop.f32.mrf.mxu1 }
0x122f   : > { %v10596_v0 = vpop.f32.mrf.mxu0  ;;  %v10707_v25 = vadd.f32 %v10706_v7, %v10705_v42 }
0x1230   : > { %v9387_v44 = vadd.f32 %v10595_v16, %v18111_v14  ;;  %v10708_v35 = vpop.f32.mrf.mxu1 }
0x1231   : > { %v10597_v1 = vpop.f32.mrf.mxu0 }
0x1232   : > { %v9548_v52 = vadd.f32 %v10707_v25, %v9387_v44  ;;  %v10598_v12 = vadd.f32 %v10597_v1, %v10596_v0  ;;  %v10709_v15 = vpop.f32.mrf.mxu1 }
0x1233   : > { %v10710_v47 = vadd.f32 %v10709_v15, %v10708_v35 }
0x1234   : > { %v9626_v54 = vadd.f32 %v9548_v52, %v18892_v23  ;;  %v9390_v61 = vadd.f32 %v10598_v12, %v18111_v14  ;;  %v18898_v52 = vld [vmem:[#allocation14_spill] sm:$0xff] }
0x1236   : > { %10157 = vst [vmem:[%s18135_s25 + $0x80] sm:$0xff] %v9626_v54  ;;  %v9551_v43 = vadd.f32 %v10710_v47, %v9390_v61  ;;  %v18899_v61 = vld [vmem:[#allocation68_spill] sm:$0xff] }
0x1237   : > { %v10599_v55 = vpop.f32.mrf.mxu0 }
0x1238   : > { %v9627_v21 = vadd.f32 %v9551_v43, %v18893_v4  ;;  %v10711_v20 = vpop.f32.mrf.mxu1 }
0x1239   : > { %v10600_v63 = vpop.f32.mrf.mxu0 }
0x123a   : > { %10158 = vst [vmem:[%s18135_s25 + $0x90] sm:$0xff] %v9627_v21  ;;  %v10601_v31 = vadd.f32 %v10600_v63, %v10599_v55  ;;  %v10712_v48 = vpop.f32.mrf.mxu1 }
0x123b   : > { %v10602_v49 = vpop.f32.mrf.mxu0  ;;  %v10713_v46 = vadd.f32 %v10712_v48, %v10711_v20 }
0x123c   : > { %v9395_v38 = vadd.f32 %v10601_v31, %v18111_v14  ;;  %v10714_v58 = vpop.f32.mrf.mxu1 }
0x123d   : > { %v10603_v30 = vpop.f32.mrf.mxu0 }
0x123e   : > { %v9556_v26 = vadd.f32 %v10713_v46, %v9395_v38  ;;  %v10604_v6 = vadd.f32 %v10603_v30, %v10602_v49  ;;  %v10715_v22 = vpop.f32.mrf.mxu1 }
0x123f   : > { %v10716_v50 = vadd.f32 %v10715_v22, %v10714_v58 }
0x1240   : > { %v9628_v8 = vadd.f32 %v9556_v26, %v18894_v41  ;;  %v9398_v10 = vadd.f32 %v10604_v6, %v18111_v14  ;;  %v18900_v6 = vld [vmem:[#allocation33_spill] sm:$0xff] }
0x1242   : > { %10159 = vst [vmem:[%s18135_s25 + $0xa0] sm:$0xff] %v9628_v8  ;;  %v9559_v3 = vadd.f32 %v10716_v50, %v9398_v10 }
0x1244   : > { %v9629_v24 = vadd.f32 %v9559_v3, %v18895_v45 }
0x1246   : > { %10160 = vst [vmem:[%s18135_s25 + $0xb0] sm:$0xff] %v9629_v24 }
0x1265   : > { %v10605_v34 = vpop.f32.mrf.mxu0 }
0x1267   : > { %v10606_v60 = vpop.f32.mrf.mxu0 }
0x1268   : > { %v10607_v32 = vadd.f32 %v10606_v60, %v10605_v34  ;;  %v18901_v60 = vld [vmem:[#allocation74_spill] sm:$0xff] }
0x1269   : > { %v10608_v57 = vpop.f32.mrf.mxu0 }
0x126a   : > { %v9403_v59 = vadd.f32 %v10607_v32, %v18111_v14 }
0x126b   : > { %v10717_v11 = vpop.f32.mrf.mxu1  ;;  %v10609_v36 = vpop.f32.mrf.mxu0 }
0x126c   : > { %v10610_v53 = vadd.f32 %v10609_v36, %v10608_v57 }
0x126d   : > { %v10718_v56 = vpop.f32.mrf.mxu1 }
0x126e   : > { %v10719_v37 = vadd.f32 %v10718_v56, %v10717_v11  ;;  %v9406_v13 = vadd.f32 %v10610_v53, %v18111_v14 }
0x126f   : > { %v10720_v39 = vpop.f32.mrf.mxu1 }
0x1270   : > { %v9564_v18 = vadd.f32 %v10719_v37, %v9403_v59 }
0x1271   : > { %v10721_v17 = vpop.f32.mrf.mxu1 }
0x1272   : > { %v9630_v28 = vadd.f32 %v9564_v18, %v18896_v27  ;;  %v10722_v33 = vadd.f32 %v10721_v17, %v10720_v39  ;;  %v18902_v18 = vld [vmem:[#allocation22_spill] sm:$0xff] }
0x1274   : > { %10161 = vst [vmem:[%s18135_s25 + $0xc0] sm:$0xff] %v9630_v28  ;;  %v9567_v19 = vadd.f32 %v10722_v33, %v9406_v13 }
0x1276   : > { %v9631_v9 = vadd.f32 %v9567_v19, %v18897_v62  ;;  %v10611_v29 = vpop.f32.mrf.mxu0 }
0x1277   : > { %v10723_v40 = vpop.f32.mrf.mxu1 }
0x1278   : > { %10162 = vst [vmem:[%s18135_s25 + $0xd0] sm:$0xff] %v9631_v9  ;;  %v10612_v51 = vpop.f32.mrf.mxu0 }
0x1279   : > { %v10613_v2 = vadd.f32 %v10612_v51, %v10611_v29  ;;  %v10724_v42 = vpop.f32.mrf.mxu1 }
0x127a   : > { %v10614_v5 = vpop.f32.mrf.mxu0  ;;  %v10725_v7 = vadd.f32 %v10724_v42, %v10723_v40  ;;  %v18903_v40 = vld [vmem:[#allocation76_spill] sm:$0xff] }
0x127b   : > { %v9411_v16 = vadd.f32 %v10613_v2, %v18111_v14  ;;  %v10726_v0 = vpop.f32.mrf.mxu1 }
0x127c   : > { %v10615_v44 = vpop.f32.mrf.mxu0 }
0x127d   : > { %v9572_v25 = vadd.f32 %v10725_v7, %v9411_v16  ;;  %v10616_v35 = vadd.f32 %v10615_v44, %v10614_v5  ;;  %v10727_v1 = vpop.f32.mrf.mxu1 }
0x127e   : > { %v10728_v23 = vadd.f32 %v10727_v1, %v10726_v0 }
0x127f   : > { %v9632_v12 = vadd.f32 %v9572_v25, %v18898_v52  ;;  %v9414_v15 = vadd.f32 %v10616_v35, %v18111_v14  ;;  %v18904_v35 = vld [vmem:[#allocation28_spill] sm:$0xff] }
0x1281   : > { %10163 = vst [vmem:[%s18135_s25 + $0xe0] sm:$0xff] %v9632_v12  ;;  %v9575_v54 = vadd.f32 %v10728_v23, %v9414_v15 }
0x1283   : > { %v9633_v47 = vadd.f32 %v9575_v54, %v18899_v61 }
0x1284   : > { %v10617_v43 = vpop.f32.mrf.mxu0 }
0x1285   : > { %10164 = vst [vmem:[%s18135_s25 + $0xf0] sm:$0xff] %v9633_v47  ;;  %v10729_v4 = vpop.f32.mrf.mxu1 }
0x1286   : > { %v10618_v21 = vpop.f32.mrf.mxu0 }
0x1287   : > { %v10619_v55 = vadd.f32 %v10618_v21, %v10617_v43  ;;  %v10730_v20 = vpop.f32.mrf.mxu1 }
0x1288   : > { %v10620_v63 = vpop.f32.mrf.mxu0  ;;  %v10731_v48 = vadd.f32 %v10730_v20, %v10729_v4  ;;  %v18905_v4 = vld [vmem:[#allocation77_spill] sm:$0xff] }
0x1289   : > { %v9419_v31 = vadd.f32 %v10619_v55, %v18111_v14  ;;  %v10732_v49 = vpop.f32.mrf.mxu1 }
0x128a   : > { %v10621_v38 = vpop.f32.mrf.mxu0 }
0x128b   : > { %v9580_v46 = vadd.f32 %v10731_v48, %v9419_v31  ;;  %v10622_v58 = vadd.f32 %v10621_v38, %v10620_v63  ;;  %v10733_v30 = vpop.f32.mrf.mxu1 }
0x128c   : > { %v10623_v26 = vpop.f32.mrf.mxu0  ;;  %v10734_v8 = vadd.f32 %v10733_v30, %v10732_v49 }
0x128d   : > { %v9634_v22 = vadd.f32 %v9580_v46, %v18900_v6  ;;  %v9422_v41 = vadd.f32 %v10622_v58, %v18111_v14  ;;  %v10735_v10 = vpop.f32.mrf.mxu1  ;;  %v18906_v46 = vld [vmem:[#allocation19_spill] sm:$0xff] }
0x128e   : > { %v10624_v50 = vpop.f32.mrf.mxu0 }
0x128f   : > { %10165 = vst [vmem:[%s18135_s25 + $0x88] sm:$0xff] %v9634_v22  ;;  %v9583_v3 = vadd.f32 %v10734_v8, %v9422_v41  ;;  %v10625_v45 = vadd.f32 %v10624_v50, %v10623_v26  ;;  %v10736_v24 = vpop.f32.mrf.mxu1  ;;  %v18907_v22 = vld [vmem:[#allocation78_spill] sm:$0xff] }
0x1290   : > { %v10626_v34 = vpop.f32.mrf.mxu0  ;;  %v10737_v11 = vadd.f32 %v10736_v24, %v10735_v10 }
0x1291   : > { %v9635_v32 = vadd.f32 %v9583_v3, %v18901_v60  ;;  %v9427_v57 = vadd.f32 %v10625_v45, %v18111_v14  ;;  %v10738_v59 = vpop.f32.mrf.mxu1 }
0x1292   : > { %v10627_v36 = vpop.f32.mrf.mxu0 }
0x1293   : > { %10166 = vst [vmem:[%s18135_s25 + $0x98] sm:$0xff] %v9635_v32  ;;  %v9588_v56 = vadd.f32 %v10737_v11, %v9427_v57  ;;  %v10628_v53 = vadd.f32 %v10627_v36, %v10626_v34  ;;  %v10739_v37 = vpop.f32.mrf.mxu1 }
0x1294   : > { %v10629_v39 = vpop.f32.mrf.mxu0  ;;  %v10740_v27 = vadd.f32 %v10739_v37, %v10738_v59 }
0x1295   : > { %v9636_v13 = vadd.f32 %v9588_v56, %v18902_v18  ;;  %v9430_v17 = vadd.f32 %v10628_v53, %v18111_v14  ;;  %v10741_v28 = vpop.f32.mrf.mxu1 }
0x1296   : > { %v10630_v33 = vpop.f32.mrf.mxu0 }
0x1297   : > { %10167 = vst [vmem:[%s18135_s25 + $0xa8] sm:$0xff] %v9636_v13  ;;  %v9591_v19 = vadd.f32 %v10740_v27, %v9430_v17  ;;  %v10631_v62 = vadd.f32 %v10630_v33, %v10629_v39  ;;  %v10742_v9 = vpop.f32.mrf.mxu1 }
0x1298   : > { %v10632_v29 = vpop.f32.mrf.mxu0  ;;  %v10743_v42 = vadd.f32 %v10742_v9, %v10741_v28 }
0x1299   : > { %v9637_v51 = vadd.f32 %v9591_v19, %v18903_v40  ;;  %v9435_v2 = vadd.f32 %v10631_v62, %v18111_v14  ;;  %v10744_v5 = vpop.f32.mrf.mxu1 }
0x129a   : > { %v10633_v16 = vpop.f32.mrf.mxu0 }
0x129b   : > { %10168 = vst [vmem:[%s18135_s25 + $0xb8] sm:$0xff] %v9637_v51  ;;  %v9596_v7 = vadd.f32 %v10743_v42, %v9435_v2  ;;  %v10634_v0 = vadd.f32 %v10633_v16, %v10632_v29  ;;  %v10745_v44 = vpop.f32.mrf.mxu1 }
0x129c   : > { %v10635_v25 = vpop.f32.mrf.mxu0  ;;  %v10746_v12 = vadd.f32 %v10745_v44, %v10744_v5 }
0x129d   : > { %v9638_v1 = vadd.f32 %v9596_v7, %v18904_v35  ;;  %v9438_v52 = vadd.f32 %v10634_v0, %v18111_v14  ;;  %v10747_v15 = vpop.f32.mrf.mxu1 }
0x129e   : > { %v10636_v23 = vpop.f32.mrf.mxu0 }
0x129f   : > { %10169 = vst [vmem:[%s18135_s25 + $0xc8] sm:$0xff] %v9638_v1  ;;  %v9599_v54 = vadd.f32 %v10746_v12, %v9438_v52  ;;  %v10637_v61 = vadd.f32 %v10636_v23, %v10635_v25  ;;  %v10748_v47 = vpop.f32.mrf.mxu1 }
0x12a0   : > { %v10638_v43 = vpop.f32.mrf.mxu0  ;;  %v10749_v20 = vadd.f32 %v10748_v47, %v10747_v15 }
0x12a1   : > { %v9639_v21 = vadd.f32 %v9599_v54, %v18905_v4  ;;  %v9443_v55 = vadd.f32 %v10637_v61, %v18111_v14  ;;  %v10750_v63 = vpop.f32.mrf.mxu1 }
0x12a2   : > { %v10639_v31 = vpop.f32.mrf.mxu0 }
0x12a3   : > { %10170 = vst [vmem:[%s18135_s25 + $0xd8] sm:$0xff] %v9639_v21  ;;  %v9604_v48 = vadd.f32 %v10749_v20, %v9443_v55  ;;  %v10640_v49 = vadd.f32 %v10639_v31, %v10638_v43  ;;  %v10751_v38 = vpop.f32.mrf.mxu1 }
0x12a4   : > { %v10752_v26 = vadd.f32 %v10751_v38, %v10750_v63 }
0x12a5   : > { %v9640_v58 = vadd.f32 %v9604_v48, %v18906_v46  ;;  %v9446_v30 = vadd.f32 %v10640_v49, %v18111_v14 }
0x12a7   : > { %10171 = vst [vmem:[%s18135_s25 + $0xe8] sm:$0xff] %v9640_v58  ;;  %v9607_v6 = vadd.f32 %v10752_v26, %v9446_v30 }
0x12a9   : > { %v9641_v41 = vadd.f32 %v9607_v6, %v18907_v22 }
0x12ab   : > { %10172 = vst [vmem:[%s18135_s25 + $0xf8] sm:$0xff] %v9641_v41 }
0x12ac PF: > { %s24_s29 = sadd.s32 1, %s12587_s29  }
0x12ad   : > { %p21_p4 = scmp.ge.s32.totalorder %s24_s29, 4  }
0x12af   :  { %23 = sbr.rel (!%p21_p4) target bundleno = 1 (0x1), region = 114 }

</bundles_post_ra>
